<compile_context>
chip_gen: v5e
topology: v5e:2x2
jax: 0.10.0
libtpu: 0.0.40
codegen_flags: <defaults>
</compile_context>

<pallas_src>
import jax
import jax.numpy as jnp
from jax.experimental import pallas as pl
from jax.experimental.pallas import tpu as pltpu


# --------------------------------------------------------------------------- helpers
def _round_up(x, m):
    return (x + m - 1) // m * m


def _stem_dims(H, W):
    """Static row-count bookkeeping for the flat-grid layout (all slabs 8-aligned)."""
    WA = W + 2                                   # row stride of padded input grid
    NA = (H + 2) * WA                            # padded input grid size
    PH, PW = (H - 2) // 2, (W - 2) // 2          # pooled spatial size
    WB = PW + 2                                  # row stride of padded pooled grid
    NOUT = PH * PW
    NOUT_PAD = _round_up(max(NOUT, 8), 8)        # lane-dense output rows (8-aligned)
    ROFF_MAX = (PH - 1) * WB + (PW - 1)          # max top-left row for conv4/conv5
    N45 = _round_up(ROFF_MAX + 1, 8)             # rows computed for conv4 / conv5
    NBP = _round_up(N45 + 2 * WB + 2, 8)         # padded pooled-grid slab (a3 / a4p)
    CPOOL_MAX = 2 * (PH - 1) * WA + 2 * (PW - 1)  # max pool-source row
    NAM = _round_up(CPOOL_MAX + 1, 8)            # rows of the pool-max slab
    A2_ROWS = _round_up(NAM + WA + 1, 8)         # conv2 slab (pool reads +WA+1)
    A1_ROWS = _round_up(A2_ROWS + 2 * WA + 2, 8)  # conv1 slab (conv2 taps read +2WA+2)
    X_ROWS = _round_up(max(A1_ROWS + 2 * WA + 2, NA), 8)  # padded / flattened input
    return dict(WA=WA, NA=NA, PH=PH, PW=PW, WB=WB, NOUT=NOUT, NOUT_PAD=NOUT_PAD,
                N45=N45, NBP=NBP, NAM=NAM, A2_ROWS=A2_ROWS, A1_ROWS=A1_ROWS,
                X_ROWS=X_ROWS)


def _build_selection_constants(H, W):
    """0/1 selection matrices + interior mask (built in plain JAX, ~100 KB total)."""
    d = _stem_dims(H, W)
    ph = jnp.arange(d["PH"])
    pw = jnp.arange(d["PW"])
    rows_int = ((1 + ph)[:, None] * d["WB"] + (1 + pw)[None, :]).reshape(-1)   # interior
    cols_pool = ((2 * ph)[:, None] * d["WA"] + (2 * pw)[None, :]).reshape(-1)  # 2x2 corners
    rows_off0 = (ph[:, None] * d["WB"] + pw[None, :]).reshape(-1)              # top-left rows
    rows_out = (ph[:, None] * d["PW"] + pw[None, :]).reshape(-1)               # raster output

    S = jnp.zeros((d["NBP"], d["NAM"]), jnp.float32).at[rows_int, cols_pool].set(1.0)
    T = jnp.zeros((d["NOUT_PAD"], d["N45"]), jnp.float32).at[rows_out, rows_off0].set(1.0)
    mask = jnp.zeros((d["NBP"], 1), jnp.float32).at[rows_int, 0].set(1.0)
    return S, T, mask


# ----------------------------------------------------------------------- fused kernel
def _make_stem_kernel(H, W, B, mm_dtype=jnp.float32):
    d = _stem_dims(H, W)
    WA, WB = d["WA"], d["WB"]
    A1_ROWS, A2_ROWS = d["A1_ROWS"], d["A2_ROWS"]
    NAM, NBP, N45 = d["NAM"], d["NBP"], d["N45"]

    def kernel(x_ref, w1_ref, b1_ref, w2_ref, b2_ref, w3_ref, b3_ref,
               w4_ref, b4_ref, w5_ref, b5_ref, s_ref, t_ref, mask_ref,
               o_ref, pooled_ref):
        f32 = jnp.float32
        x = x_ref[...]                                  # (B, X_ROWS, 1)  zero-padded
        c1 = w1_ref.shape[1]
        c4 = w4_ref.shape[1]
        c5 = w5_ref.shape[2]

        # ---- conv1: 1 -> 32, 3x3 'same' (tap-major VPU broadcasts, Cin = 1) ----------
        w1 = w1_ref[...]                                # (9, c1)
        a1 = jnp.zeros((B, A1_ROWS, c1), f32)
        for kh in range(3):
            for kw in range(3):
                t = kh * 3 + kw
                s = kh * WA + kw
                a1 = a1 + x[:, s:s + A1_ROWS, :] * w1[t:t + 1, :]
        a1 = a1 + b1_ref[...]

        # ---- conv2: 32 -> 32, 3x3 valid — im2col, ONE batched GEMM (K = 9*c1) --------
        cols2 = []
        for kh in range(3):
            for kw in range(3):
                s = kh * WA + kw
                cols2.append(a1[:, s:s + A2_ROWS, :])
        im2 = jnp.concatenate(cols2, axis=-1).reshape(B * A2_ROWS, 9 * c1)
        a2 = (jnp.dot(im2, w2_ref[...], preferred_element_type=f32)
              + b2_ref[...]).reshape(B, A2_ROWS, -1)

        # ---- maxpool 2x2 / stride 2: 4-way max of shifted slabs; per-image selection
        # matmul scatters the pooled values into a zero-ringed padded (PH+2,PW+2) grid.
        m = jnp.maximum(jnp.maximum(a2[:, 0:NAM, :], a2[:, 1:NAM + 1, :]),
                        jnp.maximum(a2[:, WA:WA + NAM, :], a2[:, WA + 1:WA + 1 + NAM, :]))
        S = s_ref[...]                                  # (NBP, NAM) 0/1 selection
        for b in range(B):
            pooled_ref[b] = jnp.dot(S, m[b], preferred_element_type=f32)
        pooled = pooled_ref[...]                        # (B, NBP, c2), zero ring
        mask = mask_ref[...]                            # (NBP, 1), 1 on interior rows

        # ---- conv3: 32 -> 64, 1x1 (single batched GEMM; bias only on the interior) ---
        a3 = jnp.dot(pooled.reshape(B * NBP, pooled.shape[-1]), w3_ref[...],
                     preferred_element_type=f32).reshape(B, NBP, -1)
        a3 = a3 + b3_ref[...] * mask

        # ---- conv4: 64 -> 128, 3x3 'same' — im2col, ONE batched GEMM (K = 9*c3) ------
        cols4 = []
        for kh in range(3):
            for kw in range(3):
                s = kh * WB + kw
                cols4.append(a3[:, s:s + N45, :])
        im4 = jnp.concatenate(cols4, axis=-1).reshape(B * N45, -1)
        a4 = jnp.dot(im4.astype(mm_dtype), w4_ref[...].astype(mm_dtype),
                     preferred_element_type=f32).reshape(B, N45, c4)

        # ---- re-center conv4 output onto the padded grid: sublane shift by WB+1 plus
        # interior mask (replaces the old 'P' selection matmul); bias interior-only.
        pieces = [jnp.zeros((B, WB + 1, c4), f32), a4]
        tail = NBP - (WB + 1) - N45
        if tail > 0:
            pieces.append(jnp.zeros((B, tail, c4), f32))
        a4p = (jnp.concatenate(pieces, axis=1) + b4_ref[...]) * mask   # (B, NBP, c4)

        # ---- conv5: 128 -> 128, 3x3 'same' (tap-major, K = 128 already MXU aligned) --
        w5 = w5_ref[...]
        a4pm = a4p.astype(mm_dtype)
        a5 = jnp.zeros((B * N45, c5), f32)
        for kh in range(3):
            for kw in range(3):
                t = kh * 3 + kw
                s = kh * WB + kw
                a5 = a5 + jnp.dot(a4pm[:, s:s + N45, :].reshape(B * N45, c4),
                                  w5[t].astype(mm_dtype),
                                  preferred_element_type=f32)
        a5 = a5.reshape(B, N45, c5)

        # ---- gather the valid rows per image and store lane-dense (rows, 128) --------
        T = t_ref[...]                                  # (NOUT_PAD, N45) 0/1 selection
        b5 = b5_ref[...]
        for b in range(B):
            o_ref[b] = (jnp.dot(T, a5[b], preferred_element_type=f32)
                        + b5).astype(o_ref.dtype)

    return kernel


# ------------------------------------------------------------------------------ Stem
def stem_forward(x_nchw, params, *, batch_tile=8, matmul_dtype=jnp.float32):
    """Pallas implementation of Stem.forward.  x_nchw: (N, 1, H, W) f32, NCHW."""
    N, C, H, W = x_nchw.shape
    assert C == 1 and H >= 4 and W >= 4
    d = _stem_dims(H, W)

    # Batch block: fold B images into the GEMM M dim (amortizes per-step overhead),
    # but keep >= 2 grid steps when possible so both v7x TensorCores get work.
    # VMEM budget note: the flat (X_ROWS, 1) input slab costs ~X_ROWS*128*4 B/image in
    # VMEM once (8,128)-tiled, plus the im2col slabs; batch_tile<=8 keeps a step well
    # under the 48 MiB limit below (and under v7x's 64 MiB physical VMEM).
    B = max(1, min(batch_tile, -(-N // 2)))
    NP = -(-N // B) * B                                  # batch padded to a multiple of B

    kernel = _make_stem_kernel(H, W, B, matmul_dtype)

    # NCHW -> zero-padded (H+2, W+2) grid, flattened row-major, zero tail so the tap
    # slices inside the kernel never go out of bounds; batch zero-padded to NP.
    xp = jnp.pad(x_nchw[:, 0, :, :], ((0, 0), (1, 1), (1, 1))).reshape(N, d["NA"], 1)
    x_flat = jnp.pad(xp, ((0, NP - N), (0, d["X_ROWS"] - d["NA"]), (0, 0)))

    c1 = params["w1"].shape[-1]
    c2 = params["w2"].shape[-1]
    c3 = params["w3"].shape[-1]
    c4 = params["w4"].shape[-1]
    c5 = params["w5"].shape[-1]

    # Tap-major / im2col weight layouts (HWIO -> flattened) and (1, C) biases.
    w1 = params["w1"].reshape(9, c1)
    w2 = params["w2"].reshape(9 * params["w2"].shape[2], c2)     # (9*c1, c2) im2col
    w3 = params["w3"].reshape(params["w3"].shape[2], c3)
    w4 = params["w4"].reshape(9 * params["w4"].shape[2], c4)     # (9*c3, c4) im2col
    w5 = params["w5"].reshape(9, params["w5"].shape[2], c5)      # tap-major
    b1 = params["b1"].reshape(1, -1)
    b2 = params["b2"].reshape(1, -1)
    b3 = params["b3"].reshape(1, -1)
    b4 = params["b4"].reshape(1, -1)
    b5 = params["b5"].reshape(1, -1)

    S, T, mask = _build_selection_constants(H, W)
    consts = (w1, b1, w2, b2, w3, b3, w4, b4, w5, b5, S, T, mask)

    def full(a):
        nd = a.ndim
        return pl.BlockSpec(a.shape, lambda n, _nd=nd: (0,) * _nd)

    flops = 2 * NP * (9 * d["A1_ROWS"] * c1
                      + d["A2_ROWS"] * 9 * c1 * c2
                      + d["NBP"] * d["NAM"] * c2
                      + d["NBP"] * c2 * c3
                      + d["N45"] * 9 * c3 * c4
                      + 9 * d["N45"] * c4 * c5
                      + d["NOUT_PAD"] * d["N45"] * c5)
    bytes_accessed = int(x_flat.size * 4 + sum(a.size * 4 for a in consts)
                         + NP * d["NOUT_PAD"] * c5 * 4)

    out = pl.pallas_call(
        kernel,
        out_shape=jax.ShapeDtypeStruct((NP, d["NOUT_PAD"], c5), jnp.float32),
        grid=(NP // B,),
        in_specs=[pl.BlockSpec((B, d["X_ROWS"], 1), lambda n: (n, 0, 0))]
                 + [full(a) for a in consts],
        out_specs=pl.BlockSpec((B, d["NOUT_PAD"], c5), lambda n: (n, 0, 0)),
        scratch_shapes=[pltpu.VMEM((B, d["NBP"], c2), jnp.float32)],
        compiler_params=pltpu.CompilerParams(
            dimension_semantics=("parallel",),
            vmem_limit_bytes=48 * 1024 * 1024),
        cost_estimate=pl.CostEstimate(flops=flops, transcendentals=0,
                                      bytes_accessed=bytes_accessed),
    )(x_flat, *consts)

    # Lane-dense kernel output -> NCHW in the wrapper (cheap XLA slice/transpose).
    out = out[:N, :d["NOUT"], :]
    return jnp.transpose(out, (0, 2, 1)).reshape(N, c5, d["PH"], d["PW"])


# ------------------------------------------------------------------------- reference
def _conv_ref(x, w, b, padding):
    pad = "SAME" if padding == "same" else "VALID"
    y = jax.lax.conv_general_dilated(
        x, w, (1, 1), pad,
        dimension_numbers=("NHWC", "HWIO", "NHWC"),
        precision=jax.lax.Precision.HIGHEST)
    return y + b.reshape(1, 1, 1, -1)


def stem_reference(x_nchw, p):
    x = jnp.transpose(x_nchw, (0, 2, 3, 1))
    x = _conv_ref(x, p["w1"], p["b1"], "same")
    x = _conv_ref(x, p["w2"], p["b2"], "valid")
    x = jax.lax.reduce_window(x, -jnp.inf, jax.lax.max,
                              (1, 2, 2, 1), (1, 2, 2, 1), "VALID")
    x = _conv_ref(x, p["w3"], p["b3"], "valid")
    x = _conv_ref(x, p["w4"], p["b4"], "same")
    x = _conv_ref(x, p["w5"], p["b5"], "same")
    return jnp.transpose(x, (0, 3, 1, 2))


# ----------------------------------------------------------------------------- main
if __name__ == "__main__":
    key = jax.random.PRNGKey(0)
    keys = jax.random.split(key, 11)

    # Deterministic synthetic parameters (HWIO layout), shapes from Stem.__init__.
    def init_conv(kw_key, kb_key, kh, kw, cin, cout, scale):
        w = jax.random.normal(kw_key, (kh, kw, cin, cout), jnp.float32) * scale
        b = jax.random.normal(kb_key, (cout,), jnp.float32) * 0.01
        return w, b

    params = {}
    params["w1"], params["b1"] = init_conv(keys[1], keys[2], 3, 3, 1, 32, 0.10)
    params["w2"], params["b2"] = init_conv(keys[3], keys[4], 3, 3, 32, 32, 0.05)
    params["w3"], params["b3"] = init_conv(keys[5], keys[6], 1, 1, 32, 64, 0.05)
    params["w4"], params["b4"] = init_conv(keys[7], keys[8], 3, 3, 64, 128, 0.03)
    params["w5"], params["b5"] = init_conv(keys[9], keys[10], 3, 3, 128, 128, 0.02)

    # Small NCHW input consistent with Conv2d(1, ...) and the valid-conv + pool path.
    x = jax.random.normal(keys[0], (2, 1, 16, 16), jnp.float32)

    fwd = jax.jit(stem_forward)
    out = jax.block_until_ready(fwd(x, params))
    assert out.shape == (2, 128, 7, 7), out.shape

    ref = jax.block_until_ready(stem_reference(x, params))
    max_err = float(jnp.max(jnp.abs(out - ref)))
    assert max_err < 2e-3, f"max abs error too large: {max_err}"

    print("KERNEL_OK")
</pallas_src>

<mosaic_0001>
module attributes {stable_mosaic.version = 11 : i64} {
  func.func @kernel(%arg0: i32, %arg1: memref<1x336x1xf32, #tpu.memory_space<vmem>>, %arg2: memref<9x32xf32, #tpu.memory_space<vmem>>, %arg3: memref<1x32xf32, #tpu.memory_space<vmem>>, %arg4: memref<288x32xf32, #tpu.memory_space<vmem>>, %arg5: memref<1x32xf32, #tpu.memory_space<vmem>>, %arg6: memref<32x64xf32, #tpu.memory_space<vmem>>, %arg7: memref<1x64xf32, #tpu.memory_space<vmem>>, %arg8: memref<576x128xf32, #tpu.memory_space<vmem>>, %arg9: memref<1x128xf32, #tpu.memory_space<vmem>>, %arg10: memref<9x128x128xf32, #tpu.memory_space<vmem>>, %arg11: memref<1x128xf32, #tpu.memory_space<vmem>>, %arg12: memref<88x232xf32, #tpu.memory_space<vmem>>, %arg13: memref<56x64xf32, #tpu.memory_space<vmem>>, %arg14: memref<88x1xf32, #tpu.memory_space<vmem>>, %arg15: memref<1x56x128xf32, #tpu.memory_space<vmem>>, %arg16: memref<1x88x32xf32, #tpu.memory_space<vmem>>) attributes {dimension_semantics = [#tpu.dimension_semantics<parallel>], iteration_bounds = array<i64: 2>, scalar_prefetch = 0 : i64, scratch_operands = 1 : i64, tpu.core_type = #tpu.core_type<tc>, window_params = [{transform_indices = @transform_0, window_bounds = array<i64: 1, 336, 1>}, {pipeline_mode = #tpu.pipeline_mode<synchronous>, transform_indices = @transform_1, window_bounds = array<i64: 9, 32>}, {pipeline_mode = #tpu.pipeline_mode<synchronous>, transform_indices = @transform_2, window_bounds = array<i64: 1, 32>}, {pipeline_mode = #tpu.pipeline_mode<synchronous>, transform_indices = @transform_3, window_bounds = array<i64: 288, 32>}, {pipeline_mode = #tpu.pipeline_mode<synchronous>, transform_indices = @transform_4, window_bounds = array<i64: 1, 32>}, {pipeline_mode = #tpu.pipeline_mode<synchronous>, transform_indices = @transform_5, window_bounds = array<i64: 32, 64>}, {pipeline_mode = #tpu.pipeline_mode<synchronous>, transform_indices = @transform_6, window_bounds = array<i64: 1, 64>}, {pipeline_mode = #tpu.pipeline_mode<synchronous>, transform_indices = @transform_7, window_bounds = array<i64: 576, 128>}, {pipeline_mode = #tpu.pipeline_mode<synchronous>, transform_indices = @transform_8, window_bounds = array<i64: 1, 128>}, {pipeline_mode = #tpu.pipeline_mode<synchronous>, transform_indices = @transform_9, window_bounds = array<i64: 9, 128, 128>}, {pipeline_mode = #tpu.pipeline_mode<synchronous>, transform_indices = @transform_10, window_bounds = array<i64: 1, 128>}, {pipeline_mode = #tpu.pipeline_mode<synchronous>, transform_indices = @transform_11, window_bounds = array<i64: 88, 232>}, {pipeline_mode = #tpu.pipeline_mode<synchronous>, transform_indices = @transform_12, window_bounds = array<i64: 56, 64>}, {pipeline_mode = #tpu.pipeline_mode<synchronous>, transform_indices = @transform_13, window_bounds = array<i64: 88, 1>}, {transform_indices = @transform_14, window_bounds = array<i64: 1, 56, 128>}]} {
    %c0 = arith.constant 0 : index
    %c0_0 = arith.constant 0 : index
    %c0_1 = arith.constant 0 : index
    %0 = vector.load %arg1[%c0, %c0_0, %c0_1] : memref<1x336x1xf32, #tpu.memory_space<vmem>>, vector<1x336x1xf32>
    %c0_2 = arith.constant 0 : index
    %c0_3 = arith.constant 0 : index
    %1 = vector.load %arg2[%c0_2, %c0_3] : memref<9x32xf32, #tpu.memory_space<vmem>>, vector<9x32xf32>
    %cst = arith.constant 0.000000e+00 : f32
    %2 = vector.broadcast %cst : f32 to vector<1x296x32xf32>
    %3 = vector.extract_strided_slice %0 {offsets = [0, 0, 0], sizes = [1, 296, 1], strides = [1, 1, 1]} : vector<1x336x1xf32> to vector<1x296x1xf32>
    %4 = vector.extract_strided_slice %1 {offsets = [0, 0], sizes = [1, 32], strides = [1, 1]} : vector<9x32xf32> to vector<1x32xf32>
    %5 = vector.shape_cast %4 : vector<1x32xf32> to vector<1x1x32xf32>
    %6 = vector.broadcast %3 : vector<1x296x1xf32> to vector<1x296x32xf32>
    %7 = vector.broadcast %5 : vector<1x1x32xf32> to vector<1x296x32xf32>
    %8 = arith.mulf %6, %7 : vector<1x296x32xf32>
    %9 = arith.addf %2, %8 : vector<1x296x32xf32>
    %10 = vector.extract_strided_slice %0 {offsets = [0, 1, 0], sizes = [1, 296, 1], strides = [1, 1, 1]} : vector<1x336x1xf32> to vector<1x296x1xf32>
    %11 = vector.extract_strided_slice %1 {offsets = [1, 0], sizes = [1, 32], strides = [1, 1]} : vector<9x32xf32> to vector<1x32xf32>
    %12 = vector.shape_cast %11 : vector<1x32xf32> to vector<1x1x32xf32>
    %13 = vector.broadcast %10 : vector<1x296x1xf32> to vector<1x296x32xf32>
    %14 = vector.broadcast %12 : vector<1x1x32xf32> to vector<1x296x32xf32>
    %15 = arith.mulf %13, %14 : vector<1x296x32xf32>
    %16 = arith.addf %9, %15 : vector<1x296x32xf32>
    %17 = vector.extract_strided_slice %0 {offsets = [0, 2, 0], sizes = [1, 296, 1], strides = [1, 1, 1]} : vector<1x336x1xf32> to vector<1x296x1xf32>
    %18 = vector.extract_strided_slice %1 {offsets = [2, 0], sizes = [1, 32], strides = [1, 1]} : vector<9x32xf32> to vector<1x32xf32>
    %19 = vector.shape_cast %18 : vector<1x32xf32> to vector<1x1x32xf32>
    %20 = vector.broadcast %17 : vector<1x296x1xf32> to vector<1x296x32xf32>
    %21 = vector.broadcast %19 : vector<1x1x32xf32> to vector<1x296x32xf32>
    %22 = arith.mulf %20, %21 : vector<1x296x32xf32>
    %23 = arith.addf %16, %22 : vector<1x296x32xf32>
    %24 = vector.extract_strided_slice %0 {offsets = [0, 18, 0], sizes = [1, 296, 1], strides = [1, 1, 1]} : vector<1x336x1xf32> to vector<1x296x1xf32>
    %25 = vector.extract_strided_slice %1 {offsets = [3, 0], sizes = [1, 32], strides = [1, 1]} : vector<9x32xf32> to vector<1x32xf32>
    %26 = vector.shape_cast %25 : vector<1x32xf32> to vector<1x1x32xf32>
    %27 = vector.broadcast %24 : vector<1x296x1xf32> to vector<1x296x32xf32>
    %28 = vector.broadcast %26 : vector<1x1x32xf32> to vector<1x296x32xf32>
    %29 = arith.mulf %27, %28 : vector<1x296x32xf32>
    %30 = arith.addf %23, %29 : vector<1x296x32xf32>
    %31 = vector.extract_strided_slice %0 {offsets = [0, 19, 0], sizes = [1, 296, 1], strides = [1, 1, 1]} : vector<1x336x1xf32> to vector<1x296x1xf32>
    %32 = vector.extract_strided_slice %1 {offsets = [4, 0], sizes = [1, 32], strides = [1, 1]} : vector<9x32xf32> to vector<1x32xf32>
    %33 = vector.shape_cast %32 : vector<1x32xf32> to vector<1x1x32xf32>
    %34 = vector.broadcast %31 : vector<1x296x1xf32> to vector<1x296x32xf32>
    %35 = vector.broadcast %33 : vector<1x1x32xf32> to vector<1x296x32xf32>
    %36 = arith.mulf %34, %35 : vector<1x296x32xf32>
    %37 = arith.addf %30, %36 : vector<1x296x32xf32>
    %38 = vector.extract_strided_slice %0 {offsets = [0, 20, 0], sizes = [1, 296, 1], strides = [1, 1, 1]} : vector<1x336x1xf32> to vector<1x296x1xf32>
    %39 = vector.extract_strided_slice %1 {offsets = [5, 0], sizes = [1, 32], strides = [1, 1]} : vector<9x32xf32> to vector<1x32xf32>
    %40 = vector.shape_cast %39 : vector<1x32xf32> to vector<1x1x32xf32>
    %41 = vector.broadcast %38 : vector<1x296x1xf32> to vector<1x296x32xf32>
    %42 = vector.broadcast %40 : vector<1x1x32xf32> to vector<1x296x32xf32>
    %43 = arith.mulf %41, %42 : vector<1x296x32xf32>
    %44 = arith.addf %37, %43 : vector<1x296x32xf32>
    %45 = vector.extract_strided_slice %0 {offsets = [0, 36, 0], sizes = [1, 296, 1], strides = [1, 1, 1]} : vector<1x336x1xf32> to vector<1x296x1xf32>
    %46 = vector.extract_strided_slice %1 {offsets = [6, 0], sizes = [1, 32], strides = [1, 1]} : vector<9x32xf32> to vector<1x32xf32>
    %47 = vector.shape_cast %46 : vector<1x32xf32> to vector<1x1x32xf32>
    %48 = vector.broadcast %45 : vector<1x296x1xf32> to vector<1x296x32xf32>
    %49 = vector.broadcast %47 : vector<1x1x32xf32> to vector<1x296x32xf32>
    %50 = arith.mulf %48, %49 : vector<1x296x32xf32>
    %51 = arith.addf %44, %50 : vector<1x296x32xf32>
    %52 = vector.extract_strided_slice %0 {offsets = [0, 37, 0], sizes = [1, 296, 1], strides = [1, 1, 1]} : vector<1x336x1xf32> to vector<1x296x1xf32>
    %53 = vector.extract_strided_slice %1 {offsets = [7, 0], sizes = [1, 32], strides = [1, 1]} : vector<9x32xf32> to vector<1x32xf32>
    %54 = vector.shape_cast %53 : vector<1x32xf32> to vector<1x1x32xf32>
    %55 = vector.broadcast %52 : vector<1x296x1xf32> to vector<1x296x32xf32>
    %56 = vector.broadcast %54 : vector<1x1x32xf32> to vector<1x296x32xf32>
    %57 = arith.mulf %55, %56 : vector<1x296x32xf32>
    %58 = arith.addf %51, %57 : vector<1x296x32xf32>
    %59 = vector.extract_strided_slice %0 {offsets = [0, 38, 0], sizes = [1, 296, 1], strides = [1, 1, 1]} : vector<1x336x1xf32> to vector<1x296x1xf32>
    %60 = vector.extract_strided_slice %1 {offsets = [8, 0], sizes = [1, 32], strides = [1, 1]} : vector<9x32xf32> to vector<1x32xf32>
    %61 = vector.shape_cast %60 : vector<1x32xf32> to vector<1x1x32xf32>
    %62 = vector.broadcast %59 : vector<1x296x1xf32> to vector<1x296x32xf32>
    %63 = vector.broadcast %61 : vector<1x1x32xf32> to vector<1x296x32xf32>
    %64 = arith.mulf %62, %63 : vector<1x296x32xf32>
    %65 = arith.addf %58, %64 : vector<1x296x32xf32>
    %c0_4 = arith.constant 0 : index
    %c0_5 = arith.constant 0 : index
    %66 = vector.load %arg3[%c0_4, %c0_5] : memref<1x32xf32, #tpu.memory_space<vmem>>, vector<1x32xf32>
    %67 = vector.shape_cast %66 : vector<1x32xf32> to vector<1x1x32xf32>
    %68 = vector.broadcast %67 : vector<1x1x32xf32> to vector<1x296x32xf32>
    %69 = arith.addf %65, %68 : vector<1x296x32xf32>
    %70 = vector.extract_strided_slice %69 {offsets = [0, 0, 0], sizes = [1, 256, 32], strides = [1, 1, 1]} : vector<1x296x32xf32> to vector<1x256x32xf32>
    %71 = vector.extract_strided_slice %69 {offsets = [0, 1, 0], sizes = [1, 256, 32], strides = [1, 1, 1]} : vector<1x296x32xf32> to vector<1x256x32xf32>
    %72 = vector.extract_strided_slice %69 {offsets = [0, 2, 0], sizes = [1, 256, 32], strides = [1, 1, 1]} : vector<1x296x32xf32> to vector<1x256x32xf32>
    %73 = vector.extract_strided_slice %69 {offsets = [0, 18, 0], sizes = [1, 256, 32], strides = [1, 1, 1]} : vector<1x296x32xf32> to vector<1x256x32xf32>
    %74 = vector.extract_strided_slice %69 {offsets = [0, 19, 0], sizes = [1, 256, 32], strides = [1, 1, 1]} : vector<1x296x32xf32> to vector<1x256x32xf32>
    %75 = vector.extract_strided_slice %69 {offsets = [0, 20, 0], sizes = [1, 256, 32], strides = [1, 1, 1]} : vector<1x296x32xf32> to vector<1x256x32xf32>
    %76 = vector.extract_strided_slice %69 {offsets = [0, 36, 0], sizes = [1, 256, 32], strides = [1, 1, 1]} : vector<1x296x32xf32> to vector<1x256x32xf32>
    %77 = vector.extract_strided_slice %69 {offsets = [0, 37, 0], sizes = [1, 256, 32], strides = [1, 1, 1]} : vector<1x296x32xf32> to vector<1x256x32xf32>
    %78 = vector.extract_strided_slice %69 {offsets = [0, 38, 0], sizes = [1, 256, 32], strides = [1, 1, 1]} : vector<1x296x32xf32> to vector<1x256x32xf32>
    %79 = tpu.concatenate %70, %71, %72, %73, %74, %75, %76, %77, %78 in 2 : vector<1x256x32xf32>, vector<1x256x32xf32>, vector<1x256x32xf32>, vector<1x256x32xf32>, vector<1x256x32xf32>, vector<1x256x32xf32>, vector<1x256x32xf32>, vector<1x256x32xf32>, vector<1x256x32xf32> -> vector<1x256x288xf32>
    %80 = vector.shape_cast %79 : vector<1x256x288xf32> to vector<256x288xf32>
    %c0_6 = arith.constant 0 : index
    %c0_7 = arith.constant 0 : index
    %81 = vector.load %arg4[%c0_6, %c0_7] : memref<288x32xf32, #tpu.memory_space<vmem>>, vector<288x32xf32>
    %cst_8 = arith.constant dense<0.000000e+00> : vector<256x32xf32>
    %82 = tpu.matmul %80, %81, %cst_8 {dimension_numbers = #tpu.dot_dimension_numbers<[1], [0], [0], [1], [0, 0, 1, 1], [], []>} : vector<256x288xf32>, vector<288x32xf32>, vector<256x32xf32> -> vector<256x32xf32>
    %c0_9 = arith.constant 0 : index
    %c0_10 = arith.constant 0 : index
    %83 = vector.load %arg5[%c0_9, %c0_10] : memref<1x32xf32, #tpu.memory_space<vmem>>, vector<1x32xf32>
    %84 = vector.broadcast %83 : vector<1x32xf32> to vector<256x32xf32>
    %85 = arith.addf %82, %84 : vector<256x32xf32>
    %86 = vector.shape_cast %85 : vector<256x32xf32> to vector<1x256x32xf32>
    %87 = vector.extract_strided_slice %86 {offsets = [0, 0, 0], sizes = [1, 232, 32], strides = [1, 1, 1]} : vector<1x256x32xf32> to vector<1x232x32xf32>
    %88 = vector.extract_strided_slice %86 {offsets = [0, 1, 0], sizes = [1, 232, 32], strides = [1, 1, 1]} : vector<1x256x32xf32> to vector<1x232x32xf32>
    %89 = arith.maximumf %87, %88 : vector<1x232x32xf32>
    %90 = vector.extract_strided_slice %86 {offsets = [0, 18, 0], sizes = [1, 232, 32], strides = [1, 1, 1]} : vector<1x256x32xf32> to vector<1x232x32xf32>
    %91 = vector.extract_strided_slice %86 {offsets = [0, 19, 0], sizes = [1, 232, 32], strides = [1, 1, 1]} : vector<1x256x32xf32> to vector<1x232x32xf32>
    %92 = arith.maximumf %90, %91 : vector<1x232x32xf32>
    %93 = arith.maximumf %89, %92 : vector<1x232x32xf32>
    %c0_11 = arith.constant 0 : index
    %c0_12 = arith.constant 0 : index
    %94 = vector.load %arg12[%c0_11, %c0_12] : memref<88x232xf32, #tpu.memory_space<vmem>>, vector<88x232xf32>
    %95 = vector.shape_cast %93 : vector<1x232x32xf32> to vector<232x32xf32>
    %cst_13 = arith.constant dense<0.000000e+00> : vector<88x32xf32>
    %96 = tpu.matmul %94, %95, %cst_13 {dimension_numbers = #tpu.dot_dimension_numbers<[1], [0], [0], [1], [0, 0, 1, 1], [], []>} : vector<88x232xf32>, vector<232x32xf32>, vector<88x32xf32> -> vector<88x32xf32>
    %c0_14 = arith.constant 0 : index
    %c0_15 = arith.constant 0 : index
    %c0_16 = arith.constant 0 : index
    %97 = vector.load %arg16[%c0_14, %c0_15, %c0_16] : memref<1x88x32xf32, #tpu.memory_space<vmem>>, vector<1x88x32xf32>
    %98 = vector.shape_cast %97 : vector<1x88x32xf32> to vector<88x32xf32>
    %99 = vector.shape_cast %96 : vector<88x32xf32> to vector<1x88x32xf32>
    tpu.vector_store %arg16[%c0_14, %c0_15, %c0_16], %99 {strides = array<i32>} : memref<1x88x32xf32, #tpu.memory_space<vmem>>, vector<1x88x32xf32>,
    %c0_17 = arith.constant 0 : index
    %c0_18 = arith.constant 0 : index
    %c0_19 = arith.constant 0 : index
    %100 = vector.load %arg16[%c0_17, %c0_18, %c0_19] : memref<1x88x32xf32, #tpu.memory_space<vmem>>, vector<1x88x32xf32>
    %c0_20 = arith.constant 0 : index
    %c0_21 = arith.constant 0 : index
    %101 = vector.load %arg14[%c0_20, %c0_21] : memref<88x1xf32, #tpu.memory_space<vmem>>, vector<88x1xf32>
    %102 = vector.shape_cast %100 : vector<1x88x32xf32> to vector<88x32xf32>
    %c0_22 = arith.constant 0 : index
    %c0_23 = arith.constant 0 : index
    %103 = vector.load %arg6[%c0_22, %c0_23] : memref<32x64xf32, #tpu.memory_space<vmem>>, vector<32x64xf32>
    %cst_24 = arith.constant dense<0.000000e+00> : vector<88x64xf32>
    %104 = tpu.matmul %102, %103, %cst_24 {dimension_numbers = #tpu.dot_dimension_numbers<[1], [0], [0], [1], [0, 0, 1, 1], [], []>} : vector<88x32xf32>, vector<32x64xf32>, vector<88x64xf32> -> vector<88x64xf32>
    %105 = vector.shape_cast %104 : vector<88x64xf32> to vector<1x88x64xf32>
    %c0_25 = arith.constant 0 : index
    %c0_26 = arith.constant 0 : index
    %106 = vector.load %arg7[%c0_25, %c0_26] : memref<1x64xf32, #tpu.memory_space<vmem>>, vector<1x64xf32>
    %107 = vector.broadcast %106 : vector<1x64xf32> to vector<88x64xf32>
    %108 = vector.broadcast %101 : vector<88x1xf32> to vector<88x64xf32>
    %109 = arith.mulf %107, %108 : vector<88x64xf32>
    %110 = vector.shape_cast %109 : vector<88x64xf32> to vector<1x88x64xf32>
    %111 = arith.addf %105, %110 : vector<1x88x64xf32>
    %112 = vector.extract_strided_slice %111 {offsets = [0, 0, 0], sizes = [1, 64, 64], strides = [1, 1, 1]} : vector<1x88x64xf32> to vector<1x64x64xf32>
    %113 = vector.extract_strided_slice %111 {offsets = [0, 1, 0], sizes = [1, 64, 64], strides = [1, 1, 1]} : vector<1x88x64xf32> to vector<1x64x64xf32>
    %114 = vector.extract_strided_slice %111 {offsets = [0, 2, 0], sizes = [1, 64, 64], strides = [1, 1, 1]} : vector<1x88x64xf32> to vector<1x64x64xf32>
    %115 = vector.extract_strided_slice %111 {offsets = [0, 9, 0], sizes = [1, 64, 64], strides = [1, 1, 1]} : vector<1x88x64xf32> to vector<1x64x64xf32>
    %116 = vector.extract_strided_slice %111 {offsets = [0, 10, 0], sizes = [1, 64, 64], strides = [1, 1, 1]} : vector<1x88x64xf32> to vector<1x64x64xf32>
    %117 = vector.extract_strided_slice %111 {offsets = [0, 11, 0], sizes = [1, 64, 64], strides = [1, 1, 1]} : vector<1x88x64xf32> to vector<1x64x64xf32>
    %118 = vector.extract_strided_slice %111 {offsets = [0, 18, 0], sizes = [1, 64, 64], strides = [1, 1, 1]} : vector<1x88x64xf32> to vector<1x64x64xf32>
    %119 = vector.extract_strided_slice %111 {offsets = [0, 19, 0], sizes = [1, 64, 64], strides = [1, 1, 1]} : vector<1x88x64xf32> to vector<1x64x64xf32>
    %120 = vector.extract_strided_slice %111 {offsets = [0, 20, 0], sizes = [1, 64, 64], strides = [1, 1, 1]} : vector<1x88x64xf32> to vector<1x64x64xf32>
    %121 = tpu.concatenate %112, %113, %114, %115, %116, %117, %118, %119, %120 in 2 : vector<1x64x64xf32>, vector<1x64x64xf32>, vector<1x64x64xf32>, vector<1x64x64xf32>, vector<1x64x64xf32>, vector<1x64x64xf32>, vector<1x64x64xf32>, vector<1x64x64xf32>, vector<1x64x64xf32> -> vector<1x64x576xf32>
    %122 = vector.shape_cast %121 : vector<1x64x576xf32> to vector<64x576xf32>
    %c0_27 = arith.constant 0 : index
    %c0_28 = arith.constant 0 : index
    %123 = vector.load %arg8[%c0_27, %c0_28] : memref<576x128xf32, #tpu.memory_space<vmem>>, vector<576x128xf32>
    %cst_29 = arith.constant dense<0.000000e+00> : vector<64x128xf32>
    %124 = tpu.matmul %122, %123, %cst_29 {dimension_numbers = #tpu.dot_dimension_numbers<[1], [0], [0], [1], [0, 0, 1, 1], [], []>} : vector<64x576xf32>, vector<576x128xf32>, vector<64x128xf32> -> vector<64x128xf32>
    %125 = vector.shape_cast %124 : vector<64x128xf32> to vector<1x64x128xf32>
    %cst_30 = arith.constant 0.000000e+00 : f32
    %126 = vector.broadcast %cst_30 : f32 to vector<1x10x128xf32>
    %cst_31 = arith.constant 0.000000e+00 : f32
    %127 = vector.broadcast %cst_31 : f32 to vector<1x14x128xf32>
    %128 = tpu.concatenate %126, %125, %127 in 1 : vector<1x10x128xf32>, vector<1x64x128xf32>, vector<1x14x128xf32> -> vector<1x88x128xf32>
    %c0_32 = arith.constant 0 : index
    %c0_33 = arith.constant 0 : index
    %129 = vector.load %arg9[%c0_32, %c0_33] : memref<1x128xf32, #tpu.memory_space<vmem>>, vector<1x128xf32>
    %130 = vector.shape_cast %129 : vector<1x128xf32> to vector<1x1x128xf32>
    %131 = vector.broadcast %130 : vector<1x1x128xf32> to vector<1x88x128xf32>
    %132 = arith.addf %128, %131 : vector<1x88x128xf32>
    %133 = vector.shape_cast %101 : vector<88x1xf32> to vector<1x88x1xf32>
    %134 = vector.broadcast %133 : vector<1x88x1xf32> to vector<1x88x128xf32>
    %135 = arith.mulf %132, %134 : vector<1x88x128xf32>
    %c0_34 = arith.constant 0 : index
    %c0_35 = arith.constant 0 : index
    %c0_36 = arith.constant 0 : index
    %136 = vector.load %arg10[%c0_34, %c0_35, %c0_36] : memref<9x128x128xf32, #tpu.memory_space<vmem>>, vector<9x128x128xf32>
    %cst_37 = arith.constant 0.000000e+00 : f32
    %137 = vector.broadcast %cst_37 : f32 to vector<64x128xf32>
    %138 = vector.extract_strided_slice %135 {offsets = [0, 0, 0], sizes = [1, 64, 128], strides = [1, 1, 1]} : vector<1x88x128xf32> to vector<1x64x128xf32>
    %139 = vector.shape_cast %138 : vector<1x64x128xf32> to vector<64x128xf32>
    %140 = vector.extract_strided_slice %136 {offsets = [0, 0, 0], sizes = [1, 128, 128], strides = [1, 1, 1]} : vector<9x128x128xf32> to vector<1x128x128xf32>
    %141 = vector.shape_cast %140 : vector<1x128x128xf32> to vector<128x128xf32>
    %cst_38 = arith.constant dense<0.000000e+00> : vector<64x128xf32>
    %142 = tpu.matmul %139, %141, %cst_38 {dimension_numbers = #tpu.dot_dimension_numbers<[1], [0], [0], [1], [0, 0, 1, 1], [], []>} : vector<64x128xf32>, vector<128x128xf32>, vector<64x128xf32> -> vector<64x128xf32>
    %143 = arith.addf %137, %142 : vector<64x128xf32>
    %144 = vector.extract_strided_slice %135 {offsets = [0, 1, 0], sizes = [1, 64, 128], strides = [1, 1, 1]} : vector<1x88x128xf32> to vector<1x64x128xf32>
    %145 = vector.shape_cast %144 : vector<1x64x128xf32> to vector<64x128xf32>
    %146 = vector.extract_strided_slice %136 {offsets = [1, 0, 0], sizes = [1, 128, 128], strides = [1, 1, 1]} : vector<9x128x128xf32> to vector<1x128x128xf32>
    %147 = vector.shape_cast %146 : vector<1x128x128xf32> to vector<128x128xf32>
    %cst_39 = arith.constant dense<0.000000e+00> : vector<64x128xf32>
    %148 = tpu.matmul %145, %147, %cst_39 {dimension_numbers = #tpu.dot_dimension_numbers<[1], [0], [0], [1], [0, 0, 1, 1], [], []>} : vector<64x128xf32>, vector<128x128xf32>, vector<64x128xf32> -> vector<64x128xf32>
    %149 = arith.addf %143, %148 : vector<64x128xf32>
    %150 = vector.extract_strided_slice %135 {offsets = [0, 2, 0], sizes = [1, 64, 128], strides = [1, 1, 1]} : vector<1x88x128xf32> to vector<1x64x128xf32>
    %151 = vector.shape_cast %150 : vector<1x64x128xf32> to vector<64x128xf32>
    %152 = vector.extract_strided_slice %136 {offsets = [2, 0, 0], sizes = [1, 128, 128], strides = [1, 1, 1]} : vector<9x128x128xf32> to vector<1x128x128xf32>
    %153 = vector.shape_cast %152 : vector<1x128x128xf32> to vector<128x128xf32>
    %cst_40 = arith.constant dense<0.000000e+00> : vector<64x128xf32>
    %154 = tpu.matmul %151, %153, %cst_40 {dimension_numbers = #tpu.dot_dimension_numbers<[1], [0], [0], [1], [0, 0, 1, 1], [], []>} : vector<64x128xf32>, vector<128x128xf32>, vector<64x128xf32> -> vector<64x128xf32>
    %155 = arith.addf %149, %154 : vector<64x128xf32>
    %156 = vector.extract_strided_slice %135 {offsets = [0, 9, 0], sizes = [1, 64, 128], strides = [1, 1, 1]} : vector<1x88x128xf32> to vector<1x64x128xf32>
    %157 = vector.shape_cast %156 : vector<1x64x128xf32> to vector<64x128xf32>
    %158 = vector.extract_strided_slice %136 {offsets = [3, 0, 0], sizes = [1, 128, 128], strides = [1, 1, 1]} : vector<9x128x128xf32> to vector<1x128x128xf32>
    %159 = vector.shape_cast %158 : vector<1x128x128xf32> to vector<128x128xf32>
    %cst_41 = arith.constant dense<0.000000e+00> : vector<64x128xf32>
    %160 = tpu.matmul %157, %159, %cst_41 {dimension_numbers = #tpu.dot_dimension_numbers<[1], [0], [0], [1], [0, 0, 1, 1], [], []>} : vector<64x128xf32>, vector<128x128xf32>, vector<64x128xf32> -> vector<64x128xf32>
    %161 = arith.addf %155, %160 : vector<64x128xf32>
    %162 = vector.extract_strided_slice %135 {offsets = [0, 10, 0], sizes = [1, 64, 128], strides = [1, 1, 1]} : vector<1x88x128xf32> to vector<1x64x128xf32>
    %163 = vector.shape_cast %162 : vector<1x64x128xf32> to vector<64x128xf32>
    %164 = vector.extract_strided_slice %136 {offsets = [4, 0, 0], sizes = [1, 128, 128], strides = [1, 1, 1]} : vector<9x128x128xf32> to vector<1x128x128xf32>
    %165 = vector.shape_cast %164 : vector<1x128x128xf32> to vector<128x128xf32>
    %cst_42 = arith.constant dense<0.000000e+00> : vector<64x128xf32>
    %166 = tpu.matmul %163, %165, %cst_42 {dimension_numbers = #tpu.dot_dimension_numbers<[1], [0], [0], [1], [0, 0, 1, 1], [], []>} : vector<64x128xf32>, vector<128x128xf32>, vector<64x128xf32> -> vector<64x128xf32>
    %167 = arith.addf %161, %166 : vector<64x128xf32>
    %168 = vector.extract_strided_slice %135 {offsets = [0, 11, 0], sizes = [1, 64, 128], strides = [1, 1, 1]} : vector<1x88x128xf32> to vector<1x64x128xf32>
    %169 = vector.shape_cast %168 : vector<1x64x128xf32> to vector<64x128xf32>
    %170 = vector.extract_strided_slice %136 {offsets = [5, 0, 0], sizes = [1, 128, 128], strides = [1, 1, 1]} : vector<9x128x128xf32> to vector<1x128x128xf32>
    %171 = vector.shape_cast %170 : vector<1x128x128xf32> to vector<128x128xf32>
    %cst_43 = arith.constant dense<0.000000e+00> : vector<64x128xf32>
    %172 = tpu.matmul %169, %171, %cst_43 {dimension_numbers = #tpu.dot_dimension_numbers<[1], [0], [0], [1], [0, 0, 1, 1], [], []>} : vector<64x128xf32>, vector<128x128xf32>, vector<64x128xf32> -> vector<64x128xf32>
    %173 = arith.addf %167, %172 : vector<64x128xf32>
    %174 = vector.extract_strided_slice %135 {offsets = [0, 18, 0], sizes = [1, 64, 128], strides = [1, 1, 1]} : vector<1x88x128xf32> to vector<1x64x128xf32>
    %175 = vector.shape_cast %174 : vector<1x64x128xf32> to vector<64x128xf32>
    %176 = vector.extract_strided_slice %136 {offsets = [6, 0, 0], sizes = [1, 128, 128], strides = [1, 1, 1]} : vector<9x128x128xf32> to vector<1x128x128xf32>
    %177 = vector.shape_cast %176 : vector<1x128x128xf32> to vector<128x128xf32>
    %cst_44 = arith.constant dense<0.000000e+00> : vector<64x128xf32>
    %178 = tpu.matmul %175, %177, %cst_44 {dimension_numbers = #tpu.dot_dimension_numbers<[1], [0], [0], [1], [0, 0, 1, 1], [], []>} : vector<64x128xf32>, vector<128x128xf32>, vector<64x128xf32> -> vector<64x128xf32>
    %179 = arith.addf %173, %178 : vector<64x128xf32>
    %180 = vector.extract_strided_slice %135 {offsets = [0, 19, 0], sizes = [1, 64, 128], strides = [1, 1, 1]} : vector<1x88x128xf32> to vector<1x64x128xf32>
    %181 = vector.shape_cast %180 : vector<1x64x128xf32> to vector<64x128xf32>
    %182 = vector.extract_strided_slice %136 {offsets = [7, 0, 0], sizes = [1, 128, 128], strides = [1, 1, 1]} : vector<9x128x128xf32> to vector<1x128x128xf32>
    %183 = vector.shape_cast %182 : vector<1x128x128xf32> to vector<128x128xf32>
    %cst_45 = arith.constant dense<0.000000e+00> : vector<64x128xf32>
    %184 = tpu.matmul %181, %183, %cst_45 {dimension_numbers = #tpu.dot_dimension_numbers<[1], [0], [0], [1], [0, 0, 1, 1], [], []>} : vector<64x128xf32>, vector<128x128xf32>, vector<64x128xf32> -> vector<64x128xf32>
    %185 = arith.addf %179, %184 : vector<64x128xf32>
    %186 = vector.extract_strided_slice %135 {offsets = [0, 20, 0], sizes = [1, 64, 128], strides = [1, 1, 1]} : vector<1x88x128xf32> to vector<1x64x128xf32>
    %187 = vector.shape_cast %186 : vector<1x64x128xf32> to vector<64x128xf32>
    %188 = vector.extract_strided_slice %136 {offsets = [8, 0, 0], sizes = [1, 128, 128], strides = [1, 1, 1]} : vector<9x128x128xf32> to vector<1x128x128xf32>
    %189 = vector.shape_cast %188 : vector<1x128x128xf32> to vector<128x128xf32>
    %cst_46 = arith.constant dense<0.000000e+00> : vector<64x128xf32>
    %190 = tpu.matmul %187, %189, %cst_46 {dimension_numbers = #tpu.dot_dimension_numbers<[1], [0], [0], [1], [0, 0, 1, 1], [], []>} : vector<64x128xf32>, vector<128x128xf32>, vector<64x128xf32> -> vector<64x128xf32>
    %191 = arith.addf %185, %190 : vector<64x128xf32>
    %192 = vector.shape_cast %191 : vector<64x128xf32> to vector<1x64x128xf32>
    %c0_47 = arith.constant 0 : index
    %c0_48 = arith.constant 0 : index
    %193 = vector.load %arg13[%c0_47, %c0_48] : memref<56x64xf32, #tpu.memory_space<vmem>>, vector<56x64xf32>
    %c0_49 = arith.constant 0 : index
    %c0_50 = arith.constant 0 : index
    %194 = vector.load %arg11[%c0_49, %c0_50] : memref<1x128xf32, #tpu.memory_space<vmem>>, vector<1x128xf32>
    %195 = vector.shape_cast %192 : vector<1x64x128xf32> to vector<64x128xf32>
    %cst_51 = arith.constant dense<0.000000e+00> : vector<56x128xf32>
    %196 = tpu.matmul %193, %195, %cst_51 {dimension_numbers = #tpu.dot_dimension_numbers<[1], [0], [0], [1], [0, 0, 1, 1], [], []>} : vector<56x64xf32>, vector<64x128xf32>, vector<56x128xf32> -> vector<56x128xf32>
    %197 = vector.broadcast %194 : vector<1x128xf32> to vector<56x128xf32>
    %198 = arith.addf %196, %197 : vector<56x128xf32>
    %c0_52 = arith.constant 0 : index
    %c0_53 = arith.constant 0 : index
    %c0_54 = arith.constant 0 : index
    %199 = vector.load %arg15[%c0_52, %c0_53, %c0_54] : memref<1x56x128xf32, #tpu.memory_space<vmem>>, vector<1x56x128xf32>
    %200 = vector.shape_cast %199 : vector<1x56x128xf32> to vector<56x128xf32>
    %201 = vector.shape_cast %198 : vector<56x128xf32> to vector<1x56x128xf32>
    tpu.vector_store %arg15[%c0_52, %c0_53, %c0_54], %201 {strides = array<i32>} : memref<1x56x128xf32, #tpu.memory_space<vmem>>, vector<1x56x128xf32>,
    return
  }
  func.func @transform_0(%arg0: i32) -> (i32, i32, i32) {
    %c0_i32 = arith.constant 0 : i32
    %c0_i32_0 = arith.constant 0 : i32
    %c0_i32_1 = arith.constant 0 : i32
    return %arg0, %c0_i32, %c0_i32_0 : i32, i32, i32
  }
  func.func @transform_1(%arg0: i32) -> (i32, i32) {
    %c0_i32 = arith.constant 0 : i32
    %c0_i32_0 = arith.constant 0 : i32
    %c0_i32_1 = arith.constant 0 : i32
    return %c0_i32, %c0_i32_0 : i32, i32
  }
  func.func @transform_2(%arg0: i32) -> (i32, i32) {
    %c0_i32 = arith.constant 0 : i32
    %c0_i32_0 = arith.constant 0 : i32
    %c0_i32_1 = arith.constant 0 : i32
    return %c0_i32, %c0_i32_0 : i32, i32
  }
  func.func @transform_3(%arg0: i32) -> (i32, i32) {
    %c0_i32 = arith.constant 0 : i32
    %c0_i32_0 = arith.constant 0 : i32
    %c0_i32_1 = arith.constant 0 : i32
    return %c0_i32, %c0_i32_0 : i32, i32
  }
  func.func @transform_4(%arg0: i32) -> (i32, i32) {
    %c0_i32 = arith.constant 0 : i32
    %c0_i32_0 = arith.constant 0 : i32
    %c0_i32_1 = arith.constant 0 : i32
    return %c0_i32, %c0_i32_0 : i32, i32
  }
  func.func @transform_5(%arg0: i32) -> (i32, i32) {
    %c0_i32 = arith.constant 0 : i32
    %c0_i32_0 = arith.constant 0 : i32
    %c0_i32_1 = arith.constant 0 : i32
    return %c0_i32, %c0_i32_0 : i32, i32
  }
  func.func @transform_6(%arg0: i32) -> (i32, i32) {
    %c0_i32 = arith.constant 0 : i32
    %c0_i32_0 = arith.constant 0 : i32
    %c0_i32_1 = arith.constant 0 : i32
    return %c0_i32, %c0_i32_0 : i32, i32
  }
  func.func @transform_7(%arg0: i32) -> (i32, i32) {
    %c0_i32 = arith.constant 0 : i32
    %c0_i32_0 = arith.constant 0 : i32
    %c0_i32_1 = arith.constant 0 : i32
    return %c0_i32, %c0_i32_0 : i32, i32
  }
  func.func @transform_8(%arg0: i32) -> (i32, i32) {
    %c0_i32 = arith.constant 0 : i32
    %c0_i32_0 = arith.constant 0 : i32
    %c0_i32_1 = arith.constant 0 : i32
    return %c0_i32, %c0_i32_0 : i32, i32
  }
  func.func @transform_9(%arg0: i32) -> (i32, i32, i32) {
    %c0_i32 = arith.constant 0 : i32
    %c0_i32_0 = arith.constant 0 : i32
    %c0_i32_1 = arith.constant 0 : i32
    %c0_i32_2 = arith.constant 0 : i32
    return %c0_i32, %c0_i32_0, %c0_i32_1 : i32, i32, i32
  }
  func.func @transform_10(%arg0: i32) -> (i32, i32) {
    %c0_i32 = arith.constant 0 : i32
    %c0_i32_0 = arith.constant 0 : i32
    %c0_i32_1 = arith.constant 0 : i32
    return %c0_i32, %c0_i32_0 : i32, i32
  }
  func.func @transform_11(%arg0: i32) -> (i32, i32) {
    %c0_i32 = arith.constant 0 : i32
    %c0_i32_0 = arith.constant 0 : i32
    %c0_i32_1 = arith.constant 0 : i32
    return %c0_i32, %c0_i32_0 : i32, i32
  }
  func.func @transform_12(%arg0: i32) -> (i32, i32) {
    %c0_i32 = arith.constant 0 : i32
    %c0_i32_0 = arith.constant 0 : i32
    %c0_i32_1 = arith.constant 0 : i32
    return %c0_i32, %c0_i32_0 : i32, i32
  }
  func.func @transform_13(%arg0: i32) -> (i32, i32) {
    %c0_i32 = arith.constant 0 : i32
    %c0_i32_0 = arith.constant 0 : i32
    %c0_i32_1 = arith.constant 0 : i32
    return %c0_i32, %c0_i32_0 : i32, i32
  }
  func.func @transform_14(%arg0: i32) -> (i32, i32, i32) {
    %c0_i32 = arith.constant 0 : i32
    %c0_i32_0 = arith.constant 0 : i32
    %c0_i32_1 = arith.constant 0 : i32
    return %arg0, %c0_i32, %c0_i32_0 : i32, i32, i32
  }
}

</mosaic_0001>

<bundles_post_ra>
// kernel: stem_forward.1
= control target key start
LH: loop header
LB: loop body
LE: loop exit
PB: predicated region body
PF: predicated region fallthrough
CT: control target
= control target key end

     0   :  { %s7051_s29 = smov 0   ;;  %s13296_s0 = inlined_call_operand.vmem [shape: f32[2,336,1], index: 0, kind: input, shape index: {}]   ;;  %s13297_s1 = inlined_call_operand.vmem [shape: f32[9,32], index: 1, kind: input, shape index: {}]   ;;  %s13298_s2 = inlined_call_operand.vmem [shape: f32[1,32], index: 2, kind: input, shape index: {}]   ;;  %s13299_s3 = inlined_call_operand.vmem [shape: f32[288,32], index: 3, kind: input, shape index: {}]   ;;  %s13300_s4 = inlined_call_operand.vmem [shape: f32[1,32], index: 4, kind: input, shape index: {}]   ;;  %s13301_s5 = inlined_call_operand.vmem [shape: f32[32,64], index: 5, kind: input, shape index: {}]   ;;  %s13302_s6 = inlined_call_operand.vmem [shape: f32[1,64], index: 6, kind: input, shape index: {}]   ;;  %s13303_s7 = inlined_call_operand.vmem [shape: f32[576,128], index: 7, kind: input, shape index: {}]   ;;  %s13304_s8 = inlined_call_operand.vmem [shape: f32[1,128], index: 8, kind: input, shape index: {}]   ;;  %s13305_s9 = inlined_call_operand.vmem [shape: f32[9,128,128], index: 9, kind: input, shape index: {}]   ;;  %s13306_s10 = inlined_call_operand.vmem [shape: f32[1,128], index: 10, kind: input, shape index: {}]   ;;  %s13307_s11 = inlined_call_operand.vmem [shape: f32[88,232], index: 11, kind: input, shape index: {}]   ;;  %s13308_s12 = inlined_call_operand.vmem [shape: f32[56,64], index: 12, kind: input, shape index: {}]   ;;  %s13309_s13 = inlined_call_operand.vmem [shape: f32[88,1], index: 13, kind: input, shape index: {}]   ;;  %s13310_s14 = inlined_call_operand.vmem [shape: f32[2,56,128], index: 14, kind: output, shape index: {}]  }
   0x1 LB: > { %s6348_s30 = sadd.s32 4294967295, %s6970_s29   ;;  %p6352_p0 = scmp.ge.s32.totalorder %s6970_s29, 1  ;;  %s6970_s29 = sphi %s7051_s29, %s24_s29  }
   0x2   : > { %p412_p1 = scmp.lt.s32.totalorder %s6970_s29, 3 }
   0x4   : > { %p413_p2 = pnand %p6352_p0, %p412_p1 }
   0x6   : > { %416 = sbr.rel (%p413_p2) target bundleno = 2254 (0x8ce), region = 76 }
   0xb   : > { %p458_p3 = scmp.lt.s32.totalorder %s6348_s30, 1  ;;  %v6972_v0 = vmov 0   ;;  %v510_v29 = vld [vmem:[%s13297_s1] sm:$0xff]  ;;  %vm854_vm0 = vcmask 1046528   ;;  %vm1081_vm1 = vcmask 1045504   ;;  %vm1544_vm2 = vcmask 1044480  }
   0xc   : > { %6466 = vset.pattern.permute.xlu2 %v6972_v0  ;;  %6465 = vset.pattern.permute.xlu1 %v6972_v0  ;;  %v7101_v31 = vperm.slane %v510_v29, 1  ;;  %v7111_v34 = vperm.slane %v510_v29, 2  ;;  %v7113_v35 = vperm.slane %v510_v29, 0  ;;  %v7115_v36 = vperm.slane %v510_v29, 5  ;;  %s6973_s20 = smov 32   ;;  %s6974_s21 = smov 96  }
   0xd   : > { %6464 = vset.pattern.permute.xlu0 %v6972_v0  ;;  %s14341_s30 = smov (!%p458_p3, %s6348_s30), 1  ;;  %v7117_v37 = vperm.slane %v510_v29, 3  ;;  %v7119_v38 = vperm.slane %v510_v29, 4  ;;  %v7133_v44 = vperm.slane %v510_v29, 6  ;;  %v7162_v54 = vperm.slane %v510_v29, 7  ;;  %s6975_s22 = smov 64  }
   0xe   : > { %s6450_s15 = smul.u32 336, %s14341_s30  ;;  %13591 = vst [vmem:[#allocation5_spill] sm:$0xff] %v7101_v31  ;;  %vm1771_vm3 = vcmask 1043456   ;;  %vm2234_vm4 = vcmask 1042432   ;;  %vm2461_vm5 = vcmask 1041408   ;;  %vm3695_vm6 = vcmask 261120  }
   0xf   : > { %13592 = vst [vmem:[#allocation6_spill] sm:$0xff] %v7111_v34  ;;  %vm3728_vm7 = vcmask 523264   ;;  %vm3761_vm8 = vcmask 785408   ;;  %vm4661_vm9 = vcmask 850944  }
  0x10   : > { %s7065_s18 = scalar_lea.vmem %s13296_s0, %s6450_s15  ;;  %13593 = vst [vmem:[#allocation7_spill] sm:$0xff] %v7113_v35 }
  0x11   : > { %v472_v1 = vld [vmem:[%s7065_s18 + $0x20] sm:$0xff]  ;;  %v470_v2 = vld [vmem:[%s7065_s18 + $0x10] sm:$0xff]  ;;  %v473_v4 = vld [vmem:[%s7065_s18 + $0x28] sm:$0xff]  ;;  %13594 = vst [vmem:[#allocation8_spill] sm:$0xff] %v7115_v36 }
  0x12   : > { %v468_v3 = vld [vmem:[%s7065_s18] sm:$0xff]  ;;  %534 = vperm.xlu2 %6466, %v472_v1   ;;  %524 = vperm.xlu1 %6465, %v470_v2   ;;  %v471_v5 = vld [vmem:[%s7065_s18 + $0x18] sm:$0xff]  ;;  %v469_v6 = vld [vmem:[%s7065_s18 + $0x8] sm:$0xff]  ;;  %13595 = vst [vmem:[#allocation9_spill] sm:$0xff] %v7117_v37 }
  0x13   : > { %514 = vperm.xlu0 %6464, %v468_v3   ;;  %v476_v7 = vld [vmem:[%s7065_s18 + $0x40] sm:$0xff]  ;;  %v475_v8 = vld [vmem:[%s7065_s18 + $0x38] sm:$0xff]  ;;  %v474_v9 = vld [vmem:[%s7065_s18 + $0x30] sm:$0xff]  ;;  %13596 = vst [vmem:[#allocation10_spill] sm:$0xff] %v7119_v38 }
  0x14   : > { %v479_v10 = vld [vmem:[%s7065_s18 + $0x58] sm:$0xff]  ;;  %v478_v11 = vld [vmem:[%s7065_s18 + $0x50] sm:$0xff]  ;;  %v477_v12 = vld [vmem:[%s7065_s18 + $0x48] sm:$0xff]  ;;  %13597 = vst [vmem:[#allocation11_spill] sm:$0xff] %v7133_v44 }
  0x15   : > { %v482_v13 = vld [vmem:[%s7065_s18 + $0x70] sm:$0xff]  ;;  %v481_v14 = vld [vmem:[%s7065_s18 + $0x68] sm:$0xff]  ;;  %v480_v15 = vld [vmem:[%s7065_s18 + $0x60] sm:$0xff] }
  0x16   : > { %v485_v16 = vld [vmem:[%s7065_s18 + $0x88] sm:$0xff]  ;;  %v484_v17 = vld [vmem:[%s7065_s18 + $0x80] sm:$0xff]  ;;  %v483_v18 = vld [vmem:[%s7065_s18 + $0x78] sm:$0xff] }
  0x17   : > { %v488_v19 = vld [vmem:[%s7065_s18 + $0xa0] sm:$0xff]  ;;  %v487_v20 = vld [vmem:[%s7065_s18 + $0x98] sm:$0xff]  ;;  %v486_v21 = vld [vmem:[%s7065_s18 + $0x90] sm:$0xff] }
  0x18   : > { %v491_v22 = vld [vmem:[%s7065_s18 + $0xb8] sm:$0xff]  ;;  %v490_v23 = vld [vmem:[%s7065_s18 + $0xb0] sm:$0xff]  ;;  %v489_v24 = vld [vmem:[%s7065_s18 + $0xa8] sm:$0xff] }
  0x19   : > { %v494_v25 = vld [vmem:[%s7065_s18 + $0xd0] sm:$0xff]  ;;  %v493_v26 = vld [vmem:[%s7065_s18 + $0xc8] sm:$0xff]  ;;  %v492_v27 = vld [vmem:[%s7065_s18 + $0xc0] sm:$0xff] }
  0x1a   : > { %539 = vperm.xlu2 %6466, %v473_v4   ;;  %529 = vperm.xlu1 %6465, %v471_v5  }
  0x1b   : > { %519 = vperm.xlu0 %6464, %v469_v6  }
  0x22   : > { %554 = vperm.xlu2 %6466, %v476_v7   ;;  %549 = vperm.xlu1 %6465, %v475_v8   ;;  %v7205_v8 = vld [vmem:[%s13297_s1 + $0x8] ss:$0 sm:$0xff] }
  0x23   : > { %544 = vperm.xlu0 %6464, %v474_v9  }
  0x2a   : > { %569 = vperm.xlu2 %6466, %v479_v10   ;;  %564 = vperm.xlu1 %6465, %v478_v11  }
  0x2b   : > { %559 = vperm.xlu0 %6464, %v477_v12  }
  0x32   : > { %584 = vperm.xlu2 %6466, %v482_v13   ;;  %579 = vperm.xlu1 %6465, %v481_v14  }
  0x33   : > { %574 = vperm.xlu0 %6464, %v480_v15  }
  0x3a   : > { %599 = vperm.xlu2 %6466, %v485_v16   ;;  %594 = vperm.xlu1 %6465, %v484_v17  }
  0x3b   : > { %589 = vperm.xlu0 %6464, %v483_v18  }
  0x42   : > { %614 = vperm.xlu2 %6466, %v488_v19   ;;  %609 = vperm.xlu1 %6465, %v487_v20  }
  0x43   : > { %604 = vperm.xlu0 %6464, %v486_v21  }
  0x4a   : > { %629 = vperm.xlu2 %6466, %v491_v22   ;;  %624 = vperm.xlu1 %6465, %v490_v23  }
  0x4b   : > { %619 = vperm.xlu0 %6464, %v489_v24  }
  0x52   : > { %644 = vperm.xlu2 %6466, %v494_v25   ;;  %639 = vperm.xlu1 %6465, %v493_v26  }
  0x53   : > { %634 = vperm.xlu0 %6464, %v492_v27  }
  0x6c   : > { %v7094_v28 = vpop.permute.xlu2 %534 }
  0x6d   : > { %13589 = vst [vmem:[#allocation3_spill] sm:$0xff] %v7094_v28  ;;  %v7109_v33 = vmul.f32 %v7101_v31, %v7094_v28  ;;  %v7131_v43 = vmul.f32 %v7111_v34, %v7094_v28  ;;  %v7137_v46 = vmul.f32 %v7117_v37, %v7094_v28  ;;  %v7149_v49 = vmul.f32 %v7119_v38, %v7094_v28 }
  0x6e   : > { %v7157_v51 = vmul.f32 %v7115_v36, %v7094_v28  ;;  %v702_v52 = vmul.f32 %v7113_v35, %v7094_v28  ;;  %v1932_v60 = vmul.f32 %v7133_v44, %v7094_v28 }
  0x6f   : > { %v13321_v42 = vrot.slane %v7109_v33, 1  ;;  %v13320_v57 = vrot.slane %v7131_v43, 2  ;;  %v13319_v58 = vrot.slane %v7137_v46, 2  ;;  %v13318_v61 = vrot.slane %v7149_v49, 3 }
  0x70   : > { %v13317_v63 = vrot.slane %v7157_v51, 4  ;;  %v2008_v11 = vrot.slane %v1932_v60, 4 }
  0x74   : > { %v7099_v30 = vpop.permute.xlu2 %539 }
  0x75   : > { %13590 = vst [vmem:[#allocation4_spill] sm:$0xff] %v7099_v30  ;;  %v7105_v32 = vmul.f32 %v7101_v31, %v7099_v30  ;;  %v7124_v40 = vmul.f32 %v7111_v34, %v7099_v30  ;;  %v7141_v47 = vmul.f32 %v7117_v37, %v7099_v30  ;;  %v7145_v48 = vmul.f32 %v7115_v36, %v7099_v30 }
  0x76   : > { %v7153_v50 = vmul.f32 %v7119_v38, %v7099_v30  ;;  %v7182_v2 = vmul.f32 %v7133_v44, %v7099_v30  ;;  %v7200_v7 = vmul.f32 %v7113_v35, %v7099_v30 }
  0x77   : > { %v13315_v39 = vrot.slane %v7105_v32, 1  ;;  %13598 = vst [vmem:[#allocation12_spill] sm:$0xff] %v7145_v48  ;;  %v13314_v53 = vrot.slane %v7124_v40, 2  ;;  %v13313_v59 = vrot.slane %v7141_v47, 2  ;;  %v13311_v0 = vrot.slane %v7145_v48, 4 }
  0x78   : > { %13599 = vst [vmem:[#allocation13_spill] sm:$0xff] %v7153_v50  ;;  %v13312_v62 = vrot.slane %v7153_v50, 3  ;;  %v13316_v21 = vrot.slane %v7182_v2, 4 }
  0x79   : > { %v865_v56 = vsel %vm854_vm0, %v13321_v42, %v13315_v39  ;;  %13600 = vst [vmem:[#allocation14_spill] sm:$0xff] %v7182_v2  ;;  %v1092_v6 = vsel %vm1081_vm1, %v13320_v57, %v13314_v53  ;;  %v7215_v10 = vsel %vm1081_vm1, %v13319_v58, %v13313_v59  ;;  %v7237_v16 = vsel %vm1771_vm3, %v13317_v63, %v13311_v0 }
  0x7a   : > { %v971_v1 = vadd.f32 %v865_v56, %v702_v52  ;;  %v7230_v15 = vsel %vm1544_vm2, %v13318_v61, %v13312_v62  ;;  %v7282_v53 = vsel %vm1771_vm3, %v2008_v11, %v13316_v21 }
  0x7c   : > { %v555_v45 = vpop.permute.xlu2 %554  ;;  %v7245_v20 = vadd.f32 %v1092_v6, %v971_v1 }
  0x7d   : > { %v7185_v3 = vmul.f32 %v7101_v31, %v555_v45  ;;  %v7188_v4 = vmul.f32 %v7111_v34, %v555_v45  ;;  %v7191_v5 = vmul.f32 %v7117_v37, %v555_v45  ;;  %v7208_v9 = vmul.f32 %v7119_v38, %v555_v45 }
  0x7e   : > { %v7218_v12 = vmul.f32 %v7115_v36, %v555_v45  ;;  %v7221_v13 = vmul.f32 %v7133_v44, %v555_v45  ;;  %v7240_v17 = vmul.f32 %v7113_v35, %v555_v45  ;;  %v7243_v18 = vmul.f32 %v7162_v54, %v555_v45 }
  0x7f   : > { %v7256_v27 = vmul.f32 %v7205_v8, %v555_v45 }
  0x80   : > { %13601 = vst [vmem:[#allocation15_spill] sm:$0xff] %v7221_v13 }
  0x81   : > { %13602 = vst [vmem:[#allocation16_spill] sm:$0xff] %v7240_v17 }
  0x82   : > { %13603 = vst [vmem:[#allocation17_spill] sm:$0xff] %v7243_v18 }
  0x83   : > { %13605 = vst [vmem:[#allocation19_spill] sm:$0xff] %v7256_v27 }
  0x84   : > { %v7126_v41 = vpop.permute.xlu1 %524  ;;  %v570_v19 = vpop.permute.xlu2 %569 }
  0x85   : > { %v7164_v55 = vpop.permute.xlu0 %514  ;;  %v7252_v25 = vmul.f32 %v7101_v31, %v570_v19  ;;  %v7259_v29 = vmul.f32 %v7111_v34, %v570_v19  ;;  %v7268_v1 = vmul.f32 %v7117_v37, %v570_v19  ;;  %v7271_v6 = vmul.f32 %v7119_v38, %v570_v19 }
  0x86   : > { %v7275_v62 = vmul.f32 %v7113_v35, %v570_v19  ;;  %v780_v59 = vmul.f32 %v7101_v31, %v7126_v41  ;;  %v7286_v56 = vmul.f32 %v7115_v36, %v570_v19  ;;  %v7289_v26 = vmul.f32 %v7133_v44, %v570_v19 }
  0x87   : > { %13604 = vst [vmem:[#allocation18_spill] sm:$0xff] %v7252_v25  ;;  %v7292_v45 = vmul.f32 %v7162_v54, %v570_v19  ;;  %v7296_v23 = vmul.f32 %v7205_v8, %v570_v19  ;;  %v1007_v22 = vmul.f32 %v7111_v34, %v7126_v41  ;;  %v7306_v63 = vmul.f32 %v7117_v37, %v7126_v41 }
  0x88   : > { %13606 = vst [vmem:[#allocation20_spill] sm:$0xff] %v7259_v29  ;;  %v7310_v24 = vmul.f32 %v7119_v38, %v7126_v41  ;;  %v778_v19 = vmul.f32 %v7101_v31, %v7164_v55  ;;  %v858_v21 = vrot.slane %v780_v59, 1  ;;  %v7322_v58 = vmul.f32 %v7115_v36, %v7126_v41 }
  0x89   : > { %13607 = vst [vmem:[#allocation21_spill] sm:$0xff] %v7268_v1  ;;  %v1005_v57 = vmul.f32 %v7111_v34, %v7164_v55  ;;  %v700_v59 = vmul.f32 %v7113_v35, %v7126_v41  ;;  %v1318_v61 = vrot.slane %v7306_v63, 2  ;;  %v698_v60 = vmul.f32 %v7113_v35, %v7164_v55 }
  0x8a   : > { %13608 = vst [vmem:[#allocation22_spill] sm:$0xff] %v7271_v6  ;;  %v1085_v28 = vrot.slane %v1007_v22, 2  ;;  %v1545_v48 = vrot.slane %v7310_v24, 3  ;;  %v855_v50 = vrot.slane %v778_v19, 1 }
  0x8b   : > { %13609 = vst [vmem:[#allocation23_spill] sm:$0xff] %v7275_v62 }
  0x8c   : > { %v7223_v14 = vpop.permute.xlu1 %529  ;;  %13610 = vst [vmem:[#allocation24_spill] sm:$0xff] %v7286_v56  ;;  %v585_v27 = vpop.permute.xlu2 %584 }
  0x8d   : > { %v7263_v52 = vmul.f32 %v7101_v31, %v7223_v14  ;;  %v520_v0 = vpop.permute.xlu0 %519  ;;  %13611 = vst [vmem:[#allocation25_spill] sm:$0xff] %v7289_v26  ;;  %v7342_v63 = vmul.f32 %v7113_v35, %v585_v27  ;;  %v7345_v55 = vmul.f32 %v7111_v34, %v585_v27  ;;  %v7348_v22 = vmul.f32 %v7117_v37, %v585_v27 }
  0x8e   : > { %13612 = vst [vmem:[#allocation26_spill] sm:$0xff] %v7292_v45  ;;  %v779_v11 = vmul.f32 %v7101_v31, %v520_v0  ;;  %v1006_v62 = vmul.f32 %v7111_v34, %v520_v0  ;;  %v7352_v19 = vmul.f32 %v7119_v38, %v585_v27  ;;  %v7366_v45 = vmul.f32 %v7133_v44, %v585_v27 }
  0x8f   : > { %13613 = vst [vmem:[#allocation27_spill] sm:$0xff] %v7296_v23  ;;  %v860_v39 = vrot.slane %v7263_v52, 1  ;;  %v7316_v52 = vmul.f32 %v7111_v34, %v7223_v14  ;;  %v1082_v23 = vrot.slane %v1005_v57, 2  ;;  %v7355_v57 = vmul.f32 %v7115_v36, %v585_v27 }
  0x90   : > { %v856_v30 = vrot.slane %v779_v11, 1  ;;  %v7339_v11 = vmul.f32 %v7101_v31, %v585_v27  ;;  %13615 = vst [vmem:[#allocation29_spill] sm:$0xff] %v7342_v63  ;;  %v699_v63 = vmul.f32 %v7113_v35, %v520_v0  ;;  %v1083_v13 = vrot.slane %v1006_v62, 2  ;;  %v3925_v62 = vld [vmem:[%s13299_s3 + $0x118] sm:$0xff]  ;;  %v3924_v0 = vld [vmem:[%s13299_s3 + $0x110] sm:$0xff] }
  0x91   : > { %v861_v2 = vsel %vm854_vm0, %v858_v21, %v860_v39  ;;  %v1087_v42 = vrot.slane %v7316_v52, 2  ;;  %13616 = vst [vmem:[#allocation30_spill] sm:$0xff] %v7345_v55  ;;  %v7370_v17 = vmul.f32 %v7162_v54, %v585_v27  ;;  %4232 = vmatpush.msra.mxu2 %v3925_v62 }
  0x92   : > { %13614 = vst [vmem:[#allocation28_spill] sm:$0xff] %v7339_v11  ;;  %v969_v41 = vadd.f32 %v861_v2, %v700_v59  ;;  %v857_v24 = vsel %vm854_vm0, %v855_v50, %v856_v30  ;;  %v1243_v2 = vmul.f32 %v7117_v37, %v7223_v14  ;;  %v859_v52 = vsel %vm854_vm0, %v856_v30, %v858_v21 }
  0x93   : > { %13617 = vst [vmem:[#allocation31_spill] sm:$0xff] %v7348_v22  ;;  %v1469_v59 = vmul.f32 %v7119_v38, %v7223_v14  ;;  %v1088_v18 = vsel %vm1081_vm1, %v1085_v28, %v1087_v42  ;;  %v967_v56 = vadd.f32 %v857_v24, %v698_v60  ;;  %v1696_v30 = vmul.f32 %v7115_v36, %v7223_v14  ;;  %v13663_v55 = vld [vmem:[#allocation24_spill] sm:$0xff] }
  0x94   : > { %13618 = vst [vmem:[#allocation32_spill] sm:$0xff] %v7352_v19  ;;  %v1196_v26 = vadd.f32 %v1088_v18, %v969_v41  ;;  %v968_v21 = vadd.f32 %v859_v52, %v699_v63  ;;  %v7379_v50 = vmul.f32 %v7205_v8, %v585_v27  ;;  %v13623_v18 = vrot.slane %v7109_v33, 1  ;;  %v600_v62 = vpop.permute.xlu2 %599  ;;  %4233 = vmatpush.msra.mxu2 %v3924_v0  ;;  %v7414_v0 = vpop.permute.xlu1 %549 }
  0x95   : > { %13619 = vst [vmem:[#allocation33_spill] sm:$0xff] %v7355_v57  ;;  %v1319_v41 = vrot.slane %v1243_v2, 2  ;;  %v701_v63 = vmul.f32 %v7113_v35, %v7223_v14  ;;  %v1546_v52 = vrot.slane %v1469_v59, 3  ;;  %v1084_v6 = vsel %vm1081_vm1, %v1082_v23, %v1083_v13  ;;  %v3923_v23 = vld [vmem:[%s13299_s3 + $0x108] sm:$0xff] }
  0x96   : > { %13620 = vst [vmem:[#allocation34_spill] sm:$0xff] %v7366_v45  ;;  %v863_v60 = vsel %vm854_vm0, %v860_v39, %v13623_v18  ;;  %v1432_v33 = vadd.f32 %v7215_v10, %v1196_v26  ;;  %v1086_v39 = vsel %vm1081_vm1, %v1083_v13, %v1085_v28  ;;  %v1194_v2 = vadd.f32 %v1084_v6, %v967_v56 }
  0x97   : > { %13621 = vst [vmem:[#allocation35_spill] sm:$0xff] %v7370_v17  ;;  %v970_v24 = vadd.f32 %v863_v60, %v701_v63  ;;  %v1773_v14 = vrot.slane %v1696_v30, 4  ;;  %v1195_v59 = vadd.f32 %v1086_v39, %v968_v21  ;;  %v13624_v10 = vrot.slane %v7131_v43, 2  ;;  %4234 = vmatpush.msra.mxu2 %v3923_v23  ;;  %v7416_v43 = vpop.permute.xlu0 %544 }
  0x98   : > { %13622 = vst [vmem:[#allocation36_spill] sm:$0xff] %v7379_v50  ;;  %v1320_v13 = vsel %vm1081_vm1, %v1318_v61, %v1319_v41  ;;  %v13625_v26 = vrot.slane %v7137_v46, 2  ;;  %v1547_v6 = vsel %vm1544_vm2, %v1545_v48, %v1546_v52  ;;  %v7409_v30 = vmul.f32 %v7101_v31, %v600_v62 }
  0x99   : > { %v1090_v28 = vsel %vm1081_vm1, %v1087_v42, %v13624_v10  ;;  %v7412_v21 = vmul.f32 %v7111_v34, %v600_v62  ;;  %v13628_v42 = vrot.slane %v7149_v49, 3  ;;  %v1659_v46 = vadd.f32 %v7230_v15, %v1432_v33 }
  0x9a   : > { %v1322_v56 = vsel %vm1081_vm1, %v1319_v41, %v13625_v26  ;;  %13626 = vst [vmem:[#allocation37_spill] sm:$0xff] %v7409_v30  ;;  %v1430_v60 = vadd.f32 %v1320_v13, %v1194_v2  ;;  %v7423_v41 = vmul.f32 %v7117_v37, %v600_v62  ;;  %v7425_v48 = vadd.f32 %v1090_v28, %v970_v24 }
  0x9b   : > { %13627 = vst [vmem:[#allocation38_spill] sm:$0xff] %v7412_v21  ;;  %v1549_v61 = vsel %vm1544_vm2, %v1546_v52, %v13628_v42  ;;  %v13630_v63 = vrot.slane %v7322_v58, 4  ;;  %v1431_v23 = vadd.f32 %v1322_v56, %v1195_v59  ;;  %v7431_v10 = vmul.f32 %v7119_v38, %v600_v62 }
  0x9c   : > { %13629 = vst [vmem:[#allocation39_spill] sm:$0xff] %v7423_v41  ;;  %v13632_v49 = vrot.slane %v7157_v51, 4  ;;  %v7437_v15 = vmul.f32 %v7113_v35, %v600_v62  ;;  %v785_v33 = vmul.f32 %v7101_v31, %v7414_v0  ;;  %v784_v24 = vmul.f32 %v7101_v31, %v7416_v43 }
  0x9d   : > { %v1774_v39 = vsel %vm1771_vm3, %v13630_v63, %v1773_v14  ;;  %13631 = vst [vmem:[#allocation40_spill] sm:$0xff] %v7431_v10  ;;  %v7446_v59 = vmul.f32 %v7115_v36, %v600_v62  ;;  %v7449_v51 = vmul.f32 %v7133_v44, %v600_v62  ;;  %v1657_v28 = vadd.f32 %v1547_v6, %v1430_v60 }
  0x9e   : > { %v1776_v52 = vsel %vm1771_vm3, %v1773_v14, %v13632_v49  ;;  %13633 = vst [vmem:[#allocation41_spill] sm:$0xff] %v7437_v15  ;;  %v7452_v14 = vadd.f32 %v7237_v16, %v1659_v46  ;;  %v1012_v26 = vmul.f32 %v7111_v34, %v7414_v0  ;;  %v1658_v56 = vadd.f32 %v1549_v61, %v1431_v23 }
  0x9f   : > { %13634 = vst [vmem:[#allocation42_spill] sm:$0xff] %v7446_v59  ;;  %v7459_v63 = vmul.f32 %v7162_v54, %v600_v62  ;;  %v7462_v49 = vmul.f32 %v7205_v8, %v600_v62  ;;  %v868_v2 = vrot.slane %v785_v33, 1  ;;  %v1247_v16 = vmul.f32 %v7117_v37, %v7414_v0 }
  0xa0   : > { %13635 = vst [vmem:[#allocation43_spill] sm:$0xff] %v7449_v51  ;;  %v866_v46 = vrot.slane %v784_v24, 1  ;;  %v1246_v6 = vmul.f32 %v7117_v37, %v7416_v43  ;;  %v1473_v23 = vmul.f32 %v7119_v38, %v7414_v0  ;;  %v1700_v42 = vmul.f32 %v7115_v36, %v7414_v0 }
  0xa1   : > { %13636 = vst [vmem:[#allocation44_spill] sm:$0xff] %v7459_v63  ;;  %v1884_v62 = vadd.f32 %v1774_v39, %v1657_v28  ;;  %v705_v33 = vmul.f32 %v7113_v35, %v7414_v0  ;;  %v1095_v13 = vrot.slane %v1012_v26, 2  ;;  %v1011_v24 = vmul.f32 %v7111_v34, %v7416_v43 }
  0xa2   : > { %13637 = vst [vmem:[#allocation45_spill] sm:$0xff] %v7462_v49  ;;  %v7478_v58 = vadd.f32 %v1776_v52, %v1658_v56  ;;  %v7484_v27 = vmul.f32 %v7133_v44, %v7414_v0  ;;  %v13638_v19 = vrot.slane %v7185_v3, 1  ;;  %v1327_v28 = vrot.slane %v1247_v16, 2  ;;  %v615_v49 = vpop.permute.xlu2 %614 }
  0xa3   : > { %v13639_v26 = vrot.slane %v7105_v32, 1  ;;  %v1325_v15 = vrot.slane %v1246_v6, 2  ;;  %v1554_v52 = vrot.slane %v1473_v23, 3  ;;  %v1781_v56 = vrot.slane %v1700_v42, 4 }
  0xa4   : > { %v871_v39 = vsel %vm854_vm0, %v868_v2, %v13638_v19  ;;  %v7494_v60 = vmul.f32 %v7162_v54, %v7414_v0  ;;  %v7498_v61 = vmul.f32 %v7119_v38, %v7416_v43  ;;  %v7501_v63 = vadd.f32 %v7282_v53, %v1884_v62 }
  0xa5   : > { %v867_v18 = vsel %vm854_vm0, %v13639_v26, %v866_v46  ;;  %v13640_v19 = vrot.slane %v7188_v4, 2  ;;  %v1093_v16 = vrot.slane %v1011_v24, 2  ;;  %v7508_v42 = vmul.f32 %v7115_v36, %v7416_v43 }
  0xa6   : > { %v974_v6 = vadd.f32 %v871_v39, %v705_v33  ;;  %v869_v26 = vsel %vm854_vm0, %v866_v46, %v868_v2  ;;  %v972_v51 = vadd.f32 %v867_v18, %v7200_v7  ;;  %v13641_v59 = vrot.slane %v7191_v5, 2 }
  0xa7   : > { %v1098_v32 = vsel %vm1081_vm1, %v1095_v13, %v13640_v19  ;;  %v704_v62 = vmul.f32 %v7113_v35, %v7416_v43  ;;  %v1328_v24 = vsel %vm1081_vm1, %v1325_v15, %v1327_v28  ;;  %v7520_v19 = vmul.f32 %v7101_v31, %v615_v49 }
  0xa8   : > { %v1330_v53 = vsel %vm1081_vm1, %v1327_v28, %v13641_v59  ;;  %v13643_v33 = vrot.slane %v7208_v9, 3  ;;  %v13644_v2 = vrot.slane %v7218_v12, 4  ;;  %v13359_v59 = vrot.slane %v7498_v61, 3 }
  0xa9   : > { %13642 = vst [vmem:[#allocation46_spill] sm:$0xff] %v7520_v19  ;;  %v973_v46 = vadd.f32 %v869_v26, %v704_v62  ;;  %v13645_v28 = vrot.slane %v7124_v40, 2  ;;  %v13360_v10 = vrot.slane %v7508_v42, 4  ;;  %v7539_v41 = vmul.f32 %v7111_v34, %v615_v49 }
  0xaa   : > { %v7525_v39 = vsel %vm1544_vm2, %v1554_v52, %v13643_v33  ;;  %v7530_v7 = vsel %vm1771_vm3, %v1781_v56, %v13644_v2  ;;  %v7541_v33 = vadd.f32 %v1098_v32, %v974_v6  ;;  %v7545_v2 = vmul.f32 %v7205_v8, %v7414_v0  ;;  %v7558_v6 = vpop.permute.xlu0 %559 }
  0xab   : > { %v1094_v23 = vsel %vm1081_vm1, %v13645_v28, %v1093_v16  ;;  %13646 = vst [vmem:[#allocation47_spill] sm:$0xff] %v7539_v41  ;;  %v1434_v18 = vadd.f32 %v1328_v24, %v7245_v20  ;;  %v1096_v26 = vsel %vm1081_vm1, %v1093_v16, %v1095_v13  ;;  %v13647_v40 = vrot.slane %v7141_v47, 2 }
  0xac   : > { %v1199_v21 = vadd.f32 %v1094_v23, %v972_v51  ;;  %v7555_v28 = vmul.f32 %v7113_v35, %v615_v49  ;;  %v1555_v0 = vsel %vm1544_vm2, %v13359_v59, %v1554_v52  ;;  %v7564_v20 = vmul.f32 %v7117_v37, %v615_v49 }
  0xad   : > { %v7552_v62 = vsel %vm1081_vm1, %v13647_v40, %v1325_v15  ;;  %v7567_v51 = vmul.f32 %v7119_v38, %v615_v49  ;;  %v7570_v47 = vmul.f32 %v7115_v36, %v615_v49  ;;  %v565_v15 = vpop.permute.xlu1 %564  ;;  %v1200_v13 = vadd.f32 %v1096_v26, %v973_v46 }
  0xae   : > { %13648 = vst [vmem:[#allocation48_spill] sm:$0xff] %v7555_v28  ;;  %v1782_v16 = vsel %vm1771_vm3, %v13360_v10, %v1781_v56  ;;  %v7577_v24 = vmul.f32 %v7133_v44, %v615_v49  ;;  %v1435_v52 = vadd.f32 %v1330_v53, %v1199_v21  ;;  %v1661_v40 = vadd.f32 %v1555_v0, %v1434_v18 }
  0xaf   : > { %13649 = vst [vmem:[#allocation49_spill] sm:$0xff] %v7564_v20  ;;  %v787_v32 = vmul.f32 %v7101_v31, %v7558_v6  ;;  %v1249_v59 = vmul.f32 %v7117_v37, %v7558_v6  ;;  %v7584_v28 = vmul.f32 %v7162_v54, %v615_v49  ;;  %v788_v46 = vmul.f32 %v7101_v31, %v565_v15 }
  0xb0   : > { %13650 = vst [vmem:[#allocation50_spill] sm:$0xff] %v7567_v51  ;;  %v7588_v56 = vmul.f32 %v7111_v34, %v565_v15  ;;  %v1250_v26 = vmul.f32 %v7117_v37, %v565_v15  ;;  %v7595_v18 = vmul.f32 %v7205_v8, %v615_v49  ;;  %v1476_v10 = vmul.f32 %v7119_v38, %v565_v15 }
  0xb1   : > { %13651 = vst [vmem:[#allocation51_spill] sm:$0xff] %v7570_v47  ;;  %v7600_v41 = vmul.f32 %v7115_v36, %v565_v15  ;;  %v7603_v19 = vmul.f32 %v7133_v44, %v565_v15  ;;  %v7605_v30 = vadd.f32 %v1782_v16, %v1661_v40  ;;  %v7608_v23 = vmul.f32 %v7162_v54, %v565_v15 }
  0xb2   : > { %13652 = vst [vmem:[#allocation52_spill] sm:$0xff] %v7577_v24  ;;  %v872_v21 = vrot.slane %v787_v32, 1  ;;  %v1331_v53 = vrot.slane %v1249_v59, 2  ;;  %v874_v47 = vrot.slane %v788_v46, 1  ;;  %v1101_v49 = vrot.slane %v7588_v56, 2 }
  0xb3   : > { %13653 = vst [vmem:[#allocation53_spill] sm:$0xff] %v7584_v28  ;;  %v1333_v51 = vrot.slane %v1250_v26, 2  ;;  %v7612_v0 = vmul.f32 %v7205_v8, %v565_v15  ;;  %v1014_v16 = vmul.f32 %v7111_v34, %v7558_v6  ;;  %v1475_v40 = vmul.f32 %v7119_v38, %v7558_v6 }
  0xb4   : > { %13654 = vst [vmem:[#allocation54_spill] sm:$0xff] %v7595_v18  ;;  %v708_v59 = vmul.f32 %v7113_v35, %v565_v15  ;;  %v1560_v32 = vrot.slane %v1476_v10, 3  ;;  %v1787_v46 = vrot.slane %v7600_v41, 4  ;;  %v2019_v56 = vrot.slane %v7603_v19, 4 }
  0xb5   : > { %v2246_v26 = vrot.slane %v7608_v23, 5  ;;  %v13655_v24 = vrot.slane %v7185_v3, 1  ;;  %v13656_v18 = vrot.slane %v7191_v5, 2  ;;  %v1937_v50 = vmul.f32 %v7133_v44, %v7558_v6  ;;  %v13661_v23 = vld [vmem:[#allocation22_spill] sm:$0xff] }
  0xb6   : > { %v13657_v10 = vrot.slane %v7252_v25, 1  ;;  %v13658_v19 = vrot.slane %v7259_v29, 2  ;;  %v1334_v3 = vsel %vm1081_vm1, %v1331_v53, %v1333_v51  ;;  %v1099_v5 = vrot.slane %v1014_v16, 2  ;;  %v13660_v29 = vld [vmem:[#allocation16_spill] sm:$0xff] }
  0xb7   : > { %v873_v20 = vsel %vm854_vm0, %v13655_v24, %v872_v21  ;;  %v1332_v28 = vsel %vm1081_vm1, %v13656_v18, %v1331_v53  ;;  %v875_v24 = vsel %vm854_vm0, %v872_v21, %v874_v47  ;;  %v1558_v17 = vrot.slane %v1475_v40, 3 }
  0xb8   : > { %v877_v41 = vsel %vm854_vm0, %v874_v47, %v13657_v10  ;;  %v1104_v15 = vsel %vm1081_vm1, %v1101_v49, %v13658_v19  ;;  %v1702_v18 = vmul.f32 %v7115_v36, %v7558_v6  ;;  %v13659_v45 = vrot.slane %v7268_v1, 2 }
  0xb9   : > { %v707_v10 = vmul.f32 %v7113_v35, %v7558_v6  ;;  %v975_v19 = vadd.f32 %v873_v20, %v13660_v29  ;;  %v1436_v22 = vadd.f32 %v1332_v28, %v1200_v13  ;;  %v13662_v25 = vrot.slane %v13661_v23, 3  ;;  %v13666_v28 = vld [vmem:[#allocation25_spill] sm:$0xff] }
  0xba   : > { %v1336_v57 = vsel %vm1081_vm1, %v1333_v51, %v13659_v45  ;;  %v1662_v47 = vadd.f32 %v7525_v39, %v1435_v52  ;;  %v1437_v21 = vadd.f32 %v1334_v3, %v7541_v33  ;;  %v2017_v16 = vrot.slane %v1937_v50, 4 }
  0xbb   : > { %v7652_v53 = vsel %vm1544_vm2, %v1560_v32, %v13662_v25  ;;  %v977_v40 = vadd.f32 %v877_v41, %v708_v59  ;;  %v13664_v1 = vrot.slane %v13663_v55, 4  ;;  %v976_v51 = vadd.f32 %v875_v24, %v707_v10  ;;  %v13670_v59 = vld [vmem:[#allocation26_spill] sm:$0xff]  ;;  %v580_v55 = vpop.permute.xlu1 %579 }
  0xbc   : > { %v2163_v29 = vmul.f32 %v7162_v54, %v7558_v6  ;;  %v13667_v20 = vrot.slane %v13666_v28, 4  ;;  %v13668_v13 = vrot.slane %v7188_v4, 2  ;;  %v13669_v50 = vrot.slane %v7208_v9, 3 }
  0xbd   : > { %v7659_v45 = vsel %vm1771_vm3, %v1787_v46, %v13664_v1  ;;  %v1785_v52 = vrot.slane %v1702_v18, 4  ;;  %v13671_v1 = vrot.slane %v13670_v59, 5  ;;  %v1561_v24 = vsel %vm1544_vm2, %v1558_v17, %v1560_v32  ;;  %v13674_v59 = vld [vmem:[#allocation27_spill] sm:$0xff] }
  0xbe   : > { %13665 = vst [vmem:[#allocation16_spill] sm:$0xff] %v7659_v45  ;;  %v2022_v25 = vsel %vm1771_vm3, %v2019_v56, %v13667_v20  ;;  %v1100_v39 = vsel %vm1081_vm1, %v13668_v13, %v1099_v5  ;;  %v1559_v33 = vsel %vm1544_vm2, %v13669_v50, %v1558_v17  ;;  %v1889_v20 = vadd.f32 %v7530_v7, %v1662_v47  ;;  %v13672_v45 = vld [vmem:[#allocation15_spill] sm:$0xff]  ;;  %v7694_v7 = vpop.permute.xlu2 %629 }
  0xbf   : > { %v7675_v41 = vsel %vm2234_vm4, %v2246_v26, %v13671_v1  ;;  %v1202_v3 = vadd.f32 %v1100_v39, %v975_v19  ;;  %v1663_v10 = vadd.f32 %v1559_v33, %v1436_v22  ;;  %v1102_v4 = vsel %vm1081_vm1, %v1099_v5, %v1101_v49  ;;  %13678 = vst [vmem:[#allocation15_spill] sm:$0xff] %v7694_v7 }
  0xc0   : > { %v1664_v13 = vadd.f32 %v1561_v24, %v1437_v21  ;;  %v13673_v9 = vrot.slane %v13672_v45, 4  ;;  %v7683_v18 = vadd.f32 %v1104_v15, %v977_v40  ;;  %v13675_v23 = vrot.slane %v13674_v59, 6 }
  0xc1   : > { %v13676_v1 = vrot.slane %v7612_v0, 6  ;;  %v7692_v17 = vadd.f32 %v1102_v4, %v976_v51  ;;  %v2244_v22 = vrot.slane %v2163_v29, 5  ;;  %v13679_v49 = vrot.slane %v7218_v12, 4  ;;  %v13682_v29 = vld [vmem:[#allocation17_spill] sm:$0xff] }
  0xc2   : > { %v2018_v50 = vsel %vm1771_vm3, %v13673_v9, %v2017_v16  ;;  %v1788_v5 = vsel %vm1771_vm3, %v1785_v52, %v1787_v46  ;;  %v2020_v15 = vsel %vm1771_vm3, %v2017_v16, %v2019_v56  ;;  %v7702_v47 = vmul.f32 %v7101_v31, %v580_v55 }
  0xc3   : > { %v7690_v19 = vsel %vm2461_vm5, %v13676_v1, %v13675_v23  ;;  %v1786_v32 = vsel %vm1771_vm3, %v13679_v49, %v1785_v52  ;;  %v3922_v23 = vld [vmem:[%s13299_s3 + $0x100] sm:$0xff]  ;;  %v7707_v21 = vadd.f32 %v1336_v57, %v1202_v3  ;;  %v7710_v51 = vadd.f32 %v2018_v50, %v7605_v30  ;;  %v7767_v50 = vpop.permute.xlu0 %574 }
  0xc4   : > { %13677 = vst [vmem:[#allocation25_spill] sm:$0xff] %v7690_v19  ;;  %v1890_v40 = vadd.f32 %v1786_v32, %v1663_v10  ;;  %v7714_v12 = vmul.f32 %v7205_v8, %v7558_v6  ;;  %4235 = vmatpush.msra.mxu2 %v3922_v23  ;;  %v7716_v46 = vadd.f32 %v1788_v5, %v1664_v13  ;;  %v13683_v30 = vrot.slane %v13682_v29, 5 }
  0xc5   : > { %v7718_v56 = vadd.f32 %v2020_v15, %v1889_v20  ;;  %v7722_v16 = vmul.f32 %v7101_v31, %v7694_v7  ;;  %v7726_v57 = vmul.f32 %v7111_v34, %v7694_v7  ;;  %v7735_v6 = vmul.f32 %v7117_v37, %v7694_v7 }
  0xc6   : > { %v7731_v39 = vsel %vm2234_vm4, %v13683_v30, %v2244_v22  ;;  %v7739_v33 = vmul.f32 %v7119_v38, %v7694_v7  ;;  %v7743_v52 = vmul.f32 %v7115_v36, %v7694_v7  ;;  %v7746_v3 = vsel %vm2234_vm4, %v2244_v22, %v2246_v26  ;;  %v13693_v30 = vld [vmem:[#allocation13_spill] sm:$0xff] }
  0xc7   : > { %13680 = vst [vmem:[#allocation27_spill] sm:$0xff] %v7722_v16  ;;  %v7750_v24 = vmul.f32 %v7133_v44, %v7694_v7  ;;  %v7754_v10 = vmul.f32 %v7162_v54, %v7694_v7  ;;  %v13395_v20 = vrot.slane %v7702_v47, 1  ;;  %v7757_v4 = vadd.f32 %v2022_v25, %v1890_v40 }
  0xc8   : > { %13681 = vst [vmem:[#allocation55_spill] sm:$0xff] %v7726_v57  ;;  %v7762_v9 = vmul.f32 %v7205_v8, %v7694_v7  ;;  %v7765_v26 = vmul.f32 %v7111_v34, %v580_v55  ;;  %v7772_v49 = vmul.f32 %v7117_v37, %v580_v55  ;;  %v7775_v25 = vmul.f32 %v7119_v38, %v580_v55 }
  0xc9   : > { %13684 = vst [vmem:[#allocation17_spill] sm:$0xff] %v7735_v6  ;;  %v711_v23 = vmul.f32 %v7113_v35, %v580_v55  ;;  %v13690_v22 = vrot.slane %v7339_v11, 1  ;;  %v7790_v13 = vmul.f32 %v7101_v31, %v7767_v50  ;;  %v7795_v32 = vmul.f32 %v7115_v36, %v580_v55 }
  0xca   : > { %13685 = vst [vmem:[#allocation56_spill] sm:$0xff] %v7739_v33  ;;  %v7798_v40 = vmul.f32 %v7133_v44, %v580_v55  ;;  %v7810_v5 = vmul.f32 %v7205_v8, %v580_v55  ;;  %v7814_v15 = vmul.f32 %v7111_v34, %v7767_v50  ;;  %v13700_v57 = vrot.slane %v13672_v45, 4 }
  0xcb   : > { %13686 = vst [vmem:[#allocation57_spill] sm:$0xff] %v7743_v52  ;;  %v883_v1 = vsel %vm854_vm0, %v13395_v20, %v13690_v22  ;;  %v7803_v22 = vmul.f32 %v7162_v54, %v580_v55  ;;  %v1433_v20 = vadd.f32 %v7552_v62, %v7425_v48  ;;  %v7824_v48 = vmul.f32 %v7117_v37, %v7767_v50  ;;  %v13699_v52 = vld [vmem:[#allocation4_spill] sm:$0xff]  ;;  %v13704_v37 = vld [vmem:[#allocation14_spill] sm:$0xff] }
  0xcc   : > { %13687 = vst [vmem:[#allocation58_spill] sm:$0xff] %v7750_v24  ;;  %v13694_v24 = vrot.slane %v13693_v30, 3  ;;  %v7828_v55 = vmul.f32 %v7119_v38, %v7767_v50  ;;  %v2159_v6 = vmul.f32 %v7162_v54, %v13699_v52 }
  0xcd   : > { %13688 = vst [vmem:[#allocation59_spill] sm:$0xff] %v7754_v10  ;;  %v7807_v10 = vadd.f32 %v883_v1, %v711_v23  ;;  %v13695_v1 = vrot.slane %v7508_v42, 4  ;;  %v13696_v23 = vld [vmem:[#allocation12_spill] sm:$0xff] }
  0xce   : > { %13689 = vst [vmem:[#allocation60_spill] sm:$0xff] %v7762_v9  ;;  %v13692_v9 = vrot.slane %v7498_v61, 3  ;;  %v13697_v33 = vrot.slane %v13696_v23, 4  ;;  %v2236_v38 = vrot.slane %v2159_v6, 5 }
  0xcf   : > { %13691 = vst [vmem:[#allocation61_spill] sm:$0xff] %v7810_v5 }
  0xd0   : > { %v1553_v7 = vsel %vm1544_vm2, %v13694_v24, %v13692_v9  ;;  %v1780_v61 = vsel %vm1771_vm3, %v13697_v33, %v13695_v1  ;;  %v1934_v24 = vmul.f32 %v7133_v44, %v7416_v43  ;;  %v13698_v9 = vld [vmem:[#allocation3_spill] sm:$0xff]  ;;  %v13702_v33 = vrot.slane %v13682_v29, 5 }
  0xd1   : > { %v1660_v62 = vadd.f32 %v1553_v7, %v1433_v20  ;;  %v2158_v30 = vmul.f32 %v7162_v54, %v13698_v9  ;;  %v13701_v7 = vrot.slane %v7484_v27, 4  ;;  %v2160_v20 = vmul.f32 %v7162_v54, %v7416_v43 }
  0xd2   : > { %v13703_v1 = vrot.slane %v7494_v60, 5  ;;  %v2011_v16 = vrot.slane %v1934_v24, 4  ;;  %v13705_v29 = vrot.slane %v13704_v37, 4 }
  0xd3   : > { %v1887_v11 = vadd.f32 %v1780_v61, %v1660_v62  ;;  %v2016_v42 = vsel %vm1771_vm3, %v13701_v7, %v13700_v57  ;;  %v2235_v19 = vrot.slane %v2158_v30, 5  ;;  %v2385_v62 = vmul.f32 %v7205_v8, %v13698_v9 }
  0xd4   : > { %v2243_v23 = vsel %vm2234_vm4, %v13703_v1, %v13702_v33  ;;  %v2238_v61 = vrot.slane %v2160_v20, 5  ;;  %v2386_v57 = vmul.f32 %v7205_v8, %v13699_v52  ;;  %v2387_v7 = vmul.f32 %v7205_v8, %v7416_v43 }
  0xd5   : > { %v2123_v45 = vadd.f32 %v2016_v42, %v1887_v11  ;;  %v2012_v34 = vsel %vm1771_vm3, %v13705_v29, %v2011_v16  ;;  %v13706_v33 = vrot.slane %v7484_v27, 4  ;;  %v2237_v6 = vsel %vm2234_vm4, %v2235_v19, %v2236_v38 }
  0xd6   : > { %v2462_v30 = vrot.slane %v2385_v62, 6  ;;  %v2121_v11 = vadd.f32 %v2012_v34, %v7478_v58  ;;  %v2239_v52 = vsel %vm2234_vm4, %v2236_v38, %v2238_v61  ;;  %v13707_v42 = vmov %v13703_v1  ;;  %v13708_v62 = vld [vmem:[#allocation19_spill] sm:$0xff]  ;;  %v7878_v34 = vld [vmem:[%s13298_s2] ss:$0 sm:$0xff] }
  0xd7   : > { %v2014_v24 = vsel %vm1771_vm3, %v2011_v16, %v13706_v33  ;;  %v2241_v43 = vsel %vm2234_vm4, %v2238_v61, %v13707_v42  ;;  %v2347_v37 = vadd.f32 %v2237_v6, %v7501_v63  ;;  %v2350_v20 = vadd.f32 %v2243_v23, %v2123_v45 }
  0xd8   : > { %v2122_v9 = vadd.f32 %v2014_v24, %v7452_v14  ;;  %v2463_v1 = vrot.slane %v2386_v57, 6  ;;  %v2465_v27 = vrot.slane %v2387_v7, 6  ;;  %v2348_v29 = vadd.f32 %v2239_v52, %v2121_v11 }
  0xd9   : > { %v2467_v19 = vrot.slane %v7545_v2, 6  ;;  %v2469_v33 = vrot.slane %v13708_v62, 6  ;;  %v2351_v14 = vadd.f32 %v7731_v39, %v7710_v51  ;;  %v2352_v63 = vadd.f32 %v7746_v3, %v7718_v56 }
  0xda   : > { %v2349_v16 = vadd.f32 %v2241_v43, %v2122_v9  ;;  %v2464_v38 = vsel %vm2461_vm5, %v2462_v30, %v2463_v1  ;;  %v2466_v58 = vsel %vm2461_vm5, %v2463_v1, %v2465_v27  ;;  %v13709_v7 = vrot.slane %v7714_v12, 6 }
  0xdb   : > { %v2468_v60 = vsel %vm2461_vm5, %v2465_v27, %v2467_v19  ;;  %v2470_v2 = vsel %vm2461_vm5, %v2467_v19, %v2469_v33  ;;  %v2574_v23 = vadd.f32 %v2464_v38, %v2347_v37  ;;  %v2575_v45 = vadd.f32 %v2466_v58, %v2348_v29 }
  0xdc   : > { %v2576_v61 = vadd.f32 %v2468_v60, %v2349_v16  ;;  %v2577_v57 = vadd.f32 %v2470_v2, %v2350_v20  ;;  %v2472_v24 = vsel %vm2461_vm5, %v2469_v33, %v13709_v7  ;;  %v13710_v6 = vrot.slane %v7612_v0, 6  ;;  %v7930_v33 = vpop.permute.xlu1 %594  ;;  %v13718_v60 = vld [vmem:[#allocation21_spill] sm:$0xff] }
  0xdd   : > { %v13711_v30 = vmov %v13709_v7  ;;  %v7897_v56 = vadd.f32 %v7878_v34, %v2574_v23  ;;  %v7900_v39 = vadd.f32 %v7878_v34, %v2575_v45  ;;  %v2578_v3 = vadd.f32 %v2472_v24, %v2351_v14 }
  0xde   : > { %v2474_v51 = vsel %vm2461_vm5, %v13711_v30, %v13710_v6  ;;  %v1337_v9 = vrot.slane %v7824_v48, 2  ;;  %v7905_v52 = vmul.f32 %v7133_v44, %v7767_v50  ;;  %v7908_v0 = vadd.f32 %v7878_v34, %v2576_v61 }
  0xdf   : > { %13712 = vst [vmem:[#allocation13_spill] sm:$0xff] %v7897_v56  ;;  %v2579_v11 = vadd.f32 %v2474_v51, %v2352_v63  ;;  %v7911_v12 = vadd.f32 %v7878_v34, %v2577_v57  ;;  %v2685_v42 = vrot.slane %v7897_v56, 1  ;;  %v13425_v43 = vrot.slane %v7900_v39, 1  ;;  %v13720_v51 = vld [vmem:[#allocation30_spill] sm:$0xff] }
  0xe0   : > { %13713 = vst [vmem:[#allocation12_spill] sm:$0xff] %v7900_v39  ;;  %v7916_v37 = vadd.f32 %v7878_v34, %v2578_v3  ;;  %v3206_v48 = vrot.slane %v7908_v0, 4  ;;  %v13423_v62 = vrot.slane %v7908_v0, 2  ;;  %v2846_v63 = vrot.slane %v7897_v56, 2 }
  0xe1   : > { %13714 = vst [vmem:[#allocation3_spill] sm:$0xff] %v7908_v0  ;;  %v7919_v20 = vadd.f32 %v7878_v34, %v2579_v11  ;;  %v13426_v1 = vrot.slane %v7911_v12, 4  ;;  %v13424_v27 = vrot.slane %v7911_v12, 2  ;;  %v2687_v29 = vsel %vm854_vm0, %v2685_v42, %v13425_v43 }
  0xe2   : > { %13715 = vst [vmem:[#allocation4_spill] sm:$0xff] %v7911_v12  ;;  %v3630_v16 = vrot.slane %v7916_v37, 6  ;;  %v3469_v58 = vrot.slane %v7916_v37, 5  ;;  %v13719_v2 = vrot.slane %v13718_v60, 2  ;;  %v13422_v57 = vrot.slane %v7900_v39, 2 }
  0xe3   : > { %13716 = vst [vmem:[#allocation14_spill] sm:$0xff] %v7916_v37  ;;  %v13420_v19 = vrot.slane %v7919_v20, 6  ;;  %v3208_v38 = vsel %vm1771_vm3, %v3206_v48, %v13426_v1  ;;  %v13421_v14 = vrot.slane %v7919_v20, 5  ;;  %v7951_v7 = vsel %vm1081_vm1, %v13423_v62, %v13424_v27 }
  0xe4   : > { %13717 = vst [vmem:[#allocation19_spill] sm:$0xff] %v7919_v20  ;;  %v1338_v23 = vsel %vm1081_vm1, %v13719_v2, %v1337_v9  ;;  %v6467_v45 = vpack.i.bf16 %v3208_v38, %v2687_v29  ;;  %v13427_v6 = vrot.slane %v7916_v37, 4  ;;  %v13419_v30 = vrot.slane %v7919_v20, 4 }
  0xe5   : > { %v3632_v61 = vsel %vm2461_vm5, %v3630_v16, %v13420_v19  ;;  %v3471_v24 = vsel %vm2234_vm4, %v3469_v58, %v13421_v14  ;;  %v13721_v3 = vrot.slane %v13720_v51, 2  ;;  %v13722_v11 = vrot.slane %v7765_v26, 2  ;;  %v13724_v58 = vld [vmem:[#allocation18_spill] sm:$0xff] }
  0xe6   : > { %6355 = vmatmul.msk.f32.vlgmr.msra.gmra.mxu2 %vm3695_vm6, %v3632_v61  ;;  %v1705_v48 = vmul.f32 %v7115_v36, %v7767_v50  ;;  %v2023_v29 = vrot.slane %v7905_v52, 4  ;;  %6468 = vrot.lane.b32.xlu2 %v6467_v45, %s6973_s20  ;;  %v6477_v16 = vpack.i.bf16 %v3471_v24, %v7951_v7  ;;  %v13723_v38 = vrot.slane %v7790_v13, 1 }
  0xe7   : > { %v1110_v42 = vsel %vm1081_vm1, %v13722_v11, %v13721_v3  ;;  %v13725_v60 = vrot.slane %v13724_v58, 1  ;;  %v1564_v61 = vrot.slane %v7828_v55, 3  ;;  %v2848_v3 = vsel %vm1081_vm1, %v2846_v63, %v13422_v57  ;;  %v13733_v57 = vld [vmem:[#allocation23_spill] sm:$0xff] }
  0xe8   : > { %v7982_v52 = vsel %vm1771_vm3, %v13427_v6, %v13419_v30  ;;  %v13726_v45 = vrot.slane %v7772_v49, 2  ;;  %v1439_v11 = vadd.f32 %v1338_v23, %v7692_v17  ;;  %v2166_v55 = vmul.f32 %v7162_v54, %v7767_v50  ;;  %6478 = vrot.lane.b32.xlu1 %v6477_v16, %s6974_s21  ;;  %v13730_v23 = vld [vmem:[#allocation32_spill] sm:$0xff] }
  0xe9   : > { %v879_v2 = vsel %vm854_vm0, %v13725_v60, %v13723_v38  ;;  %v6472_v63 = vpack.i.bf16 %v7982_v52, %v2848_v3  ;;  %v13727_v38 = vld [vmem:[#allocation31_spill] sm:$0xff]  ;;  %v1793_v19 = vrot.slane %v7795_v32, 4  ;;  %v1105_v17 = vrot.slane %v7814_v15, 2 }
  0xea   : > { %v1340_v24 = vsel %vm1081_vm1, %v1337_v9, %v13726_v45  ;;  %v13728_v58 = vrot.slane %v13727_v38, 2  ;;  %v13729_v60 = vmov %v13726_v45  ;;  %v2025_v9 = vrot.slane %v7798_v40, 4 }
  0xeb   : > { %v13731_v45 = vrot.slane %v13730_v23, 3  ;;  %v13732_v14 = vrot.slane %v7775_v25, 3  ;;  %v1665_v3 = vadd.f32 %v7652_v53, %v7707_v21  ;;  %v978_v49 = vadd.f32 %v879_v2, %v13733_v57  ;;  %6473 = vrot.lane.b32.xlu0 %v6472_v63, %s6975_s22 }
  0xec   : > { %v1342_v30 = vsel %vm1081_vm1, %v13729_v60, %v13728_v58  ;;  %v13734_v58 = vrot.slane %v13666_v28, 4  ;;  %v13735_v15 = vrot.slane %v7702_v47, 1  ;;  %v13736_v40 = vrot.slane %v7790_v13, 1 }
  0xed   : > { %v8005_v16 = vsel %vm1544_vm2, %v13732_v14, %v13731_v45  ;;  %v1440_v14 = vadd.f32 %v1340_v24, %v7683_v18  ;;  %v13737_v45 = vld [vmem:[#allocation22_spill] sm:$0xff]  ;;  %v1791_v21 = vrot.slane %v1705_v48, 4  ;;  %v710_v28 = vmul.f32 %v7113_v35, %v7767_v50  ;;  %v8035_v48 = vpop.permute.xlu1 %609 }
  0xee   : > { %v2024_v32 = vsel %vm1771_vm3, %v13734_v58, %v2023_v29  ;;  %v881_v60 = vsel %vm854_vm0, %v13736_v40, %v13735_v15  ;;  %v13738_v62 = vrot.slane %v13737_v45, 3  ;;  %v2250_v2 = vrot.slane %v2166_v55, 5  ;;  %v13740_v58 = vld [vmem:[#allocation20_spill] sm:$0xff] }
  0xef   : > { %v8027_v63 = vmul.f32 %v7205_v8, %v7767_v50  ;;  %v2252_v47 = vrot.slane %v7803_v22, 5  ;;  %v13429_v13 = vrot.slane %v7810_v5, 6  ;;  %v13741_v18 = vrot.slane %v13740_v58, 2  ;;  %v13743_v22 = vld [vmem:[#allocation33_spill] sm:$0xff]  ;;  %v13745_v58 = vld [vmem:[#allocation16_spill] sm:$0xff] }
  0xf0   : > { %v1565_v53 = vsel %vm1544_vm2, %v13738_v62, %v1564_v61  ;;  %v2127_v62 = vadd.f32 %v2024_v32, %v7716_v46  ;;  %v8038_v15 = vadd.f32 %v1110_v42, %v7807_v10  ;;  %v13742_v50 = vrot.slane %v7775_v25, 3  ;;  %v13746_v46 = vld [vmem:[#allocation24_spill] sm:$0xff]  ;;  %v13748_v10 = vld [vmem:[#allocation34_spill] sm:$0xff] }
  0xf1   : > { %v1666_v57 = vadd.f32 %v1565_v53, %v1439_v11  ;;  %13739 = vst [vmem:[#allocation21_spill] sm:$0xff] %v8027_v63  ;;  %v1106_v24 = vsel %vm1081_vm1, %v13741_v18, %v1105_v17  ;;  %v979_v11 = vadd.f32 %v881_v60, %v710_v28  ;;  %v13744_v45 = vrot.slane %v13743_v22, 4  ;;  %v13750_v25 = vld [vmem:[#allocation26_spill] sm:$0xff] }
  0xf2   : > { %v1205_v55 = vadd.f32 %v1106_v24, %v978_v49  ;;  %v1567_v40 = vsel %vm1544_vm2, %v1564_v61, %v13742_v50  ;;  %v1892_v18 = vadd.f32 %v13745_v58, %v1665_v3  ;;  %v13747_v32 = vrot.slane %v13746_v46, 4  ;;  %v8059_v50 = vpop.permute.xlu2 %644 }
  0xf3   : > { %v8046_v53 = vsel %vm1771_vm3, %v1793_v19, %v13744_v45  ;;  %v1667_v27 = vadd.f32 %v1567_v40, %v1440_v14  ;;  %v13749_v42 = vrot.slane %v13748_v10, 4  ;;  %v13751_v28 = vrot.slane %v13750_v25, 5  ;;  %13752 = vst [vmem:[#allocation30_spill] sm:$0xff] %v8059_v50  ;;  %v13753_v45 = vld [vmem:[#allocation35_spill] sm:$0xff]  ;;  %v13756_v40 = vld [vmem:[#allocation36_spill] sm:$0xff] }
  0xf4   : > { %v1792_v43 = vsel %vm1771_vm3, %v13747_v32, %v1791_v21  ;;  %v13428_v24 = vrot.slane %v8027_v63, 6  ;;  %v13754_v3 = vrot.slane %v13753_v45, 5  ;;  %v13757_v58 = vrot.slane %v13756_v40, 6 }
  0xf5   : > { %v2028_v49 = vsel %vm1771_vm3, %v2025_v9, %v13749_v42  ;;  %v1893_v60 = vadd.f32 %v1792_v43, %v1666_v57  ;;  %v2251_v61 = vsel %vm2234_vm4, %v13751_v28, %v2250_v2  ;;  %v13759_v43 = vrot.slane %v7765_v26, 2 }
  0xf6   : > { %v8064_v14 = vsel %vm2234_vm4, %v2252_v47, %v13754_v3  ;;  %v8071_v46 = vsel %vm2461_vm5, %v13429_v13, %v13757_v58  ;;  %v2354_v32 = vadd.f32 %v2251_v61, %v2127_v62  ;;  %v8078_v25 = vadd.f32 %v1342_v30, %v1205_v55  ;;  %v13765_v62 = vld [vmem:[#allocation6_spill] sm:$0xff] }
  0xf7   : > { %13755 = vst [vmem:[#allocation18_spill] sm:$0xff] %v8064_v14  ;;  %v1108_v57 = vsel %vm1081_vm1, %v1105_v17, %v13759_v43  ;;  %v1794_v28 = vsel %vm1771_vm3, %v1791_v21, %v1793_v19  ;;  %v2026_v3 = vsel %vm1771_vm3, %v2023_v29, %v2025_v9  ;;  %v8088_v58 = vmul.f32 %v7133_v44, %v8059_v50  ;;  %v8104_v29 = vpop.permute.xlu0 %589  ;;  %v13792_v14 = vld [vmem:[#allocation27_spill] sm:$0xff] }
  0xf8   : > { %13758 = vst [vmem:[#allocation31_spill] sm:$0xff] %v8071_v46  ;;  %v8076_v42 = vadd.f32 %v1108_v57, %v979_v11  ;;  %v8082_v1 = vadd.f32 %v1794_v28, %v1667_v27  ;;  %v8084_v6 = vadd.f32 %v2026_v3, %v1892_v18  ;;  %v8092_v26 = vmul.f32 %v7101_v31, %v7930_v33  ;;  %v13771_v57 = vld [vmem:[#allocation10_spill] sm:$0xff]  ;;  %v8142_v28 = vpop.permute.xlu1 %624 }
  0xf9   : > { %13761 = vst [vmem:[#allocation23_spill] sm:$0xff] %v8088_v58  ;;  %v8094_v17 = vadd.f32 %v2028_v49, %v1893_v60  ;;  %v8097_v30 = vsel %vm2234_vm4, %v2250_v2, %v2252_v47  ;;  %v13764_v27 = vrot.slane %v13674_v59, 6  ;;  %v2353_v9 = vadd.f32 %v7675_v41, %v7757_v4  ;;  %v13766_v2 = vld [vmem:[#allocation9_spill] sm:$0xff] }
  0xfa   : > { %13760 = vst [vmem:[#allocation32_spill] sm:$0xff] %v8084_v6  ;;  %v8112_v11 = vmul.f32 %v13765_v62, %v7930_v33  ;;  %v8116_v47 = vmul.f32 %v13766_v2, %v7930_v33  ;;  %v13435_v55 = vrot.slane %v7908_v0, 1  ;;  %v8121_v59 = vmul.f32 %v7162_v54, %v8059_v50 }
  0xfb   : > { %13762 = vst [vmem:[#allocation22_spill] sm:$0xff] %v8094_v17  ;;  %v2478_v19 = vsel %vm2461_vm5, %v13764_v27, %v13428_v24  ;;  %v8125_v18 = vmul.f32 %v7205_v8, %v8059_v50  ;;  %v714_v41 = vmul.f32 %v7113_v35, %v7930_v33  ;;  %v13769_v4 = vrot.slane %v7916_v37, 4 }
  0xfc   : > { %13763 = vst [vmem:[#allocation20_spill] sm:$0xff] %v8097_v30  ;;  %v8108_v21 = vadd.f32 %v2478_v19, %v2354_v32  ;;  %v13770_v49 = vrot.slane %v7911_v12, 4  ;;  %v8138_v32 = vmul.f32 %v13771_v57, %v7930_v33  ;;  %v793_v8 = vmul.f32 %v7101_v31, %v8104_v29  ;;  %v13773_v19 = vld [vmem:[#allocation25_spill] sm:$0xff] }
  0xfd   : > { %13767 = vst [vmem:[#allocation33_spill] sm:$0xff] %v8121_v59  ;;  %v8146_v3 = vmul.f32 %v7115_v36, %v7930_v33  ;;  %v8150_v27 = vmul.f32 %v7133_v44, %v7930_v33  ;;  %v1345_v13 = vrot.slane %v8116_v47, 2  ;;  %v8163_v56 = vmul.f32 %v7162_v54, %v7930_v33  ;;  %v13805_v59 = vld [vmem:[#allocation40_spill] sm:$0xff] }
  0xfe   : > { %13768 = vst [vmem:[#allocation16_spill] sm:$0xff] %v8125_v18  ;;  %v3210_v60 = vsel %vm1771_vm3, %v13770_v49, %v13769_v4  ;;  %v2580_v4 = vadd.f32 %v13773_v19, %v2353_v9  ;;  %v13774_v49 = vrot.slane %v7900_v39, 1  ;;  %v8170_v9 = vmul.f32 %v7101_v31, %v8142_v28 }
  0xff   : > { %13772 = vst [vmem:[#allocation24_spill] sm:$0xff] %v8142_v28  ;;  %v8174_v19 = vmul.f32 %v13765_v62, %v8142_v28  ;;  %v884_v24 = vrot.slane %v793_v8, 1  ;;  %v13781_v63 = vrot.slane %v7916_v37, 2  ;;  %v13784_v8 = vrot.slane %v7908_v0, 2 }
 0x100   : > { %v2689_v61 = vsel %vm854_vm0, %v13774_v49, %v13435_v55  ;;  %v8166_v58 = vadd.f32 %v7878_v34, %v2580_v4  ;;  %13776 = vst [vmem:[#allocation26_spill] sm:$0xff] %v8170_v9  ;;  %v13778_v49 = vld [vmem:[#allocation37_spill] sm:$0xff]  ;;  %v13780_v55 = vrot.slane %v8092_v26, 1  ;;  %v1255_v4 = vmul.f32 %v13766_v2, %v8104_v29 }
 0x101   : > { %v6482_v50 = vpack.i.bf16 %v3210_v60, %v2689_v61  ;;  %13777 = vst [vmem:[#allocation35_spill] sm:$0xff] %v8174_v19  ;;  %v13779_v47 = vrot.slane %v13778_v49, 1  ;;  %v13785_v61 = vrot.slane %v7900_v39, 2  ;;  %v720_v46 = vmul.f32 %v7113_v35, %v8142_v28 }
 0x102   : > { %13775 = vst [vmem:[#allocation34_spill] sm:$0xff] %v8166_v58  ;;  %v13441_v43 = vrot.slane %v8166_v58, 5  ;;  %v13786_v17 = vrot.slane %v7919_v20, 5  ;;  %v13789_v39 = vrot.slane %v8166_v58, 4  ;;  %v13793_v6 = vrot.slane %v13792_v14, 1 }
 0x103   : > { %v889_v60 = vsel %vm854_vm0, %v13780_v55, %v13779_v47  ;;  %6483 = vrot.lane.b32.xlu0 %v6482_v50, %s6973_s20  ;;  %v13782_v55 = vrot.slane %v7911_v12, 2  ;;  %v2850_v50 = vsel %vm1081_vm1, %v13785_v61, %v13784_v8  ;;  %v13790_v61 = vrot.slane %v7919_v20, 4 }
 0x104   : > { %v3473_v5 = vsel %vm2234_vm4, %v13786_v17, %v13441_v43  ;;  %v13794_v28 = vrot.slane %v8170_v9, 1  ;;  %v13797_v37 = vrot.slane %v8174_v19, 2  ;;  %v1799_v14 = vrot.slane %v8146_v3, 4 }
 0x105   : > { %v8194_v47 = vsel %vm1081_vm1, %v13782_v55, %v13781_v63  ;;  %v13787_v63 = vrot.slane %v8166_v58, 6  ;;  %v13788_v55 = vrot.slane %v7919_v20, 6  ;;  %v8219_v8 = vsel %vm1771_vm3, %v13790_v61, %v13789_v39 }
 0x106   : > { %13783 = vst [vmem:[#allocation25_spill] sm:$0xff] %v8194_v47  ;;  %v901_v49 = vsel %vm854_vm0, %v13794_v28, %v13793_v6  ;;  %v6492_v17 = vpack.i.bf16 %v3473_v5, %v8194_v47  ;;  %v6487_v43 = vpack.i.bf16 %v8219_v8, %v2850_v50  ;;  %v8239_v6 = vld [vmem:[%s13297_s1 + $0x8] ss:$0 sm:$0xff]  ;;  %v1020_v28 = vmul.f32 %v13765_v62, %v8104_v29 }
 0x107   : > { %v3634_v30 = vsel %vm2461_vm5, %v13788_v55, %v13787_v63  ;;  %13791 = vst [vmem:[#allocation62_spill] sm:$0xff] %v8219_v8  ;;  %v989_v63 = vadd.f32 %v901_v49, %v720_v46  ;;  %v13795_v55 = vld [vmem:[#allocation55_spill] sm:$0xff]  ;;  %v8243_v5 = vmul.f32 %v8239_v6, %v7930_v33  ;;  %v1343_v46 = vrot.slane %v1255_v4, 2  ;;  %v13800_v49 = vld [vmem:[#allocation38_spill] sm:$0xff] }
 0x108   : > { %6356 = vmatmul.msk.f32.gmra.mxu2 %vm3695_vm6, %v3634_v30  ;;  %v13796_v40 = vrot.slane %v13795_v55, 2  ;;  %6493 = vrot.lane.b32.xlu2 %v6492_v17, %s6974_s21  ;;  %v983_v3 = vadd.f32 %v889_v60, %v714_v41  ;;  %v13801_v50 = vrot.slane %v13800_v49, 2  ;;  %v13802_v33 = vrot.slane %v8112_v11, 2  ;;  %v13803_v55 = vld [vmem:[#allocation39_spill] sm:$0xff] }
 0x109   : > { %13798 = vst [vmem:[#allocation63_spill] sm:$0xff] %v8243_v5  ;;  %6488 = vrot.lane.b32.xlu1 %v6487_v43, %s6975_s22  ;;  %v2031_v30 = vrot.slane %v8150_v27, 4  ;;  %v1481_v61 = vmul.f32 %v13771_v57, %v8104_v29  ;;  %v13804_v18 = vrot.slane %v13803_v55, 2  ;;  %v13806_v43 = vrot.slane %v13805_v59, 3  ;;  %v8300_v59 = vpop.permute.xlu0 %604 }
 0x10a   : > { %v1128_v39 = vsel %vm1081_vm1, %v13797_v37, %v13796_v40  ;;  %v1943_v37 = vmul.f32 %v7133_v44, %v8104_v29  ;;  %v1116_v4 = vsel %vm1081_vm1, %v13802_v33, %v13801_v50  ;;  %v13810_v33 = vld [vmem:[#allocation42_spill] sm:$0xff]  ;;  %v1346_v8 = vsel %vm1081_vm1, %v1343_v46, %v1345_v13 }
 0x10b   : > { %v8252_v40 = vadd.f32 %v1128_v39, %v989_v63  ;;  %v1348_v17 = vsel %vm1081_vm1, %v1345_v13, %v13804_v18  ;;  %v13807_v63 = vrot.slane %v8138_v32, 3  ;;  %v13808_v39 = vld [vmem:[#allocation28_spill] sm:$0xff]  ;;  %v13811_v19 = vrot.slane %v13810_v33, 4 }
 0x10c   : > { %v13809_v50 = vrot.slane %v13808_v39, 1  ;;  %v13812_v18 = vrot.slane %v13727_v38, 2  ;;  %v13813_v39 = vrot.slane %v8092_v26, 1  ;;  %v1111_v60 = vrot.slane %v1020_v28, 2 }
 0x10d   : > { %13799 = vst [vmem:[#allocation64_spill] sm:$0xff] %v8252_v40  ;;  %v8270_v41 = vsel %vm1544_vm2, %v13807_v63, %v13806_v43  ;;  %v8279_v9 = vsel %vm1771_vm3, %v1799_v14, %v13811_v19  ;;  %v1708_v43 = vmul.f32 %v7115_v36, %v8104_v29  ;;  %v1668_v63 = vadd.f32 %v8005_v16, %v8078_v25  ;;  %v13814_v19 = vld [vmem:[#allocation43_spill] sm:$0xff] }
 0x10e   : > { %v885_v27 = vsel %vm854_vm0, %v13809_v50, %v884_v24  ;;  %v1344_v47 = vsel %vm1081_vm1, %v13812_v18, %v1343_v46  ;;  %v887_v50 = vsel %vm854_vm0, %v884_v24, %v13813_v39  ;;  %v2029_v33 = vrot.slane %v1943_v37, 4  ;;  %v13816_v46 = vld [vmem:[#allocation29_spill] sm:$0xff]  ;;  %v13817_v37 = vld [vmem:[#allocation44_spill] sm:$0xff] }
 0x10f   : > { %v13815_v49 = vrot.slane %v13814_v19, 4  ;;  %v713_v13 = vmul.f32 %v7113_v35, %v8104_v29  ;;  %v981_v18 = vadd.f32 %v885_v27, %v13816_v46  ;;  %v1570_v40 = vrot.slane %v1481_v61, 3 }
 0x110   : > { %v1442_v25 = vadd.f32 %v1344_v47, %v8076_v42  ;;  %v1443_v24 = vadd.f32 %v1346_v8, %v8038_v15  ;;  %v2169_v26 = vmul.f32 %v7162_v54, %v8104_v29  ;;  %v8307_v28 = vadd.f32 %v1116_v4, %v983_v3 }
 0x111   : > { %v8295_v38 = vsel %vm1771_vm3, %v2031_v30, %v13815_v49  ;;  %v13818_v49 = vrot.slane %v13817_v37, 5  ;;  %v13819_v39 = vrot.slane %v8163_v56, 5  ;;  %v982_v61 = vadd.f32 %v887_v50, %v713_v13 }
 0x112   : > { %v1797_v46 = vrot.slane %v1708_v43, 4  ;;  %v1895_v16 = vadd.f32 %v8046_v53, %v1668_v63  ;;  %v13821_v42 = vrot.slane %v13720_v51, 2  ;;  %v13822_v47 = vrot.slane %v13748_v10, 4 }
 0x113   : > { %v8314_v27 = vsel %vm2234_vm4, %v13819_v39, %v13818_v49  ;;  %v8325_v3 = vmul.f32 %v8239_v6, %v8104_v29  ;;  %v13824_v49 = vrot.slane %v13730_v23, 3  ;;  %v13825_v43 = vrot.slane %v8138_v32, 3 }
 0x114   : > { %13820 = vst [vmem:[#allocation39_spill] sm:$0xff] %v8314_v27  ;;  %v1112_v15 = vsel %vm1081_vm1, %v13821_v42, %v1111_v60  ;;  %v2030_v8 = vsel %vm1771_vm3, %v13822_v47, %v2029_v33  ;;  %v8335_v51 = vmul.f32 %v7101_v31, %v8035_v48  ;;  %v13826_v10 = vrot.slane %v8112_v11, 2 }
 0x115   : > { %13823 = vst [vmem:[#allocation28_spill] sm:$0xff] %v8325_v3  ;;  %v1208_v4 = vadd.f32 %v1112_v15, %v981_v18  ;;  %v1571_v50 = vsel %vm1544_vm2, %v13824_v49, %v1570_v40  ;;  %v1573_v53 = vsel %vm1544_vm2, %v1570_v40, %v13825_v43  ;;  %v2256_v39 = vrot.slane %v2169_v26, 5  ;;  %v13827_v18 = vld [vmem:[#allocation45_spill] sm:$0xff] }
 0x116   : > { %v1114_v63 = vsel %vm1081_vm1, %v1111_v60, %v13826_v10  ;;  %v1669_v13 = vadd.f32 %v1571_v50, %v1442_v25  ;;  %v1670_v29 = vadd.f32 %v1573_v53, %v1443_v24  ;;  %v13828_v42 = vrot.slane %v13827_v18, 6 }
 0x117   : > { %v13829_v23 = vrot.slane %v8243_v5, 6  ;;  %v8347_v32 = vadd.f32 %v1114_v63, %v982_v61  ;;  %v13831_v40 = vrot.slane %v13743_v22, 4  ;;  %v2130_v11 = vadd.f32 %v2030_v8, %v8082_v1 }
 0x118   : > { %v1800_v60 = vsel %vm1771_vm3, %v1797_v46, %v1799_v14  ;;  %v2032_v25 = vsel %vm1771_vm3, %v2029_v33, %v2031_v30  ;;  %v8357_v24 = vmul.f32 %v13765_v62, %v8035_v48  ;;  %v13452_v26 = vrot.slane %v7911_v12, 1 }
 0x119   : > { %v8345_v15 = vsel %vm2461_vm5, %v13829_v23, %v13828_v42  ;;  %v1798_v47 = vsel %vm1771_vm3, %v13831_v40, %v1797_v46  ;;  %v1444_v49 = vadd.f32 %v1348_v17, %v1208_v4  ;;  %v8360_v50 = vadd.f32 %v2032_v25, %v1895_v16  ;;  %v8383_v4 = vpop.permute.xlu0 %619 }
 0x11a   : > { %13830 = vst [vmem:[#allocation43_spill] sm:$0xff] %v8345_v15  ;;  %v13454_v61 = vrot.slane %v8335_v51, 1  ;;  %v8365_v22 = vadd.f32 %v7878_v34, %v8108_v21  ;;  %v1896_v1 = vadd.f32 %v1798_v47, %v1669_v13  ;;  %v8367_v8 = vadd.f32 %v1800_v60, %v1670_v29  ;;  %v13834_v13 = vld [vmem:[#allocation46_spill] sm:$0xff]  ;;  %v13873_v15 = vld [vmem:[#allocation37_spill] sm:$0xff] }
 0x11b   : > { %v13832_v14 = vrot.slane %v13753_v45, 5  ;;  %v717_v17 = vmul.f32 %v7113_v35, %v8035_v48  ;;  %v8377_v16 = vmul.f32 %v13766_v2, %v8035_v48  ;;  %v8381_v21 = vmul.f32 %v13771_v57, %v8035_v48 }
 0x11c   : > { %v8388_v43 = vmul.f32 %v7115_v36, %v8035_v48  ;;  %v13453_v53 = vrot.slane %v8365_v22, 4  ;;  %v13833_v10 = vrot.slane %v7908_v0, 1  ;;  %v13835_v29 = vrot.slane %v13834_v13, 1  ;;  %v13846_v0 = vld [vmem:[#allocation36_spill] sm:$0xff] }
 0x11d   : > { %v2257_v30 = vsel %vm2234_vm4, %v13832_v14, %v2256_v39  ;;  %v8403_v23 = vmul.f32 %v7133_v44, %v8035_v48  ;;  %v13455_v40 = vrot.slane %v8365_v22, 6  ;;  %v13836_v60 = vrot.slane %v8166_v58, 4 }
 0x11e   : > { %v2357_v46 = vadd.f32 %v2257_v30, %v2130_v11  ;;  %v2691_v63 = vsel %vm854_vm0, %v13833_v10, %v13452_v26  ;;  %v895_v42 = vsel %vm854_vm0, %v13454_v61, %v13835_v29  ;;  %v8409_v11 = vmul.f32 %v7162_v54, %v8035_v48  ;;  %v13839_v61 = vld [vmem:[#allocation14_spill] sm:$0xff] }
 0x11f   : > { %v6497_v47 = vpack.i.bf16 %v7982_v52, %v2691_v63  ;;  %v8416_v25 = vsel %vm1771_vm3, %v13836_v60, %v13453_v53  ;;  %v13456_v14 = vrot.slane %v7919_v20, 2  ;;  %v13459_v30 = vrot.slane %v8365_v22, 5 }
 0x120   : > { %13837 = vst [vmem:[#allocation29_spill] sm:$0xff] %v8416_v25  ;;  %v796_v52 = vmul.f32 %v7101_v31, %v8300_v59  ;;  %v6502_v63 = vpack.i.bf16 %v8416_v25, %v7951_v7  ;;  %v13838_v29 = vrot.slane %v8166_v58, 6  ;;  %v1258_v53 = vmul.f32 %v13766_v2, %v8300_v59 }
 0x121   : > { %6498 = vrot.lane.b32.xlu1 %v6497_v47, %s6973_s20  ;;  %v13840_v10 = vrot.slane %v13839_v61, 2  ;;  %v986_v45 = vadd.f32 %v895_v42, %v717_v17  ;;  %v13847_v13 = vrot.slane %v13846_v0, 6  ;;  %v8465_v17 = vpop.permute.xlu1 %639 }
 0x122   : > { %v3636_v26 = vsel %vm2461_vm5, %v13838_v29, %v13455_v40  ;;  %v13842_v29 = vrot.slane %v8166_v58, 5  ;;  %v13843_v40 = vrot.slane %v8163_v56, 5  ;;  %6503 = vrot.lane.b32.xlu2 %v6502_v63, %s6975_s22  ;;  %13848 = vst [vmem:[#allocation36_spill] sm:$0xff] %v8465_v17  ;;  %v890_v0 = vrot.slane %v796_v52, 1  ;;  %v13860_v52 = vld [vmem:[#allocation51_spill] sm:$0xff] }
 0x123   : > { %6357 = vmatmul.msk.f32.gmra.mxu2 %vm3695_vm6, %v3636_v26  ;;  %v8440_v7 = vsel %vm1081_vm1, %v13840_v10, %v13456_v14  ;;  %v8456_v10 = vadd.f32 %v8295_v38, %v1896_v1  ;;  %v13845_v14 = vrot.slane %v8325_v3, 6  ;;  %v8476_v1 = vmul.f32 %v8239_v6, %v8035_v48 }
 0x124   : > { %13841 = vst [vmem:[#allocation44_spill] sm:$0xff] %v8440_v7  ;;  %v3475_v47 = vsel %vm2234_vm4, %v13842_v29, %v13459_v30  ;;  %v8450_v60 = vsel %vm2234_vm4, %v2256_v39, %v13843_v40  ;;  %v13849_v40 = vld [vmem:[#allocation47_spill] sm:$0xff]  ;;  %v13855_v30 = vrot.slane %v8377_v16, 2  ;;  %v13858_v56 = vrot.slane %v8381_v21, 3 }
 0x125   : > { %v6507_v33 = vpack.i.bf16 %v3475_v47, %v8440_v7  ;;  %13844 = vst [vmem:[#allocation45_spill] sm:$0xff] %v8456_v10  ;;  %v2484_v29 = vsel %vm2461_vm5, %v13847_v13, %v13845_v14  ;;  %v13850_v63 = vrot.slane %v13849_v40, 2  ;;  %v13851_v47 = vrot.slane %v8357_v24, 2  ;;  %v13853_v13 = vld [vmem:[#allocation49_spill] sm:$0xff] }
 0x126   : > { %v8467_v42 = vadd.f32 %v2484_v29, %v2357_v46  ;;  %13852 = vst [vmem:[#allocation65_spill] sm:$0xff] %v8476_v1  ;;  %v13854_v14 = vrot.slane %v13853_v13, 2  ;;  %v13856_v29 = vld [vmem:[#allocation50_spill] sm:$0xff]  ;;  %v8495_v48 = vmul.f32 %v7133_v44, %v8300_v59  ;;  %v13861_v26 = vrot.slane %v13860_v52, 4  ;;  %v13869_v52 = vld [vmem:[#allocation53_spill] sm:$0xff] }
 0x127   : > { %v1122_v38 = vsel %vm1081_vm1, %v13851_v47, %v13850_v63  ;;  %6508 = vrot.lane.b32.xlu0 %v6507_v33, %s6974_s21  ;;  %v13857_v39 = vrot.slane %v13856_v29, 3  ;;  %v1349_v47 = vrot.slane %v1258_v53, 2  ;;  %v13862_v40 = vrot.slane %v8388_v43, 4  ;;  %v8511_v53 = vpop.permute.xlu0 %634 }
 0x128   : > { %v8484_v46 = vsel %vm1081_vm1, %v13855_v30, %v13854_v14  ;;  %v8497_v33 = vadd.f32 %v1122_v38, %v986_v45  ;;  %v1671_v14 = vadd.f32 %v8270_v41, %v1444_v49  ;;  %13865 = vst [vmem:[#allocation69_spill] sm:$0xff] %v8511_v53  ;;  %v13868_v45 = vrot.slane %v8403_v23, 4 }
 0x129   : > { %v8491_v63 = vsel %vm1544_vm2, %v13858_v56, %v13857_v39  ;;  %v8504_v30 = vsel %vm1771_vm3, %v13862_v40, %v13861_v26  ;;  %v8509_v56 = vmul.f32 %v13766_v2, %v8465_v17  ;;  %v13866_v39 = vld [vmem:[#allocation52_spill] sm:$0xff]  ;;  %v13871_v26 = vrot.slane %v8409_v11, 5 }
 0x12a   : > { %13859 = vst [vmem:[#allocation66_spill] sm:$0xff] %v8497_v33  ;;  %v13867_v29 = vrot.slane %v13866_v39, 4  ;;  %v13870_v33 = vrot.slane %v13869_v52, 5  ;;  %v716_v41 = vmul.f32 %v7113_v35, %v8300_v59  ;;  %v1484_v49 = vmul.f32 %v13771_v57, %v8300_v59 }
 0x12b   : > { %13863 = vst [vmem:[#allocation67_spill] sm:$0xff] %v8504_v30  ;;  %v13874_v13 = vrot.slane %v13873_v15, 1  ;;  %v13877_v52 = vrot.slane %v13803_v55, 2  ;;  %v2035_v15 = vrot.slane %v8495_v48, 4  ;;  %v8557_v27 = vmul.f32 %v7115_v36, %v8465_v17 }
 0x12c   : > { %13864 = vst [vmem:[#allocation68_spill] sm:$0xff] %v8509_v56  ;;  %v8518_v38 = vsel %vm1771_vm3, %v13868_v45, %v13867_v29  ;;  %v8525_v40 = vsel %vm2234_vm4, %v13871_v26, %v13870_v33  ;;  %v8537_v45 = vmul.f32 %v13765_v62, %v8300_v59  ;;  %v8541_v33 = vmul.f32 %v13771_v57, %v8465_v17 }
 0x12d   : > { %13872 = vst [vmem:[#allocation70_spill] sm:$0xff] %v8525_v40  ;;  %v891_v29 = vsel %vm854_vm0, %v13874_v13, %v890_v0  ;;  %v13876_v26 = vrot.slane %v8335_v51, 1  ;;  %v1350_v39 = vsel %vm1081_vm1, %v13877_v52, %v1349_v47  ;;  %v8552_v13 = vmul.f32 %v13766_v2, %v8511_v53 }
 0x12e   : > { %13875 = vst [vmem:[#allocation37_spill] sm:$0xff] %v8541_v33  ;;  %v8561_v51 = vmul.f32 %v13771_v57, %v8511_v53  ;;  %v8565_v55 = vmul.f32 %v7115_v36, %v8511_v53  ;;  %v1576_v48 = vrot.slane %v1484_v49, 3  ;;  %v8570_v52 = vmul.f32 %v7115_v36, %v8300_v59  ;;  %v13880_v53 = vld [vmem:[#allocation54_spill] sm:$0xff]  ;;  %v13884_v49 = vld [vmem:[#allocation41_spill] sm:$0xff] }
 0x12f   : > { %v893_v40 = vsel %vm854_vm0, %v890_v0, %v13876_v26  ;;  %13878 = vst [vmem:[#allocation71_spill] sm:$0xff] %v8557_v27  ;;  %v1898_v0 = vadd.f32 %v8279_v9, %v1671_v14  ;;  %v1445_v30 = vadd.f32 %v1350_v39, %v8347_v32  ;;  %v2172_v17 = vmul.f32 %v7162_v54, %v8300_v59 }
 0x130   : > { %13879 = vst [vmem:[#allocation72_spill] sm:$0xff] %v8565_v55  ;;  %v13881_v5 = vrot.slane %v13880_v53, 6  ;;  %v13882_v9 = vrot.slane %v8476_v1, 6  ;;  %v984_v7 = vadd.f32 %v891_v29, %v13884_v49  ;;  %v8586_v25 = vadd.f32 %v893_v40, %v716_v41  ;;  %v13889_v41 = vld [vmem:[#allocation40_spill] sm:$0xff] }
 0x131   : > { %v13885_v39 = vrot.slane %v13814_v19, 4  ;;  %v13886_v3 = vrot.slane %v8509_v56, 2  ;;  %v13887_v53 = vrot.slane %v8552_v13, 2  ;;  %v13888_v29 = vrot.slane %v8377_v16, 2 }
 0x132   : > { %v8583_v14 = vsel %vm2461_vm5, %v13882_v9, %v13881_v5  ;;  %v13470_v5 = vrot.slane %v8565_v55, 4  ;;  %v13890_v9 = vrot.slane %v13889_v41, 3  ;;  %v2262_v56 = vrot.slane %v2172_v17, 5 }
 0x133   : > { %13883 = vst [vmem:[#allocation73_spill] sm:$0xff] %v8583_v14  ;;  %v2036_v26 = vsel %vm1771_vm3, %v13885_v39, %v2035_v15  ;;  %v1364_v1 = vsel %vm1081_vm1, %v13887_v53, %v13886_v3  ;;  %v1352_v40 = vsel %vm1081_vm1, %v1349_v47, %v13888_v29  ;;  %v13891_v39 = vld [vmem:[#allocation64_spill] sm:$0xff]  ;;  %v8609_v14 = vmul.f32 %v8239_v6, %v8300_v59  ;;  %v13895_v29 = vld [vmem:[#allocation38_spill] sm:$0xff] }
 0x134   : > { %v1577_v19 = vsel %vm1544_vm2, %v13890_v9, %v1576_v48  ;;  %v1452_v10 = vadd.f32 %v1364_v1, %v13891_v39  ;;  %v13892_v3 = vrot.slane %v8541_v33, 3  ;;  %v13893_v16 = vrot.slane %v8561_v51, 3 }
 0x135   : > { %v1672_v32 = vadd.f32 %v1577_v19, %v1445_v30  ;;  %v13894_v53 = vrot.slane %v8537_v45, 2  ;;  %v13896_v41 = vrot.slane %v13895_v29, 2  ;;  %v2133_v1 = vadd.f32 %v2036_v26, %v8367_v8  ;;  %v13897_v30 = vld [vmem:[#allocation24_spill] sm:$0xff]  ;;  %v13901_v26 = vld [vmem:[#allocation42_spill] sm:$0xff] }
 0x136   : > { %v1591_v47 = vsel %vm1544_vm2, %v13893_v16, %v13892_v3  ;;  %v8624_v17 = vmul.f32 %v13766_v2, %v13897_v30  ;;  %v1446_v39 = vadd.f32 %v1352_v40, %v8307_v28  ;;  %v13898_v49 = vrot.slane %v8381_v21, 3 }
 0x137   : > { %v1118_v9 = vsel %vm1081_vm1, %v13896_v41, %v13894_v53  ;;  %v1679_v59 = vadd.f32 %v1591_v47, %v1452_v10  ;;  %v13899_v16 = vrot.slane %v8557_v27, 4  ;;  %v13900_v8 = vrot.slane %v8570_v52, 4  ;;  %v13905_v47 = vld [vmem:[#allocation32_spill] sm:$0xff] }
 0x138   : > { %v1211_v19 = vadd.f32 %v1118_v9, %v984_v7  ;;  %v1579_v3 = vsel %vm1544_vm2, %v1576_v48, %v13898_v49  ;;  %v13902_v29 = vrot.slane %v13901_v26, 4  ;;  %v8642_v7 = vmul.f32 %v13771_v57, %v13897_v30  ;;  %v13906_v9 = vld [vmem:[#allocation20_spill] sm:$0xff] }
 0x139   : > { %v1818_v53 = vsel %vm1771_vm3, %v13470_v5, %v13899_v16  ;;  %v13472_v21 = vrot.slane %v13839_v61, 1  ;;  %v13904_v48 = vrot.slane %v13817_v37, 5  ;;  %v2355_v16 = vadd.f32 %v13906_v9, %v13905_v47  ;;  %v13909_v5 = vld [vmem:[#allocation21_spill] sm:$0xff] }
 0x13a   : > { %v1804_v41 = vsel %vm1771_vm3, %v13902_v29, %v13900_v8  ;;  %v8644_v28 = vadd.f32 %v1818_v53, %v1679_v59  ;;  %v13471_v8 = vrot.slane %v8624_v17, 2  ;;  %v8656_v29 = vmul.f32 %v7115_v36, %v13897_v30  ;;  %v13907_v59 = vld [vmem:[#allocation61_spill] sm:$0xff] }
 0x13b   : > { %v1899_v10 = vadd.f32 %v1804_v41, %v1672_v32  ;;  %v2263_v40 = vsel %vm2234_vm4, %v13904_v48, %v2262_v56  ;;  %v13908_v53 = vrot.slane %v13907_v59, 6  ;;  %v13910_v32 = vrot.slane %v13909_v5, 6 }
 0x13c   : > { %13903 = vst [vmem:[#allocation41_spill] sm:$0xff] %v8644_v28  ;;  %v2360_v26 = vadd.f32 %v2263_v40, %v2133_v1  ;;  %v13911_v41 = vrot.slane %v8403_v23, 4  ;;  %v13912_v49 = vrot.slane %v8409_v11, 5  ;;  %v13913_v40 = vrot.slane %v7911_v12, 1 }
 0x13d   : > { %v2480_v37 = vsel %vm2461_vm5, %v13910_v32, %v13908_v53  ;;  %v13473_v5 = vrot.slane %v8642_v7, 3  ;;  %v13914_v53 = vld [vmem:[#allocation62_spill] sm:$0xff]  ;;  %v8682_v11 = vadd.f32 %v8518_v38, %v1899_v10  ;;  %v13927_v10 = vrot.slane %v8365_v22, 5 }
 0x13e   : > { %v2038_v48 = vsel %vm1771_vm3, %v2035_v15, %v13911_v41  ;;  %v8669_v1 = vsel %vm2234_vm4, %v2262_v56, %v13912_v49  ;;  %v2693_v47 = vsel %vm854_vm0, %v13913_v40, %v13472_v21  ;;  %v2582_v9 = vadd.f32 %v2480_v37, %v2355_v16  ;;  %v13918_v16 = vld [vmem:[#allocation18_spill] sm:$0xff]  ;;  %v13919_v40 = vld [vmem:[#allocation17_spill] sm:$0xff] }
 0x13f   : > { %v8676_v59 = vadd.f32 %v2038_v48, %v1898_v0  ;;  %v6512_v23 = vpack.i.bf16 %v13914_v53, %v2693_v47  ;;  %v2857_v15 = vrot.slane %v8166_v58, 2  ;;  %v13915_v56 = vrot.slane %v8609_v14, 6  ;;  %v13917_v0 = vld [vmem:[#allocation22_spill] sm:$0xff] }
 0x140   : > { %v13916_v49 = vrot.slane %v13827_v18, 6  ;;  %v8690_v41 = vadd.f32 %v7878_v34, %v2582_v9  ;;  %v2356_v37 = vadd.f32 %v13918_v16, %v13917_v0  ;;  %v13920_v47 = vrot.slane %v13919_v40, 2 }
 0x141   : > { %v8706_v18 = vmul.f32 %v7133_v44, %v13897_v30  ;;  %6513 = vrot.lane.b32.xlu2 %v6512_v23, %s6973_s20  ;;  %v13925_v23 = vrot.slane %v7919_v20, 2  ;;  %v13931_v21 = vrot.slane %v8656_v29, 4 }
 0x142   : > { %v2490_v32 = vsel %vm2461_vm5, %v13916_v49, %v13915_v56  ;;  %v8701_v38 = vsel %vm1081_vm1, %v13471_v8, %v13920_v47  ;;  %v3637_v9 = vrot.slane %v8690_v41, 6  ;;  %v3217_v53 = vrot.slane %v8690_v41, 4  ;;  %v13921_v56 = vld [vmem:[#allocation31_spill] sm:$0xff] }
 0x143   : > { %v8694_v48 = vadd.f32 %v2490_v32, %v2360_v26  ;;  %v3476_v26 = vrot.slane %v8690_v41, 5  ;;  %v2583_v49 = vadd.f32 %v13921_v56, %v2356_v37  ;;  %v13922_v32 = vld [vmem:[#allocation56_spill] sm:$0xff]  ;;  %v8722_v47 = vmul.f32 %v7162_v54, %v13897_v30 }
 0x144   : > { %v13923_v0 = vrot.slane %v13922_v32, 3  ;;  %v8727_v8 = vsel %vm1081_vm1, %v13925_v23, %v2857_v15  ;;  %v13926_v37 = vrot.slane %v8365_v22, 6  ;;  %v13929_v23 = vld [vmem:[#allocation57_spill] sm:$0xff] }
 0x145   : > { %13924 = vst [vmem:[#allocation40_spill] sm:$0xff] %v8722_v47  ;;  %v8742_v27 = vadd.f32 %v7878_v34, %v2583_v49  ;;  %v13930_v33 = vrot.slane %v13929_v23, 4  ;;  %v13937_v49 = vrot.slane %v8365_v22, 2 }
 0x146   : > { %v8718_v16 = vsel %vm1544_vm2, %v13473_v5, %v13923_v0  ;;  %v3638_v56 = vsel %vm2461_vm5, %v13926_v37, %v3637_v9  ;;  %v3477_v0 = vsel %vm2234_vm4, %v13927_v10, %v3476_v26  ;;  %v13928_v5 = vrot.slane %v8365_v22, 4 }
 0x147   : > { %v8749_v12 = vsel %vm1771_vm3, %v13931_v21, %v13930_v33  ;;  %v8753_v37 = vmul.f32 %v8239_v6, %v13897_v30  ;;  %6358 = vmatmul.msk.f32.gmra.mxu2 %vm3695_vm6, %v3638_v56  ;;  %v6522_v10 = vpack.i.bf16 %v3477_v0, %v8727_v8  ;;  %v3478_v23 = vrot.slane %v8742_v27, 5 }
 0x148   : > { %v8739_v28 = vsel %vm1771_vm3, %v13928_v5, %v3217_v53  ;;  %13932 = vst [vmem:[#allocation64_spill] sm:$0xff] %v8749_v12  ;;  %v13934_v5 = vld [vmem:[#allocation25_spill] sm:$0xff]  ;;  %v3219_v32 = vrot.slane %v8742_v27, 4  ;;  %v8764_v33 = vadd.f32 %v7878_v34, %v8467_v42  ;;  %v13935_v21 = vrot.slane %v8357_v24, 2 }
 0x149   : > { %13933 = vst [vmem:[#allocation38_spill] sm:$0xff] %v8753_v37  ;;  %v6517_v55 = vpack.i.bf16 %v8739_v28, %v13934_v5  ;;  %v13936_v56 = vrot.slane %v8537_v45, 2  ;;  %v1447_v5 = vadd.f32 %v8484_v46, %v1211_v19  ;;  %v1673_v12 = vadd.f32 %v1579_v3, %v1446_v39  ;;  %6523 = vrot.lane.b32.xlu1 %v6522_v10, %s6974_s21  ;;  %v13948_v10 = vld [vmem:[#allocation28_spill] sm:$0xff] }
 0x14a   : > { %v8778_v42 = vsel %vm1081_vm1, %v2857_v15, %v13937_v49  ;;  %v3479_v30 = vsel %vm2234_vm4, %v3476_v26, %v3478_v23  ;;  %v3639_v24 = vrot.slane %v8742_v27, 6  ;;  %v2694_v45 = vrot.slane %v7919_v20, 1 }
 0x14b   : > { %v1120_v0 = vsel %vm1081_vm1, %v13936_v56, %v13935_v21  ;;  %6518 = vrot.lane.b32.xlu0 %v6517_v55, %s6975_s22  ;;  %v1261_v19 = vmul.f32 %v13766_v2, %v8383_v4  ;;  %v6537_v55 = vpack.i.bf16 %v3479_v30, %v8778_v42  ;;  %v13938_v39 = vrot.slane %v8388_v43, 4 }
 0x14c   : > { %v1212_v46 = vadd.f32 %v1120_v0, %v8586_v25  ;;  %v13939_v3 = vrot.slane %v8570_v52, 4  ;;  %v8794_v26 = vsel %vm1771_vm3, %v3217_v53, %v3219_v32  ;;  %v2358_v49 = vadd.f32 %v8450_v60, %v8360_v50  ;;  %v13940_v25 = vld [vmem:[#allocation58_spill] sm:$0xff] }
 0x14d   : > { %v13941_v56 = vrot.slane %v13940_v25, 4  ;;  %v13942_v0 = vrot.slane %v8706_v18, 4  ;;  %v1674_v43 = vadd.f32 %v8491_v63, %v1447_v5  ;;  %v799_v53 = vmul.f32 %v7101_v31, %v8383_v4  ;;  %6538 = vrot.lane.b32.xlu2 %v6537_v55, %s6974_s21  ;;  %v13944_v5 = vld [vmem:[#allocation29_spill] sm:$0xff]  ;;  %v13952_v31 = vld [vmem:[#allocation39_spill] sm:$0xff] }
 0x14e   : > { %v1806_v15 = vsel %vm1771_vm3, %v13939_v3, %v13938_v39  ;;  %v719_v39 = vmul.f32 %v7113_v35, %v8383_v4  ;;  %v8816_v50 = vmul.f32 %v13765_v62, %v8383_v4  ;;  %v3640_v60 = vsel %vm2461_vm5, %v3637_v9, %v3639_v24 }
 0x14f   : > { %v8804_v30 = vsel %vm1771_vm3, %v13942_v0, %v13941_v56  ;;  %v8807_v52 = vadd.f32 %v1806_v15, %v1673_v12  ;;  %v13943_v3 = vrot.slane %v13839_v61, 1  ;;  %v1355_v12 = vrot.slane %v1261_v19, 2  ;;  %6359 = vmatmul.msk.f32.gmra.mxu2 %vm3695_vm6, %v3640_v60  ;;  %v13945_v56 = vld [vmem:[#allocation44_spill] sm:$0xff]  ;;  %v13946_v0 = vld [vmem:[#allocation63_spill] sm:$0xff]  ;;  %v13951_v60 = vld [vmem:[#allocation45_spill] sm:$0xff] }
 0x150   : > { %v6532_v55 = vpack.i.bf16 %v8794_v26, %v13945_v56  ;;  %v13947_v21 = vrot.slane %v13946_v0, 6  ;;  %v13949_v2 = vrot.slane %v13948_v10, 6  ;;  %v13950_v9 = vrot.slane %v8764_v33, 4  ;;  %v13956_v10 = vld [vmem:[#allocation60_spill] sm:$0xff] }
 0x151   : > { %v2695_v63 = vsel %vm854_vm0, %v13943_v3, %v2694_v45  ;;  %v3480_v19 = vrot.slane %v8764_v33, 5  ;;  %v13955_v56 = vrot.slane %v8722_v47, 5 }
 0x152   : > { %v6527_v15 = vpack.i.bf16 %v13944_v5, %v2695_v63  ;;  %v2486_v35 = vsel %vm2461_vm5, %v13949_v2, %v13947_v21  ;;  %v8834_v62 = vsel %vm1771_vm3, %v3219_v32, %v13950_v9  ;;  %v2359_v63 = vadd.f32 %v13952_v31, %v13951_v60  ;;  %v13953_v5 = vld [vmem:[#allocation59_spill] sm:$0xff]  ;;  %6533 = vrot.lane.b32.xlu1 %v6532_v55, %s6975_s22  ;;  %v13962_v55 = vld [vmem:[#allocation49_spill] sm:$0xff] }
 0x153   : > { %v2585_v3 = vadd.f32 %v2486_v35, %v2358_v49  ;;  %v13954_v20 = vrot.slane %v13953_v5, 5  ;;  %v13957_v2 = vrot.slane %v13956_v10, 6  ;;  %v13958_v21 = vrot.slane %v8753_v37, 6  ;;  %v13960_v31 = vld [vmem:[#allocation67_spill] sm:$0xff] }
 0x154   : > { %v896_v9 = vrot.slane %v799_v53, 1  ;;  %v1487_v35 = vmul.f32 %v13771_v57, %v8383_v4  ;;  %6528 = vrot.lane.b32.xlu0 %v6527_v15, %s6973_s20  ;;  %v8858_v49 = vadd.f32 %v13960_v31, %v1674_v43  ;;  %v2696_v60 = vrot.slane %v8166_v58, 1 }
 0x155   : > { %v8844_v0 = vsel %vm2234_vm4, %v13955_v56, %v13954_v20  ;;  %v8851_v32 = vsel %vm2461_vm5, %v13958_v21, %v13957_v2  ;;  %v3641_v20 = vrot.slane %v8764_v33, 6  ;;  %v2861_v56 = vrot.slane %v8690_v41, 2 }
 0x156   : > { %13959 = vst [vmem:[#allocation24_spill] sm:$0xff] %v8851_v32  ;;  %v1123_v2 = vrot.slane %v8816_v50, 2  ;;  %v8866_v53 = vmul.f32 %v7115_v36, %v8383_v4  ;;  %v8870_v15 = vmul.f32 %v7133_v44, %v8383_v4  ;;  %v6547_v43 = vpack.i.bf16 %v8834_v62, %v8727_v8  ;;  %v13964_v50 = vld [vmem:[#allocation43_spill] sm:$0xff]  ;;  %v13965_v36 = vld [vmem:[#allocation46_spill] sm:$0xff] }
 0x157   : > { %13961 = vst [vmem:[#allocation42_spill] sm:$0xff] %v8858_v49  ;;  %v13963_v21 = vrot.slane %v13962_v55, 2  ;;  %v3481_v57 = vsel %vm2234_vm4, %v3478_v23, %v3480_v19  ;;  %v8879_v58 = vadd.f32 %v7878_v34, %v2585_v3  ;;  %v2586_v61 = vadd.f32 %v13964_v50, %v2359_v63 }
 0x158   : > { %v13966_v37 = vrot.slane %v13965_v36, 1  ;;  %v13967_v49 = vrot.slane %v8624_v17, 2  ;;  %v1582_v8 = vrot.slane %v1487_v35, 3  ;;  %v8890_v55 = vmul.f32 %v7162_v54, %v8383_v4  ;;  %6548 = vrot.lane.b32.xlu2 %v6547_v43, %s6975_s22 }
 0x159   : > { %v1356_v31 = vsel %vm1081_vm1, %v13963_v21, %v1355_v12  ;;  %v3642_v23 = vsel %vm2461_vm5, %v3639_v24, %v3641_v20  ;;  %v2697_v3 = vsel %vm854_vm0, %v2694_v45, %v2696_v60  ;;  %v13968_v63 = vrot.slane %v8365_v22, 2 }
 0x15a   : > { %v897_v47 = vsel %vm854_vm0, %v13966_v37, %v896_v9  ;;  %v1358_v32 = vsel %vm1081_vm1, %v1355_v12, %v13967_v49  ;;  %v1448_v37 = vadd.f32 %v1356_v31, %v1212_v46  ;;  %v8903_v12 = vmul.f32 %v8239_v6, %v8383_v4  ;;  %6360 = vmatmul.msk.f32.gmra.mxu2 %vm3695_vm6, %v3642_v23  ;;  %v13969_v49 = vld [vmem:[#allocation26_spill] sm:$0xff]  ;;  %v13971_v31 = vld [vmem:[#allocation48_spill] sm:$0xff] }
 0x15b   : > { %v8898_v36 = vsel %vm1081_vm1, %v13968_v63, %v2861_v56  ;;  %v6542_v35 = vpack.i.bf16 %v8739_v28, %v2697_v3  ;;  %v13970_v45 = vrot.slane %v13969_v49, 1  ;;  %v3482_v21 = vrot.slane %v8879_v58, 5  ;;  %v13972_v63 = vld [vmem:[#allocation66_spill] sm:$0xff] }
 0x15c   : > { %v6552_v24 = vpack.i.bf16 %v3481_v57, %v8898_v36  ;;  %v3223_v50 = vrot.slane %v8879_v58, 4  ;;  %v8914_v46 = vadd.f32 %v7878_v34, %v2586_v61  ;;  %v987_v4 = vadd.f32 %v897_v47, %v13971_v31  ;;  %v13973_v23 = vld [vmem:[#allocation50_spill] sm:$0xff] }
 0x15d   : > { %v899_v43 = vsel %vm854_vm0, %v896_v9, %v13970_v45  ;;  %v1449_v17 = vadd.f32 %v1358_v32, %v13972_v63  ;;  %v13974_v10 = vrot.slane %v13973_v23, 3  ;;  %v1809_v57 = vrot.slane %v8866_v53, 4  ;;  %6543 = vrot.lane.b32.xlu1 %v6542_v35, %s6973_s20  ;;  %v13976_v45 = vld [vmem:[#allocation47_spill] sm:$0xff] }
 0x15e   : > { %6553 = vrot.lane.b32.xlu0 %v6552_v24, %s6974_s21  ;;  %v2041_v9 = vrot.slane %v8870_v15, 4  ;;  %v13975_v3 = vrot.slane %v8365_v22, 1  ;;  %v3643_v47 = vrot.slane %v8879_v58, 6  ;;  %v2863_v32 = vrot.slane %v8742_v27, 2  ;;  %v3914_v15 = vld [vmem:[%s13299_s3 + $0xc0] sm:$0xff] }
 0x15f   : > { %v1583_v28 = vsel %vm1544_vm2, %v13974_v10, %v1582_v8  ;;  %v988_v49 = vadd.f32 %v899_v43, %v719_v39  ;;  %v13977_v31 = vrot.slane %v13976_v45, 2  ;;  %v13978_v24 = vrot.slane %v8642_v7, 3  ;;  %v13980_v43 = vld [vmem:[#allocation35_spill] sm:$0xff] }
 0x160   : > { %v2699_v61 = vsel %vm854_vm0, %v2696_v60, %v13975_v3  ;;  %v1675_v53 = vadd.f32 %v1583_v28, %v1448_v37  ;;  %v3483_v23 = vsel %vm2234_vm4, %v3480_v19, %v3482_v21  ;;  %v13979_v60 = vrot.slane %v8764_v33, 4  ;;  %v13984_v19 = vld [vmem:[#allocation52_spill] sm:$0xff] }
 0x161   : > { %v1124_v10 = vsel %vm1081_vm1, %v13977_v31, %v1123_v2  ;;  %v6557_v35 = vpack.i.bf16 %v8794_v26, %v2699_v61  ;;  %v1585_v63 = vsel %vm1544_vm2, %v1582_v8, %v13978_v24  ;;  %v3484_v39 = vrot.slane %v8914_v46, 5  ;;  %v13982_v26 = vld [vmem:[#allocation51_spill] sm:$0xff] }
 0x162   : > { %v8941_v3 = vsel %vm1771_vm3, %v13979_v60, %v3223_v50  ;;  %v13981_v45 = vrot.slane %v13980_v43, 2  ;;  %v1214_v37 = vadd.f32 %v1124_v10, %v987_v4  ;;  %v1676_v28 = vadd.f32 %v1585_v63, %v1449_v17 }
 0x163   : > { %v13983_v61 = vrot.slane %v13982_v26, 4  ;;  %6558 = vrot.lane.b32.xlu2 %v6557_v35, %s6973_s20  ;;  %v13985_v8 = vrot.slane %v13984_v19, 4  ;;  %v3644_v60 = vsel %vm2461_vm5, %v3641_v20, %v3643_v47  ;;  %v8958_v43 = vsel %vm1081_vm1, %v2861_v56, %v2863_v32 }
 0x164   : > { %v1126_v31 = vsel %vm1081_vm1, %v1123_v2, %v13981_v45  ;;  %v2865_v2 = vrot.slane %v8764_v33, 2  ;;  %v2268_v4 = vrot.slane %v8890_v55, 5  ;;  %6361 = vmatmul.msk.f32.gmra.mxu2 %vm3695_vm6, %v3644_v60  ;;  %v6567_v10 = vpack.i.bf16 %v3483_v23, %v8958_v43  ;;  %v3894_v55 = vld [vmem:[%s13299_s3 + $0x20] sm:$0xff] }
 0x165   : > { %v1810_v7 = vsel %vm1771_vm3, %v13983_v61, %v1809_v57  ;;  %v2042_v24 = vsel %vm1771_vm3, %v13985_v8, %v2041_v9  ;;  %v6562_v35 = vpack.i.bf16 %v8941_v3, %v8778_v42  ;;  %v1215_v63 = vadd.f32 %v1126_v31, %v988_v49 }
 0x166   : > { %v1902_v17 = vadd.f32 %v1810_v7, %v1675_v53  ;;  %v3485_v20 = vsel %vm2234_vm4, %v3482_v21, %v3484_v39  ;;  %v3225_v56 = vrot.slane %v8914_v46, 4  ;;  %v8972_v45 = vadd.f32 %v7878_v34, %v8694_v48  ;;  %6568 = vrot.lane.b32.xlu1 %v6567_v10, %s6974_s21  ;;  %v13987_v21 = vld [vmem:[#allocation69_spill] sm:$0xff] }
 0x167   : > { %v1450_v53 = vadd.f32 %v8701_v38, %v1214_v37  ;;  %v13986_v26 = vrot.slane %v8656_v29, 4  ;;  %v2136_v61 = vadd.f32 %v2042_v24, %v8807_v52  ;;  %v2495_v42 = vrot.slane %v8903_v12, 6  ;;  %6563 = vrot.lane.b32.xlu0 %v6562_v35, %s6975_s22  ;;  %v3892_v12 = vld [vmem:[%s13299_s3 + $0x10] sm:$0xff] }
 0x168   : > { %v8984_v49 = vmul.f32 %v7133_v44, %v13987_v21  ;;  %v8989_v34 = vsel %vm1081_vm1, %v2863_v32, %v2865_v2  ;;  %v3645_v29 = vrot.slane %v8914_v46, 6  ;;  %v2700_v48 = vrot.slane %v8690_v41, 1 }
 0x169   : > { %v1812_v23 = vsel %vm1771_vm3, %v1809_v57, %v13986_v26  ;;  %v8994_v52 = vadd.f32 %v8804_v30, %v1902_v17  ;;  %v13988_v57 = vld [vmem:[#allocation53_spill] sm:$0xff]  ;;  %v6582_v7 = vpack.i.bf16 %v3485_v20, %v8989_v34  ;;  %v13990_v19 = vrot.slane %v8552_v13, 2  ;;  %v13992_v17 = vld [vmem:[#allocation54_spill] sm:$0xff] }
 0x16a   : > { %v1903_v38 = vadd.f32 %v1812_v23, %v1676_v28  ;;  %v13989_v31 = vrot.slane %v13988_v57, 5  ;;  %v13991_v32 = vrot.slane %v13919_v40, 2  ;;  %v9008_v24 = vsel %vm1771_vm3, %v3223_v50, %v3225_v56  ;;  %v13994_v40 = vld [vmem:[#allocation36_spill] sm:$0xff] }
 0x16b   : > { %v3227_v30 = vrot.slane %v8972_v45, 4  ;;  %v2361_v28 = vadd.f32 %v8669_v1, %v8676_v59  ;;  %v13993_v10 = vrot.slane %v13992_v17, 6  ;;  %v9024_v35 = vmul.f32 %v7133_v44, %v13994_v40  ;;  %6583 = vrot.lane.b32.xlu2 %v6582_v7, %s6974_s21 }
 0x16c   : > { %v2269_v37 = vsel %vm2234_vm4, %v13989_v31, %v2268_v4  ;;  %v1362_v8 = vsel %vm1081_vm1, %v13991_v32, %v13990_v19  ;;  %v9028_v50 = vmul.f32 %v7162_v54, %v13994_v40  ;;  %v1677_v1 = vadd.f32 %v8718_v16, %v1450_v53  ;;  %v13996_v53 = vld [vmem:[#allocation65_spill] sm:$0xff] }
 0x16d   : > { %v9013_v60 = vadd.f32 %v2269_v37, %v2136_v61  ;;  %v9020_v13 = vsel %vm2461_vm5, %v13993_v10, %v2495_v42  ;;  %v2047_v59 = vrot.slane %v8984_v49, 4  ;;  %v3646_v20 = vsel %vm2461_vm5, %v3643_v47, %v3645_v29  ;;  %v3905_v37 = vld [vmem:[%s13299_s3 + $0x78] sm:$0xff]  ;;  %v14001_v10 = vld [vmem:[#allocation56_spill] sm:$0xff] }
 0x16e   : > { %v13995_v26 = vrot.slane %v8365_v22, 1  ;;  %v1451_v61 = vadd.f32 %v1362_v8, %v1215_v63  ;;  %6362 = vmatmul.msk.f32.gmra.mxu2 %vm3695_vm6, %v3646_v20  ;;  %v6577_v16 = vpack.i.bf16 %v9008_v24, %v8898_v36  ;;  %v13997_v49 = vrot.slane %v13996_v53, 6  ;;  %v3921_v63 = vld [vmem:[%s13299_s3 + $0xf8] sm:$0xff]  ;;  %3994 = vmatpush.msra.mxu0 %v3905_v37 }
 0x16f   : > { %v13998_v31 = vrot.slane %v8609_v14, 6  ;;  %v3486_v36 = vrot.slane %v8972_v45, 5  ;;  %v13999_v14 = vld [vmem:[#allocation70_spill] sm:$0xff]  ;;  %4107 = vmatpush.msra.mxu1 %v3921_v63  ;;  %v2049_v32 = vrot.slane %v9024_v35, 4  ;;  %v9067_v8 = vmul.f32 %v8239_v6, %v13994_v40 }
 0x170   : > { %v2701_v23 = vsel %vm854_vm0, %v13995_v26, %v2700_v48  ;;  %v2362_v19 = vadd.f32 %v13999_v14, %v8682_v11  ;;  %v14000_v17 = vrot.slane %v8561_v51, 3  ;;  %v14002_v20 = vrot.slane %v14001_v10, 3  ;;  %6578 = vrot.lane.b32.xlu1 %v6577_v16, %s6975_s22  ;;  %v3904_v11 = vld [vmem:[%s13299_s3 + $0x70] sm:$0xff]  ;;  %v3903_v16 = vld [vmem:[%s13299_s3 + $0x68] sm:$0xff] }
 0x171   : > { %v6572_v57 = vpack.i.bf16 %v8834_v62, %v2701_v23  ;;  %v2492_v47 = vsel %vm2461_vm5, %v13998_v31, %v13997_v49  ;;  %v9059_v62 = vsel %vm1771_vm3, %v3225_v56, %v3227_v30  ;;  %v3920_v35 = vld [vmem:[%s13299_s3 + $0xf0] sm:$0xff]  ;;  %v14003_v51 = vrot.slane %v13940_v25, 4  ;;  %3995 = vmatpush.msra.mxu0 %v3904_v11  ;;  %v3919_v49 = vld [vmem:[%s13299_s3 + $0xe8] sm:$0xff]  ;;  %v14004_v31 = vld [vmem:[#allocation64_spill] sm:$0xff] }
 0x172   : > { %v2588_v7 = vadd.f32 %v2492_v47, %v2361_v28  ;;  %v1589_v56 = vsel %vm1544_vm2, %v14002_v20, %v14000_v17  ;;  %v2178_v28 = vmul.f32 %v7162_v54, %v13987_v21  ;;  %v3647_v23 = vrot.slane %v8972_v45, 6  ;;  %4108 = vmatpush.msra.mxu1 %v3920_v35  ;;  %v14009_v20 = vld [vmem:[#allocation57_spill] sm:$0xff] }
 0x173   : > { %6573 = vrot.lane.b32.xlu0 %v6572_v57, %s6973_s20  ;;  %v2048_v26 = vsel %vm1771_vm3, %v14003_v51, %v2047_v59  ;;  %v2702_v53 = vrot.slane %v8742_v27, 1  ;;  %v2867_v57 = vrot.slane %v8879_v58, 2  ;;  %v1904_v25 = vadd.f32 %v14004_v31, %v1677_v1  ;;  %v9112_v1 = vld [vmem:[%s13298_s2] ss:$0 sm:$0xff]  ;;  %3996 = vmatpush.msra.mxu0 %v3903_v16 }
 0x174   : > { %v1678_v47 = vadd.f32 %v1589_v56, %v1451_v61  ;;  %v9099_v37 = vmul.f32 %v8239_v6, %v13987_v21  ;;  %v6592_v63 = vpack.i.bf16 %v9059_v62, %v8958_v43  ;;  %v2276_v14 = vrot.slane %v9028_v50, 5  ;;  %v14006_v6 = vld [vmem:[#allocation73_spill] sm:$0xff]  ;;  %4109 = vmatpush.msra.mxu1 %v3919_v49  ;;  %v14007_v43 = vld [vmem:[#allocation72_spill] sm:$0xff] }
 0x175   : > { %v3487_v17 = vsel %vm2234_vm4, %v3484_v39, %v3486_v36  ;;  %v9115_v61 = vadd.f32 %v9112_v1, %v2588_v7  ;;  %v2589_v10 = vadd.f32 %v14006_v6, %v2362_v19  ;;  %v14008_v50 = vrot.slane %v14007_v43, 4  ;;  %v3902_v7 = vld [vmem:[%s13299_s3 + $0x60] sm:$0xff] }
 0x176   : > { %v14010_v56 = vrot.slane %v14009_v20, 4  ;;  %v2050_v39 = vsel %vm1771_vm3, %v2047_v59, %v2049_v32  ;;  %v2139_v35 = vadd.f32 %v2048_v26, %v1903_v38  ;;  %v2274_v51 = vrot.slane %v2178_v28, 5  ;;  %6593 = vrot.lane.b32.xlu2 %v6592_v63, %s6975_s22  ;;  %v3918_v19 = vld [vmem:[%s13299_s3 + $0xe0] sm:$0xff]  ;;  %3997 = vmatpush.msra.mxu0 %v3902_v7  ;;  %v14011_v63 = vld [vmem:[#allocation23_spill] sm:$0xff]  ;;  %v3915_v7 = vld [vmem:[%s13299_s3 + $0xc8] sm:$0xff] }
 0x177   : > { %14005 = vst [vmem:[#allocation32_spill] sm:$0xff] %v9115_v61  ;;  %v3648_v16 = vsel %vm2461_vm5, %v3645_v29, %v3647_v23  ;;  %v2703_v38 = vsel %vm854_vm0, %v2700_v48, %v2702_v53  ;;  %v9144_v59 = vsel %vm1081_vm1, %v2865_v2, %v2867_v57  ;;  %v2704_v28 = vrot.slane %v8764_v33, 1  ;;  %4110 = vmatpush.msra.mxu1 %v3918_v19  ;;  %v3901_v48 = vld [vmem:[%s13299_s3 + $0x58] sm:$0xff] }
 0x178   : > { %v1816_v11 = vsel %vm1771_vm3, %v14010_v56, %v14008_v50  ;;  %v2140_v49 = vadd.f32 %v2050_v39, %v1904_v25  ;;  %6363 = vmatmul.msk.f32.gmra.mxu2 %vm3695_vm6, %v3648_v16  ;;  %v6587_v29 = vpack.i.bf16 %v8941_v3, %v2703_v38  ;;  %v6597_v31 = vpack.i.bf16 %v3487_v17, %v9144_v59  ;;  %v3917_v2 = vld [vmem:[%s13299_s3 + $0xd8] sm:$0xff] }
 0x179   : > { %v1905_v26 = vadd.f32 %v1816_v11, %v1678_v47  ;;  %v14012_v6 = vrot.slane %v14011_v63, 4  ;;  %v3488_v25 = vrot.slane %v9115_v61, 5  ;;  %v3229_v47 = vrot.slane %v9115_v61, 4  ;;  %3998 = vmatpush.msra.mxu0 %v3901_v48  ;;  %4111 = vmatpush.msra.mxu1 %v3917_v2 }
 0x17a   : > { %v9162_v3 = vadd.f32 %v9112_v1, %v2589_v10  ;;  %v2503_v17 = vrot.slane %v9067_v8, 6  ;;  %v14014_v50 = vrot.slane %v13953_v5, 5  ;;  %v2277_v56 = vsel %vm2234_vm4, %v2274_v51, %v2276_v14  ;;  %6588 = vrot.lane.b32.xlu1 %v6587_v29, %s6973_s20  ;;  %v3916_v8 = vld [vmem:[%s13299_s3 + $0xd0] sm:$0xff] }
 0x17b   : > { %v2052_v43 = vsel %vm1771_vm3, %v2049_v32, %v14012_v6  ;;  %v2501_v11 = vrot.slane %v9099_v37, 6  ;;  %6598 = vrot.lane.b32.xlu0 %v6597_v31, %s6974_s21  ;;  %v3900_v32 = vld [vmem:[%s13299_s3 + $0x50] sm:$0xff]  ;;  %v2705_v5 = vsel %vm854_vm0, %v2702_v53, %v2704_v28  ;;  %v3649_v39 = vrot.slane %v9115_v61, 6  ;;  %4112 = vmatpush.msra.mxu1 %v3916_v8 }
 0x17c   : > { %14013 = vst [vmem:[#allocation20_spill] sm:$0xff] %v9162_v3  ;;  %v2275_v20 = vsel %vm2234_vm4, %v14014_v50, %v2274_v51  ;;  %v2869_v37 = vrot.slane %v8914_v46, 2  ;;  %3999 = vmatpush.msra.mxu0 %v3900_v32  ;;  %v3899_v51 = vld [vmem:[%s13299_s3 + $0x48] sm:$0xff]  ;;  %v2141_v19 = vadd.f32 %v2052_v43, %v1905_v26  ;;  %v2367_v16 = vadd.f32 %v2277_v56, %v2140_v49  ;;  %v14018_v26 = vld [vmem:[#allocation60_spill] sm:$0xff] }
 0x17d   : > { %v2366_v10 = vadd.f32 %v2275_v20, %v2139_v35  ;;  %v2365_v35 = vadd.f32 %v8844_v0, %v8994_v52  ;;  %v6602_v53 = vpack.i.bf16 %v9008_v24, %v2705_v5  ;;  %v2590_v38 = vadd.f32 %v9020_v13, %v9013_v60  ;;  %4113 = vmatpush.msra.mxu1 %v3915_v7  ;;  %v14016_v60 = vld [vmem:[#allocation33_spill] sm:$0xff]  ;;  %v14023_v7 = vld [vmem:[#allocation16_spill] sm:$0xff] }
 0x17e   : > { %v3489_v29 = vsel %vm2234_vm4, %v3486_v36, %v3488_v25  ;;  %v9202_v31 = vsel %vm1771_vm3, %v3227_v30, %v3229_v47  ;;  %v3490_v0 = vrot.slane %v9162_v3, 5  ;;  %4000 = vmatpush.msra.mxu0 %v3899_v51  ;;  %v14015_v52 = vrot.slane %v8706_v18, 4  ;;  %v3898_v18 = vld [vmem:[%s13299_s3 + $0x40] sm:$0xff] }
 0x17f   : > { %v14017_v13 = vrot.slane %v14016_v60, 5  ;;  %v14019_v49 = vrot.slane %v14018_v26, 6  ;;  %v2504_v30 = vsel %vm2461_vm5, %v2501_v11, %v2503_v17  ;;  %6603 = vrot.lane.b32.xlu2 %v6602_v53, %s6973_s20  ;;  %v9232_v2 = vsel %vm1081_vm1, %v2867_v57, %v2869_v37  ;;  %4114 = vmatpush.msra.mxu1 %v3914_v15  ;;  %v3913_v57 = vld [vmem:[%s13299_s3 + $0xb8] sm:$0xff]  ;;  %v14027_v26 = vld [vmem:[#allocation40_spill] sm:$0xff] }
 0x180   : > { %v2044_v24 = vsel %vm1771_vm3, %v2041_v9, %v14015_v52  ;;  %v2871_v6 = vrot.slane %v8972_v45, 2  ;;  %4001 = vmatpush.msra.mxu0 %v3898_v18  ;;  %v2594_v50 = vadd.f32 %v2504_v30, %v2367_v16  ;;  %v6612_v20 = vpack.i.bf16 %v3489_v29, %v9232_v2  ;;  %v3895_v29 = vld [vmem:[%s13299_s3 + $0x28] sm:$0xff] }
 0x181   : > { %v2279_v36 = vsel %vm2234_vm4, %v2276_v14, %v14017_v13  ;;  %v2502_v48 = vsel %vm2461_vm5, %v14019_v49, %v2501_v11  ;;  %v3650_v14 = vsel %vm2461_vm5, %v3647_v23, %v3649_v39  ;;  %v6607_v56 = vpack.i.bf16 %v9202_v31, %v8989_v34  ;;  %v3897_v23 = vld [vmem:[%s13299_s3 + $0x38] sm:$0xff]  ;;  %4115 = vmatpush.msra.mxu1 %v3913_v57  ;;  %v14022_v34 = vld [vmem:[#allocation42_spill] sm:$0xff]  ;;  %v3911_v52 = vld [vmem:[%s13299_s3 + $0xa8] sm:$0xff] }
 0x182   : > { %v2593_v9 = vadd.f32 %v2502_v48, %v2366_v10  ;;  %v2368_v43 = vadd.f32 %v2279_v36, %v2141_v19  ;;  %6364 = vmatmul.msk.f32.gmra.mxu2 %vm3695_vm6, %v3650_v14  ;;  %v9246_v11 = vadd.f32 %v9112_v1, %v2590_v38  ;;  %v3491_v32 = vsel %vm2234_vm4, %v3488_v25, %v3490_v0  ;;  %v14021_v10 = vld [vmem:[#allocation24_spill] sm:$0xff]  ;;  %v3896_v25 = vld [vmem:[%s13299_s3 + $0x30] sm:$0xff] }
 0x183   : > { %v3231_v8 = vrot.slane %v9162_v3, 4  ;;  %v2592_v5 = vadd.f32 %v14021_v10, %v2365_v35  ;;  %4002 = vmatpush.msra.mxu0 %v3897_v23  ;;  %v2137_v51 = vadd.f32 %v2044_v24, %v14022_v34  ;;  %v14024_v19 = vrot.slane %v14023_v7, 6  ;;  %6613 = vrot.lane.b32.xlu1 %v6612_v20, %s6974_s21  ;;  %v3912_v35 = vld [vmem:[%s13299_s3 + $0xb0] sm:$0xff]  ;;  %v6469_v23 = vpop.permute.xlu2 %6468 }
 0x184   : > { %14020 = vst [vmem:[#allocation61_spill] sm:$0xff] %v9246_v11  ;;  %6608 = vrot.lane.b32.xlu0 %v6607_v56, %s6975_s22  ;;  %v9268_v53 = vsel %vm1081_vm1, %v2869_v37, %v2871_v6  ;;  %v3651_v38 = vrot.slane %v9162_v3, 6  ;;  %4116 = vmatpush.msra.mxu1 %v3912_v35  ;;  %v9279_v24 = vadd.f32 %v9112_v1, %v2593_v9  ;;  %v14028_v49 = vrot.slane %v14027_v26, 5  ;;  %v14031_v10 = vld [vmem:[#allocation38_spill] sm:$0xff]  ;;  %v14035_v26 = vld [vmem:[#allocation4_spill] sm:$0xff] }
 0x185   : > { %v2506_v16 = vsel %vm2461_vm5, %v2503_v17, %v14024_v19  ;;  %v2706_v17 = vrot.slane %v8879_v58, 1  ;;  %4003 = vmatpush.msra.mxu0 %v3896_v25  ;;  %v6627_v37 = vpack.i.bf16 %v3491_v32, %v9268_v53  ;;  %v9283_v13 = vadd.f32 %v9112_v1, %v2594_v50  ;;  %v6479_v19 = vpop.permute.xlu1 %6478 }
 0x186   : > { %14025 = vst [vmem:[#allocation21_spill] sm:$0xff] %v9279_v24  ;;  %v2595_v36 = vadd.f32 %v2506_v16, %v2368_v43  ;;  %v2271_v48 = vsel %vm2234_vm4, %v2268_v4, %v14028_v49  ;;  %v9293_v30 = vsel %vm1771_vm3, %v3229_v47, %v3231_v8  ;;  %v3233_v18 = vrot.slane %v9246_v11, 4  ;;  %4117 = vmatpush.msra.mxu1 %v3911_v52  ;;  %v3910_v4 = vld [vmem:[%s13299_s3 + $0xa0] sm:$0xff]  ;;  %v3907_v52 = vld [vmem:[%s13299_s3 + $0x88] sm:$0xff] }
 0x187   : > { %14026 = vst [vmem:[#allocation62_spill] sm:$0xff] %v9283_v13  ;;  %v9297_v15 = vadd.f32 %v9112_v1, %v2592_v5  ;;  %4004 = vmatpush.msra.mxu0 %v3895_v29  ;;  %v2364_v9 = vadd.f32 %v2271_v48, %v2137_v51  ;;  %6628 = vrot.lane.b32.xlu2 %v6627_v37, %s6974_s21  ;;  %v13498_v50 = vrot.slane %v9279_v24, 1  ;;  %v3241_v57 = vrot.slane %v9283_v13, 4  ;;  %v3891_v29 = vld [vmem:[%s13299_s3 + $0x8] sm:$0xff] }
 0x188   : > { %v9307_v47 = vadd.f32 %v9112_v1, %v2595_v36  ;;  %v3652_v14 = vsel %vm2461_vm5, %v3649_v39, %v3651_v38  ;;  %v2707_v43 = vsel %vm854_vm0, %v2704_v28, %v2706_v17  ;;  %4118 = vmatpush.msra.mxu1 %v3910_v4  ;;  %v6622_v56 = vpack.i.bf16 %v9293_v30, %v9144_v59  ;;  %v3893_v39 = vld [vmem:[%s13299_s3 + $0x18] sm:$0xff] }
 0x189   : > { %14029 = vst [vmem:[#allocation22_spill] sm:$0xff] %v9297_v15  ;;  %4005 = vmatpush.msra.mxu0 %v3894_v55  ;;  %v6617_v20 = vpack.i.bf16 %v9059_v62, %v2707_v43  ;;  %v3909_v28 = vld [vmem:[%s13299_s3 + $0x98] sm:$0xff]  ;;  %v14032_v5 = vrot.slane %v14031_v10, 6  ;;  %v9340_v59 = vsel %vm1771_vm3, %v3231_v8, %v3233_v18  ;;  %v2720_v34 = vrot.slane %v9297_v15, 1  ;;  %v6474_v8 = vpop.permute.xlu0 %6473 }
 0x18a   : > { %14030 = vst [vmem:[#allocation18_spill] sm:$0xff] %v9307_v47  ;;  %6365 = vmatmul.msk.f32.gmra.mxu2 %vm3695_vm6, %v3652_v14  ;;  %v13495_v32 = vrot.slane %v9307_v47, 4  ;;  %4119 = vmatpush.msra.mxu1 %v3909_v28  ;;  %v3653_v25 = vrot.slane %v9246_v11, 6  ;;  %v2708_v35 = vrot.slane %v8914_v46, 1  ;;  %v6637_v36 = vpack.i.bf16 %v9340_v59, %v9232_v2  ;;  %v3890_v2 = vld [vmem:[%s13299_s3] sm:$0xff]  ;;  %v495_v10 = vld [vmem:[%s7065_s18 + $0xd8] sm:$0xff] }
 0x18b   : > { %v2498_v62 = vsel %vm2461_vm5, %v2495_v42, %v14032_v5  ;;  %4006 = vmatpush.msra.mxu0 %v3893_v39  ;;  %6623 = vrot.lane.b32.xlu1 %v6622_v56, %s6975_s22  ;;  %v3908_v42 = vld [vmem:[%s13299_s3 + $0x90] sm:$0xff]  ;;  %v9371_v37 = vsel %vm854_vm0, %v2720_v34, %v13498_v50  ;;  %v3110_v49 = vrot.slane %v14035_v26, 3  ;;  %v6470_v55 = vunpack.i.l.bf16 %v6469_v23  ;;  %v3906_v56 = vld [vmem:[%s13299_s3 + $0x80] sm:$0xff] }
 0x18c   : > { %v2591_v51 = vadd.f32 %v2498_v62, %v2364_v9  ;;  %6618 = vrot.lane.b32.xlu0 %v6617_v20, %s6973_s20  ;;  %v9356_v16 = vsel %vm1771_vm3, %v3241_v57, %v13495_v32  ;;  %4120 = vmatpush.msra.mxu1 %v3908_v42  ;;  %14034 = vst [vmem:[#allocation31_spill] sm:$0xff] %v9371_v37  ;;  %v6471_v9 = vunpack.i.h.bf16 %v6469_v23  ;;  %v2710_v4 = vrot.slane %v8972_v45, 1  ;;  %v14037_v23 = vld [vmem:[#allocation3_spill] sm:$0xff] }
 0x18d   : > { %14033 = vst [vmem:[#allocation17_spill] sm:$0xff] %v9356_v16  ;;  %4007 = vmatpush.msra.mxu0 %v3892_v12  ;;  %v6476_v43 = vunpack.i.h.bf16 %v6474_v8  ;;  %v6475_v20 = vunpack.i.l.bf16 %v6474_v8  ;;  %v3109_v39 = vrot.slane %v14037_v23, 3  ;;  %v3654_v28 = vsel %vm2461_vm5, %v3651_v38, %v3653_v25  ;;  %v14038_v8 = vld [vmem:[#allocation13_spill] sm:$0xff] }
 0x18e   : > { %4121 = vmatpush.msra.mxu1 %v3907_v52  ;;  %v9381_v14 = vadd.f32 %v9112_v1, %v2591_v51  ;;  %v2709_v1 = vsel %vm854_vm0, %v2706_v17, %v2708_v35  ;;  %v6481_v5 = vunpack.i.h.bf16 %v6479_v19  ;;  %v6480_v62 = vunpack.i.l.bf16 %v6479_v19  ;;  %v6494_v19 = vpop.permute.xlu2 %6493 }
 0x18f   : > { %4008 = vmatpush.msra.mxu0 %v3891_v29  ;;  %6638 = vrot.lane.b32.xlu2 %v6637_v36, %s6975_s22  ;;  %v6632_v51 = vpack.i.bf16 %v9202_v31, %v2709_v1  ;;  %v3492_v12 = vrot.slane %v9246_v11, 5  ;;  %v3111_v42 = vsel %vm1544_vm2, %v3109_v39, %v3110_v49  ;;  %v3696_v38 = vsel %vm3695_vm6, %v14038_v8, %v6470_v55 }
 0x190   : > { %14036 = vst [vmem:[#allocation25_spill] sm:$0xff] %v9381_v14  ;;  %4122 = vmatpush.msra.mxu1 %v3906_v56  ;;  %v3794_v29 = vsel %vm3695_vm6, %v3111_v42, %v6471_v9  ;;  %v2711_v17 = vsel %vm854_vm0, %v2708_v35, %v2710_v4  ;;  %v3729_v31 = vsel %vm3728_vm7, %v3696_v38, %v6475_v20  ;;  %v3655_v36 = vrot.slane %v9381_v14, 6  ;;  %v6489_v35 = vpop.permute.xlu1 %6488 }
 0x191   : > { %4009 = vmatpush.msra.mxu0 %v3890_v2  ;;  %v3826_v52 = vsel %vm3728_vm7, %v3794_v29, %v6476_v43  ;;  %v2873_v55 = vrot.slane %v9115_v61, 2  ;;  %v3762_v2 = vsel %vm3761_vm8, %v3729_v31, %v6480_v62  ;;  %v6484_v56 = vpop.permute.xlu0 %6483  ;;  %v6647_v39 = vpack.i.bf16 %v9293_v30, %v2711_v17  ;;  %v14039_v43 = vld [vmem:[#allocation14_spill] sm:$0xff]  ;;  %v14040_v31 = vld [vmem:[#allocation12_spill] sm:$0xff] }
 0x192   : > { %6366 = vmatmul.msk.f32.gmra.mxu2 %vm3695_vm6, %v3654_v28  ;;  %v3858_v9 = vsel %vm3761_vm8, %v3826_v52, %v6481_v5  ;;  %4010 = vmatmul.f32.vlgmr.msra.gmra.mxu0 %v3762_v2  ;;  %v3493_v20 = vsel %vm2234_vm4, %v3490_v0, %v3492_v12  ;;  %v3112_v28 = vrot.slane %v14039_v43, 3  ;;  %v6485_v1 = vunpack.i.l.bf16 %v6484_v56  ;;  %v496_v5 = vld [vmem:[%s7065_s18 + $0xe0] sm:$0xff]  ;;  %v497_v2 = vld [vmem:[%s7065_s18 + $0xe8] sm:$0xff] }
 0x193   : > { %6633 = vrot.lane.b32.xlu1 %v6632_v51, %s6973_s20  ;;  %4123 = vmatmul.f32.vlgmr.msra.gmra.mxu1 %v3858_v9  ;;  %v3656_v62 = vsel %vm2461_vm5, %v3653_v25, %v3655_v36  ;;  %v9425_v30 = vsel %vm1081_vm1, %v2871_v6, %v2873_v55  ;;  %v6491_v51 = vunpack.i.h.bf16 %v6489_v35  ;;  %v6490_v42 = vunpack.i.l.bf16 %v6489_v35 }
 0x194   : > { %649 = vperm.xlu0 %6464, %v495_v10   ;;  %v6486_v10 = vunpack.i.h.bf16 %v6484_v56  ;;  %v6642_v0 = vpack.i.bf16 %v3493_v20, %v9425_v30  ;;  %v3494_v8 = vrot.slane %v9381_v14, 5  ;;  %v3235_v38 = vrot.slane %v9381_v14, 4 }
 0x195   : > { %v3113_v29 = vsel %vm1544_vm2, %v3110_v49, %v3112_v28  ;;  %v6496_v25 = vunpack.i.h.bf16 %v6494_v19  ;;  %v6495_v17 = vunpack.i.l.bf16 %v6494_v19  ;;  %v3697_v6 = vsel %vm3695_vm6, %v14040_v31, %v6485_v1 }
 0x196   : > { %v3795_v52 = vsel %vm3695_vm6, %v3113_v29, %v6486_v10  ;;  %v3657_v9 = vrot.slane %v9297_v15, 6  ;;  %v2875_v56 = vrot.slane %v9162_v3, 2  ;;  %v6504_v49 = vpop.permute.xlu2 %6503  ;;  %v3236_v10 = vsel %vm1771_vm3, %v3233_v18, %v3235_v38 }
 0x197   : > { %6648 = vrot.lane.b32.xlu2 %v6647_v39, %s6973_s20  ;;  %v3730_v39 = vsel %vm3728_vm7, %v3697_v6, %v6490_v42  ;;  %v3827_v35 = vsel %vm3728_vm7, %v3795_v52, %v6491_v51  ;;  %v3496_v1 = vrot.slane %v9297_v15, 5  ;;  %v2877_v42 = vrot.slane %v9246_v11, 2 }
 0x198   : > { %v3763_v19 = vsel %vm3761_vm8, %v3730_v39, %v6495_v17  ;;  %v3859_v20 = vsel %vm3761_vm8, %v3827_v35, %v6496_v25  ;;  %v2876_v51 = vsel %vm1081_vm1, %v2873_v55, %v2875_v56  ;;  %v3237_v29 = vrot.slane %v9297_v15, 4  ;;  %v6499_v52 = vpop.permute.xlu1 %6498 }
 0x199   : > { %v3497_v18 = vsel %vm2234_vm4, %v3494_v8, %v3496_v1  ;;  %v9463_v55 = vsel %vm1081_vm1, %v2875_v56, %v2877_v42  ;;  %v3659_v25 = vrot.slane %v9279_v24, 6  ;;  %v3239_v6 = vrot.slane %v9279_v24, 4 }
 0x19a   : > { %6367 = vmatmul.msk.f32.gmra.mxu2 %vm3695_vm6, %v3656_v62  ;;  %v3495_v62 = vsel %vm2234_vm4, %v3492_v12, %v3494_v8  ;;  %4013 = vmatmul.f32.gmra.mxu0 %v3763_v19  ;;  %v6652_v12 = vpack.i.bf16 %v3236_v10, %v9268_v53  ;;  %v14041_v53 = vld [vmem:[#allocation19_spill] sm:$0xff]  ;;  %v6672_v31 = vpack.i.bf16 %v3497_v18, %v9463_v55  ;;  %v6501_v39 = vunpack.i.h.bf16 %v6499_v52 }
 0x19b   : > { %654 = vperm.xlu1 %6465, %v496_v5   ;;  %4126 = vmatmul.f32.gmra.mxu1 %v3859_v20  ;;  %v3658_v5 = vsel %vm2461_vm5, %v3655_v36, %v3657_v9  ;;  %v2712_v36 = vrot.slane %v9115_v61, 1  ;;  %v3114_v17 = vrot.slane %v14041_v53, 3  ;;  %v3238_v8 = vsel %vm1771_vm3, %v3235_v38, %v3237_v29 }
 0x19c   : > { %6643 = vrot.lane.b32.xlu0 %v6642_v0, %s6974_s21  ;;  %v6657_v0 = vpack.i.bf16 %v3495_v62, %v2876_v51  ;;  %v6500_v35 = vunpack.i.l.bf16 %v6499_v52  ;;  %v6506_v19 = vunpack.i.h.bf16 %v6504_v49  ;;  %v6505_v20 = vunpack.i.l.bf16 %v6504_v49  ;;  %v6509_v49 = vpop.permute.xlu0 %6508 }
 0x19d   : > { %v2713_v56 = vsel %vm854_vm0, %v2710_v4, %v2712_v36  ;;  %v3660_v62 = vsel %vm2461_vm5, %v3657_v9, %v3659_v25  ;;  %v3115_v38 = vsel %vm1544_vm2, %v3112_v28, %v3114_v17  ;;  %v9487_v18 = vsel %vm1771_vm3, %v3237_v29, %v3239_v6 }
 0x19e   : > { %v3796_v4 = vsel %vm3695_vm6, %v3115_v38, %v6501_v39  ;;  %v6682_v52 = vpack.i.bf16 %v9487_v18, %v2876_v51  ;;  %v3498_v38 = vrot.slane %v9279_v24, 5 }
 0x19f   : > { %659 = vperm.xlu2 %6466, %v497_v2   ;;  %v9471_v2 = vpop.permute.xlu2 %6513  ;;  %v3828_v28 = vsel %vm3728_vm7, %v3796_v4, %v6506_v19  ;;  %v499_v4 = vld [vmem:[%s7065_s18 + $0xf8] sm:$0xff] }
 0x1a2   : > { %6368 = vmatmul.msk.f32.gmra.mxu2 %vm3695_vm6, %v3658_v5  ;;  %v6662_v5 = vpack.i.bf16 %v9340_v59, %v2713_v56  ;;  %v6511_v59 = vunpack.i.h.bf16 %v6509_v49 }
 0x1a3   : > { %6658 = vrot.lane.b32.xlu1 %v6657_v0, %s6974_s21  ;;  %v6667_v0 = vpack.i.bf16 %v3238_v8, %v9425_v30  ;;  %v6510_v30 = vunpack.i.l.bf16 %v6509_v49 }
 0x1a4   : > { %6653 = vrot.lane.b32.xlu0 %v6652_v12, %s6975_s22  ;;  %v3698_v12 = vsel %vm3695_vm6, %v14037_v23, %v6500_v35  ;;  %v2714_v23 = vrot.slane %v9162_v3, 1  ;;  %v3860_v56 = vsel %vm3761_vm8, %v3828_v28, %v6511_v59  ;;  %v498_v35 = vld [vmem:[%s7065_s18 + $0xf0] sm:$0xff]  ;;  %v3500_v28 = vrot.slane %v9283_v13, 5 }
 0x1a5   : > { %v3731_v9 = vsel %vm3728_vm7, %v3698_v12, %v6505_v20  ;;  %4129 = vmatmul.f32.gmra.mxu1 %v3860_v56  ;;  %v2716_v20 = vrot.slane %v9246_v11, 1  ;;  %v3499_v12 = vsel %vm2234_vm4, %v3496_v1, %v3498_v38  ;;  %v500_v1 = vld [vmem:[%s7065_s18 + $0x100] sm:$0xff]  ;;  %v2881_v59 = vrot.slane %v9297_v15, 2 }
 0x1a6   : > { %v3764_v29 = vsel %vm3761_vm8, %v3731_v9, %v6510_v30  ;;  %v2715_v19 = vsel %vm854_vm0, %v2712_v36, %v2714_v23  ;;  %v3501_v30 = vsel %vm2234_vm4, %v3498_v38, %v3500_v28 }
 0x1a7   : > { %6673 = vrot.lane.b32.xlu2 %v6672_v31, %s6974_s21  ;;  %v3661_v31 = vrot.slane %v9283_v13, 6  ;;  %4016 = vmatmul.f32.gmra.mxu0 %v3764_v29  ;;  %v6677_v51 = vpack.i.bf16 %v3236_v10, %v2715_v19 }
 0x1a9   : > { %v3662_v39 = vsel %vm2461_vm5, %v3659_v25, %v3661_v31  ;;  %v13497_v25 = vrot.slane %v9307_v47, 6 }
 0x1aa   : > { %6369 = vmatmul.msk.f32.gmra.mxu2 %vm3695_vm6, %v3660_v62  ;;  %v9503_v62 = vpop.permute.xlu2 %6538 }
 0x1ab   : > { %6668 = vrot.lane.b32.xlu1 %v6667_v0, %s6975_s22  ;;  %v2879_v0 = vrot.slane %v9381_v14, 2  ;;  %v3664_v10 = vsel %vm2461_vm5, %v3661_v31, %v13497_v25  ;;  %v3242_v31 = vsel %vm1771_vm3, %v3239_v6, %v3241_v57  ;;  %v6516_v6 = vunpack.i.h.bf16 %v9471_v2 }
 0x1ac   : > { %6663 = vrot.lane.b32.xlu0 %v6662_v5, %s6973_s20  ;;  %v2717_v5 = vsel %vm854_vm0, %v2714_v23, %v2716_v20 }
 0x1ad   : > { %v6692_v36 = vpack.i.bf16 %v3238_v8, %v2717_v5  ;;  %v2880_v49 = vsel %vm1081_vm1, %v2877_v42, %v2879_v0  ;;  %v13496_v42 = vrot.slane %v9307_v47, 5  ;;  %v9535_v23 = vsel %vm1081_vm1, %v2879_v0, %v2881_v59 }
 0x1ae   : > { %v6687_v8 = vpack.i.bf16 %v3499_v12, %v2880_v49  ;;  %v6702_v56 = vpack.i.bf16 %v3501_v30, %v9535_v23 }
 0x1af   : > { %6683 = vrot.lane.b32.xlu2 %v6682_v52, %s6975_s22  ;;  %v13499_v52 = vrot.slane %v9279_v24, 2  ;;  %v3503_v57 = vsel %vm2234_vm4, %v3500_v28, %v13496_v42 }
 0x1b1   : > { %v9553_v38 = vsel %vm1081_vm1, %v2881_v59, %v13499_v52 }
 0x1b2   : > { %6370 = vmatmul.msk.f32.gmra.mxu2 %vm3695_vm6, %v3662_v39  ;;  %v9522_v9 = vpop.permute.xlu2 %6548  ;;  %v6697_v39 = vpack.i.bf16 %v3242_v31, %v9463_v55  ;;  %14043 = vst [vmem:[#allocation58_spill] sm:$0xff] %v9553_v38  ;;  %v2718_v55 = vrot.slane %v9381_v14, 1 }
 0x1b3   : > { %6678 = vrot.lane.b32.xlu1 %v6677_v51, %s6973_s20  ;;  %v6515_v51 = vunpack.i.l.bf16 %v9471_v2 }
 0x1b4   : > { %664 = vperm.xlu0 %6464, %v498_v35   ;;  %v14042_v35 = vld [vmem:[#allocation34_spill] sm:$0xff]  ;;  %v2719_v59 = vsel %vm854_vm0, %v2716_v20, %v2718_v55 }
 0x1b5   : > { %v3116_v19 = vrot.slane %v14042_v35, 3  ;;  %v3699_v28 = vsel %vm3695_vm6, %v14035_v26, %v6515_v51  ;;  %v3118_v26 = vrot.slane %v8365_v22, 3 }
 0x1b7   : > { %6693 = vrot.lane.b32.xlu2 %v6692_v36, %s6973_s20  ;;  %v6717_v36 = vpack.i.bf16 %v3503_v57, %v9553_v38  ;;  %v3117_v12 = vsel %vm1544_vm2, %v3114_v17, %v3116_v19  ;;  %v6707_v17 = vpack.i.bf16 %v9487_v18, %v2719_v59  ;;  %v6712_v57 = vpack.i.bf16 %v9356_v16, %v2880_v49 }
 0x1b8   : > { %v2721_v49 = vsel %vm854_vm0, %v2718_v55, %v2720_v34 }
 0x1ba   : > { %6371 = vmatmul.msk.f32.gmra.mxu2 %vm3695_vm6, %v3664_v10 }
 0x1bb   : > { %669 = vperm.xlu1 %6465, %v499_v4   ;;  %v6524_v5 = vpop.permute.xlu1 %6523 }
 0x1bc   : > { %6688 = vrot.lane.b32.xlu0 %v6687_v8, %s6974_s21  ;;  %v6526_v2 = vunpack.i.h.bf16 %v6524_v5  ;;  %v6525_v10 = vunpack.i.l.bf16 %v6524_v5 }
 0x1bd   : > { %v9538_v29 = vpop.permute.xlu2 %6558  ;;  %v6519_v0 = vpop.permute.xlu0 %6518 }
 0x1be   : > { %v6521_v4 = vunpack.i.h.bf16 %v6519_v0  ;;  %v6520_v8 = vunpack.i.l.bf16 %v6519_v0 }
 0x1bf   : > { %674 = vperm.xlu2 %6466, %v500_v1   ;;  %v3797_v1 = vsel %vm3695_vm6, %v3117_v12, %v6516_v6 }
 0x1c0   : > { %v3732_v30 = vsel %vm3728_vm7, %v3699_v28, %v6520_v8  ;;  %v501_v8 = vld [vmem:[%s7065_s18 + $0x108] sm:$0xff] }
 0x1c1   : > { %v3765_v5 = vsel %vm3761_vm8, %v3732_v30, %v6525_v10  ;;  %v6541_v10 = vunpack.i.h.bf16 %v9503_v62  ;;  %v6722_v30 = vpack.i.bf16 %v3242_v31, %v2721_v49 }
 0x1c2   : > { %4019 = vmatmul.f32.gmra.mxu0 %v3765_v5  ;;  %v6551_v5 = vunpack.i.h.bf16 %v9522_v9 }
 0x1c3   : > { %6703 = vrot.lane.b32.xlu1 %v6702_v56, %s6974_s21  ;;  %v3829_v56 = vsel %vm3728_vm7, %v3797_v1, %v6521_v4  ;;  %v6540_v4 = vunpack.i.l.bf16 %v9503_v62  ;;  %v3120_v62 = vrot.slane %v8690_v41, 3 }
 0x1c4   : > { %6698 = vrot.lane.b32.xlu0 %v6697_v39, %s6975_s22  ;;  %v3861_v0 = vsel %vm3761_vm8, %v3829_v56, %v6526_v2  ;;  %v6534_v20 = vpop.permute.xlu1 %6533  ;;  %v3119_v2 = vsel %vm1544_vm2, %v3116_v19, %v3118_v26 }
 0x1c5   : > { %v9567_v39 = vpop.permute.xlu2 %6583  ;;  %4132 = vmatmul.f32.gmra.mxu1 %v3861_v0  ;;  %v6536_v51 = vunpack.i.h.bf16 %v6534_v20  ;;  %v6550_v0 = vunpack.i.l.bf16 %v9522_v9 }
 0x1c6   : > { %v6529_v6 = vpop.permute.xlu0 %6528 }
 0x1c7   : > { %6718 = vrot.lane.b32.xlu2 %v6717_v36, %s6974_s21  ;;  %v6535_v36 = vunpack.i.l.bf16 %v6534_v20  ;;  %v6531_v18 = vunpack.i.h.bf16 %v6529_v6  ;;  %v6530_v12 = vunpack.i.l.bf16 %v6529_v6  ;;  %v3121_v20 = vsel %vm1544_vm2, %v3118_v26, %v3120_v62 }
 0x1c9   : > { %v3700_v28 = vsel %vm3695_vm6, %v14039_v43, %v6530_v12  ;;  %v3798_v1 = vsel %vm3695_vm6, %v3119_v2, %v6531_v18 }
 0x1ca   : > { %v3733_v56 = vsel %vm3728_vm7, %v3700_v28, %v6535_v36  ;;  %v502_v36 = vld [vmem:[%s7065_s18 + $0x110] sm:$0xff]  ;;  %v6560_v28 = vunpack.i.l.bf16 %v9538_v29 }
 0x1cb   : > { %6713 = vrot.lane.b32.xlu1 %v6712_v57, %s6975_s22  ;;  %v3766_v34 = vsel %vm3761_vm8, %v3733_v56, %v6540_v4 }
 0x1cc   : > { %6708 = vrot.lane.b32.xlu0 %v6707_v17, %s6973_s20  ;;  %v3830_v17 = vsel %vm3728_vm7, %v3798_v1, %v6536_v51  ;;  %4022 = vmatmul.f32.gmra.mxu0 %v3766_v34 }
 0x1cd   : > { %v3862_v19 = vsel %vm3761_vm8, %v3830_v17, %v6541_v10  ;;  %v3122_v10 = vrot.slane %v8742_v27, 3 }
 0x1ce   : > { %4135 = vmatmul.f32.gmra.mxu1 %v3862_v19 }
 0x1cf   : > { %v6544_v43 = vpop.permute.xlu1 %6543 }
 0x1d0   : > { %v9586_v59 = vpop.permute.xlu2 %6593  ;;  %v6554_v55 = vpop.permute.xlu0 %6553  ;;  %v6546_v57 = vunpack.i.h.bf16 %v6544_v43  ;;  %v6545_v31 = vunpack.i.l.bf16 %v6544_v43  ;;  %v3702_v43 = vsel %vm3695_vm6, %v14042_v35, %v6560_v28 }
 0x1d1   : > { %v6556_v6 = vunpack.i.h.bf16 %v6554_v55  ;;  %v6555_v51 = vunpack.i.l.bf16 %v6554_v55 }
 0x1d2   : > { %v3701_v18 = vsel %vm3695_vm6, %v14041_v53, %v6545_v31  ;;  %v3799_v12 = vsel %vm3695_vm6, %v3121_v20, %v6546_v57 }
 0x1d3   : > { %6723 = vrot.lane.b32.xlu1 %v6722_v30, %s6973_s20  ;;  %v3734_v49 = vsel %vm3728_vm7, %v3701_v18, %v6550_v0  ;;  %v3831_v2 = vsel %vm3728_vm7, %v3799_v12, %v6551_v5  ;;  %v3123_v30 = vsel %vm1544_vm2, %v3120_v62, %v3122_v10  ;;  %v3124_v0 = vrot.slane %v8764_v33, 3 }
 0x1d4   : > { %679 = vperm.xlu0 %6464, %v501_v8   ;;  %v3767_v9 = vsel %vm3761_vm8, %v3734_v49, %v6555_v51  ;;  %v3863_v26 = vsel %vm3761_vm8, %v3831_v2, %v6556_v6  ;;  %v6561_v8 = vunpack.i.h.bf16 %v9538_v29  ;;  %v6586_v49 = vunpack.i.h.bf16 %v9567_v39 }
 0x1d5   : > { %4025 = vmatmul.f32.gmra.mxu0 %v3767_v9  ;;  %v3125_v12 = vsel %vm1544_vm2, %v3122_v10, %v3124_v0  ;;  %v6585_v2 = vunpack.i.l.bf16 %v9567_v39  ;;  %v14044_v10 = vld [vmem:[#allocation5_spill] sm:$0xff] }
 0x1d6   : > { %4138 = vmatmul.f32.gmra.mxu1 %v3863_v26  ;;  %v3800_v55 = vsel %vm3695_vm6, %v3123_v30, %v6561_v8  ;;  %v3126_v30 = vrot.slane %v8879_v58, 3  ;;  %v9634_v39 = vmul.f32 %v14044_v10, %v13987_v21 }
 0x1d8   : > { %v6569_v53 = vpop.permute.xlu1 %6568 }
 0x1d9   : > { %v9604_v4 = vpop.permute.xlu2 %6603  ;;  %v6564_v1 = vpop.permute.xlu0 %6563  ;;  %v6571_v56 = vunpack.i.h.bf16 %v6569_v53  ;;  %v6570_v17 = vunpack.i.l.bf16 %v6569_v53 }
 0x1da   : > { %v6566_v34 = vunpack.i.h.bf16 %v6564_v1  ;;  %v6565_v19 = vunpack.i.l.bf16 %v6564_v1 }
 0x1db   : > { %684 = vperm.xlu1 %6465, %v502_v36  }
 0x1dc   : > { %v3735_v57 = vsel %vm3728_vm7, %v3702_v43, %v6565_v19  ;;  %v3832_v29 = vsel %vm3728_vm7, %v3800_v55, %v6566_v34  ;;  %v6596_v43 = vunpack.i.h.bf16 %v9586_v59  ;;  %v6595_v55 = vunpack.i.l.bf16 %v9586_v59 }
 0x1dd   : > { %v3768_v31 = vsel %vm3761_vm8, %v3735_v57, %v6570_v17  ;;  %v3864_v5 = vsel %vm3761_vm8, %v3832_v29, %v6571_v56  ;;  %v3127_v57 = vsel %vm1544_vm2, %v3124_v0, %v3126_v30  ;;  %v14045_v0 = vld [vmem:[#allocation6_spill] sm:$0xff] }
 0x1de   : > { %4028 = vmatmul.f32.gmra.mxu0 %v3768_v31  ;;  %4141 = vmatmul.f32.gmra.mxu1 %v3864_v5 }
 0x1e1   : > { %v9619_v62 = vpop.permute.xlu2 %6628 }
 0x1e2   : > { %v6579_v20 = vpop.permute.xlu1 %6578 }
 0x1e3   : > { %v6581_v51 = vunpack.i.h.bf16 %v6579_v20  ;;  %v6580_v35 = vunpack.i.l.bf16 %v6579_v20 }
 0x1e5   : > { %v6574_v6 = vpop.permute.xlu0 %6573 }
 0x1e6   : > { %v6576_v36 = vunpack.i.h.bf16 %v6574_v6  ;;  %v6575_v18 = vunpack.i.l.bf16 %v6574_v6  ;;  %v902_v6 = vrot.slane %v9634_v39, 1 }
 0x1e8   : > { %v3703_v9 = vsel %vm3695_vm6, %v8365_v22, %v6575_v18  ;;  %v3801_v26 = vsel %vm3695_vm6, %v3125_v12, %v6576_v36  ;;  %v3128_v36 = vrot.slane %v8914_v46, 3  ;;  %v9652_v12 = vmul.f32 %v14045_v0, %v13987_v21 }
 0x1e9   : > { %v3736_v8 = vsel %vm3728_vm7, %v3703_v9, %v6580_v35  ;;  %v3833_v28 = vsel %vm3728_vm7, %v3801_v26, %v6581_v51  ;;  %v9636_v17 = vpop.permute.xlu2 %6638  ;;  %v14047_v9 = vld [vmem:[#allocation7_spill] sm:$0xff] }
 0x1ea   : > { %v3769_v53 = vsel %vm3761_vm8, %v3736_v8, %v6585_v2  ;;  %v3865_v1 = vsel %vm3761_vm8, %v3833_v28, %v6586_v49  ;;  %v6605_v49 = vunpack.i.l.bf16 %v9604_v4  ;;  %v14046_v2 = vld [vmem:[#allocation15_spill] sm:$0xff]  ;;  %v14048_v8 = vld [vmem:[#allocation30_spill] sm:$0xff] }
 0x1eb   : > { %4031 = vmatmul.f32.gmra.mxu0 %v3769_v53  ;;  %4144 = vmatmul.f32.gmra.mxu1 %v3865_v1  ;;  %v721_v26 = vmul.f32 %v14047_v9, %v14046_v2  ;;  %v9660_v28 = vmul.f32 %v14044_v10, %v14048_v8  ;;  %v9664_v53 = vmul.f32 %v14045_v0, %v14048_v8  ;;  %v14049_v1 = vld [vmem:[#allocation27_spill] sm:$0xff] }
 0x1ec   : > { %v6589_v56 = vpop.permute.xlu1 %6588  ;;  %v14050_v39 = vrot.slane %v14049_v1, 1  ;;  %v14052_v1 = vld [vmem:[#allocation10_spill] sm:$0xff] }
 0x1ed   : > { %v6599_v22 = vpop.permute.xlu0 %6598  ;;  %v6591_v34 = vunpack.i.h.bf16 %v6589_v56  ;;  %v6590_v19 = vunpack.i.l.bf16 %v6589_v56 }
 0x1ee   : > { %v6601_v29 = vunpack.i.h.bf16 %v6599_v22  ;;  %v6600_v31 = vunpack.i.l.bf16 %v6599_v22  ;;  %v903_v56 = vsel %vm854_vm0, %v14050_v39, %v902_v6  ;;  %v9686_v39 = vmul.f32 %v14052_v1, %v14048_v8 }
 0x1ef   : > { %v3704_v5 = vsel %vm3695_vm6, %v8690_v41, %v6590_v19  ;;  %v3802_v20 = vsel %vm3695_vm6, %v3127_v57, %v6591_v34  ;;  %v6606_v41 = vunpack.i.h.bf16 %v9604_v4  ;;  %v3129_v4 = vsel %vm1544_vm2, %v3126_v30, %v3128_v36 }
 0x1f0   : > { %v3737_v51 = vsel %vm3728_vm7, %v3704_v5, %v6595_v55  ;;  %v3834_v35 = vsel %vm3728_vm7, %v3802_v20, %v6596_v43  ;;  %v3705_v5 = vsel %vm3695_vm6, %v8742_v27, %v6605_v49 }
 0x1f1   : > { %v3770_v18 = vsel %vm3761_vm8, %v3737_v51, %v6600_v31  ;;  %v3866_v59 = vsel %vm3761_vm8, %v3834_v35, %v6601_v29  ;;  %v803_v29 = vmul.f32 %v14044_v10, %v13994_v40  ;;  %v13500_v31 = vrot.slane %v9652_v12, 2  ;;  %v14051_v51 = vld [vmem:[#allocation9_spill] sm:$0xff]  ;;  %v9680_v30 = vpop.permute.xlu2 %6648 }
 0x1f2   : > { %v3803_v20 = vsel %vm3695_vm6, %v3129_v4, %v6606_v41  ;;  %v9678_v35 = vmul.f32 %v14051_v51, %v14048_v8 }
 0x1f3   : > { %4034 = vmatmul.f32.gmra.mxu0 %v3770_v18  ;;  %4147 = vmatmul.f32.gmra.mxu1 %v3866_v59  ;;  %v990_v18 = vadd.f32 %v903_v56, %v721_v26  ;;  %v1030_v26 = vmul.f32 %v14045_v0, %v13994_v40  ;;  %v904_v56 = vrot.slane %v803_v29, 1 }
 0x1f4   : > { %v13507_v29 = vrot.slane %v9678_v35, 2 }
 0x1f5   : > { %v6614_v22 = vpop.permute.xlu1 %6613 }
 0x1f6   : > { %v6609_v34 = vpop.permute.xlu0 %6608  ;;  %v6616_v19 = vunpack.i.h.bf16 %v6614_v22  ;;  %v6615_v43 = vunpack.i.l.bf16 %v6614_v22  ;;  %v14053_v22 = vld [vmem:[#allocation8_spill] sm:$0xff] }
 0x1f7   : > { %v6611_v55 = vunpack.i.h.bf16 %v6609_v34  ;;  %v6610_v57 = vunpack.i.l.bf16 %v6609_v34  ;;  %v9690_v27 = vmul.f32 %v14053_v22, %v14048_v8  ;;  %v14054_v34 = vld [vmem:[#allocation55_spill] sm:$0xff] }
 0x1f8   : > { %v14055_v4 = vrot.slane %v14054_v34, 2  ;;  %v723_v34 = vmul.f32 %v14047_v9, %v13994_v40  ;;  %v905_v40 = vsel %vm854_vm0, %v902_v6, %v904_v56 }
 0x1f9   : > { %v3738_v59 = vsel %vm3728_vm7, %v3705_v5, %v6610_v57  ;;  %v3835_v2 = vsel %vm3728_vm7, %v3803_v20, %v6611_v55  ;;  %v3130_v57 = vrot.slane %v8972_v45, 3  ;;  %v9704_v5 = vmul.f32 %v14047_v9, %v14048_v8 }
 0x1fa   : > { %v3771_v41 = vsel %vm3761_vm8, %v3738_v59, %v6615_v43  ;;  %v3867_v49 = vsel %vm3761_vm8, %v3835_v2, %v6616_v19  ;;  %v1130_v55 = vsel %vm1081_vm1, %v14055_v4, %v13500_v31  ;;  %v13501_v43 = vrot.slane %v9660_v28, 1 }
 0x1fb   : > { %v13506_v19 = vrot.slane %v9664_v53, 2  ;;  %v1217_v20 = vadd.f32 %v1130_v55, %v990_v18  ;;  %4037 = vmatmul.f32.gmra.mxu0 %v3771_v41  ;;  %4150 = vmatmul.f32.gmra.mxu1 %v3867_v49  ;;  %v13502_v59 = vrot.slane %v9686_v39, 3  ;;  %v1131_v8 = vrot.slane %v1030_v26, 2  ;;  %v14056_v41 = vld [vmem:[#allocation68_spill] sm:$0xff] }
 0x1fc   : > { %v907_v18 = vsel %vm854_vm0, %v904_v56, %v13501_v43  ;;  %v14057_v49 = vrot.slane %v14056_v41, 2  ;;  %v3131_v52 = vsel %vm1544_vm2, %v3128_v36, %v3130_v57  ;;  %v6631_v26 = vunpack.i.h.bf16 %v9619_v62  ;;  %v14058_v36 = vld [vmem:[#allocation37_spill] sm:$0xff] }
 0x1fd   : > { %v6624_v4 = vpop.permute.xlu1 %6623  ;;  %v722_v2 = vmul.f32 %v14047_v9, %v13987_v21  ;;  %v6630_v43 = vunpack.i.l.bf16 %v9619_v62  ;;  %v14059_v6 = vrot.slane %v14058_v36, 3  ;;  %v14063_v36 = vrot.slane %v9652_v12, 2 }
 0x1fe   : > { %v6619_v48 = vpop.permute.xlu0 %6618  ;;  %v6626_v32 = vunpack.i.h.bf16 %v6624_v4  ;;  %v6625_v42 = vunpack.i.l.bf16 %v6624_v4  ;;  %v1366_v55 = vsel %vm1081_vm1, %v14057_v49, %v13507_v29 }
 0x1ff   : > { %v6621_v25 = vunpack.i.h.bf16 %v6619_v48  ;;  %v6620_v50 = vunpack.i.l.bf16 %v6619_v48  ;;  %v1453_v31 = vadd.f32 %v1366_v55, %v1217_v20  ;;  %v992_v48 = vadd.f32 %v907_v18, %v723_v34  ;;  %v9736_v20 = vpop.permute.xlu2 %659 }
 0x200   : > { %v1593_v56 = vsel %vm1544_vm2, %v14059_v6, %v13502_v59  ;;  %v3136_v18 = vrot.slane %v9246_v11, 3  ;;  %v14060_v55 = vrot.slane %v9690_v27, 4  ;;  %v1132_v6 = vsel %vm1081_vm1, %v14063_v36, %v1131_v8 }
 0x201   : > { %v3804_v4 = vsel %vm3695_vm6, %v3131_v52, %v6621_v25  ;;  %v3706_v41 = vsel %vm3695_vm6, %v8764_v33, %v6620_v50  ;;  %v991_v52 = vadd.f32 %v905_v40, %v722_v2  ;;  %v3132_v33 = vrot.slane %v9115_v61, 3  ;;  %v14061_v2 = vld [vmem:[#allocation71_spill] sm:$0xff] }
 0x202   : > { %v3836_v49 = vsel %vm3728_vm7, %v3804_v4, %v6626_v32  ;;  %v3739_v25 = vsel %vm3728_vm7, %v3706_v41, %v6625_v42  ;;  %v3134_v50 = vrot.slane %v9162_v3, 3  ;;  %v1134_v32 = vsel %vm1081_vm1, %v1131_v8, %v13506_v19 }
 0x203   : > { %v3868_v21 = vsel %vm3761_vm8, %v3836_v49, %v6631_v26  ;;  %v3772_v62 = vsel %vm3761_vm8, %v3739_v25, %v6630_v43  ;;  %v1680_v34 = vadd.f32 %v1593_v56, %v1453_v31  ;;  %v3138_v42 = vrot.slane %v9381_v14, 3 }
 0x204   : > { %4040 = vmatmul.f32.gmra.mxu0 %v3772_v62  ;;  %4153 = vmatmul.f32.gmra.mxu1 %v3868_v21  ;;  %v14062_v40 = vrot.slane %v14061_v2, 4  ;;  %v2885_v41 = vrot.slane %v9283_v13, 2  ;;  %v2724_v49 = vrot.slane %v9283_v13, 1  ;;  %v3140_v31 = vrot.slane %v9297_v15, 3 }
 0x205   : > { %v9753_v26 = vpop.permute.xlu1 %6633  ;;  %v13503_v56 = vrot.slane %v9307_v47, 2  ;;  %v13505_v25 = vrot.slane %v9307_v47, 1  ;;  %v13504_v21 = vrot.slane %v9279_v24, 3  ;;  %v9766_v62 = vadd.f32 %v1134_v32, %v992_v48 }
 0x206   : > { %v1820_v43 = vsel %vm1771_vm3, %v14062_v40, %v14060_v55  ;;  %v9755_v4 = vpop.permute.xlu0 %649  ;;  %v1218_v55 = vadd.f32 %v1132_v6, %v991_v52  ;;  %v9769_v2 = vsel %vm1544_vm2, %v3130_v57, %v3132_v33  ;;  %v9772_v40 = vsel %vm1544_vm2, %v3132_v33, %v3134_v50 }
 0x207   : > { %v9776_v12 = vmul.f32 %v7133_v44, %v9755_v4  ;;  %v9778_v8 = vadd.f32 %v1820_v43, %v1680_v34  ;;  %v9781_v36 = vsel %vm1544_vm2, %v3134_v50, %v3136_v18  ;;  %v9784_v59 = vsel %vm1544_vm2, %v3136_v18, %v3138_v42 }
 0x208   : > { %14064 = vst [vmem:[#allocation29_spill] sm:$0xff] %v9784_v59  ;;  %v9788_v48 = vmul.f32 %v14051_v51, %v9755_v4  ;;  %v14065_v57 = vrot.slane %v9279_v24, 2  ;;  %v14066_v33 = vrot.slane %v9279_v24, 1  ;;  %v9801_v50 = vsel %vm1544_vm2, %v3138_v42, %v3140_v31 }
 0x209   : > { %14068 = vst [vmem:[#allocation63_spill] sm:$0xff] %v9801_v50  ;;  %v9807_v18 = vsel %vm1081_vm1, %v2885_v41, %v13503_v56  ;;  %v9812_v43 = vsel %vm854_vm0, %v2724_v49, %v13505_v25  ;;  %v9817_v6 = vsel %vm1544_vm2, %v3140_v31, %v13504_v21  ;;  %v9833_v31 = vmul.f32 %v14044_v10, %v9736_v20  ;;  %v9835_v21 = vpop.permute.xlu2 %6673 }
 0x20a   : > { %v9793_v52 = vsel %vm1081_vm1, %v14065_v57, %v2885_v41  ;;  %v9798_v32 = vsel %vm854_vm0, %v14066_v33, %v2724_v49  ;;  %14069 = vst [vmem:[#allocation28_spill] sm:$0xff] %v9812_v43  ;;  %v9824_v41 = vmul.f32 %v14044_v10, %v9755_v4  ;;  %v9829_v49 = vmul.f32 %v14047_v9, %v9736_v20 }
 0x20b   : > { %14067 = vst [vmem:[#allocation44_spill] sm:$0xff] %v9798_v32  ;;  %v9839_v25 = vmul.f32 %v7162_v54, %v9755_v4  ;;  %v9843_v33 = vmul.f32 %v14045_v0, %v9736_v20  ;;  %v9847_v56 = vmul.f32 %v14051_v51, %v9736_v20  ;;  %v9851_v42 = vmul.f32 %v14052_v1, %v9736_v20  ;;  %v14080_v32 = vld [vmem:[#allocation41_spill] sm:$0xff] }
 0x20c   : > { %14070 = vst [vmem:[#allocation45_spill] sm:$0xff] %v9817_v6  ;;  %v9860_v34 = vmul.f32 %v14053_v22, %v9736_v20  ;;  %v9864_v15 = vmul.f32 %v7133_v44, %v9736_v20  ;;  %v9868_v14 = vmul.f32 %v7162_v54, %v9736_v20  ;;  %v14075_v24 = vrot.slane %v9776_v12, 4 }
 0x20d   : > { %14071 = vst [vmem:[#allocation39_spill] sm:$0xff] %v9829_v49  ;;  %v9854_v19 = vpop.permute.xlu1 %654  ;;  %v14076_v57 = vrot.slane %v14011_v63, 4  ;;  %v9878_v6 = vmul.f32 %v14045_v0, %v9755_v4  ;;  %v9882_v11 = vmul.f32 %v14052_v1, %v9755_v4  ;;  %v9886_v50 = vmul.f32 %v14053_v22, %v9755_v4 }
 0x20e   : > { %14072 = vst [vmem:[#allocation59_spill] sm:$0xff] %v9833_v31  ;;  %v9856_v29 = vpop.permute.xlu0 %6643  ;;  %v2280_v63 = vrot.slane %v9839_v25, 5  ;;  %v9901_v49 = vmul.f32 %v7133_v44, %v9854_v19  ;;  %v14078_v25 = vrot.slane %v9788_v48, 2  ;;  %v14079_v61 = vrot.slane %v9678_v35, 2 }
 0x20f   : > { %14073 = vst [vmem:[#allocation67_spill] sm:$0xff] %v9843_v33  ;;  %v2054_v13 = vsel %vm1771_vm3, %v14076_v57, %v14075_v24  ;;  %v9893_v24 = vld [vmem:[%s13297_s1 + $0x8] ss:$0 sm:$0xff]  ;;  %v14081_v33 = vrot.slane %v9824_v41, 1  ;;  %v13525_v35 = vrot.slane %v9878_v6, 2  ;;  %v14086_v44 = vrot.slane %v9686_v39, 3 }
 0x210   : > { %14074 = vst [vmem:[#allocation49_spill] sm:$0xff] %v9860_v34  ;;  %v9897_v57 = vmul.f32 %v9893_v24, %v9755_v4  ;;  %v9906_v3 = vmul.f32 %v9893_v24, %v9736_v20  ;;  %v1368_v43 = vsel %vm1081_vm1, %v14079_v61, %v14078_v25  ;;  %v2142_v37 = vadd.f32 %v2054_v13, %v14080_v32 }
 0x211   : > { %14077 = vst [vmem:[#allocation43_spill] sm:$0xff] %v9893_v24  ;;  %v14082_v20 = vrot.slane %v9660_v28, 1  ;;  %v13526_v13 = vrot.slane %v9886_v50, 4  ;;  %v1454_v32 = vadd.f32 %v1368_v43, %v1218_v55  ;;  %v14083_v25 = vrot.slane %v14016_v60, 5  ;;  %v9958_v16 = vpop.permute.xlu2 %6683 }
 0x212   : > { %v2055_v59 = vrot.slane %v9901_v49, 4  ;;  %v6636_v60 = vunpack.i.h.bf16 %v9753_v26  ;;  %v6635_v43 = vunpack.i.l.bf16 %v9753_v26  ;;  %v14085_v28 = vrot.slane %v9882_v11, 3 }
 0x213   : > { %v909_v38 = vsel %vm854_vm0, %v14082_v20, %v14081_v33  ;;  %v2281_v34 = vsel %vm2234_vm4, %v14083_v25, %v2280_v63  ;;  %v806_v20 = vmul.f32 %v14044_v10, %v9854_v19  ;;  %v725_v25 = vmul.f32 %v14047_v9, %v9755_v4 }
 0x214   : > { %v2369_v33 = vadd.f32 %v2281_v34, %v2142_v37  ;;  %v993_v49 = vadd.f32 %v909_v38, %v9704_v5  ;;  %v14084_v37 = vrot.slane %v9664_v53, 2  ;;  %v1595_v55 = vsel %vm1544_vm2, %v14086_v44, %v14085_v28 }
 0x215   : > { %v9935_v61 = vpop.permute.xlu1 %6658  ;;  %v14087_v26 = vrot.slane %v9690_v27, 4  ;;  %v1681_v5 = vadd.f32 %v1595_v55, %v1454_v32  ;;  %v14088_v53 = vrot.slane %v9897_v57, 6  ;;  %v14090_v39 = vrot.slane %v9776_v12, 4 }
 0x216   : > { %v1136_v34 = vsel %vm1081_vm1, %v14084_v37, %v13525_v35  ;;  %v9960_v38 = vpop.permute.xlu0 %6653  ;;  %v14089_v37 = vrot.slane %v14023_v7, 6  ;;  %v9972_v27 = vmul.f32 %v7162_v54, %v9854_v19  ;;  %v6645_v32 = vunpack.i.l.bf16 %v9856_v29 }
 0x217   : > { %v1822_v4 = vsel %vm1771_vm3, %v14087_v26, %v13526_v13  ;;  %v2056_v44 = vsel %vm1771_vm3, %v14090_v39, %v2055_v59  ;;  %v910_v26 = vrot.slane %v806_v20, 1  ;;  %v6646_v13 = vunpack.i.h.bf16 %v9856_v29 }
 0x218   : > { %v2508_v35 = vsel %vm2461_vm5, %v14089_v37, %v14088_v53  ;;  %v9979_v7 = vmul.f32 %v9893_v24, %v9854_v19  ;;  %v3707_v12 = vsel %vm3695_vm6, %v8879_v58, %v6635_v43  ;;  %v3805_v53 = vsel %vm3695_vm6, %v9769_v2, %v6636_v60 }
 0x219   : > { %v2596_v28 = vadd.f32 %v2508_v35, %v2369_v33  ;;  %v9987_v35 = vmul.f32 %v14045_v0, %v9854_v19  ;;  %v1268_v33 = vmul.f32 %v14051_v51, %v9854_v19  ;;  %v9993_v29 = vmul.f32 %v14052_v1, %v9854_v19 }
 0x21a   : > { %v2143_v20 = vadd.f32 %v2056_v44, %v9778_v8  ;;  %v1220_v37 = vadd.f32 %v1136_v34, %v993_v49  ;;  %v726_v58 = vmul.f32 %v14047_v9, %v9854_v19  ;;  %v14091_v43 = vunpack.i.l.bf16 %v9636_v17 }
 0x21b   : > { %v14092_v60 = vunpack.i.h.bf16 %v9636_v17  ;;  %v1908_v55 = vadd.f32 %v1822_v4, %v1681_v5  ;;  %v10006_v24 = vmul.f32 %v14053_v22, %v9854_v19  ;;  %v14093_v34 = vrot.slane %v9824_v41, 1  ;;  %v10022_v19 = vld [vmem:[%s13298_s2] ss:$0 sm:$0xff] }
 0x21c   : > { %v3740_v2 = vsel %vm3728_vm7, %v3707_v12, %v14091_v43  ;;  %v14094_v12 = vrot.slane %v9972_v27, 5  ;;  %v13531_v4 = vrot.slane %v9979_v7, 6  ;;  %v1369_v5 = vrot.slane %v1268_v33, 2  ;;  %v10040_v33 = vpop.permute.xlu2 %6693 }
 0x21d   : > { %v3837_v39 = vsel %vm3728_vm7, %v3805_v53, %v14092_v60  ;;  %v3773_v1 = vsel %vm3761_vm8, %v3740_v2, %v6645_v32  ;;  %v10010_v49 = vpop.permute.xlu1 %6668  ;;  %v911_v44 = vsel %vm854_vm0, %v14093_v34, %v910_v26  ;;  %v1596_v32 = vrot.slane %v9993_v29, 3 }
 0x21e   : > { %v3869_v8 = vsel %vm3761_vm8, %v3837_v39, %v6646_v13  ;;  %v2283_v17 = vsel %vm2234_vm4, %v2280_v63, %v14094_v12  ;;  %4043 = vmatmul.f32.gmra.mxu0 %v3773_v1  ;;  %v10025_v13 = vadd.f32 %v10022_v19, %v2596_v28  ;;  %v14095_v63 = vrot.slane %v9833_v31, 1  ;;  %v6664_v34 = vpop.permute.xlu0 %6663 }
 0x21f   : > { %4156 = vmatmul.f32.gmra.mxu1 %v3869_v8  ;;  %v2370_v53 = vadd.f32 %v2283_v17, %v2143_v20  ;;  %v10035_v39 = vadd.f32 %v911_v44, %v725_v25  ;;  %v14096_v28 = vrot.slane %v9864_v15, 4  ;;  %v6660_v29 = vunpack.i.l.bf16 %v9935_v61 }
 0x220   : > { %v913_v43 = vsel %vm854_vm0, %v910_v26, %v14095_v63  ;;  %v3665_v1 = vrot.slane %v10025_v13, 6  ;;  %v3504_v2 = vrot.slane %v10025_v13, 5  ;;  %v3245_v60 = vrot.slane %v10025_v13, 4 }
 0x221   : > { %v2058_v8 = vsel %vm1771_vm3, %v2055_v59, %v14096_v28  ;;  %v6655_v20 = vunpack.i.l.bf16 %v9960_v38  ;;  %v14097_v26 = vrot.slane %v9897_v57, 6  ;;  %v14098_v25 = vrot.slane %v9307_v47, 6 }
 0x222   : > { %v14099_v17 = vrot.slane %v9307_v47, 5  ;;  %v14100_v63 = vrot.slane %v9307_v47, 4  ;;  %v6656_v31 = vunpack.i.h.bf16 %v9960_v38  ;;  %v6661_v47 = vunpack.i.h.bf16 %v9935_v61 }
 0x223   : > { %v2510_v12 = vsel %vm2461_vm5, %v14097_v26, %v13531_v4  ;;  %v3666_v44 = vsel %vm2461_vm5, %v14098_v25, %v3665_v1  ;;  %v995_v25 = vadd.f32 %v913_v43, %v726_v58  ;;  %v14101_v4 = vrot.slane %v9788_v48, 2 }
 0x224   : > { %v3505_v59 = vsel %vm2234_vm4, %v14099_v17, %v3504_v2  ;;  %v10058_v28 = vsel %vm1771_vm3, %v14100_v63, %v3245_v60  ;;  %v2597_v41 = vadd.f32 %v2510_v12, %v2370_v53  ;;  %6372 = vmatmul.msk.f32.gmra.mxu2 %vm3695_vm6, %v3666_v44  ;;  %v14102_v63 = vunpack.i.l.bf16 %v9680_v30 }
 0x225   : > { %v6732_v57 = vpack.i.bf16 %v3505_v59, %v9793_v52  ;;  %v6727_v26 = vpack.i.bf16 %v10058_v28, %v9535_v23  ;;  %v1370_v17 = vsel %vm1081_vm1, %v14101_v4, %v1369_v5  ;;  %v14103_v38 = vrot.slane %v9847_v56, 2 }
 0x226   : > { %v3708_v53 = vsel %vm3695_vm6, %v8914_v46, %v14102_v63  ;;  %v14104_v44 = vrot.slane %v9882_v11, 3  ;;  %v1823_v58 = vrot.slane %v10006_v24, 4  ;;  %v2144_v61 = vadd.f32 %v2058_v8, %v1908_v55 }
 0x227   : > { %v1372_v12 = vsel %vm1081_vm1, %v1369_v5, %v14103_v38  ;;  %6733 = vrot.lane.b32.xlu0 %v6732_v57, %s6974_s21  ;;  %6728 = vrot.lane.b32.xlu2 %v6727_v26, %s6975_s22  ;;  %v3741_v48 = vsel %vm3728_vm7, %v3708_v53, %v6655_v20  ;;  %v14105_v46 = vunpack.i.h.bf16 %v9680_v30  ;;  %v6670_v11 = vunpack.i.l.bf16 %v10010_v49  ;;  %v10093_v26 = vpop.permute.xlu1 %6678  ;;  %v10114_v38 = vpop.permute.xlu2 %674 }
 0x228   : > { %v1597_v23 = vsel %vm1544_vm2, %v14104_v44, %v1596_v32  ;;  %v3774_v4 = vsel %vm3761_vm8, %v3741_v48, %v6660_v29  ;;  %v6666_v24 = vunpack.i.h.bf16 %v6664_v34  ;;  %v6665_v59 = vunpack.i.l.bf16 %v6664_v34  ;;  %v14109_v44 = vld [vmem:[#allocation58_spill] sm:$0xff] }
 0x229   : > { %v3806_v5 = vsel %vm3695_vm6, %v9772_v40, %v14105_v46  ;;  %4046 = vmatmul.f32.gmra.mxu0 %v3774_v4  ;;  %v10091_v57 = vadd.f32 %v10022_v19, %v2597_v41  ;;  %v1455_v55 = vadd.f32 %v1370_v17, %v9766_v62  ;;  %v1456_v8 = vadd.f32 %v1372_v12, %v1220_v37  ;;  %v10127_v12 = vpop.permute.xlu0 %664  ;;  %v14111_v4 = vld [vmem:[#allocation49_spill] sm:$0xff] }
 0x22a   : > { %v3838_v43 = vsel %vm3728_vm7, %v3806_v5, %v6656_v31  ;;  %v6671_v29 = vunpack.i.h.bf16 %v10010_v49  ;;  %v3709_v41 = vsel %vm3695_vm6, %v8972_v45, %v6665_v59  ;;  %v14106_v34 = vrot.slane %v9851_v42, 3  ;;  %v14114_v59 = vld [vmem:[#allocation17_spill] sm:$0xff] }
 0x22b   : > { %v3870_v30 = vsel %vm3761_vm8, %v3838_v43, %v6661_v47  ;;  %v3667_v40 = vrot.slane %v10091_v57, 6  ;;  %v13537_v20 = vrot.slane %v10091_v57, 5  ;;  %v3247_v31 = vrot.slane %v10091_v57, 4 }
 0x22c   : > { %4159 = vmatmul.f32.gmra.mxu1 %v3870_v30  ;;  %v1599_v63 = vsel %vm1544_vm2, %v1596_v32, %v14106_v34  ;;  %v14107_v62 = vrot.slane %v9868_v14, 5  ;;  %v14108_v47 = vrot.slane %v9972_v27, 5  ;;  %v3742_v49 = vsel %vm3728_vm7, %v3709_v41, %v6670_v11  ;;  %v14115_v30 = vld [vmem:[#allocation31_spill] sm:$0xff] }
 0x22d   : > { %v3807_v17 = vsel %vm3695_vm6, %v9781_v36, %v6666_v24  ;;  %v3668_v45 = vsel %vm2461_vm5, %v3665_v1, %v3667_v40  ;;  %v3507_v32 = vsel %vm2234_vm4, %v3504_v2, %v13537_v20  ;;  %v10125_v27 = vsel %vm1771_vm3, %v3245_v60, %v3247_v31  ;;  %v14130_v34 = vld [vmem:[#allocation43_spill] sm:$0xff] }
 0x22e   : > { %v2285_v37 = vsel %vm2234_vm4, %v14108_v47, %v14107_v62  ;;  %6373 = vmatmul.msk.f32.gmra.mxu2 %vm3695_vm6, %v3668_v45  ;;  %v6747_v36 = vpack.i.bf16 %v3507_v32, %v9807_v18  ;;  %v6742_v48 = vpack.i.bf16 %v10125_v27, %v14109_v44  ;;  %v14110_v1 = vunpack.i.l.bf16 %v9835_v21 }
 0x22f   : > { %v2371_v53 = vadd.f32 %v2285_v37, %v2144_v61  ;;  %v3839_v2 = vsel %vm3728_vm7, %v3807_v17, %v6671_v29  ;;  %v1825_v46 = vrot.slane %v14111_v4, 4  ;;  %v1682_v5 = vadd.f32 %v1597_v23, %v1455_v55  ;;  %v14122_v37 = vld [vmem:[#allocation67_spill] sm:$0xff] }
 0x230   : > { %v3775_v61 = vsel %vm3761_vm8, %v3742_v49, %v14110_v1  ;;  %v1683_v60 = vadd.f32 %v1599_v63, %v1456_v8  ;;  %v14112_v11 = vrot.slane %v9906_v3, 6  ;;  %v14113_v43 = vrot.slane %v9979_v7, 6  ;;  %6748 = vrot.lane.b32.xlu1 %v6747_v36, %s6974_s21  ;;  %6743 = vrot.lane.b32.xlu0 %v6742_v48, %s6975_s22 }
 0x231   : > { %v14116_v41 = vpack.i.bf16 %v14114_v59, %v14115_v30  ;;  %v10150_v29 = vmul.f32 %v14044_v10, %v10114_v38  ;;  %v10154_v23 = vmul.f32 %v14045_v0, %v10114_v38  ;;  %v14119_v7 = vunpack.i.h.bf16 %v9835_v21  ;;  %4049 = vmatmul.f32.gmra.mxu0 %v3775_v61  ;;  %v10193_v61 = vpop.permute.xlu1 %669 }
 0x232   : > { %v2512_v24 = vsel %vm2461_vm5, %v14113_v43, %v14112_v11  ;;  %v14120_v63 = vrot.slane %v9987_v35, 2  ;;  %v14121_v62 = vrot.slane %v9878_v6, 2  ;;  %v14123_v49 = vrot.slane %v14122_v37, 2 }
 0x233   : > { %6738 = vrot.lane.b32.xlu2 %v14116_v41, %s6973_s20  ;;  %14117 = vst [vmem:[#allocation46_spill] sm:$0xff] %v10150_v29  ;;  %v3871_v55 = vsel %vm3761_vm8, %v3839_v2, %v14119_v7  ;;  %v2598_v32 = vadd.f32 %v2512_v24, %v2371_v53  ;;  %v14125_v44 = vrot.slane %v9886_v50, 4  ;;  %v1826_v48 = vsel %vm1771_vm3, %v1823_v58, %v1825_v46  ;;  %v14127_v41 = vld [vmem:[#allocation10_spill] sm:$0xff] }
 0x234   : > { %14118 = vst [vmem:[#allocation26_spill] sm:$0xff] %v10154_v23  ;;  %v1138_v47 = vsel %vm1081_vm1, %v14121_v62, %v14120_v63  ;;  %v14124_v17 = vmov %v14120_v63  ;;  %v10183_v35 = vadd.f32 %v1826_v48, %v1683_v60  ;;  %4162 = vmatmul.f32.gmra.mxu1 %v3871_v55  ;;  %v10187_v53 = vmul.f32 %v14044_v10, %v10127_v12  ;;  %v503_v60 = vld [vmem:[%s7065_s18 + $0x118] sm:$0xff]  ;;  %v14128_v55 = vld [vmem:[#allocation44_spill] sm:$0xff] }
 0x235   : > { %v1140_v45 = vsel %vm1081_vm1, %v14124_v17, %v14123_v49  ;;  %v10173_v21 = vadd.f32 %v1138_v47, %v10035_v39  ;;  %v1824_v6 = vsel %vm1771_vm3, %v14125_v44, %v1823_v58  ;;  %v14126_v39 = vld [vmem:[#allocation11_spill] sm:$0xff]  ;;  %v13539_v2 = vrot.slane %v10150_v29, 1 }
 0x236   : > { %v10175_v36 = vadd.f32 %v1140_v45, %v995_v25  ;;  %v1909_v1 = vadd.f32 %v1824_v6, %v1682_v5  ;;  %v10191_v25 = vmul.f32 %v14126_v39, %v10127_v12  ;;  %v13538_v58 = vrot.slane %v10154_v23, 2 }
 0x237   : > { %v10200_v5 = vmul.f32 %v14051_v51, %v10127_v12  ;;  %v10205_v11 = vmul.f32 %v14126_v39, %v10114_v38  ;;  %v10209_v43 = vmul.f32 %v7162_v54, %v10114_v38  ;;  %v10213_v24 = vmul.f32 %v14045_v0, %v10127_v12 }
 0x238   : > { %v10216_v59 = vadd.f32 %v10022_v19, %v2598_v32  ;;  %v728_v30 = vmul.f32 %v14047_v9, %v10127_v12  ;;  %v10222_v7 = vmul.f32 %v14127_v41, %v10127_v12  ;;  %v6752_v63 = vpack.i.bf16 %v10058_v28, %v14128_v55  ;;  %v10232_v32 = vpop.permute.xlu0 %6688 }
 0x239   : > { %v809_v62 = vmul.f32 %v14044_v10, %v10193_v61  ;;  %v13536_v47 = vrot.slane %v10187_v53, 1  ;;  %v2059_v49 = vrot.slane %v10191_v25, 4  ;;  %v13541_v44 = vrot.slane %v10200_v5, 2 }
 0x23a   : > { %v13534_v17 = vrot.slane %v10216_v59, 6  ;;  %v13535_v45 = vrot.slane %v10216_v59, 4  ;;  %v10237_v6 = vmul.f32 %v7162_v54, %v10127_v12  ;;  %6753 = vrot.lane.b32.xlu0 %v6752_v63, %s6973_s20  ;;  %v1036_v48 = vmul.f32 %v14045_v0, %v10193_v61 }
 0x23b   : > { %689 = vperm.xlu2 %6466, %v503_v60   ;;  %v916_v28 = vrot.slane %v809_v62, 1  ;;  %v13540_v25 = vrot.slane %v10213_v24, 2  ;;  %v729_v63 = vmul.f32 %v14047_v9, %v10193_v61  ;;  %v14142_v4 = vrot.slane %v10091_v57, 5 }
 0x23c   : > { %v3670_v60 = vsel %vm2461_vm5, %v3667_v40, %v13534_v17  ;;  %v10253_v55 = vsel %vm1771_vm3, %v3247_v31, %v13535_v45  ;;  %v1143_v17 = vrot.slane %v1036_v48, 2  ;;  %v14129_v31 = vrot.slane %v9864_v15, 4  ;;  %v10290_v48 = vpop.permute.xlu2 %6718 }
 0x23d   : > { %6374 = vmatmul.msk.f32.gmra.mxu2 %vm3695_vm6, %v3670_v60  ;;  %v6757_v62 = vpack.i.bf16 %v10253_v55, %v9793_v52  ;;  %v917_v50 = vsel %vm854_vm0, %v13536_v47, %v916_v28  ;;  %v919_v40 = vsel %vm854_vm0, %v916_v28, %v13539_v2  ;;  %v10271_v60 = vmul.f32 %v14130_v34, %v10127_v12 }
 0x23e   : > { %v2060_v45 = vsel %vm1771_vm3, %v14129_v31, %v2059_v49  ;;  %v997_v8 = vadd.f32 %v917_v50, %v728_v30  ;;  %v998_v52 = vadd.f32 %v919_v40, %v729_v63  ;;  %v14131_v47 = vrot.slane %v9847_v56, 2 }
 0x23f   : > { %6758 = vrot.lane.b32.xlu1 %v6757_v62, %s6975_s22  ;;  %v1144_v15 = vsel %vm1081_vm1, %v13540_v25, %v1143_v17  ;;  %v1146_v28 = vsel %vm1081_vm1, %v1143_v17, %v13538_v58  ;;  %v10287_v50 = vmul.f32 %v14126_v39, %v10193_v61  ;;  %v2286_v56 = vrot.slane %v10237_v6, 5  ;;  %v504_v62 = vld [vmem:[%s7065_s18 + $0x120] sm:$0xff] }
 0x240   : > { %v1374_v20 = vsel %vm1081_vm1, %v14131_v47, %v13541_v44  ;;  %v10293_v47 = vadd.f32 %v1144_v15, %v997_v8  ;;  %v10295_v63 = vadd.f32 %v1146_v28, %v998_v52  ;;  %v10300_v40 = vmul.f32 %v14051_v51, %v10114_v38  ;;  %v6699_v15 = vpop.permute.xlu0 %6698 }
 0x241   : > { %v13543_v17 = vrot.slane %v10222_v7, 3  ;;  %v10305_v31 = vmul.f32 %v14053_v22, %v10127_v12  ;;  %v2145_v58 = vadd.f32 %v2060_v45, %v1909_v1  ;;  %v10309_v2 = vmul.f32 %v14130_v34, %v10114_v38 }
 0x242   : > { %14132 = vst [vmem:[#allocation48_spill] sm:$0xff] %v10295_v63  ;;  %v1457_v8 = vadd.f32 %v1374_v20, %v10173_v21  ;;  %v13542_v6 = vrot.slane %v10287_v50, 4  ;;  %v10315_v52 = vmul.f32 %v7162_v54, %v10193_v61  ;;  %v2513_v1 = vrot.slane %v10271_v60, 6  ;;  %694 = vperm.xlu0 %6464, %v504_v62  }
 0x243   : > { %v6681_v45 = vunpack.i.h.bf16 %v10093_v26  ;;  %v6680_v25 = vunpack.i.l.bf16 %v10093_v26  ;;  %v14133_v20 = vrot.slane %v9868_v14, 5  ;;  %v14134_v12 = vrot.slane %v9851_v42, 3 }
 0x244   : > { %v2062_v44 = vsel %vm1771_vm3, %v2059_v49, %v13542_v6  ;;  %v13547_v62 = vrot.slane %v10305_v31, 4  ;;  %v10337_v26 = vmul.f32 %v14130_v34, %v10193_v61  ;;  %v2889_v49 = vrot.slane %v10025_v13, 2 }
 0x245   : > { %v2287_v21 = vsel %vm2234_vm4, %v14133_v20, %v2286_v56  ;;  %v1601_v60 = vsel %vm1544_vm2, %v14134_v12, %v13543_v17  ;;  %v2146_v20 = vadd.f32 %v2062_v44, %v10183_v35  ;;  %v14135_v6 = vrot.slane %v9906_v3, 6  ;;  %v14138_v3 = vld [vmem:[#allocation29_spill] sm:$0xff] }
 0x246   : > { %v2372_v28 = vadd.f32 %v2287_v21, %v2145_v58  ;;  %v1684_v14 = vadd.f32 %v1601_v60, %v1457_v8  ;;  %v10347_v12 = vmul.f32 %v14051_v51, %v10193_v61  ;;  %v3508_v58 = vrot.slane %v10216_v59, 5  ;;  %v14136_v21 = vld [vmem:[#allocation28_spill] sm:$0xff]  ;;  %v6704_v8 = vpop.permute.xlu1 %6703 }
 0x247   : > { %v2514_v42 = vsel %vm2461_vm5, %v14135_v6, %v2513_v1  ;;  %v6767_v17 = vpack.i.bf16 %v10125_v27, %v14136_v21  ;;  %v6691_v35 = vunpack.i.h.bf16 %v10232_v32  ;;  %v6690_v44 = vunpack.i.l.bf16 %v10232_v32  ;;  %v14137_v60 = vld [vmem:[#allocation32_spill] sm:$0xff] }
 0x248   : > { %v3710_v30 = vsel %vm3695_vm6, %v14137_v60, %v6680_v25  ;;  %v3808_v6 = vsel %vm3695_vm6, %v14138_v3, %v6681_v45  ;;  %v1828_v63 = vsel %vm1771_vm3, %v1825_v46, %v13547_v62  ;;  %v2599_v23 = vadd.f32 %v2514_v42, %v2372_v28  ;;  %v14140_v60 = vld [vmem:[#allocation18_spill] sm:$0xff] }
 0x249   : > { %v14139_v27 = vrot.slane %v10315_v52, 5  ;;  %v13548_v29 = vrot.slane %v10337_v26, 6  ;;  %6768 = vrot.lane.b32.xlu1 %v6767_v17, %s6973_s20  ;;  %v1911_v32 = vadd.f32 %v1828_v63, %v1684_v14  ;;  %v14141_v9 = vrot.slane %v14140_v60, 2 }
 0x24a   : > { %v3509_v46 = vsel %vm2234_vm4, %v14142_v4, %v3508_v58  ;;  %v10378_v28 = vmul.f32 %v14127_v41, %v10193_v61  ;;  %v14143_v42 = vunpack.i.l.bf16 %v9958_v16  ;;  %v14144_v17 = vunpack.i.h.bf16 %v9958_v16 }
 0x24b   : > { %v2289_v21 = vsel %vm2234_vm4, %v2286_v56, %v14139_v27  ;;  %v10371_v45 = vsel %vm1081_vm1, %v14141_v9, %v2889_v49  ;;  %v1375_v14 = vrot.slane %v10347_v12, 2  ;;  %v6701_v27 = vunpack.i.h.bf16 %v6699_v15 }
 0x24c   : > { %v2373_v25 = vadd.f32 %v2289_v21, %v2146_v20  ;;  %v6762_v56 = vpack.i.bf16 %v3509_v46, %v10371_v45  ;;  %v3743_v63 = vsel %vm3728_vm7, %v3710_v30, %v14143_v42  ;;  %v3840_v9 = vsel %vm3728_vm7, %v3808_v6, %v14144_v17  ;;  %v505_v42 = vld [vmem:[%s7065_s18 + $0x128] sm:$0xff] }
 0x24d   : > { %v3776_v20 = vsel %vm3761_vm8, %v3743_v63, %v6690_v44  ;;  %v3872_v3 = vsel %vm3761_vm8, %v3840_v9, %v6691_v35  ;;  %v2516_v21 = vsel %vm2461_vm5, %v2513_v1, %v13548_v29  ;;  %v6700_v30 = vunpack.i.l.bf16 %v6699_v15  ;;  %v14147_v63 = vld [vmem:[#allocation20_spill] sm:$0xff]  ;;  %v6709_v1 = vpop.permute.xlu0 %6708 }
 0x24e   : > { %6763 = vrot.lane.b32.xlu2 %v6762_v56, %s6974_s21  ;;  %4052 = vmatmul.f32.gmra.mxu0 %v3776_v20  ;;  %v10395_v16 = vadd.f32 %v10022_v19, %v2599_v23  ;;  %v2891_v6 = vrot.slane %v10091_v57, 2  ;;  %v2600_v4 = vadd.f32 %v2516_v21, %v2373_v25  ;;  %v6706_v46 = vunpack.i.h.bf16 %v6704_v8  ;;  %v14149_v20 = vld [vmem:[#allocation63_spill] sm:$0xff] }
 0x24f   : > { %4165 = vmatmul.f32.gmra.mxu1 %v3872_v3  ;;  %v6705_v44 = vunpack.i.l.bf16 %v6704_v8  ;;  %v14146_v35 = vunpack.i.l.bf16 %v10040_v33  ;;  %v14148_v9 = vunpack.i.h.bf16 %v10040_v33  ;;  %v14150_v8 = vrot.slane %v10200_v5, 2 }
 0x250   : > { %14145 = vst [vmem:[#allocation66_spill] sm:$0xff] %v10395_v16  ;;  %v3671_v56 = vrot.slane %v10395_v16, 6  ;;  %v3510_v15 = vrot.slane %v10395_v16, 5  ;;  %v3251_v23 = vrot.slane %v10395_v16, 4  ;;  %v14151_v21 = vrot.slane %v10205_v11, 4 }
 0x251   : > { %v3711_v17 = vsel %vm3695_vm6, %v14147_v63, %v14146_v35  ;;  %v3809_v25 = vsel %vm3695_vm6, %v14149_v20, %v14148_v9  ;;  %v1376_v3 = vsel %vm1081_vm1, %v14150_v8, %v1375_v14  ;;  %v14152_v35 = vrot.slane %v10287_v50, 4  ;;  %774 = vperm.xlu1 %6465, %v505_v42  }
 0x252   : > { %v3744_v62 = vsel %vm3728_vm7, %v3711_v17, %v6700_v30  ;;  %v3841_v29 = vsel %vm3728_vm7, %v3809_v25, %v6701_v27  ;;  %v14153_v33 = vrot.slane %v10216_v59, 6  ;;  %v10426_v20 = vsel %vm1081_vm1, %v2889_v49, %v2891_v6 }
 0x253   : > { %v2064_v63 = vsel %vm1771_vm3, %v14152_v35, %v14151_v21  ;;  %v3511_v5 = vsel %vm2234_vm4, %v3508_v58, %v3510_v15  ;;  %v14154_v8 = vrot.slane %v10216_v59, 4  ;;  %v6714_v21 = vpop.permute.xlu1 %6713  ;;  %v3777_v42 = vsel %vm3761_vm8, %v3744_v62, %v6705_v44 }
 0x254   : > { %v3672_v9 = vsel %vm2461_vm5, %v14153_v33, %v3671_v56  ;;  %v6777_v27 = vpack.i.bf16 %v3511_v5, %v10426_v20  ;;  %v3873_v49 = vsel %vm3761_vm8, %v3841_v29, %v6706_v46  ;;  %v6711_v17 = vunpack.i.h.bf16 %v6709_v1 }
 0x255   : > { %v10432_v50 = vsel %vm1771_vm3, %v14154_v8, %v3251_v23  ;;  %6375 = vmatmul.msk.f32.gmra.mxu2 %vm3695_vm6, %v3672_v9  ;;  %v6710_v25 = vunpack.i.l.bf16 %v6709_v1  ;;  %v10441_v58 = vadd.f32 %v10022_v19, %v2600_v4  ;;  %v2893_v35 = vrot.slane %v10216_v59, 2  ;;  %v14156_v1 = vld [vmem:[#allocation61_spill] sm:$0xff] }
 0x256   : > { %v6772_v30 = vpack.i.bf16 %v10432_v50, %v9807_v18  ;;  %v1602_v33 = vrot.slane %v10378_v28, 3  ;;  %v10447_v9 = vmul.f32 %v14053_v22, %v10193_v61  ;;  %v2147_v5 = vadd.f32 %v2064_v63, %v1911_v32  ;;  %6778 = vrot.lane.b32.xlu0 %v6777_v27, %s6974_s21  ;;  %4055 = vmatmul.f32.gmra.mxu0 %v3777_v42  ;;  %v14157_v63 = vld [vmem:[#allocation45_spill] sm:$0xff] }
 0x257   : > { %14155 = vst [vmem:[#allocation50_spill] sm:$0xff] %v10441_v58  ;;  %v6715_v18 = vunpack.i.l.bf16 %v6714_v21  ;;  %v6716_v29 = vunpack.i.h.bf16 %v6714_v21  ;;  %v3673_v62 = vrot.slane %v10441_v58, 6  ;;  %v13549_v4 = vrot.slane %v10441_v58, 5  ;;  %4168 = vmatmul.f32.gmra.mxu1 %v3873_v49 }
 0x258   : > { %6773 = vrot.lane.b32.xlu2 %v6772_v30, %s6975_s22  ;;  %v3253_v46 = vrot.slane %v10441_v58, 4  ;;  %v1458_v44 = vadd.f32 %v1376_v3, %v10175_v36  ;;  %v2728_v61 = vrot.slane %v10025_v13, 1  ;;  %v3712_v32 = vsel %vm3695_vm6, %v14156_v1, %v6710_v25  ;;  %v10485_v25 = vpop.permute.xlu0 %679  ;;  %v14161_v1 = vld [vmem:[#allocation59_spill] sm:$0xff] }
 0x259   : > { %v3810_v8 = vsel %vm3695_vm6, %v14157_v63, %v6711_v17  ;;  %v3674_v21 = vsel %vm2461_vm5, %v3671_v56, %v3673_v62  ;;  %v10466_v27 = vsel %vm1081_vm1, %v2891_v6, %v2893_v35  ;;  %v3513_v36 = vsel %vm2234_vm4, %v3510_v15, %v13549_v4 }
 0x25a   : > { %v10474_v3 = vsel %vm1771_vm3, %v3251_v23, %v3253_v46  ;;  %v14158_v30 = vrot.slane %v10209_v43, 5  ;;  %v14159_v42 = vrot.slane %v10315_v52, 5  ;;  %v6792_v49 = vpack.i.bf16 %v3513_v36, %v10466_v27 }
 0x25b   : > { %v6787_v6 = vpack.i.bf16 %v10474_v3, %v10371_v45  ;;  %v3745_v17 = vsel %vm3728_vm7, %v3712_v32, %v6715_v18  ;;  %v6721_v15 = vunpack.i.h.bf16 %v10290_v48  ;;  %v14160_v23 = vrot.slane %v10187_v53, 1 }
 0x25c   : > { %v2291_v56 = vsel %vm2234_vm4, %v14159_v42, %v14158_v30  ;;  %v14162_v63 = vrot.slane %v14161_v1, 1  ;;  %v3842_v30 = vsel %vm3728_vm7, %v3810_v8, %v6716_v29  ;;  %v2517_v36 = vrot.slane %v10309_v2, 6  ;;  %6793 = vrot.lane.b32.xlu1 %v6792_v49, %s6974_s21  ;;  %v10511_v42 = vpop.permute.xlu1 %6723 }
 0x25d   : > { %v2374_v52 = vadd.f32 %v2291_v56, %v2147_v5  ;;  %v14163_v45 = vrot.slane %v10222_v7, 3  ;;  %6376 = vmatmul.msk.f32.gmra.mxu2 %vm3695_vm6, %v3674_v21  ;;  %v14164_v53 = vrot.slane %v14140_v60, 1  ;;  %v14165_v5 = vunpack.i.l.bf16 %v10290_v48  ;;  %v14166_v56 = vld [vmem:[#allocation39_spill] sm:$0xff] }
 0x25e   : > { %v915_v4 = vsel %vm854_vm0, %v14162_v63, %v14160_v23  ;;  %v1829_v2 = vrot.slane %v10447_v9, 4  ;;  %v3874_v7 = vsel %vm3761_vm8, %v3842_v30, %v6721_v15  ;;  %v1961_v21 = vmul.f32 %v14126_v39, %v10485_v25  ;;  %6788 = vrot.lane.b32.xlu0 %v6787_v6, %s6975_s22 }
 0x25f   : > { %v1603_v18 = vsel %vm1544_vm2, %v14163_v45, %v1602_v33  ;;  %v2729_v32 = vsel %vm854_vm0, %v14164_v53, %v2728_v61  ;;  %v3778_v29 = vsel %vm3761_vm8, %v3745_v17, %v14165_v5  ;;  %v996_v49 = vadd.f32 %v915_v4, %v14166_v56  ;;  %4171 = vmatmul.f32.gmra.mxu1 %v3874_v7 }
 0x260   : > { %v6782_v8 = vpack.i.bf16 %v10253_v55, %v2729_v32  ;;  %v1685_v23 = vadd.f32 %v1603_v18, %v1458_v44  ;;  %v14167_v1 = vrot.slane %v10337_v26, 6  ;;  %4058 = vmatmul.f32.gmra.mxu0 %v3778_v29  ;;  %v2065_v55 = vrot.slane %v1961_v21, 4 }
 0x261   : > { %v2187_v9 = vmul.f32 %v7162_v54, %v10485_v25  ;;  %v1377_v15 = vrot.slane %v10300_v40, 2  ;;  %v10526_v4 = vmul.f32 %v14127_v41, %v10114_v38  ;;  %v14168_v26 = vrot.slane %v10213_v24, 2 }
 0x262   : > { %v2518_v48 = vsel %vm2461_vm5, %v14167_v1, %v2517_v36  ;;  %6783 = vrot.lane.b32.xlu2 %v6782_v8, %s6973_s20  ;;  %v14169_v44 = vrot.slane %v14122_v37, 2  ;;  %v14170_v63 = vrot.slane %v10305_v31, 4  ;;  %v14171_v53 = vrot.slane %v10205_v11, 4 }
 0x263   : > { %v2601_v17 = vadd.f32 %v2518_v48, %v2374_v52  ;;  %v1378_v45 = vsel %vm1081_vm1, %v1375_v14, %v1377_v15  ;;  %v2292_v32 = vrot.slane %v2187_v9, 5  ;;  %v2414_v37 = vmul.f32 %v14130_v34, %v10485_v25  ;;  %v506_v14 = vld [vmem:[%s7065_s18 + $0x130] sm:$0xff] }
 0x264   : > { %v1142_v6 = vsel %vm1081_vm1, %v14169_v44, %v14168_v26  ;;  %v1830_v52 = vsel %vm1771_vm3, %v14170_v63, %v1829_v2  ;;  %v2066_v24 = vsel %vm1771_vm3, %v14171_v53, %v2065_v55  ;;  %v2730_v5 = vrot.slane %v10091_v57, 1  ;;  %v10571_v9 = vpop.permute.xlu1 %684  ;;  %v507_v53 = vld [vmem:[%s7065_s18 + $0x138] sm:$0xff] }
 0x265   : > { %v1223_v30 = vadd.f32 %v1142_v6, %v996_v49  ;;  %v1912_v18 = vadd.f32 %v1830_v52, %v1685_v23  ;;  %v10547_v31 = vadd.f32 %v10022_v19, %v2601_v17  ;;  %v10552_v29 = vmul.f32 %v14053_v22, %v10114_v38 }
 0x266   : > { %v2731_v7 = vsel %vm854_vm0, %v2728_v61, %v2730_v5  ;;  %v1604_v56 = vrot.slane %v10526_v4, 3  ;;  %v14173_v23 = vrot.slane %v10209_v43, 5  ;;  %v2519_v48 = vrot.slane %v2414_v37, 6 }
 0x267   : > { %14172 = vst [vmem:[#allocation47_spill] sm:$0xff] %v10547_v31  ;;  %v2148_v12 = vadd.f32 %v2066_v24, %v1912_v18  ;;  %v1459_v8 = vadd.f32 %v1378_v45, %v1223_v30  ;;  %v3675_v11 = vrot.slane %v10547_v31, 6  ;;  %v3255_v21 = vrot.slane %v10547_v31, 4 }
 0x268   : > { %v6797_v49 = vpack.i.bf16 %v10432_v50, %v2731_v7  ;;  %v2293_v1 = vsel %vm2234_vm4, %v14173_v23, %v2292_v32  ;;  %v1605_v43 = vsel %vm1544_vm2, %v1602_v33, %v1604_v56  ;;  %v10586_v44 = vmul.f32 %v14126_v39, %v10571_v9 }
 0x269   : > { %v3676_v17 = vsel %vm2461_vm5, %v3673_v62, %v3675_v11  ;;  %v10569_v61 = vsel %vm1771_vm3, %v3253_v46, %v3255_v21  ;;  %v2375_v50 = vadd.f32 %v2293_v1, %v2148_v12  ;;  %v1831_v46 = vrot.slane %v10552_v29, 4 }
 0x26a   : > { %1233 = vperm.xlu2 %6466, %v506_v14   ;;  %6377 = vmatmul.msk.f32.gmra.mxu2 %vm3695_vm6, %v3676_v17  ;;  %v6802_v62 = vpack.i.bf16 %v10569_v61, %v10426_v20  ;;  %v1686_v26 = vadd.f32 %v1605_v43, %v1459_v8  ;;  %v10590_v28 = vmul.f32 %v7162_v54, %v10571_v9  ;;  %v2067_v52 = vrot.slane %v10586_v44, 4 }
 0x26b   : > { %6798 = vrot.lane.b32.xlu0 %v6797_v49, %s6973_s20  ;;  %v1832_v33 = vsel %vm1771_vm3, %v1829_v2, %v1831_v46  ;;  %v2520_v6 = vsel %vm2461_vm5, %v2517_v36, %v2519_v48  ;;  %v10598_v20 = vmul.f32 %v14130_v34, %v10571_v9  ;;  %v2895_v45 = vrot.slane %v10395_v16, 2 }
 0x26c   : > { %6803 = vrot.lane.b32.xlu1 %v6802_v62, %s6975_s22  ;;  %v2602_v63 = vadd.f32 %v2520_v6, %v2375_v50  ;;  %v13559_v30 = vrot.slane %v10590_v28, 5  ;;  %v1913_v18 = vadd.f32 %v1832_v33, %v1686_v26  ;;  %v2068_v24 = vsel %vm1771_vm3, %v2065_v55, %v2067_v52 }
 0x26d   : > { %v13557_v2 = vrot.slane %v10598_v20, 6  ;;  %v3514_v37 = vrot.slane %v10547_v31, 5  ;;  %v2732_v12 = vrot.slane %v10216_v59, 1  ;;  %v2896_v8 = vsel %vm1081_vm1, %v2893_v35, %v2895_v45 }
 0x26e   : > { %v2149_v36 = vadd.f32 %v2068_v24, %v1913_v18  ;;  %v2295_v14 = vsel %vm2234_vm4, %v2292_v32, %v13559_v30  ;;  %v10617_v7 = vadd.f32 %v10022_v19, %v2602_v63  ;;  %v14175_v49 = vrot.slane %v10441_v58, 5  ;;  %v508_v24 = vld [vmem:[%s7065_s18 + $0x140] sm:$0xff] }
 0x26f   : > { %v2733_v1 = vsel %vm854_vm0, %v2730_v5, %v2732_v12  ;;  %v2897_v17 = vrot.slane %v10441_v58, 2  ;;  %v2522_v32 = vsel %vm2461_vm5, %v2519_v48, %v13557_v2 }
 0x270   : > { %14174 = vst [vmem:[#allocation35_spill] sm:$0xff] %v10617_v7  ;;  %v2376_v55 = vadd.f32 %v2295_v14, %v2149_v36  ;;  %v3515_v23 = vsel %vm2234_vm4, %v14175_v49, %v3514_v37  ;;  %v6812_v50 = vpack.i.bf16 %v10474_v3, %v2733_v1  ;;  %v3677_v62 = vrot.slane %v10617_v7, 6  ;;  %v10653_v14 = vpop.f32.mrf.mxu0  ;;  %v10659_v49 = vpop.f32.mrf.mxu2 }
 0x271   : > { %v6807_v43 = vpack.i.bf16 %v3515_v23, %v2896_v8  ;;  %v3516_v26 = vrot.slane %v10617_v7, 5  ;;  %v3257_v5 = vrot.slane %v10617_v7, 4  ;;  %v10635_v6 = vsel %vm1081_vm1, %v2895_v45, %v2897_v17  ;;  %14177 = vst [vmem:[#allocation52_spill] sm:$0xff] %v10653_v14  ;;  %v10662_v23 = vpop.f32.mrf.mxu1 }
 0x272   : > { %v2603_v35 = vadd.f32 %v2522_v32, %v2376_v55  ;;  %v3678_v33 = vsel %vm2461_vm5, %v3675_v11, %v3677_v62  ;;  %v13556_v55 = vrot.slane %v10547_v31, 2  ;;  %14178 = vst [vmem:[#allocation69_spill] sm:$0xff] %v10659_v49  ;;  %v2734_v32 = vrot.slane %v10395_v16, 1  ;;  %v14194_v49 = vld [vmem:[#allocation25_spill] sm:$0xff] }
 0x273   : > { %1238 = vperm.xlu0 %6464, %v507_v53   ;;  %6808 = vrot.lane.b32.xlu2 %v6807_v43, %s6974_s21  ;;  %v3517_v48 = vsel %vm2234_vm4, %v3514_v37, %v3516_v26  ;;  %v3258_v18 = vsel %vm1771_vm3, %v3255_v21, %v3257_v5  ;;  %14179 = vst [vmem:[#allocation53_spill] sm:$0xff] %v10662_v23 }
 0x274   : > { %6813 = vrot.lane.b32.xlu1 %v6812_v50, %s6973_s20  ;;  %v10639_v3 = vadd.f32 %v10022_v19, %v2603_v35  ;;  %6378 = vmatmul.msk.f32.gmra.mxu2 %vm3695_vm6, %v3678_v33  ;;  %v6822_v63 = vpack.i.bf16 %v3517_v48, %v10635_v6  ;;  %v6817_v11 = vpack.i.bf16 %v3258_v18, %v10466_v27  ;;  %v2736_v35 = vrot.slane %v10441_v58, 1 }
 0x275   : > { %v10672_v43 = vsel %vm1081_vm1, %v2897_v17, %v13556_v55 }
 0x276   : > { %14176 = vst [vmem:[#allocation51_spill] sm:$0xff] %v10639_v3  ;;  %v13554_v53 = vrot.slane %v10639_v3, 6  ;;  %v13552_v45 = vrot.slane %v10639_v3, 4  ;;  %v13553_v36 = vrot.slane %v10639_v3, 5  ;;  %v2737_v17 = vsel %vm854_vm0, %v2734_v32, %v2736_v35 }
 0x277   : > { %v6842_v33 = vpack.i.bf16 %v3258_v18, %v2737_v17  ;;  %v10701_v18 = vmul.f32 %v14127_v41, %v10485_v25 }
 0x278   : > { %v3260_v37 = vsel %vm1771_vm3, %v3257_v5, %v13552_v45  ;;  %v3680_v21 = vsel %vm2461_vm5, %v3677_v62, %v13554_v53  ;;  %v3519_v1 = vsel %vm2234_vm4, %v3516_v26, %v13553_v36  ;;  %v10681_v26 = vpop.f32.mrf.mxu0  ;;  %v10684_v5 = vpop.f32.mrf.mxu2 }
 0x279   : > { %v6832_v27 = vpack.i.bf16 %v3260_v37, %v2896_v8  ;;  %v6837_v50 = vpack.i.bf16 %v3519_v1, %v10672_v43  ;;  %v2735_v8 = vsel %vm854_vm0, %v2732_v12, %v2734_v32  ;;  %14180 = vst [vmem:[#allocation54_spill] sm:$0xff] %v10681_v26  ;;  %v10690_v12 = vmul.f32 %v14051_v51, %v10485_v25 }
 0x27a   : > { %v6827_v62 = vpack.i.bf16 %v10569_v61, %v2735_v8  ;;  %14181 = vst [vmem:[#allocation36_spill] sm:$0xff] %v10684_v5  ;;  %v509_v61 = vld [vmem:[%s7065_s18 + $0x148] sm:$0xff]  ;;  %v14232_v26 = vrot.slane %v10547_v31, 3 }
 0x27b   : > { %6823 = vrot.lane.b32.xlu0 %v6822_v63, %s6974_s21  ;;  %6818 = vrot.lane.b32.xlu2 %v6817_v11, %s6975_s22  ;;  %v10686_v63 = vpop.f32.mrf.mxu1  ;;  %v13555_v11 = vrot.slane %v10547_v31, 1 }
 0x27c   : > { %1923 = vperm.xlu1 %6465, %v508_v24   ;;  %6379 = vmatmul.msk.f32.gmra.mxu2 %vm3695_vm6, %v3680_v21  ;;  %14182 = vst [vmem:[#allocation65_spill] sm:$0xff] %v10686_v63  ;;  %v13551_v24 = vrot.slane %v10690_v12, 2 }
 0x27d   : > { %v2739_v21 = vsel %vm854_vm0, %v2736_v35, %v13555_v11 }
 0x27e   : > { %v1380_v8 = vsel %vm1081_vm1, %v1377_v15, %v13551_v24 }
 0x27f   : > { %v1460_v17 = vadd.f32 %v1380_v8, %v10293_v47 }
 0x280   : > { %v10705_v32 = vpop.f32.mrf.mxu0 }
 0x281   : > { %v6729_v48 = vpop.permute.xlu2 %6728  ;;  %14183 = vst [vmem:[#allocation70_spill] sm:$0xff] %v10705_v32 }
 0x282   : > { %v6731_v11 = vunpack.i.h.bf16 %v6729_v48  ;;  %v6730_v55 = vunpack.i.l.bf16 %v6729_v48  ;;  %v14193_v48 = vrot.slane %v10590_v28, 5  ;;  %v14196_v28 = vrot.slane %v10598_v20, 6 }
 0x283   : > { %6833 = vrot.lane.b32.xlu0 %v6832_v27, %s6975_s22  ;;  %6828 = vrot.lane.b32.xlu2 %v6827_v62, %s6973_s20  ;;  %v6857_v27 = vpack.i.bf16 %v3260_v37, %v2739_v21  ;;  %v10715_v35 = vpop.f32.mrf.mxu1  ;;  %v13550_v62 = vrot.slane %v10701_v18, 3  ;;  %v10720_v37 = vmul.f32 %v14053_v22, %v10485_v25  ;;  %v13563_v20 = vrot.slane %v10617_v7, 1 }
 0x284   : > { %6838 = vrot.lane.b32.xlu1 %v6837_v50, %s6974_s21  ;;  %v10707_v50 = vpop.f32.mrf.mxu2  ;;  %14185 = vst [vmem:[#allocation64_spill] sm:$0xff] %v10715_v35 }
 0x285   : > { %14184 = vst [vmem:[#allocation56_spill] sm:$0xff] %v10707_v50  ;;  %v1607_v40 = vsel %vm1544_vm2, %v1604_v56, %v13550_v62  ;;  %v13558_v15 = vrot.slane %v10720_v37, 4  ;;  %v14187_v56 = vld [vmem:[#allocation62_spill] sm:$0xff] }
 0x286   : > { %v3144_v8 = vrot.slane %v14187_v56, 3 }
 0x288   : > { %v10743_v4 = vpop.f32.mrf.mxu0 }
 0x289   : > { %14186 = vst [vmem:[#allocation73_spill] sm:$0xff] %v10743_v4  ;;  %v14209_v4 = vld [vmem:[#allocation46_spill] sm:$0xff] }
 0x28b   : > { %6843 = vrot.lane.b32.xlu0 %v6842_v33, %s6973_s20  ;;  %1928 = vperm.xlu2 %6466, %v509_v61   ;;  %v1687_v61 = vadd.f32 %v1607_v40, %v1460_v17  ;;  %v6725_v17 = vunpack.i.l.bf16 %v10511_v42  ;;  %v1834_v40 = vsel %vm1771_vm3, %v1831_v46, %v13558_v15  ;;  %v10757_v53 = vpop.f32.mrf.mxu1  ;;  %v14190_v15 = vld [vmem:[#allocation21_spill] sm:$0xff] }
 0x28c   : > { %v10746_v62 = vpop.f32.mrf.mxu2  ;;  %14189 = vst [vmem:[#allocation57_spill] sm:$0xff] %v10757_v53  ;;  %v14191_v30 = vrot.slane %v14190_v15, 3 }
 0x28d   : > { %v10703_v1 = vpop.permute.xlu2 %6738  ;;  %14188 = vst [vmem:[#allocation72_spill] sm:$0xff] %v10746_v62  ;;  %v1914_v36 = vadd.f32 %v1834_v40, %v1687_v61  ;;  %v10783_v62 = vmul.f32 %v14045_v0, %v10485_v25 }
 0x28e   : > { %v3145_v45 = vsel %vm1544_vm2, %v14191_v30, %v3144_v8 }
 0x293   : > { %6858 = vrot.lane.b32.xlu0 %v6857_v27, %s6973_s20 }
 0x295   : > { %v10729_v33 = vpop.permute.xlu2 %689 }
 0x296   : > { %v10733_v21 = vmul.f32 %v14126_v39, %v10729_v33  ;;  %v10737_v27 = vmul.f32 %v7162_v54, %v10729_v33  ;;  %v10741_v47 = vmul.f32 %v14130_v34, %v10729_v33  ;;  %v6726_v34 = vunpack.i.h.bf16 %v10511_v42 }
 0x297   : > { %v10770_v42 = vmul.f32 %v14044_v10, %v10485_v25 }
 0x298   : > { %v13560_v24 = vrot.slane %v10733_v21, 4  ;;  %v14192_v61 = vrot.slane %v10737_v27, 5  ;;  %v3811_v30 = vsel %vm3695_vm6, %v3145_v45, %v6726_v34  ;;  %v14195_v50 = vrot.slane %v10741_v47, 6 }
 0x299   : > { %v6734_v44 = vpop.permute.xlu0 %6733  ;;  %v10796_v45 = vmul.f32 %v14051_v51, %v10571_v9  ;;  %v13562_v34 = vrot.slane %v10617_v7, 2 }
 0x29a   : > { %v2070_v2 = vsel %vm1771_vm3, %v2067_v52, %v13560_v24  ;;  %v2297_v40 = vsel %vm2234_vm4, %v14193_v48, %v14192_v61  ;;  %v3713_v52 = vsel %vm3695_vm6, %v14194_v49, %v6725_v17  ;;  %v6736_v24 = vunpack.i.h.bf16 %v6734_v44 }
 0x29b   : > { %v2150_v46 = vadd.f32 %v2070_v2, %v1914_v36  ;;  %v13561_v2 = vrot.slane %v14140_v60, 3  ;;  %v6735_v29 = vunpack.i.l.bf16 %v6734_v44  ;;  %v2524_v61 = vsel %vm2461_vm5, %v14196_v28, %v14195_v50  ;;  %v10800_v50 = vpop.f32.mrf.mxu0  ;;  %v10815_v28 = vpop.f32.mrf.mxu1 }
 0x29c   : > { %v3746_v48 = vsel %vm3728_vm7, %v3713_v52, %v6730_v55  ;;  %v3843_v49 = vsel %vm3728_vm7, %v3811_v30, %v6731_v11  ;;  %14197 = vst [vmem:[#allocation23_spill] sm:$0xff] %v10800_v50  ;;  %v6740_v55 = vunpack.i.l.bf16 %v10703_v1  ;;  %v920_v52 = vrot.slane %v10770_v42, 1 }
 0x29d   : > { %v2377_v36 = vadd.f32 %v2297_v40, %v2150_v46  ;;  %v3779_v46 = vsel %vm3761_vm8, %v3746_v48, %v6735_v29  ;;  %v3875_v40 = vsel %vm3761_vm8, %v3843_v49, %v6736_v24  ;;  %v10806_v29 = vpop.f32.mrf.mxu2  ;;  %v14200_v24 = vld [vmem:[#allocation7_spill] sm:$0xff]  ;;  %v3147_v30 = vsel %vm1544_vm2, %v3144_v8, %v13561_v2  ;;  %14201 = vst [vmem:[#allocation24_spill] sm:$0xff] %v10815_v28 }
 0x29e   : > { %4061 = vmatmul.f32.gmra.mxu0 %v3779_v46  ;;  %4174 = vmatmul.f32.gmra.mxu1 %v3875_v40  ;;  %14199 = vst [vmem:[#allocation60_spill] sm:$0xff] %v10806_v29  ;;  %v730_v44 = vmul.f32 %v14200_v24, %v10114_v38  ;;  %v10823_v38 = vmul.f32 %v14044_v10, %v10571_v9  ;;  %v14202_v8 = vrot.slane %v10547_v31, 2  ;;  %v14205_v49 = vrot.slane %v10639_v3, 5 }
 0x29f   : > { %v2604_v17 = vadd.f32 %v2524_v61, %v2377_v36  ;;  %v6741_v61 = vunpack.i.h.bf16 %v10703_v1  ;;  %v14203_v1 = vrot.slane %v10547_v31, 1  ;;  %v14204_v36 = vrot.slane %v10639_v3, 6 }
 0x2a0   : > { %v14207_v29 = vrot.slane %v10639_v3, 4 }
 0x2a1   : > { %v10804_v11 = vadd.f32 %v10022_v19, %v2604_v17  ;;  %v10831_v17 = vsel %vm1081_vm1, %v14202_v8, %v13562_v34  ;;  %v2741_v46 = vsel %vm854_vm0, %v14203_v1, %v13563_v20  ;;  %v14208_v20 = vld [vmem:[#allocation22_spill] sm:$0xff]  ;;  %v3812_v35 = vsel %vm3695_vm6, %v3147_v30, %v6741_v61 }
 0x2a2   : > { %v6749_v40 = vpop.permute.xlu1 %6748  ;;  %v6744_v2 = vpop.permute.xlu0 %6743  ;;  %v3714_v28 = vsel %vm3695_vm6, %v14208_v20, %v6740_v55  ;;  %v10866_v20 = vmul.f32 %v14127_v41, %v10571_v9  ;;  %v14211_v30 = vrot.slane %v10796_v45, 2 }
 0x2a3   : > { %14198 = vst [vmem:[#allocation33_spill] sm:$0xff] %v10804_v11  ;;  %v13564_v19 = vrot.slane %v10804_v11, 6  ;;  %v13565_v48 = vrot.slane %v10804_v11, 5  ;;  %v14206_v34 = vrot.slane %v10804_v11, 4  ;;  %v6751_v53 = vunpack.i.h.bf16 %v6749_v40  ;;  %v10889_v61 = vpop.f32.mrf.mxu0 }
 0x2a4   : > { %v6750_v5 = vunpack.i.l.bf16 %v6749_v40  ;;  %v6746_v23 = vunpack.i.h.bf16 %v6744_v2  ;;  %v6745_v50 = vunpack.i.l.bf16 %v6744_v2  ;;  %14213 = vst [vmem:[#allocation42_spill] sm:$0xff] %v10889_v61  ;;  %v14215_v40 = vrot.slane %v10783_v62, 2 }
 0x2a5   : > { %v3682_v42 = vsel %vm2461_vm5, %v14204_v36, %v13564_v19  ;;  %v3521_v8 = vsel %vm2234_vm4, %v14205_v49, %v13565_v48  ;;  %v3262_v1 = vsel %vm1771_vm3, %v14207_v29, %v14206_v34  ;;  %v14210_v34 = vrot.slane %v14209_v4, 1 }
 0x2a6   : > { %6380 = vmatmul.msk.f32.gmra.mxu2 %vm3695_vm6, %v3682_v42  ;;  %v6852_v19 = vpack.i.bf16 %v3521_v8, %v10831_v17  ;;  %v6872_v49 = vpack.i.bf16 %v3262_v1, %v2741_v46  ;;  %v6847_v48 = vpack.i.bf16 %v3262_v1, %v10635_v6  ;;  %v3747_v2 = vsel %vm3728_vm7, %v3714_v28, %v6745_v50  ;;  %v14216_v8 = vld [vmem:[#allocation26_spill] sm:$0xff] }
 0x2a7   : > { %v921_v29 = vsel %vm854_vm0, %v14210_v34, %v920_v52  ;;  %v3844_v55 = vsel %vm3728_vm7, %v3812_v35, %v6746_v23  ;;  %v13566_v42 = vrot.slane %v10823_v38, 1  ;;  %v10873_v46 = vmul.f32 %v14045_v0, %v10571_v9  ;;  %v14218_v34 = vld [vmem:[#allocation48_spill] sm:$0xff] }
 0x2a8   : > { %v10856_v36 = vpop.permute.xlu2 %6763  ;;  %6853 = vrot.lane.b32.xlu2 %v6852_v19, %s6974_s21  ;;  %6873 = vrot.lane.b32.xlu0 %v6872_v49, %s6973_s20  ;;  %v3780_v6 = vsel %vm3761_vm8, %v3747_v2, %v6750_v5  ;;  %v3876_v4 = vsel %vm3761_vm8, %v3844_v55, %v6751_v53  ;;  %v14212_v50 = vrot.slane %v10690_v12, 2  ;;  %v10886_v35 = vmul.f32 %v14053_v22, %v10571_v9  ;;  %v10891_v5 = vpop.f32.mrf.mxu2 }
 0x2a9   : > { %6848 = vrot.lane.b32.xlu1 %v6847_v48, %s6975_s22  ;;  %4064 = vmatmul.f32.gmra.mxu0 %v3780_v6  ;;  %v999_v28 = vadd.f32 %v921_v29, %v730_v44  ;;  %14214 = vst [vmem:[#allocation16_spill] sm:$0xff] %v10891_v5  ;;  %v731_v53 = vmul.f32 %v14200_v24, %v10485_v25  ;;  %v13567_v12 = vrot.slane %v10866_v20, 3  ;;  %v3148_v19 = vrot.slane %v10025_v13, 3  ;;  %v10907_v2 = vpop.f32.mrf.mxu1 }
 0x2aa   : > { %v1382_v23 = vsel %vm1081_vm1, %v14212_v50, %v14211_v30  ;;  %4177 = vmatmul.f32.gmra.mxu1 %v3876_v4  ;;  %v14217_v1 = vrot.slane %v14216_v8, 2  ;;  %v923_v44 = vsel %vm854_vm0, %v920_v52, %v13566_v42  ;;  %v13568_v49 = vrot.slane %v10873_v46, 2  ;;  %14219 = vst [vmem:[#allocation40_spill] sm:$0xff] %v10907_v2 }
 0x2ab   : > { %v1461_v29 = vadd.f32 %v1382_v23, %v14218_v34  ;;  %v13569_v55 = vrot.slane %v10886_v35, 4  ;;  %v1275_v6 = vmul.f32 %v14051_v51, %v10729_v33  ;;  %v10916_v52 = vmul.f32 %v14200_v24, %v10571_v9 }
 0x2ac   : > { %v1148_v48 = vsel %vm1081_vm1, %v14217_v1, %v14215_v40  ;;  %v6754_v25 = vpop.permute.xlu0 %6753  ;;  %v1000_v8 = vadd.f32 %v923_v44, %v731_v53  ;;  %v14220_v23 = vrot.slane %v10701_v18, 3  ;;  %v14221_v34 = vrot.slane %v14140_v60, 3 }
 0x2ad   : > { %v6756_v4 = vunpack.i.h.bf16 %v6754_v25  ;;  %v6755_v30 = vunpack.i.l.bf16 %v6754_v25  ;;  %v1226_v50 = vadd.f32 %v1148_v48, %v999_v28  ;;  %v14222_v28 = vrot.slane %v10783_v62, 2 }
 0x2ae   : > { %v1609_v1 = vsel %vm1544_vm2, %v14220_v23, %v13567_v12  ;;  %v3149_v42 = vsel %vm1544_vm2, %v14221_v34, %v3148_v19  ;;  %v14223_v18 = vrot.slane %v10720_v37, 4  ;;  %v1383_v34 = vrot.slane %v1275_v6, 2 }
 0x2af   : > { %v1150_v48 = vsel %vm1081_vm1, %v14222_v28, %v13568_v49  ;;  %v1688_v25 = vadd.f32 %v1609_v1, %v1461_v29  ;;  %v3715_v53 = vsel %vm3695_vm6, %v14190_v15, %v6755_v30  ;;  %v3813_v44 = vsel %vm3695_vm6, %v3149_v42, %v6756_v4 }
 0x2b0   : > { %v1836_v23 = vsel %vm1771_vm3, %v14223_v18, %v13569_v55  ;;  %v10941_v62 = vmul.f32 %v14127_v41, %v10729_v33  ;;  %v6766_v29 = vunpack.i.h.bf16 %v10856_v36  ;;  %v6765_v1 = vunpack.i.l.bf16 %v10856_v36  ;;  %v10956_v36 = vpop.f32.mrf.mxu2 }
 0x2b1   : > { %v6759_v9 = vpop.permute.xlu1 %6758  ;;  %v3150_v15 = vrot.slane %v10091_v57, 3  ;;  %v3152_v37 = vrot.slane %v10216_v59, 3  ;;  %v3154_v6 = vrot.slane %v10395_v16, 3  ;;  %v1227_v30 = vadd.f32 %v1150_v48, %v1000_v8  ;;  %14225 = vst [vmem:[#allocation4_spill] sm:$0xff] %v10956_v36 }
 0x2b2   : > { %v10912_v40 = vpop.permute.xlu2 %6773  ;;  %v6761_v12 = vunpack.i.h.bf16 %v6759_v9  ;;  %v6760_v5 = vunpack.i.l.bf16 %v6759_v9  ;;  %v1915_v28 = vadd.f32 %v1836_v23, %v1688_v25  ;;  %v10950_v9 = vpop.f32.mrf.mxu0  ;;  %v3156_v48 = vrot.slane %v10441_v58, 3 }
 0x2b3   : > { %14224 = vst [vmem:[#allocation38_spill] sm:$0xff] %v10950_v9  ;;  %v10970_v25 = vpop.f32.mrf.mxu1  ;;  %v14231_v36 = vrot.slane %v10737_v27, 5 }
 0x2b4   : > { %v3748_v42 = vsel %vm3728_vm7, %v3715_v53, %v6760_v5  ;;  %v3845_v4 = vsel %vm3728_vm7, %v3813_v44, %v6761_v12  ;;  %v10954_v55 = vpop.permute.xlu0 %694  ;;  %v14226_v5 = vrot.slane %v10796_v45, 2  ;;  %v10963_v53 = vmul.f32 %v14053_v22, %v10729_v33  ;;  %14227 = vst [vmem:[#allocation3_spill] sm:$0xff] %v10970_v25 }
 0x2b5   : > { %v3781_v18 = vsel %vm3761_vm8, %v3748_v42, %v6765_v1  ;;  %v3877_v49 = vsel %vm3761_vm8, %v3845_v4, %v6766_v29  ;;  %v10967_v8 = vmul.f32 %v14051_v51, %v10954_v55  ;;  %v1610_v44 = vrot.slane %v10941_v62, 3 }
 0x2b6   : > { %v1384_v12 = vsel %vm1081_vm1, %v14226_v5, %v1383_v34  ;;  %4067 = vmatmul.f32.gmra.mxu0 %v3781_v18  ;;  %4180 = vmatmul.f32.gmra.mxu1 %v3877_v49  ;;  %v10975_v45 = vmul.f32 %v14127_v41, %v10954_v55  ;;  %v10979_v29 = vmul.f32 %v14126_v39, %v10954_v55  ;;  %v1837_v25 = vrot.slane %v10963_v53, 4 }
 0x2b7   : > { %v10983_v49 = vmul.f32 %v7162_v54, %v10954_v55  ;;  %v13571_v1 = vrot.slane %v10967_v8, 2  ;;  %v3151_v42 = vsel %vm1544_vm2, %v3148_v19, %v3150_v15  ;;  %v3153_v4 = vsel %vm1544_vm2, %v3150_v15, %v3152_v37  ;;  %v11001_v19 = vld [vmem:[%s13297_s1 + $0x8] ss:$0 sm:$0xff] }
 0x2b8   : > { %v10989_v62 = vsel %vm1544_vm2, %v3152_v37, %v3154_v6  ;;  %v1462_v18 = vadd.f32 %v1384_v12, %v1226_v50  ;;  %v13572_v5 = vrot.slane %v10979_v29, 4  ;;  %v11005_v50 = vmul.f32 %v11001_v19, %v10954_v55  ;;  %v11063_v32 = vpop.f32.mrf.mxu2 }
 0x2b9   : > { %v1386_v9 = vsel %vm1081_vm1, %v1383_v34, %v13571_v1  ;;  %v11008_v15 = vsel %vm1544_vm2, %v3154_v6, %v3156_v48  ;;  %v14228_v37 = vrot.slane %v10866_v20, 3  ;;  %v11016_v34 = vmul.f32 %v14053_v22, %v10954_v55  ;;  %14239 = vst [vmem:[#allocation12_spill] sm:$0xff] %v11063_v32 }
 0x2ba   : > { %v14229_v1 = vrot.slane %v10733_v21, 4  ;;  %v1463_v2 = vadd.f32 %v1386_v9, %v1227_v30  ;;  %v13574_v61 = vrot.slane %v11005_v50, 6  ;;  %v13573_v20 = vrot.slane %v10639_v3, 2 }
 0x2bb   : > { %v1611_v12 = vsel %vm1544_vm2, %v14228_v37, %v1610_v44  ;;  %v6769_v53 = vpop.permute.xlu1 %6768  ;;  %v14230_v37 = vrot.slane %v10983_v49, 5  ;;  %v11034_v21 = vsel %vm1544_vm2, %v3156_v48, %v14232_v26  ;;  %v14234_v9 = vrot.slane %v10886_v35, 4 }
 0x2bc   : > { %v6784_v23 = vpop.permute.xlu2 %6783  ;;  %v2072_v58 = vsel %vm1771_vm3, %v14229_v1, %v13572_v5  ;;  %v1689_v14 = vadd.f32 %v1611_v12, %v1462_v18  ;;  %14233 = vst [vmem:[#allocation13_spill] sm:$0xff] %v11034_v21  ;;  %v11043_v1 = vpop.f32.mrf.mxu0  ;;  %v6770_v18 = vunpack.i.l.bf16 %v6769_v53  ;;  %v6771_v5 = vunpack.i.h.bf16 %v6769_v53 }
 0x2bd   : > { %v2151_v6 = vadd.f32 %v2072_v58, %v1915_v28  ;;  %v2299_v63 = vsel %vm2234_vm4, %v14231_v36, %v14230_v37  ;;  %v11038_v58 = vmul.f32 %v14044_v10, %v10729_v33  ;;  %v6785_v30 = vunpack.i.l.bf16 %v6784_v23  ;;  %14235 = vst [vmem:[#allocation14_spill] sm:$0xff] %v11043_v1 }
 0x2be   : > { %v1838_v27 = vsel %vm1771_vm3, %v14234_v9, %v1837_v25  ;;  %v6786_v36 = vunpack.i.h.bf16 %v6784_v23  ;;  %v14236_v37 = vrot.slane %v10975_v45, 3  ;;  %v14238_v23 = vrot.slane %v10617_v7, 2 }
 0x2bf   : > { %v2378_v28 = vadd.f32 %v2299_v63, %v2151_v6  ;;  %v14237_v63 = vrot.slane %v10741_v47, 6  ;;  %v6776_v53 = vunpack.i.h.bf16 %v10912_v40  ;;  %v1916_v48 = vadd.f32 %v1838_v27, %v1689_v14 }
 0x2c0   : > { %v1613_v26 = vsel %vm1544_vm2, %v1610_v44, %v14236_v37  ;;  %v11061_v9 = vsel %vm1081_vm1, %v14238_v23, %v13573_v20  ;;  %v11065_v44 = vpop.f32.mrf.mxu1  ;;  %v14241_v47 = vrot.slane %v10639_v3, 1  ;;  %v11082_v20 = vmul.f32 %v14044_v10, %v10954_v55 }
 0x2c1   : > { %v2526_v35 = vsel %vm2461_vm5, %v14237_v63, %v13574_v61  ;;  %v1690_v6 = vadd.f32 %v1613_v26, %v1463_v2  ;;  %14240 = vst [vmem:[#allocation19_spill] sm:$0xff] %v11065_v44  ;;  %v14242_v63 = vrot.slane %v10617_v7, 1  ;;  %v6775_v26 = vunpack.i.l.bf16 %v10912_v40 }
 0x2c2   : > { %v2605_v37 = vadd.f32 %v2526_v35, %v2378_v28  ;;  %v11086_v14 = vsel %vm3695_vm6, %v14140_v60, %v6785_v30  ;;  %v14243_v27 = vrot.slane %v11016_v34, 4  ;;  %v3716_v40 = vsel %vm3695_vm6, %v14187_v56, %v6770_v18 }
 0x2c3   : > { %v11073_v2 = vsel %vm854_vm0, %v14242_v63, %v14241_v47  ;;  %v11088_v28 = vpop.permute.xlu1 %774  ;;  %v11098_v47 = vld [vmem:[%s13298_s2] ss:$0 sm:$0xff]  ;;  %v11104_v60 = vsel %vm3695_vm6, %v3153_v4, %v6786_v36  ;;  %v3814_v56 = vsel %vm3695_vm6, %v3151_v42, %v6771_v5  ;;  %v3749_v32 = vsel %vm3728_vm7, %v3716_v40, %v6775_v26 }
 0x2c4   : > { %v11045_v12 = vpop.permute.xlu2 %1233  ;;  %v1840_v35 = vsel %vm1771_vm3, %v1837_v25, %v14243_v27  ;;  %v11101_v63 = vadd.f32 %v11098_v47, %v2605_v37  ;;  %v1965_v25 = vmul.f32 %v14126_v39, %v11088_v28  ;;  %v2191_v37 = vmul.f32 %v7162_v54, %v11088_v28 }
 0x2c5   : > { %v11078_v23 = vmul.f32 %v14126_v39, %v11045_v12  ;;  %v11108_v30 = vmul.f32 %v7162_v54, %v11045_v12  ;;  %v1917_v61 = vadd.f32 %v1840_v35, %v1690_v6  ;;  %v11115_v18 = vmul.f32 %v11001_v19, %v11045_v12 }
 0x2c6   : > { %v2418_v4 = vmul.f32 %v11001_v19, %v11088_v28  ;;  %v2073_v6 = vrot.slane %v1965_v25, 4  ;;  %v13581_v42 = vrot.slane %v11101_v63, 5  ;;  %v2300_v5 = vrot.slane %v2191_v37, 5  ;;  %v11137_v37 = vpop.f32.mrf.mxu0 }
 0x2c7   : > { %v13580_v27 = vrot.slane %v11078_v23, 4  ;;  %v3846_v16 = vsel %vm3728_vm7, %v3814_v56, %v6776_v53  ;;  %v14244_v31 = vrot.slane %v10979_v29, 4  ;;  %v14245_v25 = vrot.slane %v11101_v63, 6 }
 0x2c8   : > { %v6779_v35 = vpop.permute.xlu0 %6778  ;;  %v2527_v21 = vrot.slane %v2418_v4, 6  ;;  %v14246_v26 = vrot.slane %v10804_v11, 6  ;;  %v13582_v53 = vrot.slane %v11115_v18, 6 }
 0x2c9   : > { %v6781_v44 = vunpack.i.h.bf16 %v6779_v35  ;;  %v6780_v1 = vunpack.i.l.bf16 %v6779_v35  ;;  %v2074_v7 = vsel %vm1771_vm3, %v14244_v31, %v2073_v6  ;;  %v2076_v36 = vsel %vm1771_vm3, %v2073_v6, %v13580_v27  ;;  %v11152_v35 = vpop.f32.mrf.mxu2 }
 0x2ca   : > { %v3684_v40 = vsel %vm2461_vm5, %v14246_v26, %v14245_v25  ;;  %v2152_v29 = vadd.f32 %v2074_v7, %v1916_v48  ;;  %v2153_v56 = vadd.f32 %v2076_v36, %v1917_v61  ;;  %v14247_v31 = vrot.slane %v10983_v49, 5  ;;  %14249 = vst [vmem:[#allocation34_spill] sm:$0xff] %v11152_v35  ;;  %v11154_v7 = vpop.f32.mrf.mxu1 }
 0x2cb   : > { %6381 = vmatmul.msk.f32.gmra.mxu2 %vm3695_vm6, %v3684_v40  ;;  %v3782_v6 = vsel %vm3761_vm8, %v3749_v32, %v6780_v1  ;;  %v3878_v27 = vsel %vm3761_vm8, %v3846_v16, %v6781_v44  ;;  %v14248_v25 = vrot.slane %v10804_v11, 5  ;;  %14250 = vst [vmem:[#allocation5_spill] sm:$0xff] %v11154_v7  ;;  %v14251_v61 = vrot.slane %v11108_v30, 5 }
 0x2cc   : > { %v2301_v4 = vsel %vm2234_vm4, %v14247_v31, %v2300_v5  ;;  %4070 = vmatmul.f32.gmra.mxu0 %v3782_v6  ;;  %4183 = vmatmul.f32.gmra.mxu1 %v3878_v27  ;;  %v3263_v16 = vrot.slane %v11101_v63, 4  ;;  %v14252_v1 = vrot.slane %v11005_v50, 6  ;;  %v13583_v31 = vrot.slane %v10804_v11, 2 }
 0x2cd   : > { %v3523_v26 = vsel %vm2234_vm4, %v14248_v25, %v13581_v42  ;;  %v2303_v49 = vsel %vm2234_vm4, %v2300_v5, %v14251_v61  ;;  %v2379_v48 = vadd.f32 %v2301_v4, %v2152_v29  ;;  %v11164_v36 = vpop.permute.xlu2 %6808  ;;  %v11170_v5 = vmul.f32 %v14051_v51, %v11045_v12 }
 0x2ce   : > { %v6867_v32 = vpack.i.bf16 %v3523_v26, %v11061_v9  ;;  %v2528_v44 = vsel %vm2461_vm5, %v14252_v1, %v2527_v21  ;;  %v6794_v40 = vpop.permute.xlu1 %6793  ;;  %v2380_v42 = vadd.f32 %v2303_v49, %v2153_v56  ;;  %v11174_v27 = vmul.f32 %v14127_v41, %v11045_v12 }
 0x2cf   : > { %v2606_v29 = vadd.f32 %v2528_v44, %v2379_v48  ;;  %v2530_v50 = vsel %vm2461_vm5, %v2527_v21, %v13582_v53  ;;  %v6796_v4 = vunpack.i.h.bf16 %v6794_v40  ;;  %v6795_v6 = vunpack.i.l.bf16 %v6794_v40 }
 0x2d0   : > { %6868 = vrot.lane.b32.xlu2 %v6867_v32, %s6974_s21  ;;  %v6789_v26 = vpop.permute.xlu0 %6788  ;;  %v14253_v56 = vrot.slane %v10804_v11, 4  ;;  %v2607_v49 = vadd.f32 %v2530_v50, %v2380_v42  ;;  %v11185_v1 = vmul.f32 %v14051_v51, %v11088_v28  ;;  %v11190_v44 = vmul.f32 %v14053_v22, %v11045_v12 }
 0x2d1   : > { %v6791_v25 = vunpack.i.h.bf16 %v6789_v26  ;;  %v6790_v48 = vunpack.i.l.bf16 %v6789_v26  ;;  %v11194_v21 = vmul.f32 %v14044_v10, %v11088_v28  ;;  %v11198_v42 = vadd.f32 %v11098_v47, %v2606_v29  ;;  %v11243_v53 = vpop.f32.mrf.mxu2 }
 0x2d2   : > { %v3264_v61 = vsel %vm1771_vm3, %v14253_v56, %v3263_v16  ;;  %v11202_v50 = vmul.f32 %v14045_v0, %v11088_v28  ;;  %v11210_v10 = vadd.f32 %v11098_v47, %v2607_v49  ;;  %14259 = vst [vmem:[#allocation6_spill] sm:$0xff] %v11243_v53  ;;  %v14261_v35 = vrot.slane %v11185_v1, 2 }
 0x2d3   : > { %v6887_v32 = vpack.i.bf16 %v3264_v61, %v11073_v2  ;;  %v6862_v40 = vpack.i.bf16 %v3264_v61, %v10672_v43  ;;  %v3750_v2 = vsel %vm3728_vm7, %v11086_v14, %v6790_v48  ;;  %v3847_v12 = vsel %vm3728_vm7, %v11104_v60, %v6791_v25  ;;  %v11217_v61 = vpop.f32.mrf.mxu0 }
 0x2d4   : > { %v3783_v43 = vsel %vm3761_vm8, %v3750_v2, %v6795_v6  ;;  %v3879_v29 = vsel %vm3761_vm8, %v3847_v12, %v6796_v4  ;;  %v3685_v26 = vrot.slane %v11198_v42, 6  ;;  %v3524_v56 = vrot.slane %v11198_v42, 5 }
 0x2d5   : > { %6888 = vrot.lane.b32.xlu0 %v6887_v32, %s6973_s20  ;;  %6863 = vrot.lane.b32.xlu1 %v6862_v40, %s6975_s22  ;;  %v14254_v60 = vrot.slane %v10639_v3, 2  ;;  %v14255_v6 = vrot.slane %v10804_v11, 1  ;;  %v14256_v4 = vrot.slane %v10639_v3, 1  ;;  %v3265_v48 = vrot.slane %v11198_v42, 4  ;;  %v11235_v2 = vpop.permute.xlu2 %6818 }
 0x2d6   : > { %4073 = vmatmul.f32.gmra.mxu0 %v3783_v43  ;;  %4186 = vmatmul.f32.gmra.mxu1 %v3879_v29  ;;  %v14257_v12 = vrot.slane %v11101_v63, 6  ;;  %v14258_v29 = vrot.slane %v11101_v63, 5  ;;  %v11293_v3 = vmul.f32 %v14200_v24, %v10729_v33 }
 0x2d7   : > { %v11225_v25 = vsel %vm1081_vm1, %v14254_v60, %v13583_v31  ;;  %v2745_v49 = vsel %vm854_vm0, %v14256_v4, %v14255_v6  ;;  %v11245_v31 = vpop.f32.mrf.mxu1  ;;  %v3266_v14 = vsel %vm1771_vm3, %v3263_v16, %v3265_v48  ;;  %v14262_v6 = vrot.slane %v10967_v8, 2 }
 0x2d8   : > { %v3686_v43 = vsel %vm2461_vm5, %v14257_v12, %v3685_v26  ;;  %v3525_v60 = vsel %vm2234_vm4, %v14258_v29, %v3524_v56  ;;  %14260 = vst [vmem:[#allocation15_spill] sm:$0xff] %v11245_v31  ;;  %v6877_v12 = vpack.i.bf16 %v3266_v14, %v10831_v17  ;;  %v11271_v8 = vmul.f32 %v14045_v0, %v10729_v33 }
 0x2d9   : > { %6382 = vmatmul.msk.f32.gmra.mxu2 %vm3695_vm6, %v3686_v43  ;;  %v6882_v40 = vpack.i.bf16 %v3525_v60, %v11225_v25  ;;  %v11261_v4 = vsel %vm1081_vm1, %v14262_v6, %v14261_v35  ;;  %v6811_v43 = vunpack.i.h.bf16 %v11164_v36  ;;  %v6902_v60 = vpack.i.bf16 %v3266_v14, %v2745_v49 }
 0x2da   : > { %v6810_v35 = vunpack.i.l.bf16 %v11164_v36  ;;  %v14263_v49 = vrot.slane %v11101_v63, 2  ;;  %v14264_v17 = vrot.slane %v10804_v11, 2  ;;  %v14265_v29 = vrot.slane %v11210_v10, 5 }
 0x2db   : > { %6883 = vrot.lane.b32.xlu2 %v6882_v40, %s6974_s21  ;;  %v14266_v36 = vrot.slane %v11101_v63, 1 }
 0x2dc   : > { %v11280_v14 = vsel %vm1081_vm1, %v14264_v17, %v14263_v49  ;;  %v3527_v16 = vsel %vm2234_vm4, %v3524_v56, %v14265_v29  ;;  %v14268_v49 = vrot.slane %v11038_v58, 1  ;;  %v14269_v17 = vrot.slane %v10823_v38, 1 }
 0x2dd   : > { %v6799_v32 = vpop.permute.xlu0 %6798  ;;  %6903 = vrot.lane.b32.xlu0 %v6902_v60, %s6973_s20  ;;  %6878 = vrot.lane.b32.xlu1 %v6877_v12, %s6975_s22  ;;  %v1503_v29 = vmul.f32 %v14127_v41, %v11088_v28  ;;  %v14271_v38 = vrot.slane %v11210_v10, 4 }
 0x2de   : > { %v6801_v6 = vunpack.i.h.bf16 %v6799_v32  ;;  %v6800_v53 = vunpack.i.l.bf16 %v6799_v32  ;;  %v6804_v40 = vpop.permute.xlu1 %6803  ;;  %v14267_v32 = vrot.slane %v10804_v11, 1  ;;  %v925_v12 = vsel %vm854_vm0, %v14269_v17, %v14268_v49  ;;  %v11304_v11 = vpop.permute.xlu2 %6828 }
 0x2df   : > { %v6806_v7 = vunpack.i.h.bf16 %v6804_v40  ;;  %v6805_v31 = vunpack.i.l.bf16 %v6804_v40  ;;  %v3268_v49 = vsel %vm1771_vm3, %v3265_v48, %v14271_v38  ;;  %v11315_v17 = vpop.f32.mrf.mxu0  ;;  %v11329_v40 = vpop.f32.mrf.mxu2 }
 0x2e0   : > { %v2747_v60 = vsel %vm854_vm0, %v14267_v32, %v14266_v36  ;;  %v3718_v56 = vsel %vm3695_vm6, %v10025_v13, %v6800_v53  ;;  %v3816_v33 = vsel %vm3695_vm6, %v10989_v62, %v6801_v6  ;;  %v14270_v36 = vrot.slane %v11210_v10, 6 }
 0x2e1   : > { %v3751_v13 = vsel %vm3728_vm7, %v3718_v56, %v6805_v31  ;;  %v6897_v53 = vpack.i.bf16 %v3527_v16, %v11280_v14  ;;  %v1001_v62 = vadd.f32 %v925_v12, %v10916_v52  ;;  %v11323_v6 = vmul.f32 %v14053_v22, %v11088_v28  ;;  %v11331_v31 = vpop.f32.mrf.mxu1 }
 0x2e2   : > { %v3688_v32 = vsel %vm2461_vm5, %v3685_v26, %v14270_v36  ;;  %v3784_v36 = vsel %vm3761_vm8, %v3751_v13, %v6810_v35  ;;  %v3848_v38 = vsel %vm3728_vm7, %v3816_v33, %v6806_v7  ;;  %v6917_v52 = vpack.i.bf16 %v3268_v49, %v2747_v60 }
 0x2e3   : > { %6383 = vmatmul.msk.f32.gmra.mxu2 %vm3695_vm6, %v3688_v32  ;;  %4076 = vmatmul.f32.gmra.mxu0 %v3784_v36  ;;  %v3880_v16 = vsel %vm3761_vm8, %v3848_v38, %v6811_v43  ;;  %v6892_v28 = vpack.i.bf16 %v3268_v49, %v11061_v9  ;;  %v1614_v12 = vrot.slane %v1503_v29, 3  ;;  %v14272_v35 = vrot.slane %v11271_v8, 2 }
 0x2e4   : > { %6898 = vrot.lane.b32.xlu2 %v6897_v53, %s6974_s21  ;;  %4189 = vmatmul.f32.gmra.mxu1 %v3880_v16  ;;  %v14273_v7 = vrot.slane %v10873_v46, 2  ;;  %v14274_v13 = vrot.slane %v11170_v5, 2  ;;  %v14275_v43 = vrot.slane %v11185_v1, 2  ;;  %v926_v60 = vrot.slane %v11082_v20, 1 }
 0x2e5   : > { %v1239_v32 = vpop.permute.xlu0 %1238  ;;  %6918 = vrot.lane.b32.xlu0 %v6917_v52, %s6973_s20  ;;  %v1841_v46 = vrot.slane %v11323_v6, 4  ;;  %6893 = vrot.lane.b32.xlu1 %v6892_v28, %s6975_s22  ;;  %v1041_v6 = vmul.f32 %v14045_v0, %v10954_v55  ;;  %v14279_v0 = vrot.slane %v11190_v44, 4  ;;  %v14280_v56 = vrot.slane %v10975_v45, 3 }
 0x2e6   : > { %v1152_v33 = vsel %vm1081_vm1, %v14273_v7, %v14272_v35  ;;  %v1390_v53 = vsel %vm1081_vm1, %v14275_v43, %v14274_v13  ;;  %v1279_v9 = vmul.f32 %v14051_v51, %v1239_v32  ;;  %v11350_v29 = vmul.f32 %v14127_v41, %v1239_v32  ;;  %v6814_v16 = vpop.permute.xlu1 %6813  ;;  %v1929_v52 = vpop.permute.xlu2 %1928 }
 0x2e7   : > { %v1228_v49 = vadd.f32 %v1152_v33, %v1001_v62  ;;  %v11355_v36 = vmul.f32 %v14053_v22, %v1239_v32  ;;  %v11358_v38 = vmul.f32 %v14126_v39, %v1239_v32  ;;  %v11361_v1 = vmul.f32 %v7162_v54, %v1239_v32  ;;  %v11383_v43 = vpop.f32.mrf.mxu0 }
 0x2e8   : > { %v11364_v20 = vmul.f32 %v11001_v19, %v1239_v32  ;;  %v14276_v41 = vrot.slane %v11174_v27, 3  ;;  %v734_v22 = vmul.f32 %v14200_v24, %v10954_v55  ;;  %v14277_v32 = vrot.slane %v11038_v58, 1 }
 0x2e9   : > { %v13588_v35 = vrot.slane %v11358_v38, 4  ;;  %v14278_v7 = vrot.slane %v11194_v21, 1  ;;  %v1464_v13 = vadd.f32 %v11261_v4, %v1228_v49  ;;  %v1391_v24 = vrot.slane %v1279_v9, 2  ;;  %v11395_v49 = vpop.f32.mrf.mxu1 }
 0x2ea   : > { %v1617_v62 = vsel %vm1544_vm2, %v1614_v12, %v14276_v41  ;;  %v927_v28 = vsel %vm854_vm0, %v14277_v32, %v926_v60  ;;  %v1618_v41 = vrot.slane %v11350_v29, 3  ;;  %v1844_v55 = vsel %vm1771_vm3, %v1841_v46, %v14279_v0 }
 0x2eb   : > { %v929_v33 = vsel %vm854_vm0, %v926_v60, %v14278_v7  ;;  %v1615_v58 = vsel %vm1544_vm2, %v14280_v56, %v1614_v12  ;;  %v6815_v32 = vunpack.i.l.bf16 %v6814_v16  ;;  %v1845_v21 = vrot.slane %v11355_v36, 4 }
 0x2ec   : > { %v6816_v9 = vunpack.i.h.bf16 %v6814_v16  ;;  %v1969_v29 = vmul.f32 %v14126_v39, %v1929_v52  ;;  %v1002_v7 = vadd.f32 %v927_v28, %v11293_v3  ;;  %v1003_v51 = vadd.f32 %v929_v33, %v734_v22  ;;  %v11410_v16 = vpop.f32.mrf.mxu2 }
 0x2ed   : > { %v11400_v0 = vmul.f32 %v7162_v54, %v1929_v52  ;;  %v11403_v45 = vmul.f32 %v11001_v19, %v1929_v52  ;;  %v14281_v12 = vrot.slane %v11078_v23, 4  ;;  %v1153_v36 = vrot.slane %v1041_v6, 2  ;;  %v6824_v4 = vpop.permute.xlu0 %6823 }
 0x2ee   : > { %v14282_v26 = vrot.slane %v11170_v5, 2  ;;  %v1691_v22 = vadd.f32 %v1615_v58, %v1464_v13  ;;  %v14283_v28 = vrot.slane %v11016_v34, 4  ;;  %v6826_v33 = vunpack.i.h.bf16 %v6824_v4 }
 0x2ef   : > { %v2078_v56 = vsel %vm1771_vm3, %v14281_v12, %v13588_v35  ;;  %v14284_v60 = vrot.slane %v11271_v8, 2  ;;  %v14285_v12 = vrot.slane %v11202_v50, 2  ;;  %v6825_v35 = vunpack.i.l.bf16 %v6824_v4 }
 0x2f0   : > { %v1392_v3 = vsel %vm1081_vm1, %v14282_v26, %v1391_v24  ;;  %v1842_v52 = vsel %vm1771_vm3, %v14283_v28, %v1841_v46  ;;  %v3719_v5 = vsel %vm3695_vm6, %v10091_v57, %v6815_v32  ;;  %v14286_v34 = vunpack.i.l.bf16 %v11235_v2 }
 0x2f1   : > { %v1154_v23 = vsel %vm1081_vm1, %v14284_v60, %v1153_v36  ;;  %v1156_v6 = vsel %vm1081_vm1, %v1153_v36, %v14285_v12  ;;  %v1918_v13 = vadd.f32 %v1842_v52, %v1691_v22  ;;  %v2081_v24 = vrot.slane %v1969_v29, 4  ;;  %v1924_v60 = vpop.permute.xlu1 %1923 }
 0x2f2   : > { %v1229_v48 = vadd.f32 %v1154_v23, %v1002_v7  ;;  %v1230_v26 = vadd.f32 %v1156_v6, %v1003_v51  ;;  %v3752_v46 = vsel %vm3728_vm7, %v3719_v5, %v14286_v34  ;;  %v14287_v8 = vrot.slane %v11361_v1, 5  ;;  %v11446_v23 = vpop.f32.mrf.mxu0 }
 0x2f3   : > { %v14288_v58 = vrot.slane %v11108_v30, 5  ;;  %v3785_v4 = vsel %vm3761_vm8, %v3752_v46, %v6825_v35  ;;  %v3817_v57 = vsel %vm3695_vm6, %v11008_v15, %v6816_v9  ;;  %v1968_v7 = vmul.f32 %v14126_v39, %v1924_v60 }
 0x2f4   : > { %v1465_v32 = vadd.f32 %v1390_v53, %v1229_v48  ;;  %v1466_v51 = vadd.f32 %v1392_v3, %v1230_v26  ;;  %v2154_v36 = vadd.f32 %v2078_v56, %v1918_v13  ;;  %4079 = vmatmul.f32.gmra.mxu0 %v3785_v4  ;;  %v14289_v29 = vrot.slane %v11174_v27, 3  ;;  %v11455_v3 = vpop.f32.mrf.mxu1  ;;  %v11466_v46 = vpop.f32.mrf.mxu2 }
 0x2f5   : > { %v2305_v50 = vsel %vm2234_vm4, %v14288_v58, %v14287_v8  ;;  %v2194_v30 = vmul.f32 %v7162_v54, %v1924_v60  ;;  %v2421_v28 = vmul.f32 %v11001_v19, %v1924_v60  ;;  %v14290_v52 = vunpack.i.h.bf16 %v11235_v2  ;;  %v6834_v2 = vpop.permute.xlu0 %6833 }
 0x2f6   : > { %v1619_v22 = vsel %vm1544_vm2, %v14289_v29, %v1618_v41  ;;  %v1692_v15 = vadd.f32 %v1617_v62, %v1465_v32  ;;  %v2079_v53 = vrot.slane %v1968_v7, 4  ;;  %v2308_v9 = vrot.slane %v11400_v0, 5 }
 0x2f7   : > { %v3849_v35 = vsel %vm3728_vm7, %v3817_v57, %v14290_v52  ;;  %v1693_v48 = vadd.f32 %v1619_v22, %v1466_v51  ;;  %v14291_v27 = vrot.slane %v11364_v20, 6  ;;  %v14292_v41 = vrot.slane %v11115_v18, 6 }
 0x2f8   : > { %v3881_v39 = vsel %vm3761_vm8, %v3849_v35, %v6826_v33  ;;  %v2306_v19 = vrot.slane %v2194_v30, 5  ;;  %v2381_v56 = vadd.f32 %v2305_v50, %v2154_v36  ;;  %v14293_v62 = vrot.slane %v11190_v44, 4  ;;  %v14298_v36 = vld [vmem:[#allocation13_spill] sm:$0xff] }
 0x2f9   : > { %v2532_v54 = vsel %vm2461_vm5, %v14292_v41, %v14291_v27  ;;  %4192 = vmatmul.f32.gmra.mxu1 %v3881_v39  ;;  %v1919_v6 = vadd.f32 %v1844_v55, %v1692_v15  ;;  %v14294_v33 = vrot.slane %v11358_v38, 4  ;;  %v2082_v5 = vsel %vm1771_vm3, %v2079_v53, %v2081_v24  ;;  %v6839_v60 = vpop.permute.xlu1 %6838 }
 0x2fa   : > { %v1846_v12 = vsel %vm1771_vm3, %v14293_v62, %v1845_v21  ;;  %v2535_v18 = vrot.slane %v11403_v45, 6  ;;  %v2533_v13 = vrot.slane %v2421_v28, 6  ;;  %v2909_v34 = vrot.slane %v11198_v42, 2 }
 0x2fb   : > { %v2080_v0 = vsel %vm1771_vm3, %v14294_v33, %v2079_v53  ;;  %v1920_v26 = vadd.f32 %v1846_v12, %v1693_v48  ;;  %v6836_v58 = vunpack.i.h.bf16 %v6834_v2  ;;  %v6835_v44 = vunpack.i.l.bf16 %v6834_v2 }
 0x2fc   : > { %v2155_v8 = vadd.f32 %v2080_v0, %v1919_v6  ;;  %v2748_v21 = vrot.slane %v11198_v42, 1  ;;  %v14295_v38 = vrot.slane %v11361_v1, 5  ;;  %v2608_v24 = vadd.f32 %v2532_v54, %v2381_v56 }
 0x2fd   : > { %v2156_v55 = vadd.f32 %v2082_v5, %v1920_v26  ;;  %v14296_v45 = vunpack.i.l.bf16 %v11304_v11  ;;  %v6841_v32 = vunpack.i.h.bf16 %v6839_v60  ;;  %v6840_v51 = vunpack.i.l.bf16 %v6839_v60  ;;  %v11513_v26 = vpop.f32.mrf.mxu1 }
 0x2fe   : > { %v2307_v50 = vsel %vm2234_vm4, %v14295_v38, %v2306_v19  ;;  %v14297_v7 = vunpack.i.h.bf16 %v11304_v11  ;;  %v14299_v22 = vmov %v14291_v27  ;;  %v11484_v30 = vadd.f32 %v11098_v47, %v2608_v24  ;;  %v11494_v27 = vpop.f32.mrf.mxu0 }
 0x2ff   : > { %v3720_v4 = vsel %vm3695_vm6, %v10216_v59, %v14296_v45  ;;  %v2382_v57 = vadd.f32 %v2307_v50, %v2155_v8  ;;  %v2534_v1 = vsel %vm2461_vm5, %v14299_v22, %v2533_v13  ;;  %v2309_v59 = vsel %vm2234_vm4, %v2306_v19, %v2308_v9  ;;  %v11518_v50 = vpop.f32.mrf.mxu2 }
 0x300   : > { %v3818_v29 = vsel %vm3695_vm6, %v14298_v36, %v14297_v7  ;;  %v3753_v28 = vsel %vm3728_vm7, %v3720_v4, %v6835_v44  ;;  %v2383_v48 = vadd.f32 %v2309_v59, %v2156_v55  ;;  %v3689_v53 = vrot.slane %v11484_v30, 6  ;;  %v4820_v59 = vld [vmem:[%s13309_s13 + $0x18] sm:$0xff] }
 0x301   : > { %v3850_v52 = vsel %vm3728_vm7, %v3818_v29, %v6836_v58  ;;  %v2609_v35 = vadd.f32 %v2534_v1, %v2382_v57  ;;  %v3786_v15 = vsel %vm3761_vm8, %v3753_v28, %v6840_v51  ;;  %v3528_v20 = vrot.slane %v11484_v30, 5  ;;  %v4817_v51 = vld [vmem:[%s13309_s13] sm:$0xff] }
 0x302   : > { %v3882_v11 = vsel %vm3761_vm8, %v3850_v52, %v6841_v32  ;;  %v3269_v39 = vrot.slane %v11484_v30, 4  ;;  %4082 = vmatmul.f32.gmra.mxu0 %v3786_v15  ;;  %v14300_v9 = vrot.slane %v11101_v63, 2  ;;  %v14301_v19 = vrot.slane %v11101_v63, 1 }
 0x303   : > { %4195 = vmatmul.f32.gmra.mxu1 %v3882_v11  ;;  %v2650_v41 = vadd.f32 %v11098_v47, %v2609_v35  ;;  %v2536_v56 = vsel %vm2461_vm5, %v2533_v13, %v2535_v18  ;;  %v14302_v62 = vrot.slane %v11210_v10, 6  ;;  %v14303_v6 = vrot.slane %v11210_v10, 5 }
 0x304   : > { %v2910_v54 = vsel %vm1081_vm1, %v14300_v9, %v2909_v34  ;;  %v2749_v2 = vsel %vm854_vm0, %v14301_v19, %v2748_v21  ;;  %v14304_v0 = vrot.slane %v11210_v10, 4  ;;  %v3009_v13 = vrot.slane %v11210_v10, 2  ;;  %v4818_v9 = vld [vmem:[%s13309_s13 + $0x8] sm:$0xff] }
 0x305   : > { %v3690_v12 = vsel %vm2461_vm5, %v14302_v62, %v3689_v53  ;;  %v3529_v33 = vsel %vm2234_vm4, %v14303_v6, %v3528_v20  ;;  %v2610_v44 = vadd.f32 %v2536_v56, %v2383_v48  ;;  %v3691_v21 = vrot.slane %v2650_v41, 6  ;;  %v11534_v36 = vpop.f32.mrf.mxu1  ;;  %v14305_v56 = vld [vmem:[#allocation35_spill] sm:$0xff] }
 0x306   : > { %v3270_v5 = vsel %vm1771_vm3, %v14304_v0, %v3269_v39  ;;  %6384 = vmatmul.msk.f32.gmra.mxu2 %vm3695_vm6, %v3690_v12  ;;  %v6912_v8 = vpack.i.bf16 %v3529_v33, %v2910_v54  ;;  %v3530_v55 = vrot.slane %v2650_v41, 5  ;;  %v3369_v38 = vrot.slane %v2650_v41, 4  ;;  %v11528_v57 = vpop.f32.mrf.mxu0  ;;  %v4819_v41 = vld [vmem:[%s13309_s13 + $0x10] sm:$0xff]  ;;  %v4822_v33 = vld [vmem:[%s13309_s13 + $0x28] sm:$0xff] }
 0x307   : > { %v6932_v58 = vpack.i.bf16 %v3270_v5, %v2749_v2  ;;  %v6907_v18 = vpack.i.bf16 %v3270_v5, %v11225_v25  ;;  %v2651_v25 = vadd.f32 %v11098_v47, %v2610_v44  ;;  %v3692_v45 = vsel %vm2461_vm5, %v3689_v53, %v3691_v21  ;;  %v11540_v1 = vpop.f32.mrf.mxu2  ;;  %v6844_v2 = vpop.permute.xlu0 %6843 }
 0x308   : > { %6913 = vrot.lane.b32.xlu2 %v6912_v8, %s6974_s21  ;;  %v3531_v60 = vsel %vm2234_vm4, %v3528_v20, %v3530_v55  ;;  %v3370_v24 = vsel %vm1771_vm3, %v3269_v39, %v3369_v38  ;;  %v3010_v4 = vsel %vm1081_vm1, %v2909_v34, %v3009_v13  ;;  %v3011_v22 = vrot.slane %v11484_v30, 2  ;;  %v4823_v39 = vld [vmem:[%s13309_s13 + $0x30] sm:$0xff]  ;;  %v6854_v5 = vpop.permute.xlu2 %6853  ;;  %v4821_v8 = vld [vmem:[%s13309_s13 + $0x20] sm:$0xff] }
 0x309   : > { %6933 = vrot.lane.b32.xlu0 %v6932_v58, %s6973_s20  ;;  %6908 = vrot.lane.b32.xlu1 %v6907_v18, %s6975_s22  ;;  %v6927_v32 = vpack.i.bf16 %v3531_v60, %v3010_v4  ;;  %v6922_v7 = vpack.i.bf16 %v3370_v24, %v11280_v14  ;;  %v3532_v29 = vrot.slane %v2651_v25, 5  ;;  %v3371_v47 = vrot.slane %v2651_v25, 4 }
 0x30a   : > { %v3693_v34 = vrot.slane %v2651_v25, 6  ;;  %v3012_v35 = vsel %vm1081_vm1, %v3009_v13, %v3011_v22  ;;  %v3160_v62 = vrot.slane %v14305_v56, 3  ;;  %v6846_v12 = vunpack.i.h.bf16 %v6844_v2  ;;  %v14308_v25 = vld [vmem:[#allocation66_spill] sm:$0xff]  ;;  %v4825_v22 = vld [vmem:[%s13309_s13 + $0x40] sm:$0xff] }
 0x30b   : > { %v3533_v28 = vsel %vm2234_vm4, %v3530_v55, %v3532_v29  ;;  %v3372_v14 = vsel %vm1771_vm3, %v3369_v38, %v3371_v47  ;;  %v6845_v6 = vunpack.i.l.bf16 %v6844_v2  ;;  %v6856_v60 = vunpack.i.h.bf16 %v6854_v5 }
 0x30c   : > { %v3694_v52 = vsel %vm2461_vm5, %v3691_v21, %v3693_v34  ;;  %v6942_v11 = vpack.i.bf16 %v3533_v28, %v3012_v35  ;;  %v6937_v48 = vpack.i.bf16 %v3372_v14, %v2910_v54  ;;  %v14306_v21 = vld [vmem:[#allocation47_spill] sm:$0xff]  ;;  %v6855_v24 = vunpack.i.l.bf16 %v6854_v5  ;;  %v11593_v34 = vld [vmem:[%s13300_s4] ss:$0 sm:$0xff]  ;;  %v14309_v28 = vld [vmem:[#allocation54_spill] sm:$0xff] }
 0x30d   : > { %v11552_v53 = vpop.f32.mrf.mxu1  ;;  %v14307_v55 = vrot.slane %v14306_v21, 3  ;;  %v4015_v14 = vadd.f32 %v11593_v34, %v14309_v28  ;;  %v14310_v35 = vld [vmem:[#allocation70_spill] sm:$0xff] }
 0x30e   : > { %6385 = vmatmul.msk.f32.gmra.mxu2 %vm3695_vm6, %v3692_v45  ;;  %v11549_v15 = vpop.f32.mrf.mxu0  ;;  %v3721_v45 = vsel %vm3695_vm6, %v14308_v25, %v6845_v6 }
 0x30f   : > { %v11556_v20 = vpop.f32.mrf.mxu2  ;;  %v3161_v38 = vsel %vm1544_vm2, %v14307_v55, %v3160_v62 }
 0x310   : > { %6928 = vrot.lane.b32.xlu2 %v6927_v32, %s6974_s21  ;;  %v3819_v4 = vsel %vm3695_vm6, %v3161_v38, %v6846_v12  ;;  %v14313_v12 = vld [vmem:[#allocation73_spill] sm:$0xff]  ;;  %v14316_v38 = vld [vmem:[#allocation23_spill] sm:$0xff] }
 0x311   : > { %4921 = vperm.xlu0 %6464, %v4817_v51   ;;  %6923 = vrot.lane.b32.xlu1 %v6922_v7, %s6975_s22  ;;  %v4021_v6 = vadd.f32 %v11593_v34, %v14313_v12 }
 0x315   : > { %v11567_v19 = vpop.f32.mrf.mxu1 }
 0x316   : > { %6386 = vmatmul.msk.f32.gmra.mxu2 %vm3695_vm6, %v3694_v52  ;;  %v4059_v54 = vpop.f32.mrf.mxu0 }
 0x317   : > { %v11573_v0 = vpop.f32.mrf.mxu2 }
 0x318   : > { %6943 = vrot.lane.b32.xlu2 %v6942_v11, %s6974_s21  ;;  %v4018_v11 = vadd.f32 %v11593_v34, %v14310_v35  ;;  %v14320_v35 = vld [vmem:[#allocation56_spill] sm:$0xff] }
 0x319   : > { %4936 = vperm.xlu0 %6464, %v4820_v59   ;;  %6938 = vrot.lane.b32.xlu1 %v6937_v48, %s6975_s22  ;;  %v4824_v59 = vld [vmem:[%s13309_s13 + $0x38] sm:$0xff]  ;;  %v14311_v48 = vld [vmem:[#allocation52_spill] sm:$0xff] }
 0x31b   : > { %v6849_v58 = vpop.permute.xlu1 %6848 }
 0x31c   : > { %v6851_v18 = vunpack.i.h.bf16 %v6849_v58  ;;  %v6850_v13 = vunpack.i.l.bf16 %v6849_v58 }
 0x31d   : > { %v4175_v32 = vpop.f32.mrf.mxu1 }
 0x31e   : > { %v4062_v44 = vpop.f32.mrf.mxu0  ;;  %v3754_v51 = vsel %vm3728_vm7, %v3721_v45, %v6850_v13  ;;  %v3851_v7 = vsel %vm3728_vm7, %v3819_v4, %v6851_v18  ;;  %v14315_v18 = vld [vmem:[#allocation42_spill] sm:$0xff]  ;;  %v14317_v45 = vld [vmem:[#allocation53_spill] sm:$0xff] }
 0x31f   : > { %v3787_v29 = vsel %vm3761_vm8, %v3754_v51, %v6855_v24  ;;  %v3883_v47 = vsel %vm3761_vm8, %v3851_v7, %v6856_v60  ;;  %v4288_v52 = vpop.f32.mrf.mxu2  ;;  %v4027_v13 = vadd.f32 %v11593_v34, %v14315_v18  ;;  %v4024_v60 = vadd.f32 %v11593_v34, %v14316_v38  ;;  %v14318_v51 = vld [vmem:[#allocation36_spill] sm:$0xff] }
 0x320   : > { %4931 = vperm.xlu2 %6466, %v4819_v41   ;;  %4085 = vmatmul.f32.gmra.mxu0 %v3787_v29  ;;  %v14312_v41 = vld [vmem:[#allocation65_spill] sm:$0xff]  ;;  %v4060_v24 = vadd.f32 %v11593_v34, %v4059_v54  ;;  %v4054_v29 = vadd.f32 %v11593_v34, %v11528_v57  ;;  %v4048_v54 = vadd.f32 %v11593_v34, %v11446_v23  ;;  %v14326_v38 = vld [vmem:[#allocation16_spill] sm:$0xff] }
 0x321   : > { %4951 = vperm.xlu0 %6464, %v4823_v39   ;;  %4926 = vperm.xlu1 %6465, %v4818_v9   ;;  %v4012_v39 = vadd.f32 %v11593_v34, %v14311_v48  ;;  %v4128_v9 = vadd.f32 %v14312_v41, %v4015_v14  ;;  %v4057_v14 = vadd.f32 %v11593_v34, %v11549_v15 }
 0x322   : > { %4198 = vmatmul.f32.gmra.mxu1 %v3883_v47  ;;  %v4826_v47 = vld [vmem:[%s13309_s13 + $0x48] sm:$0xff]  ;;  %v4045_v41 = vadd.f32 %v11593_v34, %v11383_v43  ;;  %v4173_v15 = vadd.f32 %v11567_v19, %v4060_v24  ;;  %v4167_v43 = vadd.f32 %v11534_v36, %v4054_v29  ;;  %v14327_v24 = vld [vmem:[#allocation3_spill] sm:$0xff] }
 0x323   : > { %v11619_v4 = vadd.f32 %v14317_v45, %v4012_v39  ;;  %v11622_v7 = vadd.f32 %v14318_v51, %v4128_v9  ;;  %v14322_v39 = vld [vmem:[#allocation38_spill] sm:$0xff]  ;;  %v14329_v45 = vld [vmem:[#allocation19_spill] sm:$0xff] }
 0x324   : > { %v4030_v57 = vadd.f32 %v11593_v34, %v14322_v39  ;;  %v14333_v39 = vld [vmem:[#allocation12_spill] sm:$0xff] }
 0x326   : > { %v4065_v2 = vpop.f32.mrf.mxu0 }
 0x327   : > { %v4066_v5 = vadd.f32 %v11593_v34, %v4065_v2  ;;  %v4178_v55 = vpop.f32.mrf.mxu1  ;;  %v4291_v9 = vpop.f32.mrf.mxu2  ;;  %v14323_v2 = vld [vmem:[#allocation24_spill] sm:$0xff] }
 0x328   : > { %4946 = vperm.xlu2 %6466, %v4822_v33   ;;  %v4063_v33 = vadd.f32 %v11593_v34, %v4062_v44  ;;  %v4051_v44 = vadd.f32 %v11593_v34, %v11494_v27  ;;  %v14321_v27 = vld [vmem:[#allocation40_spill] sm:$0xff]  ;;  %v4137_v12 = vadd.f32 %v14323_v2, %v4024_v60 }
 0x329   : > { %4941 = vperm.xlu1 %6465, %v4821_v8   ;;  %v14314_v8 = vld [vmem:[#allocation64_spill] sm:$0xff]  ;;  %v4179_v25 = vadd.f32 %v4178_v55, %v4066_v5  ;;  %v4140_v48 = vadd.f32 %v14321_v27, %v4027_v13  ;;  %v4042_v5 = vadd.f32 %v11593_v34, %v11315_v17  ;;  %v4161_v13 = vadd.f32 %v11455_v3, %v4048_v54  ;;  %v14332_v27 = vld [vmem:[#allocation5_spill] sm:$0xff] }
 0x32a   : > { %v4131_v58 = vadd.f32 %v14314_v8, %v4018_v11  ;;  %v4164_v8 = vadd.f32 %v11513_v26, %v4051_v44  ;;  %v4170_v55 = vadd.f32 %v11552_v53, %v4057_v14  ;;  %v4036_v17 = vadd.f32 %v11593_v34, %v11137_v37  ;;  %v14330_v53 = vld [vmem:[#allocation15_spill] sm:$0xff] }
 0x32b   : > { %v11660_v60 = vadd.f32 %v14326_v38, %v4140_v48  ;;  %v4158_v26 = vadd.f32 %v11395_v49, %v4045_v41  ;;  %v4286_v3 = vadd.f32 %v11573_v0, %v4173_v15  ;;  %v4155_v29 = vadd.f32 %v11331_v31, %v4042_v5  ;;  %v14331_v0 = vld [vmem:[#allocation4_spill] sm:$0xff]  ;;  %v14334_v41 = vld [vmem:[#allocation6_spill] sm:$0xff] }
 0x32c   : > { %v11637_v11 = vadd.f32 %v14320_v35, %v4131_v58  ;;  %v14325_v58 = vld [vmem:[#allocation72_spill] sm:$0xff]  ;;  %v4274_v37 = vadd.f32 %v11466_v46, %v4161_v13  ;;  %v4283_v49 = vadd.f32 %v11556_v20, %v4170_v55  ;;  %v4149_v48 = vadd.f32 %v14332_v27, %v4036_v17 }
 0x32d   : > { %v4271_v31 = vadd.f32 %v11410_v16, %v4158_v26  ;;  %v4268_v2 = vadd.f32 %v11329_v40, %v4155_v29 }
 0x32e   : > { %v4386_v15 = vrot.slane %v4274_v37, 1 }
 0x32f   : > { %v4384_v13 = vrot.slane %v4271_v31, 1  ;;  %v4382_v26 = vrot.slane %v4268_v2, 1 }
 0x330   : > { %4961 = vperm.xlu2 %6466, %v4825_v22   ;;  %v14319_v22 = vld [vmem:[#allocation57_spill] sm:$0xff] }
 0x331   : > { %4956 = vperm.xlu1 %6465, %v4824_v59   ;;  %v4134_v28 = vadd.f32 %v14319_v22, %v4021_v6  ;;  %v4176_v59 = vadd.f32 %v4175_v32, %v4063_v33  ;;  %v14324_v6 = vld [vmem:[#allocation14_spill] sm:$0xff]  ;;  %v4292_v32 = vadd.f32 %v4291_v9, %v4179_v25  ;;  %v4039_v33 = vadd.f32 %v11593_v34, %v11217_v61  ;;  %v14328_v25 = vld [vmem:[#allocation60_spill] sm:$0xff] }
 0x332   : > { %v4033_v23 = vadd.f32 %v11593_v34, %v14324_v6  ;;  %v4143_v61 = vadd.f32 %v14327_v24, %v4030_v57  ;;  %v11667_v36 = vadd.f32 %v14328_v25, %v4137_v12  ;;  %v4280_v22 = vadd.f32 %v11540_v1, %v4167_v43  ;;  %v4294_v6 = vpop.f32.mrf.mxu2  ;;  %v14335_v43 = vld [vmem:[#allocation34_spill] sm:$0xff]  ;;  %v14336_v24 = vld [vmem:[#allocation51_spill] sm:$0xff] }
 0x333   : > { %v11655_v18 = vadd.f32 %v14325_v58, %v4134_v28  ;;  %v4289_v19 = vadd.f32 %v4288_v52, %v4176_v59  ;;  %v4398_v44 = vrot.slane %v4292_v32, 1  ;;  %v4152_v52 = vadd.f32 %v14330_v53, %v4039_v33  ;;  %v4068_v28 = vpop.f32.mrf.mxu0 }
 0x334   : > { %v4146_v51 = vadd.f32 %v14329_v45, %v4033_v23  ;;  %v4069_v14 = vadd.f32 %v11593_v34, %v4068_v28  ;;  %v4372_v59 = vrot.slane %v11660_v60, 1  ;;  %v11680_v35 = vadd.f32 %v14331_v0, %v4143_v61  ;;  %v6859_v28 = vpop.permute.xlu0 %6858 }
 0x335   : > { %v4396_v54 = vrot.slane %v4289_v19, 1  ;;  %v4394_v57 = vrot.slane %v4286_v3, 1  ;;  %v4265_v9 = vadd.f32 %v14334_v41, %v4152_v52  ;;  %v4390_v23 = vrot.slane %v4280_v22, 1  ;;  %v14337_v41 = vld [vmem:[#allocation33_spill] sm:$0xff] }
 0x336   : > { %v11685_v1 = vadd.f32 %v14333_v39, %v4146_v51  ;;  %v4392_v33 = vrot.slane %v4283_v49, 1  ;;  %v4262_v58 = vadd.f32 %v14335_v43, %v4149_v48  ;;  %v3162_v61 = vrot.slane %v14336_v24, 3  ;;  %v6869_v39 = vpop.permute.xlu2 %6868 }
 0x337   : > { %v4399_v20 = vsel %vm854_vm0, %v4396_v54, %v4398_v44  ;;  %v4397_v16 = vsel %vm854_vm0, %v4394_v57, %v4396_v54  ;;  %v4380_v53 = vrot.slane %v4265_v9, 1  ;;  %v4387_v29 = vsel %vm854_vm0, %v4384_v13, %v4386_v15 }
 0x338   : > { %v11695_v55 = vmax.f32 %v4289_v19, %v4399_v20  ;;  %v4376_v38 = vrot.slane %v11685_v1, 1  ;;  %v4395_v17 = vsel %vm854_vm0, %v4392_v33, %v4394_v57  ;;  %v11701_v25 = vmax.f32 %v4286_v3, %v4397_v16 }
 0x339   : > { %4966 = vperm.xlu1 %6465, %v4826_v47   ;;  %v4277_v47 = vadd.f32 %v11518_v50, %v4164_v8  ;;  %v4181_v50 = vpop.f32.mrf.mxu1  ;;  %v4374_v8 = vrot.slane %v11680_v35, 1  ;;  %v4393_v52 = vsel %vm854_vm0, %v4390_v23, %v4392_v33  ;;  %v4466_v54 = vmax.f32 %v4283_v49, %v4395_v17 }
 0x33a   : > { %v4182_v46 = vadd.f32 %v4181_v50, %v4069_v14  ;;  %v4551_v3 = vrot.slane %v11695_v55, 2  ;;  %v4385_v0 = vsel %vm854_vm0, %v4382_v26, %v4384_v13  ;;  %v4378_v27 = vrot.slane %v4262_v58, 1 }
 0x33b   : > { %v4388_v12 = vrot.slane %v4277_v47, 1  ;;  %v3163_v48 = vsel %vm1544_vm2, %v3160_v62, %v3162_v61  ;;  %v4462_v49 = vmax.f32 %v4271_v31, %v4387_v29  ;;  %v6861_v20 = vunpack.i.h.bf16 %v6859_v28 }
 0x33c   : > { %v11690_v5 = vadd.f32 %v4294_v6, %v4182_v46  ;;  %v4465_v46 = vmax.f32 %v4280_v22, %v4393_v52  ;;  %v11722_v6 = vmax.f32 %v4268_v2, %v4385_v0  ;;  %v6860_v22 = vunpack.i.l.bf16 %v6859_v28  ;;  %v14338_v0 = vld [vmem:[#allocation50_spill] sm:$0xff] }
 0x33d   : > { %v4391_v45 = vsel %vm854_vm0, %v4388_v12, %v4390_v23  ;;  %v4389_v51 = vsel %vm854_vm0, %v4386_v15, %v4388_v12  ;;  %v3164_v12 = vrot.slane %v14337_v41, 3  ;;  %v4383_v23 = vsel %vm854_vm0, %v4380_v53, %v4382_v26 }
 0x33e   : > { %v4400_v40 = vrot.slane %v11690_v5, 1  ;;  %v4463_v50 = vmax.f32 %v4274_v37, %v4389_v51  ;;  %v4547_v15 = vrot.slane %v4466_v54, 2  ;;  %v4381_v37 = vsel %vm854_vm0, %v4378_v27, %v4380_v53 }
 0x33f   : > { %v4545_v43 = vrot.slane %v4465_v46, 2  ;;  %v4539_v2 = vrot.slane %v4462_v49, 2  ;;  %v11731_v17 = vmax.f32 %v4265_v9, %v4383_v23  ;;  %v4537_v51 = vrot.slane %v11722_v6, 2 }
 0x340   : > { %v4401_v19 = vsel %vm854_vm0, %v4398_v44, %v4400_v40  ;;  %v4464_v44 = vmax.f32 %v4277_v47, %v4391_v45  ;;  %v4541_v31 = vrot.slane %v4463_v50, 2  ;;  %v4379_v52 = vsel %vm854_vm0, %v4376_v38, %v4378_v27 }
 0x341   : > { %v11710_v14 = vmax.f32 %v4292_v32, %v4401_v19  ;;  %v4549_v32 = vrot.slane %v11701_v25, 2  ;;  %v11734_v19 = vmax.f32 %v4262_v58, %v4381_v37  ;;  %v6871_v53 = vunpack.i.h.bf16 %v6869_v39 }
 0x342   : > { %v4543_v16 = vrot.slane %v4464_v44, 2  ;;  %v3820_v9 = vsel %vm3695_vm6, %v3163_v48, %v6861_v20  ;;  %v11750_v48 = vmax.f32 %v11685_v1, %v4379_v52  ;;  %v6884_v20 = vpop.permute.xlu2 %6883 }
 0x343   : > { %v4553_v57 = vrot.slane %v11710_v14, 2  ;;  %v4552_v47 = vsel %vm1081_vm1, %v4549_v32, %v4551_v3  ;;  %v4550_v13 = vsel %vm1081_vm1, %v4547_v15, %v4549_v32  ;;  %v3722_v32 = vsel %vm3695_vm6, %v14338_v0, %v6860_v22 }
 0x344   : > { %v4624_v45 = vmax.f32 %v4465_v46, %v4552_v47  ;;  %v4623_v23 = vmax.f32 %v4464_v44, %v4550_v13  ;;  %v6874_v46 = vpop.permute.xlu0 %6873  ;;  %v4546_v27 = vsel %vm1081_vm1, %v4543_v16, %v4545_v43  ;;  %v4377_v47 = vsel %vm854_vm0, %v4374_v8, %v4376_v38 }
 0x345   : > { %v4554_v62 = vsel %vm1081_vm1, %v4551_v3, %v4553_v57  ;;  %v6870_v3 = vunpack.i.l.bf16 %v6869_v39  ;;  %v4368_v44 = vrot.slane %v11655_v18, 1  ;;  %v4544_v22 = vsel %vm1081_vm1, %v4541_v31, %v4543_v16 }
 0x346   : > { %v4625_v33 = vmax.f32 %v4466_v54, %v4554_v62  ;;  %v4548_v54 = vsel %vm1081_vm1, %v4545_v43, %v4547_v15  ;;  %v4375_v38 = vsel %vm854_vm0, %v4372_v59, %v4374_v8  ;;  %v6876_v43 = vunpack.i.h.bf16 %v6874_v46 }
 0x347   : > { %v6864_v26 = vpop.permute.xlu1 %6863  ;;  %v4622_v37 = vmax.f32 %v4463_v50, %v4548_v54  ;;  %v6875_v50 = vunpack.i.l.bf16 %v6874_v46  ;;  %v4621_v1 = vmax.f32 %v4462_v49, %v4546_v27  ;;  %v4540_v13 = vsel %vm1081_vm1, %v4537_v51, %v4539_v2  ;;  %v14339_v27 = vld [vmem:[#allocation69_spill] sm:$0xff] }
 0x348   : > { %4695 = vmatpush.msra.mxu3 %v4625_v33  ;;  %v6866_v29 = vunpack.i.h.bf16 %v6864_v26  ;;  %v6865_v28 = vunpack.i.l.bf16 %v6864_v26  ;;  %v4542_v33 = vsel %vm1081_vm1, %v4539_v2, %v4541_v31  ;;  %v4370_v26 = vrot.slane %v11667_v36, 1 }
 0x349   : > { %v3165_v16 = vsel %vm1544_vm2, %v3162_v61, %v3164_v12  ;;  %v4535_v31 = vrot.slane %v11731_v17, 2  ;;  %v4620_v8 = vmax.f32 %v11722_v6, %v4544_v22  ;;  %v4619_v49 = vmax.f32 %v11731_v17, %v4542_v33 }
 0x34a   : > { %4696 = vmatpush.msra.mxu3 %v4624_v45  ;;  %v3755_v62 = vsel %vm3728_vm7, %v3722_v32, %v6865_v28  ;;  %v3852_v58 = vsel %vm3728_vm7, %v3820_v9, %v6866_v29  ;;  %v4533_v45 = vrot.slane %v11734_v19, 2  ;;  %v4457_v2 = vmax.f32 %v11680_v35, %v4377_v47  ;;  %v6899_v33 = vpop.permute.xlu2 %6898 }
 0x34b   : > { %v3788_v39 = vsel %vm3761_vm8, %v3755_v62, %v6870_v3  ;;  %v3884_v15 = vsel %vm3761_vm8, %v3852_v58, %v6871_v53  ;;  %v11773_v53 = vmax.f32 %v11660_v60, %v4375_v38  ;;  %v4618_v54 = vmax.f32 %v11734_v19, %v4540_v13 }
 0x34c   : > { %4697 = vmatpush.msra.mxu3 %v4623_v23  ;;  %4088 = vmatmul.f32.gmra.mxu0 %v3788_v39  ;;  %v4531_v61 = vrot.slane %v11750_v48, 2  ;;  %v6886_v3 = vunpack.i.h.bf16 %v6884_v20  ;;  %v6885_v0 = vunpack.i.l.bf16 %v6884_v20  ;;  %v3723_v32 = vsel %vm3695_vm6, %v14306_v21, %v6875_v50  ;;  %v6889_v17 = vpop.permute.xlu0 %6888 }
 0x34d   : > { %4201 = vmatmul.f32.gmra.mxu1 %v3884_v15  ;;  %v3821_v6 = vsel %vm3695_vm6, %v3165_v16, %v6876_v43  ;;  %v3166_v23 = vrot.slane %v11101_v63, 3  ;;  %v4538_v46 = vsel %vm1081_vm1, %v4535_v31, %v4537_v51  ;;  %v4536_v58 = vsel %vm1081_vm1, %v4533_v45, %v4535_v31 }
 0x34e   : > { %4698 = vmatpush.msra.mxu3 %v4622_v37  ;;  %v4373_v21 = vsel %vm854_vm0, %v4370_v26, %v4372_v59  ;;  %v4238_v47 = vadd.f32 %v14339_v27, %v11619_v4  ;;  %v4366_v39 = vrot.slane %v11637_v11, 1  ;;  %v4529_v15 = vrot.slane %v4457_v2, 2 }
 0x34f   : > { %v6879_v52 = vpop.permute.xlu1 %6878  ;;  %v4534_v51 = vsel %vm1081_vm1, %v4531_v61, %v4533_v45  ;;  %v6891_v37 = vunpack.i.h.bf16 %v6889_v17  ;;  %v6890_v20 = vunpack.i.l.bf16 %v6889_v17  ;;  %v4617_v22 = vmax.f32 %v11750_v48, %v4538_v46 }
 0x350   : > { %4699 = vmatpush.msra.mxu3 %v4621_v1  ;;  %v6881_v29 = vunpack.i.h.bf16 %v6879_v52  ;;  %v6880_v28 = vunpack.i.l.bf16 %v6879_v52  ;;  %v4371_v60 = vsel %vm854_vm0, %v4368_v44, %v4370_v26  ;;  %v4364_v59 = vrot.slane %v11622_v7, 1 }
 0x351   : > { %v4616_v4 = vmax.f32 %v4457_v2, %v4536_v58  ;;  %v4527_v38 = vrot.slane %v11773_v53, 2  ;;  %v4455_v43 = vmax.f32 %v11667_v36, %v4373_v21  ;;  %v3167_v1 = vsel %vm1544_vm2, %v3164_v12, %v3166_v23 }
 0x352   : > { %4700 = vmatpush.msra.mxu3 %v4620_v8  ;;  %v3756_v35 = vsel %vm3728_vm7, %v3723_v32, %v6880_v28  ;;  %v3853_v9 = vsel %vm3728_vm7, %v3821_v6, %v6881_v29  ;;  %v4615_v48 = vmax.f32 %v11773_v53, %v4534_v51  ;;  %v4532_v13 = vsel %vm1081_vm1, %v4529_v15, %v4531_v61 }
 0x353   : > { %v3789_v19 = vsel %vm3761_vm8, %v3756_v35, %v6885_v0  ;;  %v3885_v62 = vsel %vm3761_vm8, %v3853_v9, %v6886_v3  ;;  %v4369_v26 = vsel %vm854_vm0, %v4366_v39, %v4368_v44  ;;  %v4454_v36 = vmax.f32 %v11655_v18, %v4371_v60 }
 0x354   : > { %4701 = vmatpush.msra.mxu3 %v4619_v49  ;;  %4091 = vmatmul.f32.gmra.mxu0 %v3789_v19  ;;  %v4530_v45 = vsel %vm1081_vm1, %v4527_v38, %v4529_v15  ;;  %v6901_v52 = vunpack.i.h.bf16 %v6899_v33  ;;  %v6900_v8 = vunpack.i.l.bf16 %v6899_v33  ;;  %v3724_v12 = vsel %vm3695_vm6, %v14305_v56, %v6890_v20  ;;  %v6904_v21 = vpop.permute.xlu0 %6903 }
 0x355   : > { %4204 = vmatmul.f32.gmra.mxu1 %v3885_v62  ;;  %v3822_v49 = vsel %vm3695_vm6, %v3167_v1, %v6891_v37  ;;  %v4525_v29 = vrot.slane %v4455_v43, 2  ;;  %v4453_v44 = vmax.f32 %v11637_v11, %v4369_v26  ;;  %v4363_v61 = vrot.slane %v4238_v47, 1 }
 0x356   : > { %4702 = vmatpush.msra.mxu3 %v4618_v54  ;;  %v4614_v54 = vmax.f32 %v4455_v43, %v4532_v13  ;;  %v4523_v56 = vrot.slane %v4454_v36, 2  ;;  %v4367_v0 = vsel %vm854_vm0, %v4364_v59, %v4366_v39  ;;  %v4613_v32 = vmax.f32 %v4454_v36, %v4530_v45 }
 0x357   : > { %v6894_v50 = vpop.permute.xlu1 %6893  ;;  %v4528_v3 = vsel %vm1081_vm1, %v4525_v29, %v4527_v38  ;;  %v4522_v6 = vrot.slane %v4453_v44, 2  ;;  %v4365_v11 = vsel %vm854_vm0, %v4363_v61, %v4364_v59  ;;  %v4452_v9 = vmax.f32 %v11622_v7, %v4367_v0 }
 0x358   : > { %4703 = vmatpush.msra.mxu3 %v4617_v22  ;;  %v6896_v16 = vunpack.i.h.bf16 %v6894_v50  ;;  %v6895_v31 = vunpack.i.l.bf16 %v6894_v50  ;;  %v4526_v17 = vsel %vm1081_vm1, %v4523_v56, %v4525_v29  ;;  %v4612_v35 = vmax.f32 %v4453_v44, %v4528_v3 }
 0x359   : > { %v4524_v46 = vsel %vm1081_vm1, %v4522_v6, %v4523_v56  ;;  %v4611_v19 = vmax.f32 %v4452_v9, %v4526_v17  ;;  %v4451_v62 = vmax.f32 %v4238_v47, %v4365_v11  ;;  %v3168_v39 = vrot.slane %v11198_v42, 3  ;;  %v11856_v9 = vpop.f32.mrf.mxu2 }
 0x35a   : > { %4704 = vmatpush.msra.mxu3 %v4616_v4  ;;  %v3757_v2 = vsel %vm3728_vm7, %v3724_v12, %v6895_v31  ;;  %v3854_v53 = vsel %vm3728_vm7, %v3822_v49, %v6896_v16  ;;  %v6906_v15 = vunpack.i.h.bf16 %v6904_v21  ;;  %v6905_v51 = vunpack.i.l.bf16 %v6904_v21  ;;  %v4639_v21 = vld [vmem:[%s13307_s11] sm:$0xff] }
 0x35b   : > { %v3790_v28 = vsel %vm3761_vm8, %v3757_v2, %v6900_v8  ;;  %v3886_v18 = vsel %vm3761_vm8, %v3854_v53, %v6901_v52  ;;  %v4610_v58 = vmax.f32 %v4451_v62, %v4524_v46  ;;  %v3169_v7 = vsel %vm1544_vm2, %v3166_v23, %v3168_v39  ;;  %v11858_v46 = vpop.f32.mrf.mxu0 }
 0x35c   : > { %4705 = vmatpush.msra.mxu3 %v4615_v48  ;;  %4094 = vmatmul.f32.gmra.mxu0 %v3790_v28  ;;  %v3725_v47 = vsel %vm3695_vm6, %v14336_v24, %v6905_v51  ;;  %v3823_v33 = vsel %vm3695_vm6, %v3169_v7, %v6906_v15  ;;  %v6919_v4 = vpop.permute.xlu0 %6918  ;;  %v3170_v23 = vrot.slane %v11210_v10, 3  ;;  %v3172_v29 = vrot.slane %v11484_v30, 3  ;;  %v4641_v51 = vld [vmem:[%s13307_s11 + $0x10] sm:$0xff]  ;;  %v4643_v7 = vld [vmem:[%s13307_s11 + $0x20] sm:$0xff] }
 0x35d   : > { %4207 = vmatmul.f32.gmra.mxu1 %v3886_v18  ;;  %v6921_v48 = vunpack.i.h.bf16 %v6919_v4  ;;  %v6920_v13 = vunpack.i.l.bf16 %v6919_v4 }
 0x35e   : > { %4706 = vmatpush.msra.mxu3 %v4614_v54  ;;  %v3171_v31 = vsel %vm1544_vm2, %v3168_v39, %v3170_v23  ;;  %v3173_v56 = vsel %vm1544_vm2, %v3170_v23, %v3172_v29  ;;  %v4647_v23 = vld [vmem:[%s13307_s11 + $0x40] sm:$0xff] }
 0x35f   : > { %v3726_v52 = vsel %vm3695_vm6, %v14337_v41, %v6920_v13  ;;  %v3824_v8 = vsel %vm3695_vm6, %v3171_v31, %v6921_v48 }
 0x360   : > { %4707 = vmatpush.msra.mxu3 %v4613_v32 }
 0x361   : > { %v11862_v62 = vpop.f32.mrf.mxu2 }
 0x362   : > { %4708 = vmatpush.msra.mxu3 %v4612_v35  ;;  %v6914_v27 = vpop.permute.xlu2 %6913 }
 0x363   : > { %v6916_v60 = vunpack.i.h.bf16 %v6914_v27  ;;  %v6915_v59 = vunpack.i.l.bf16 %v6914_v27 }
 0x364   : > { %4709 = vmatpush.msra.mxu3 %v4611_v19  ;;  %v11860_v19 = vpop.f32.mrf.mxu1 }
 0x366   : > { %4710 = vmatpush.msra.mxu3 %v4610_v58 }
 0x367   : > { %4711 = vmatmul.f32.vlgmr.msra.gmra.mxu3 %v4639_v21 }
 0x369   : > { %v11871_v27 = vpop.f32.mrf.mxu2 }
 0x36a   : > { %v6929_v1 = vpop.permute.xlu2 %6928 }
 0x36b   : > { %v6931_v36 = vunpack.i.h.bf16 %v6929_v1  ;;  %v6930_v45 = vunpack.i.l.bf16 %v6929_v1 }
 0x36c   : > { %v11866_v58 = vpop.f32.mrf.mxu1 }
 0x36f   : > { %4714 = vmatmul.f32.gmra.mxu3 %v4641_v51 }
 0x372   : > { %v6944_v18 = vpop.permute.xlu2 %6943 }
 0x373   : > { %v6946_v3 = vunpack.i.h.bf16 %v6944_v18  ;;  %v6945_v0 = vunpack.i.l.bf16 %v6944_v18 }
 0x374   : > { %v11875_v15 = vpop.f32.mrf.mxu1 }
 0x377   : > { %4717 = vmatmul.f32.gmra.mxu3 %v4643_v7 }
 0x37b   : > { %v6909_v37 = vpop.permute.xlu1 %6908  ;;  %v6934_v12 = vpop.permute.xlu0 %6933 }
 0x37c   : > { %v6911_v20 = vunpack.i.h.bf16 %v6909_v37  ;;  %v6910_v22 = vunpack.i.l.bf16 %v6909_v37  ;;  %v6936_v44 = vunpack.i.h.bf16 %v6934_v12  ;;  %v6935_v28 = vunpack.i.l.bf16 %v6934_v12  ;;  %v11880_v37 = vpop.f32.mrf.mxu2 }
 0x37e   : > { %v3758_v38 = vsel %vm3728_vm7, %v3725_v47, %v6910_v22  ;;  %v3855_v42 = vsel %vm3728_vm7, %v3823_v33, %v6911_v20  ;;  %v3727_v32 = vsel %vm3695_vm6, %v11101_v63, %v6935_v28  ;;  %v3825_v6 = vsel %vm3695_vm6, %v3173_v56, %v6936_v44  ;;  %v11864_v63 = vpop.f32.mrf.mxu0  ;;  %v11882_v22 = vpop.f32.mrf.mxu1  ;;  %v4655_v28 = vld [vmem:[%s13307_s11 + $0x80] sm:$0xff] }
 0x37f   : > { %v3791_v43 = vsel %vm3761_vm8, %v3758_v38, %v6915_v59  ;;  %v3887_v50 = vsel %vm3761_vm8, %v3855_v42, %v6916_v60  ;;  %v4645_v60 = vld [vmem:[%s13307_s11 + $0x30] sm:$0xff] }
 0x380   : > { %4097 = vmatmul.f32.gmra.mxu0 %v3791_v43  ;;  %4210 = vmatmul.f32.gmra.mxu1 %v3887_v50 }
 0x381   : > { %4720 = vmatmul.f32.gmra.mxu3 %v4645_v60  ;;  %v4657_v60 = vld [vmem:[%s13307_s11 + $0x90] sm:$0xff] }
 0x383   : > { %v6924_v26 = vpop.permute.xlu1 %6923 }
 0x384   : > { %v6926_v24 = vunpack.i.h.bf16 %v6924_v26  ;;  %v6925_v16 = vunpack.i.l.bf16 %v6924_v26  ;;  %v11890_v59 = vpop.f32.mrf.mxu2 }
 0x386   : > { %v3759_v49 = vsel %vm3728_vm7, %v3726_v52, %v6925_v16  ;;  %v3856_v2 = vsel %vm3728_vm7, %v3824_v8, %v6926_v24  ;;  %v11873_v39 = vpop.f32.mrf.mxu0  ;;  %v4196_v33 = vpop.f32.mrf.mxu1  ;;  %v4649_v24 = vld [vmem:[%s13307_s11 + $0x50] sm:$0xff] }
 0x387   : > { %v3792_v10 = vsel %vm3761_vm8, %v3759_v49, %v6930_v45  ;;  %v3888_v53 = vsel %vm3761_vm8, %v3856_v2, %v6931_v36  ;;  %v4651_v45 = vld [vmem:[%s13307_s11 + $0x60] sm:$0xff]  ;;  %v4653_v49 = vld [vmem:[%s13307_s11 + $0x70] sm:$0xff] }
 0x388   : > { %4100 = vmatmul.f32.gmra.mxu0 %v3792_v10  ;;  %4213 = vmatmul.f32.gmra.mxu1 %v3888_v53 }
 0x389   : > { %4723 = vmatmul.f32.gmra.mxu3 %v4647_v23 }
 0x38b   : > { %v6939_v54 = vpop.permute.xlu1 %6938 }
 0x38c   : > { %v6941_v41 = vunpack.i.h.bf16 %v6939_v54  ;;  %v6940_v61 = vunpack.i.l.bf16 %v6939_v54  ;;  %v11892_v4 = vpop.f32.mrf.mxu2 }
 0x38e   : > { %v3760_v17 = vsel %vm3728_vm7, %v3727_v32, %v6940_v61  ;;  %v3857_v11 = vsel %vm3728_vm7, %v3825_v6, %v6941_v41  ;;  %v4080_v20 = vpop.f32.mrf.mxu0 }
 0x38f   : > { %v3793_v30 = vsel %vm3761_vm8, %v3760_v17, %v6945_v0  ;;  %v3889_v35 = vsel %vm3761_vm8, %v3857_v11, %v6946_v3 }
 0x390   : > { %4103 = vmatmul.f32.gmra.mxu0 %v3793_v30  ;;  %4216 = vmatmul.f32.gmra.mxu1 %v3889_v35 }
 0x391   : > { %4726 = vmatmul.f32.gmra.mxu3 %v4649_v24 }
 0x394   : > { %v4315_v43 = vpop.f32.mrf.mxu2 }
 0x396   : > { %v4083_v47 = vpop.f32.mrf.mxu0 }
 0x397   : > { %v4084_v11 = vadd.f32 %v11593_v34, %v4083_v47  ;;  %v4078_v47 = vadd.f32 %v11593_v34, %v11873_v39  ;;  %v4072_v39 = vadd.f32 %v11593_v34, %v11858_v46 }
 0x399   : > { %4729 = vmatmul.f32.gmra.mxu3 %v4651_v45 }
 0x39c   : > { %v4318_v48 = vpop.f32.mrf.mxu2 }
 0x39e   : > { %v4086_v38 = vpop.f32.mrf.mxu0 }
 0x39f   : > { %v4199_v42 = vpop.f32.mrf.mxu1  ;;  %v4087_v32 = vadd.f32 %v11593_v34, %v4086_v38 }
 0x3a1   : > { %4732 = vmatmul.f32.gmra.mxu3 %v4653_v49 }
 0x3a4   : > { %v4321_v16 = vpop.f32.mrf.mxu2 }
 0x3a9   : > { %4735 = vmatmul.f32.gmra.mxu3 %v4655_v28 }
 0x3ac   : > { %v4324_v52 = vpop.f32.mrf.mxu2 }
 0x3b1   : > { %4738 = vmatmul.f32.gmra.mxu3 %v4657_v60 }
 0x3b4   : > { %v4327_v18 = vpop.f32.mrf.mxu2 }
 0x3c9   : > { %v4089_v50 = vpop.f32.mrf.mxu0 }
 0x3ca   : > { %v4202_v1 = vpop.f32.mrf.mxu1  ;;  %v4090_v56 = vadd.f32 %v11593_v34, %v4089_v50  ;;  %v4081_v50 = vadd.f32 %v11593_v34, %v4080_v20 }
 0x3cc   : > { %v4203_v35 = vadd.f32 %v4202_v1, %v4090_v56  ;;  %v4330_v1 = vpop.f32.mrf.mxu2  ;;  %v4194_v20 = vadd.f32 %v11882_v22, %v4081_v50 }
 0x3d1   : > { %v4092_v13 = vpop.f32.mrf.mxu0 }
 0x3d2   : > { %v4205_v26 = vpop.f32.mrf.mxu1  ;;  %v4093_v54 = vadd.f32 %v11593_v34, %v4092_v13  ;;  %v4200_v13 = vadd.f32 %v4199_v42, %v4087_v32 }
 0x3d4   : > { %v4206_v6 = vadd.f32 %v4205_v26, %v4093_v54  ;;  %v4313_v42 = vadd.f32 %v11892_v4, %v4200_v13  ;;  %v4659_v4 = vld [vmem:[%s13307_s11 + $0xa0] sm:$0xff] }
 0x3d5   : > { %4741 = vmatmul.f32.gmra.mxu3 %v4659_v4 }
 0x3d6   : > { %v4319_v24 = vadd.f32 %v4318_v48, %v4206_v6  ;;  %v4412_v46 = vrot.slane %v4313_v42, 1 }
 0x3d8   : > { %v4416_v48 = vrot.slane %v4319_v24, 1 }
 0x3d9   : > { %v4095_v31 = vpop.f32.mrf.mxu0 }
 0x3da   : > { %v4208_v36 = vpop.f32.mrf.mxu1  ;;  %v4096_v29 = vadd.f32 %v11593_v34, %v4095_v31  ;;  %v4197_v31 = vadd.f32 %v4196_v33, %v4084_v11  ;;  %v4191_v33 = vadd.f32 %v11875_v15, %v4078_v47 }
 0x3dc   : > { %v4209_v3 = vadd.f32 %v4208_v36, %v4096_v29  ;;  %v4304_v56 = vadd.f32 %v11871_v27, %v4191_v33 }
 0x3de   : > { %v4322_v21 = vadd.f32 %v4321_v16, %v4209_v3  ;;  %v4316_v16 = vadd.f32 %v4315_v43, %v4203_v35  ;;  %v4310_v43 = vadd.f32 %v11890_v59, %v4197_v31 }
 0x3e0   : > { %v4418_v36 = vrot.slane %v4322_v21, 1  ;;  %v4410_v3 = vrot.slane %v4310_v43, 1 }
 0x3e2   : > { %v4419_v22 = vsel %vm854_vm0, %v4416_v48, %v4418_v36  ;;  %v4413_v35 = vsel %vm854_vm0, %v4410_v3, %v4412_v46 }
 0x3e3   : > { %v4478_v54 = vmax.f32 %v4319_v24, %v4419_v22  ;;  %v4475_v24 = vmax.f32 %v4310_v43, %v4413_v35  ;;  %v4658_v35 = vld [vmem:[%s13307_s11 + $0x98] sm:$0xff] }
 0x3fd   : > { %v4098_v8 = vpop.f32.mrf.mxu0  ;;  %v4211_v12 = vpop.f32.mrf.mxu1 }
 0x3fe   : > { %v4099_v2 = vadd.f32 %v11593_v34, %v4098_v8  ;;  %v4075_v8 = vadd.f32 %v11593_v34, %v11864_v63 }
 0x400   : > { %v4212_v41 = vadd.f32 %v4211_v12, %v4099_v2  ;;  %v4188_v29 = vadd.f32 %v11866_v58, %v4075_v8 }
 0x402   : > { %v4325_v17 = vadd.f32 %v4324_v52, %v4212_v41 }
 0x404   : > { %v4420_v38 = vrot.slane %v4325_v17, 1 }
 0x405   : > { %v4101_v10 = vpop.f32.mrf.mxu0  ;;  %v4214_v53 = vpop.f32.mrf.mxu1 }
 0x406   : > { %v4102_v44 = vadd.f32 %v11593_v34, %v4101_v10  ;;  %v4421_v49 = vsel %vm854_vm0, %v4418_v36, %v4420_v38  ;;  %v4414_v10 = vrot.slane %v4316_v16, 1 }
 0x408   : > { %v4215_v61 = vadd.f32 %v4214_v53, %v4102_v44  ;;  %v4479_v44 = vmax.f32 %v4322_v21, %v4421_v49  ;;  %v4417_v59 = vsel %vm854_vm0, %v4414_v10, %v4416_v48  ;;  %v4415_v32 = vsel %vm854_vm0, %v4412_v46, %v4414_v10 }
 0x409   : > { %v4477_v6 = vmax.f32 %v4316_v16, %v4417_v59  ;;  %v4571_v21 = vrot.slane %v4478_v54, 2 }
 0x40a   : > { %v4328_v0 = vadd.f32 %v4327_v18, %v4215_v61  ;;  %v4185_v61 = vadd.f32 %v11860_v19, %v4072_v39  ;;  %v4573_v58 = vrot.slane %v4479_v44, 2 }
 0x40c   : > { %v4482_v51 = vrot.slane %v4328_v0, 1  ;;  %v4298_v27 = vadd.f32 %v11856_v9, %v4185_v61  ;;  %v4574_v13 = vsel %vm1081_vm1, %v4571_v21, %v4573_v58  ;;  %v4640_v61 = vld [vmem:[%s13307_s11 + $0x8] sm:$0xff] }
 0x40d   : > { %v4104_v30 = vpop.f32.mrf.mxu0  ;;  %v4217_v23 = vpop.f32.mrf.mxu1 }
 0x40e   : > { %v4105_v7 = vadd.f32 %v11593_v34, %v4104_v30  ;;  %v4483_v52 = vsel %vm854_vm0, %v4420_v38, %v4482_v51  ;;  %v4307_v34 = vadd.f32 %v11880_v37, %v4194_v20  ;;  %v4402_v16 = vrot.slane %v4298_v27, 1 }
 0x40f   : > { %v4489_v2 = vmax.f32 %v4325_v17, %v4483_v52  ;;  %v4301_v17 = vadd.f32 %v11862_v62, %v4188_v29 }
 0x410   : > { %v4218_v26 = vadd.f32 %v4217_v23, %v4105_v7  ;;  %v4408_v11 = vrot.slane %v4307_v34, 1  ;;  %v4406_v7 = vrot.slane %v4304_v56, 1  ;;  %v4569_v23 = vrot.slane %v4477_v6, 2 }
 0x411   : > { %v4575_v41 = vrot.slane %v4489_v2, 2  ;;  %v4404_v62 = vrot.slane %v4301_v17, 1  ;;  %v4403_v33 = vsel %vm854_vm0, %v4400_v40, %v4402_v16 }
 0x412   : > { %v4331_v45 = vadd.f32 %v4330_v1, %v4218_v26  ;;  %v4411_v50 = vsel %vm854_vm0, %v4408_v11, %v4410_v3  ;;  %v4409_v26 = vsel %vm854_vm0, %v4406_v7, %v4408_v11  ;;  %v4572_v31 = vsel %vm1081_vm1, %v4569_v23, %v4571_v21 }
 0x413   : > { %v4576_v19 = vsel %vm1081_vm1, %v4573_v58, %v4575_v41  ;;  %v4474_v1 = vmax.f32 %v4307_v34, %v4411_v50  ;;  %v4407_v36 = vsel %vm854_vm0, %v4404_v62, %v4406_v7  ;;  %v4473_v8 = vmax.f32 %v4304_v56, %v4409_v26  ;;  %v4648_v56 = vld [vmem:[%s13307_s11 + $0x48] sm:$0xff] }
 0x414   : > { %v4484_v12 = vrot.slane %v4331_v45, 1  ;;  %v4636_v38 = vmax.f32 %v4477_v6, %v4576_v19  ;;  %v4634_v20 = vmax.f32 %v4475_v24, %v4572_v31  ;;  %v4472_v49 = vmax.f32 %v4301_v17, %v4407_v36  ;;  %v4654_v6 = vld [vmem:[%s13307_s11 + $0x78] sm:$0xff]  ;;  %v4656_v17 = vld [vmem:[%s13307_s11 + $0x88] sm:$0xff] }
 0x415   : > { %v4563_v48 = vrot.slane %v4474_v1, 2  ;;  %v4561_v43 = vrot.slane %v4473_v8, 2  ;;  %v4470_v4 = vmax.f32 %v11690_v5, %v4403_v33  ;;  %v4660_v19 = vld [vmem:[%s13307_s11 + $0xa8] sm:$0xff] }
 0x416   : > { %v4491_v53 = vmax.f32 %v4331_v45, %v4484_v12  ;;  %v4485_v63 = vsel %vm854_vm0, %v4482_v51, %v4484_v12  ;;  %v4476_v51 = vmax.f32 %v4313_v42, %v4415_v32  ;;  %v4565_v45 = vrot.slane %v4475_v24, 2  ;;  %v4650_v32 = vld [vmem:[%s13307_s11 + $0x58] sm:$0xff]  ;;  %v4829_v50 = vld [vmem:[%s13301_s5 + $0x8] sm:$0xff] }
 0x417   : > { %v4490_v28 = vmax.f32 %v4328_v0, %v4485_v63  ;;  %v4405_v42 = vsel %vm854_vm0, %v4402_v16, %v4404_v62  ;;  %v4559_v63 = vrot.slane %v4472_v49, 2  ;;  %v4564_v22 = vsel %vm1081_vm1, %v4561_v43, %v4563_v48 }
 0x418   : > { %v4579_v15 = vrot.slane %v4491_v53, 2  ;;  %v4567_v47 = vrot.slane %v4476_v51, 2  ;;  %v4635_v9 = vmax.f32 %v4476_v51, %v4574_v13  ;;  %v4566_v2 = vsel %vm1081_vm1, %v4563_v48, %v4565_v45 }
 0x419   : > { %v4577_v18 = vrot.slane %v4490_v28, 2  ;;  %v4471_v10 = vmax.f32 %v4298_v27, %v4405_v42  ;;  %v4631_v29 = vmax.f32 %v4472_v49, %v4566_v2  ;;  %v4562_v28 = vsel %vm1081_vm1, %v4559_v63, %v4561_v43 }
 0x41a   : > { %v4570_v52 = vsel %vm1081_vm1, %v4567_v47, %v4569_v23  ;;  %v4568_v12 = vsel %vm1081_vm1, %v4565_v45, %v4567_v47  ;;  %v4555_v46 = vrot.slane %v4470_v4, 2  ;;  %v4828_v23 = vld [vmem:[%s13301_s5] sm:$0xff] }
 0x41b   : > { %v4580_v0 = vsel %vm1081_vm1, %v4577_v18, %v4579_v15  ;;  %v4578_v37 = vsel %vm1081_vm1, %v4575_v41, %v4577_v18  ;;  %v4633_v39 = vmax.f32 %v4474_v1, %v4570_v52  ;;  %v4632_v53 = vmax.f32 %v4473_v8, %v4568_v12 }
 0x41c   : > { %v4638_v30 = vmax.f32 %v4479_v44, %v4580_v0  ;;  %v4637_v60 = vmax.f32 %v4478_v54, %v4578_v37  ;;  %v4557_v44 = vrot.slane %v4471_v10, 2  ;;  %v4630_v34 = vmax.f32 %v4471_v10, %v4564_v22  ;;  %v4652_v0 = vld [vmem:[%s13307_s11 + $0x68] sm:$0xff] }
 0x41d   : > { %v4629_v15 = vmax.f32 %v4470_v4, %v4562_v28  ;;  %v4556_v5 = vsel %vm1081_vm1, %v4553_v57, %v4555_v46  ;;  %v4712_v57 = vpop.f32.mrf.mxu3 }
 0x41e   : > { %4748 = vmatpush.msrb.mxu3 %v4638_v30  ;;  %v4560_v40 = vsel %vm1081_vm1, %v4557_v44, %v4559_v63  ;;  %v4558_v59 = vsel %vm1081_vm1, %v4555_v46, %v4557_v44  ;;  %v4626_v41 = vmax.f32 %v11701_v25, %v4556_v5  ;;  %v4646_v25 = vld [vmem:[%s13307_s11 + $0x38] sm:$0xff] }
 0x41f   : > { %v4628_v18 = vmax.f32 %v11710_v14, %v4560_v40  ;;  %v4627_v54 = vmax.f32 %v11695_v55, %v4558_v59  ;;  %v4642_v14 = vld [vmem:[%s13307_s11 + $0x18] sm:$0xff]  ;;  %v4644_v55 = vld [vmem:[%s13307_s11 + $0x28] sm:$0xff] }
 0x420   : > { %4749 = vmatpush.msrb.mxu3 %v4637_v60  ;;  %v4831_v30 = vld [vmem:[%s13301_s5 + $0x18] sm:$0xff]  ;;  %v4830_v60 = vld [vmem:[%s13301_s5 + $0x10] sm:$0xff] }
 0x421   : > { %v5187_v59 = vld [vmem:[%s13303_s7 + $0x78] sm:$0xff] }
 0x422   : > { %4750 = vmatpush.msrb.mxu3 %v4636_v38  ;;  %5260 = vmatpush.msrb.mxu2 %v5187_v59 }
 0x424   : > { %4751 = vmatpush.msrb.mxu3 %v4635_v9 }
 0x425   : > { %v4715_v3 = vpop.f32.mrf.mxu3 }
 0x426   : > { %4752 = vmatpush.msrb.mxu3 %v4634_v20 }
 0x428   : > { %4753 = vmatpush.msrb.mxu3 %v4633_v39 }
 0x42a   : > { %4754 = vmatpush.msrb.mxu3 %v4632_v53 }
 0x42c   : > { %4755 = vmatpush.msrb.mxu3 %v4631_v29 }
 0x42d   : > { %v4718_v58 = vpop.f32.mrf.mxu3 }
 0x42e   : > { %4756 = vmatpush.msrb.mxu3 %v4630_v34 }
 0x430   : > { %4757 = vmatpush.msrb.mxu3 %v4629_v15 }
 0x432   : > { %4758 = vmatpush.msrb.mxu3 %v4628_v18  ;;  %v5186_v18 = vld [vmem:[%s13303_s7 + $0x70] sm:$0xff] }
 0x433   : > { %5261 = vmatpush.msrb.mxu2 %v5186_v18  ;;  %v5197_v18 = vld [vmem:[%s13303_s7 + $0xc8] sm:$0xff] }
 0x434   : > { %4759 = vmatpush.msrb.mxu3 %v4627_v54  ;;  %v5185_v54 = vld [vmem:[%s13303_s7 + $0x68] sm:$0xff] }
 0x435   : > { %v4721_v37 = vpop.f32.mrf.mxu3  ;;  %5262 = vmatpush.msrb.mxu2 %v5185_v54 }
 0x436   : > { %4760 = vmatpush.msrb.mxu3 %v4626_v41  ;;  %v12060_v41 = vpop.permute.xlu0 %4921 }
 0x437   : > { %6387 = vmatmul.msk.f32.vlgmr.msrb.gmra.mxu3 %vm4661_vm9, %v4640_v61  ;;  %v12065_v61 = vld [vmem:[%s13302_s6] ss:$0 sm:$0xff] }
 0x438   : > { %4877 = vmatpush.msra.mxu3 %v4831_v30  ;;  %v5184_v30 = vld [vmem:[%s13303_s7 + $0x60] sm:$0xff] }
 0x439   : > { %5263 = vmatpush.msrb.mxu2 %v5184_v30 }
 0x43a   : > { %4878 = vmatpush.msra.mxu3 %v4830_v60 }
 0x43c   : > { %4879 = vmatpush.msra.mxu3 %v4829_v50 }
 0x43d   : > { %v4724_v11 = vpop.f32.mrf.mxu3 }
 0x43e   : > { %4880 = vmatpush.msra.mxu3 %v4828_v23 }
 0x43f   : > { %6388 = vmatmul.msk.f32.gmra.mxu3 %vm4661_vm9, %v4642_v14  ;;  %v12067_v14 = vpop.permute.xlu1 %4926 }
 0x445   : > { %v4727_v21 = vpop.f32.mrf.mxu3 }
 0x447   : > { %6389 = vmatmul.msk.f32.gmra.mxu3 %vm4661_vm9, %v4644_v55  ;;  %v4974_v55 = vmul.f32 %v12065_v61, %v12060_v41  ;;  %v12100_v50 = vpop.permute.xlu1 %4941 }
 0x44d   : > { %v4730_v51 = vpop.f32.mrf.mxu3 }
 0x44f   : > { %6390 = vmatmul.msk.f32.gmra.mxu3 %vm4661_vm9, %v4646_v25  ;;  %v4975_v25 = vmul.f32 %v12065_v61, %v12067_v14 }
 0x455   : > { %v4733_v27 = vpop.f32.mrf.mxu3 }
 0x457   : > { %6391 = vmatmul.msk.f32.gmra.mxu3 %vm4661_vm9, %v4648_v56 }
 0x45d   : > { %v4736_v7 = vpop.f32.mrf.mxu3 }
 0x45f   : > { %6392 = vmatmul.msk.f32.gmra.mxu3 %vm4661_vm9, %v4650_v32 }
 0x465   : > { %v4739_v13 = vpop.f32.mrf.mxu3 }
 0x467   : > { %6393 = vmatmul.msk.f32.gmra.mxu3 %vm4661_vm9, %v4652_v0  ;;  %v12079_v0 = vpop.permute.xlu2 %4931 }
 0x46d   : > { %v4742_v24 = vpop.f32.mrf.mxu3 }
 0x46f   : > { %6394 = vmatmul.msk.f32.gmra.mxu3 %vm4661_vm9, %v4654_v6  ;;  %v4976_v6 = vmul.f32 %v12065_v61, %v12079_v0 }
 0x477   : > { %6395 = vmatmul.msk.f32.gmra.mxu3 %vm4661_vm9, %v4656_v17 }
 0x47f   : > { %6396 = vmatmul.msk.f32.gmra.mxu3 %vm4661_vm9, %v4658_v35 }
 0x487   : > { %6397 = vmatmul.msk.f32.gmra.mxu3 %vm4661_vm9, %v4660_v19 }
 0x4ba   : > { %v4762_v62 = vpop.f32.mrf.mxu3 }
 0x4bb   : > { %v4763_v38 = vadd.f32 %v4762_v62, %v4712_v57 }
 0x4bd   : > { %4795 = vst.msk [vmem:[#allocation2] sm:$0xff] %vm3695_vm6, %v4763_v38  ;;  %v5183_v38 = vld [vmem:[%s13303_s7 + $0x58] sm:$0xff] }
 0x4be   : > { %5264 = vmatpush.msrb.mxu2 %v5183_v38  ;;  %v4827_v38 = vld [vmem:[%s13309_s13 + $0x50] sm:$0xff] }
 0x4c2   : > { %v4765_v26 = vpop.f32.mrf.mxu3 }
 0x4c3   : > { %v4766_v47 = vadd.f32 %v4765_v26, %v4715_v3  ;;  %v5203_v26 = vld [vmem:[%s13303_s7 + $0xf8] sm:$0xff] }
 0x4c4   : > { %v4806_v31 = vld [vmem:[#allocation2] sm:$0xff]  ;;  %5301 = vmatpush.msrb.mxu0 %v5203_v26  ;;  %6426 = vmatpush.msrb.mxu3 %v5203_v26 }
 0x4c5   : > { %4796 = vst.msk [vmem:[#allocation2 + $0x8] sm:$0xff] %vm3695_vm6, %v4766_v47  ;;  %6398 = vmatmul.msk.f32.vlgmr.msra.gmra.mxu3 %vm3695_vm6, %v4806_v31 }
 0x4ca   : > { %v4768_v1 = vpop.f32.mrf.mxu3 }
 0x4cb   : > { %v4769_v16 = vadd.f32 %v4768_v1, %v4718_v58  ;;  %v5219_v1 = vld [vmem:[%s13303_s7 + $0x178] sm:$0xff] }
 0x4cc   : > { %v4807_v9 = vld [vmem:[#allocation2 + $0x8] sm:$0xff]  ;;  %5342 = vmatpush.msrb.mxu1 %v5219_v1 }
 0x4cd   : > { %4797 = vst.msk [vmem:[#allocation2 + $0x10] sm:$0xff] %vm3695_vm6, %v4769_v16  ;;  %6399 = vmatmul.msk.f32.gmra.mxu3 %vm3695_vm6, %v4807_v9  ;;  %v12120_v16 = vpop.permute.xlu2 %4946 }
 0x4d2   : > { %v4771_v36 = vpop.f32.mrf.mxu3 }
 0x4d3   : > { %v4772_v45 = vadd.f32 %v4771_v36, %v4721_v37  ;;  %v4979_v36 = vmul.f32 %v12065_v61, %v12120_v16 }
 0x4d4   : > { %v4808_v52 = vld [vmem:[#allocation2 + $0x10] sm:$0xff] }
 0x4d5   : > { %4798 = vst.msk [vmem:[#allocation2 + $0x18] sm:$0xff] %vm3695_vm6, %v4772_v45  ;;  %6400 = vmatmul.msk.f32.gmra.mxu3 %vm3695_vm6, %v4808_v52 }
 0x4da   : > { %v4774_v8 = vpop.f32.mrf.mxu3 }
 0x4db   : > { %v4775_v20 = vadd.f32 %v4774_v8, %v4724_v11 }
 0x4dc   : > { %v4809_v42 = vld [vmem:[#allocation2 + $0x18] sm:$0xff] }
 0x4dd   : > { %4799 = vst.msk [vmem:[#allocation2 + $0x20] sm:$0xff] %vm3695_vm6, %v4775_v20  ;;  %6401 = vmatmul.msk.f32.gmra.mxu3 %vm3695_vm6, %v4809_v42  ;;  %v5182_v42 = vld [vmem:[%s13303_s7 + $0x50] sm:$0xff] }
 0x4de   : > { %5265 = vmatpush.msrb.mxu2 %v5182_v42  ;;  %v5180_v42 = vld [vmem:[%s13303_s7 + $0x40] sm:$0xff] }
 0x4e2   : > { %v4777_v48 = vpop.f32.mrf.mxu3 }
 0x4e3   : > { %v4778_v12 = vadd.f32 %v4777_v48, %v4727_v21  ;;  %v12091_v21 = vpop.permute.xlu0 %4936  ;;  %v5202_v48 = vld [vmem:[%s13303_s7 + $0xf0] sm:$0xff] }
 0x4e4   : > { %v4810_v49 = vld [vmem:[#allocation2 + $0x20] sm:$0xff]  ;;  %5302 = vmatpush.msrb.mxu0 %v5202_v48  ;;  %6427 = vmatpush.msrb.mxu3 %v5202_v48 }
 0x4e5   : > { %4800 = vst.msk [vmem:[#allocation2 + $0x28] sm:$0xff] %vm3695_vm6, %v4778_v12  ;;  %6402 = vmatmul.msk.f32.gmra.mxu3 %vm3695_vm6, %v4810_v49  ;;  %v5188_v48 = vld [vmem:[%s13303_s7 + $0x80] sm:$0xff] }
 0x4ea   : > { %v4780_v39 = vpop.f32.mrf.mxu3 }
 0x4eb   : > { %v4781_v33 = vadd.f32 %v4780_v39, %v4730_v51  ;;  %v4977_v51 = vmul.f32 %v12065_v61, %v12091_v21  ;;  %v12124_v45 = vpop.permute.xlu0 %4951 }
 0x4ec   : > { %v4811_v43 = vld [vmem:[#allocation2 + $0x28] sm:$0xff]  ;;  %v4980_v8 = vmul.f32 %v12065_v61, %v12124_v45 }
 0x4ed   : > { %4801 = vst.msk [vmem:[#allocation2 + $0x30] sm:$0xff] %vm3695_vm6, %v4781_v33  ;;  %6403 = vmatmul.msk.f32.gmra.mxu3 %vm3695_vm6, %v4811_v43  ;;  %v12140_v33 = vpop.permute.xlu1 %4956 }
 0x4f2   : > { %v4783_v2 = vpop.f32.mrf.mxu3 }
 0x4f3   : > { %v4784_v10 = vadd.f32 %v4783_v2, %v4733_v27 }
 0x4f4   : > { %v4812_v53 = vld [vmem:[#allocation2 + $0x30] sm:$0xff] }
 0x4f5   : > { %4802 = vst.msk [vmem:[#allocation2 + $0x38] sm:$0xff] %vm3695_vm6, %v4784_v10  ;;  %6404 = vmatmul.msk.f32.gmra.mxu3 %vm3695_vm6, %v4812_v53  ;;  %v4981_v53 = vmul.f32 %v12065_v61, %v12140_v33 }
 0x4fa   : > { %v4786_v63 = vpop.f32.mrf.mxu3 }
 0x4fb   : > { %v4787_v22 = vadd.f32 %v4786_v63, %v4736_v7  ;;  %v5201_v63 = vld [vmem:[%s13303_s7 + $0xe8] sm:$0xff] }
 0x4fc   : > { %v4813_v4 = vld [vmem:[#allocation2 + $0x38] sm:$0xff]  ;;  %5303 = vmatpush.msrb.mxu0 %v5201_v63  ;;  %6428 = vmatpush.msrb.mxu3 %v5201_v63 }
 0x4fd   : > { %4803 = vst.msk [vmem:[#allocation2 + $0x40] sm:$0xff] %vm3695_vm6, %v4787_v22  ;;  %6405 = vmatmul.msk.f32.gmra.mxu3 %vm3695_vm6, %v4813_v4  ;;  %v5218_v22 = vld [vmem:[%s13303_s7 + $0x170] sm:$0xff]  ;;  %v5200_v4 = vld [vmem:[%s13303_s7 + $0xe0] sm:$0xff] }
 0x4fe   : > { %5343 = vmatpush.msrb.mxu1 %v5218_v22  ;;  %5304 = vmatpush.msrb.mxu0 %v5200_v4 }
 0x4ff   : > { %6429 = vmatpush.msrb.mxu3 %v5200_v4  ;;  %v5177_v4 = vld [vmem:[%s13303_s7 + $0x28] sm:$0xff] }
 0x502   : > { %v4789_v29 = vpop.f32.mrf.mxu3 }
 0x503   : > { %v4790_v44 = vadd.f32 %v4789_v29, %v4739_v13  ;;  %v4978_v13 = vmul.f32 %v12065_v61, %v12100_v50 }
 0x504   : > { %v4814_v28 = vld [vmem:[#allocation2 + $0x40] sm:$0xff] }
 0x505   : > { %4804 = vst.msk [vmem:[#allocation2 + $0x48] sm:$0xff] %vm3695_vm6, %v4790_v44  ;;  %6406 = vmatmul.msk.f32.gmra.mxu3 %vm3695_vm6, %v4814_v28  ;;  %v5199_v28 = vld [vmem:[%s13303_s7 + $0xd8] sm:$0xff] }
 0x506   : > { %5305 = vmatpush.msrb.mxu0 %v5199_v28  ;;  %6430 = vmatpush.msrb.mxu3 %v5199_v28 }
 0x50a   : > { %v4792_v34 = vpop.f32.mrf.mxu3 }
 0x50b   : > { %v4793_v46 = vadd.f32 %v4792_v34, %v4742_v24 }
 0x50c   : > { %v4815_v40 = vld [vmem:[#allocation2 + $0x48] sm:$0xff] }
 0x50d   : > { %4805 = vst.msk [vmem:[#allocation2 + $0x50] sm:$0xff] %vm3695_vm6, %v4793_v46  ;;  %6407 = vmatmul.msk.f32.gmra.mxu3 %vm3695_vm6, %v4815_v40  ;;  %v5198_v46 = vld [vmem:[%s13303_s7 + $0xd0] sm:$0xff]  ;;  %v12165_v40 = vpop.permute.xlu2 %4961 }
 0x50e   : > { %5306 = vmatpush.msrb.mxu0 %v5198_v46  ;;  %v4982_v59 = vmul.f32 %v12065_v61, %v12165_v40  ;;  %6431 = vmatpush.msrb.mxu3 %v5198_v46  ;;  %v5174_v46 = vld [vmem:[%s13303_s7 + $0x10] sm:$0xff] }
 0x510   : > { %5307 = vmatpush.msrb.mxu0 %v5197_v18  ;;  %6432 = vmatpush.msrb.mxu3 %v5197_v18  ;;  %v5173_v18 = vld [vmem:[%s13303_s7 + $0x8] sm:$0xff] }
 0x514   : > { %v4816_v15 = vld [vmem:[#allocation2 + $0x50] sm:$0xff] }
 0x515   : > { %6408 = vmatmul.msk.f32.gmra.mxu3 %vm3695_vm6, %v4816_v15 }
 0x548   : > { %v4882_v5 = vpop.f32.mrf.mxu3 }
 0x549   : > { %v12073_v57 = vadd.f32 %v4974_v55, %v4882_v5  ;;  %v5196_v5 = vld [vmem:[%s13303_s7 + $0xc0] sm:$0xff]  ;;  %v5181_v55 = vld [vmem:[%s13303_s7 + $0x48] sm:$0xff] }
 0x54a   : > { %5266 = vmatpush.msrb.mxu2 %v5181_v55  ;;  %5308 = vmatpush.msrb.mxu0 %v5196_v5  ;;  %v5215_v55 = vld [vmem:[%s13303_s7 + $0x158] sm:$0xff] }
 0x54b   : > { %v5005_v32 = vrot.slane %v12073_v57, 1  ;;  %6433 = vmatpush.msrb.mxu3 %v5196_v5  ;;  %v5172_v5 = vld [vmem:[%s13303_s7] sm:$0xff] }
 0x54c   : > { %5267 = vmatpush.msrb.mxu2 %v5180_v42  ;;  %v5211_v42 = vld [vmem:[%s13303_s7 + $0x138] sm:$0xff] }
 0x550   : > { %v4885_v56 = vpop.f32.mrf.mxu3 }
 0x551   : > { %v12075_v3 = vadd.f32 %v4975_v25, %v4885_v56 }
 0x553   : > { %v5006_v58 = vrot.slane %v12075_v3, 1  ;;  %v5080_v26 = vrot.slane %v12075_v3, 3 }
 0x555   : > { %v5007_v37 = vsel %vm854_vm0, %v5005_v32, %v5006_v58  ;;  %v5195_v32 = vld [vmem:[%s13303_s7 + $0xb8] sm:$0xff] }
 0x556   : > { %5022 = vrot.lane.b32.xlu0 %v5007_v37, %s6975_s22  ;;  %5309 = vmatpush.msrb.mxu0 %v5195_v32 }
 0x557   : > { %6434 = vmatpush.msrb.mxu3 %v5195_v32  ;;  %v5047_v32 = vrot.slane %v12075_v3, 2 }
 0x558   : > { %v4888_v17 = vpop.f32.mrf.mxu3 }
 0x559   : > { %v12085_v11 = vadd.f32 %v4976_v6, %v4888_v17  ;;  %v12188_v6 = vpop.permute.xlu1 %4966  ;;  %v5194_v17 = vld [vmem:[%s13303_s7 + $0xb0] sm:$0xff] }
 0x55a   : > { %5310 = vmatpush.msrb.mxu0 %v5194_v17  ;;  %6435 = vmatpush.msrb.mxu3 %v5194_v17 }
 0x55b   : > { %v5008_v35 = vrot.slane %v12085_v11, 1 }
 0x55d   : > { %v5009_v19 = vsel %vm854_vm0, %v5006_v58, %v5008_v35  ;;  %v5081_v58 = vrot.slane %v12085_v11, 3 }
 0x55e   : > { %5024 = vrot.lane.b32.xlu2 %v5009_v19, %s6975_s22  ;;  %v4983_v19 = vmul.f32 %v12065_v61, %v12188_v6 }
 0x55f   : > { %v5082_v1 = vsel %vm1544_vm2, %v5080_v26, %v5081_v58 }
 0x560   : > { %v4891_v27 = vpop.f32.mrf.mxu3 }
 0x561   : > { %v12097_v7 = vadd.f32 %v4977_v51, %v4891_v27  ;;  %v5193_v51 = vld [vmem:[%s13303_s7 + $0xa8] sm:$0xff] }
 0x562   : > { %v5217_v27 = vld [vmem:[%s13303_s7 + $0x168] sm:$0xff]  ;;  %5311 = vmatpush.msrb.mxu0 %v5193_v51  ;;  %6436 = vmatpush.msrb.mxu3 %v5193_v51 }
 0x563   : > { %v5010_v60 = vrot.slane %v12097_v7, 1  ;;  %v5083_v56 = vrot.slane %v12097_v7, 3  ;;  %5344 = vmatpush.msrb.mxu1 %v5217_v27  ;;  %v5213_v27 = vld [vmem:[%s13303_s7 + $0x148] sm:$0xff] }
 0x565   : > { %v5011_v23 = vsel %vm854_vm0, %v5008_v35, %v5010_v60  ;;  %v5084_v30 = vsel %vm1544_vm2, %v5081_v58, %v5083_v56  ;;  %v5046_v58 = vrot.slane %v12073_v57, 2 }
 0x566   : > { %5026 = vrot.lane.b32.xlu0 %v5011_v23, %s6975_s22  ;;  %v5192_v23 = vld [vmem:[%s13303_s7 + $0xa0] sm:$0xff] }
 0x567   : > { %5312 = vmatpush.msrb.mxu0 %v5192_v23  ;;  %6437 = vmatpush.msrb.mxu3 %v5192_v23  ;;  %v5235_v23 = vld [vmem:[%s13303_s7 + $0x1f8] sm:$0xff] }
 0x568   : > { %v4894_v24 = vpop.f32.mrf.mxu3 }
 0x569   : > { %v12106_v62 = vadd.f32 %v4978_v13, %v4894_v24  ;;  %v5191_v24 = vld [vmem:[%s13303_s7 + $0x98] sm:$0xff] }
 0x56a   : > { %5313 = vmatpush.msrb.mxu0 %v5191_v24  ;;  %6438 = vmatpush.msrb.mxu3 %v5191_v24  ;;  %v5234_v24 = vld [vmem:[%s13303_s7 + $0x1f0] sm:$0xff] }
 0x56b   : > { %v5012_v47 = vrot.slane %v12106_v62, 1 }
 0x56d   : > { %v5013_v31 = vsel %vm854_vm0, %v5010_v60, %v5012_v47 }
 0x56e   : > { %5028 = vrot.lane.b32.xlu1 %v5013_v31, %s6975_s22  ;;  %v5190_v31 = vld [vmem:[%s13303_s7 + $0x90] sm:$0xff] }
 0x56f   : > { %5314 = vmatpush.msrb.mxu0 %v5190_v31  ;;  %6439 = vmatpush.msrb.mxu3 %v5190_v31 }
 0x570   : > { %v4897_v9 = vpop.f32.mrf.mxu3 }
 0x571   : > { %v12126_v52 = vadd.f32 %v4979_v36, %v4897_v9  ;;  %v5189_v36 = vld [vmem:[%s13303_s7 + $0x88] sm:$0xff] }
 0x572   : > { %5315 = vmatpush.msrb.mxu0 %v5189_v36  ;;  %6440 = vmatpush.msrb.mxu3 %v5189_v36  ;;  %v5232_v36 = vld [vmem:[%s13303_s7 + $0x1e0] sm:$0xff] }
 0x573   : > { %v5014_v49 = vrot.slane %v12126_v52, 1 }
 0x574   : > { %5316 = vmatpush.msrb.mxu0 %v5188_v48  ;;  %6441 = vmatpush.msrb.mxu3 %v5188_v48  ;;  %v5243_v48 = vld [vmem:[%s13303_s7 + $0x238] sm:$0xff] }
 0x575   : > { %v5015_v43 = vsel %vm854_vm0, %v5012_v47, %v5014_v49 }
 0x576   : > { %5383 = vmatpush.msra.mxu3 %v5235_v23 }
 0x578   : > { %v4900_v20 = vpop.f32.mrf.mxu3  ;;  %5384 = vmatpush.msra.mxu3 %v5234_v24 }
 0x579   : > { %v12136_v12 = vadd.f32 %v4980_v8, %v4900_v20  ;;  %v5087_v20 = vrot.slane %v12126_v52, 3 }
 0x57b   : > { %v5016_v39 = vrot.slane %v12136_v12, 1 }
 0x57d   : > { %v5017_v2 = vsel %vm854_vm0, %v5014_v49, %v5016_v39  ;;  %v5085_v49 = vrot.slane %v12106_v62, 3 }
 0x57e   : > { %v6947_v10 = vpack.i.bf16 %v5015_v43, %v5017_v2  ;;  %v5089_v43 = vrot.slane %v12136_v12, 3  ;;  %v5216_v2 = vld [vmem:[%s13303_s7 + $0x160] sm:$0xff] }
 0x57f   : > { %5345 = vmatpush.msrb.mxu1 %v5216_v2  ;;  %v5088_v63 = vsel %vm1544_vm2, %v5085_v49, %v5087_v20  ;;  %v5086_v22 = vsel %vm1544_vm2, %v5083_v56, %v5085_v49  ;;  %v5051_v2 = vrot.slane %v12097_v7, 2 }
 0x580   : > { %6948 = vrot.lane.b32.xlu2 %v6947_v10, %s6975_s22  ;;  %v4903_v29 = vpop.f32.mrf.mxu3  ;;  %v5178_v10 = vld [vmem:[%s13303_s7 + $0x30] sm:$0xff] }
 0x581   : > { %v12156_v44 = vadd.f32 %v4981_v53, %v4903_v29  ;;  %v5176_v29 = vld [vmem:[%s13303_s7 + $0x20] sm:$0xff]  ;;  %5346 = vmatpush.msrb.mxu1 %v5215_v55 }
 0x582   : > { %v5228_v55 = vld [vmem:[%s13303_s7 + $0x1c0] sm:$0xff] }
 0x583   : > { %v5018_v34 = vrot.slane %v12156_v44, 1  ;;  %v5091_v8 = vrot.slane %v12156_v44, 3 }
 0x585   : > { %v5019_v15 = vsel %vm854_vm0, %v5016_v39, %v5018_v34  ;;  %v5179_v39 = vld [vmem:[%s13303_s7 + $0x38] sm:$0xff]  ;;  %v5092_v53 = vsel %vm1544_vm2, %v5089_v43, %v5091_v8 }
 0x586   : > { %5034 = vrot.lane.b32.xlu0 %v5019_v15, %s6975_s22  ;;  %5268 = vmatpush.msrb.mxu2 %v5179_v39  ;;  %v5242_v39 = vld [vmem:[%s13303_s7 + $0x230] sm:$0xff] }
 0x588   : > { %v4906_v54 = vpop.f32.mrf.mxu3  ;;  %5269 = vmatpush.msrb.mxu2 %v5178_v10  ;;  %v5231_v10 = vld [vmem:[%s13303_s7 + $0x1d8] sm:$0xff] }
 0x589   : > { %v12180_v25 = vadd.f32 %v4982_v59, %v4906_v54  ;;  %v5090_v59 = vsel %vm1544_vm2, %v5087_v20, %v5089_v43  ;;  %v5053_v20 = vrot.slane %v12106_v62, 2 }
 0x58a   : > { %5270 = vmatpush.msrb.mxu2 %v5177_v4  ;;  %v5230_v4 = vld [vmem:[%s13303_s7 + $0x1d0] sm:$0xff] }
 0x58b   : > { %v5020_v37 = vrot.slane %v12180_v25, 1  ;;  %v5093_v28 = vrot.slane %v12180_v25, 3 }
 0x58c   : > { %5271 = vmatpush.msrb.mxu2 %v5176_v29  ;;  %v5209_v29 = vld [vmem:[%s13303_s7 + $0x128] sm:$0xff] }
 0x58d   : > { %v5021_v35 = vsel %vm854_vm0, %v5018_v34, %v5020_v37  ;;  %v5175_v34 = vld [vmem:[%s13303_s7 + $0x18] sm:$0xff]  ;;  %v5094_v15 = vsel %vm1544_vm2, %v5091_v8, %v5093_v28 }
 0x58e   : > { %5099 = vrot.lane.b32.xlu0 %v5084_v30, %s6975_s22  ;;  %5036 = vrot.lane.b32.xlu1 %v5021_v35, %s6975_s22  ;;  %v5214_v35 = vld [vmem:[%s13303_s7 + $0x150] sm:$0xff] }
 0x58f   : > { %5272 = vmatpush.msrb.mxu2 %v5175_v34  ;;  %5347 = vmatpush.msrb.mxu1 %v5214_v35  ;;  %v5226_v35 = vld [vmem:[%s13303_s7 + $0x1b0] sm:$0xff] }
 0x590   : > { %v4909_v60 = vpop.f32.mrf.mxu3 }
 0x591   : > { %v12210_v13 = vadd.f32 %v4983_v19, %v4909_v60  ;;  %5273 = vmatpush.msrb.mxu2 %v5174_v46  ;;  %5348 = vmatpush.msrb.mxu1 %v5213_v27  ;;  %v5229_v46 = vld [vmem:[%s13303_s7 + $0x1c8] sm:$0xff] }
 0x592   : > { %v5225_v27 = vld [vmem:[%s13303_s7 + $0x1a8] sm:$0xff] }
 0x593   : > { %v5072_v47 = vrot.slane %v12210_v13, 1  ;;  %5274 = vmatpush.msrb.mxu2 %v5173_v18  ;;  %v5095_v54 = vrot.slane %v12210_v13, 3  ;;  %v5208_v18 = vld [vmem:[%s13303_s7 + $0x120] sm:$0xff] }
 0x595   : > { %v5073_v9 = vsel %vm854_vm0, %v5020_v37, %v5072_v47  ;;  %5275 = vmatpush.msrb.mxu2 %v5172_v5  ;;  %v5096_v56 = vsel %vm1544_vm2, %v5093_v28, %v5095_v54  ;;  %v5048_v37 = vsel %vm1081_vm1, %v5046_v58, %v5047_v32  ;;  %v5055_v47 = vrot.slane %v12126_v52, 2  ;;  %v5240_v5 = vld [vmem:[%s13303_s7 + $0x220] sm:$0xff]  ;;  %v5227_v58 = vld [vmem:[%s13303_s7 + $0x1b8] sm:$0xff] }
 0x596   : > { %4971 = vperm.xlu0 %6464, %v4827_v38   ;;  %5097 = vrot.lane.b32.xlu1 %v5082_v1, %s6975_s22  ;;  %v5233_v38 = vld [vmem:[%s13303_s7 + $0x1e8] sm:$0xff] }
 0x597   : > { %5074 = vrot.lane.b32.xlu2 %v5073_v9, %s6975_s22  ;;  %5385 = vmatpush.msra.mxu3 %v5233_v38  ;;  %v5212_v9 = vld [vmem:[%s13303_s7 + $0x140] sm:$0xff]  ;;  %v12342_v43 = vsel %vm1081_vm1, %v5053_v20, %v5055_v47 }
 0x598   : > { %5349 = vmatpush.msrb.mxu1 %v5212_v9  ;;  %5432 = vmatpush.msra.mxu2 %v5243_v48  ;;  %v5224_v38 = vld [vmem:[%s13303_s7 + $0x1a0] sm:$0xff] }
 0x599   : > { %5386 = vmatpush.msra.mxu3 %v5232_v36  ;;  %v5221_v36 = vld [vmem:[%s13303_s7 + $0x188] sm:$0xff] }
 0x59a   : > { %5350 = vmatpush.msrb.mxu1 %v5211_v42  ;;  %5433 = vmatpush.msra.mxu2 %v5242_v39  ;;  %v5057_v42 = vrot.slane %v12136_v12, 2 }
 0x59b   : > { %5387 = vmatpush.msra.mxu3 %v5231_v10 }
 0x59d   : > { %5388 = vmatpush.msra.mxu3 %v5230_v4  ;;  %v5061_v4 = vrot.slane %v12180_v25, 2 }
 0x59e   : > { %5107 = vrot.lane.b32.xlu0 %v5092_v53, %s6975_s22  ;;  %5103 = vrot.lane.b32.xlu1 %v5088_v63, %s6975_s22  ;;  %v5210_v53 = vld [vmem:[%s13303_s7 + $0x130] sm:$0xff] }
 0x59f   : > { %5101 = vrot.lane.b32.xlu2 %v5086_v22, %s6975_s22  ;;  %v5241_v22 = vld [vmem:[%s13303_s7 + $0x228] sm:$0xff]  ;;  %5351 = vmatpush.msrb.mxu1 %v5210_v53 }
 0x5a0   : > { %5434 = vmatpush.msra.mxu2 %v5241_v22  ;;  %5389 = vmatpush.msra.mxu3 %v5229_v46 }
 0x5a1   : > { %5352 = vmatpush.msrb.mxu1 %v5209_v29 }
 0x5a2   : > { %5435 = vmatpush.msra.mxu2 %v5240_v5  ;;  %5390 = vmatpush.msra.mxu3 %v5228_v55 }
 0x5a3   : > { %5353 = vmatpush.msrb.mxu1 %v5208_v18  ;;  %v5130_v18 = vrot.slane %v12085_v11, 4 }
 0x5a4   : > { %5391 = vmatpush.msra.mxu3 %v5227_v58 }
 0x5a6   : > { %5109 = vrot.lane.b32.xlu1 %v5094_v15, %s6975_s22  ;;  %5392 = vmatpush.msra.mxu3 %v5226_v35  ;;  %v5536_v35 = vld [vmem:[%s13305_s9 + $0x60] sm:$0xff] }
 0x5a7   : > { %5105 = vrot.lane.b32.xlu2 %v5090_v59, %s6975_s22 }
 0x5a8   : > { %5393 = vmatpush.msra.mxu3 %v5225_v27 }
 0x5aa   : > { %5394 = vmatpush.msra.mxu3 %v5224_v38 }
 0x5af   : > { %5111 = vrot.lane.b32.xlu2 %v5096_v56, %s6975_s22  ;;  %v5207_v56 = vld [vmem:[%s13303_s7 + $0x118] sm:$0xff] }
 0x5b0   : > { %5354 = vmatpush.msrb.mxu1 %v5207_v56 }
 0x5b8   : > { %v5025_v17 = vpop.permute.xlu2 %5024 }
 0x5b9   : > { %v5155_v30 = vsel %vm3728_vm7, %v5048_v37, %v5025_v17  ;;  %v5148_v60 = vsel %vm3728_vm7, %v12075_v3, %v5025_v17  ;;  %v5206_v37 = vld [vmem:[%s13303_s7 + $0x110] sm:$0xff] }
 0x5ba   : > { %5317 = vmatmul.f32.vlgmr.msrb.gmra.mxu0 %v5155_v30  ;;  %v5238_v30 = vld [vmem:[%s13303_s7 + $0x210] sm:$0xff]  ;;  %5355 = vmatpush.msrb.mxu1 %v5206_v37  ;;  %v5537_v37 = vld [vmem:[%s13305_s9 + $0x68] sm:$0xff] }
 0x5c8   : > { %v5023_v19 = vpop.permute.xlu0 %5022 }
 0x5c9   : > { %v5147_v51 = vsel %vm3728_vm7, %v12073_v57, %v5023_v19  ;;  %v5049_v57 = vrot.slane %v12085_v11, 2  ;;  %v5205_v19 = vld [vmem:[%s13303_s7 + $0x108] sm:$0xff] }
 0x5ca   : > { %5276 = vmatmul.f32.vlgmr.msrb.gmra.mxu2 %v5147_v51  ;;  %v12406_v51 = vsel %vm1081_vm1, %v5051_v2, %v5053_v20  ;;  %5356 = vmatpush.msrb.mxu1 %v5205_v19  ;;  %v5220_v20 = vld [vmem:[%s13303_s7 + $0x180] sm:$0xff] }
 0x5cb   : > { %v12313_v3 = vsel %vm1081_vm1, %v5047_v32, %v5049_v57  ;;  %v12365_v34 = vsel %vm1081_vm1, %v5049_v57, %v5051_v2  ;;  %v5239_v32 = vld [vmem:[%s13303_s7 + $0x218] sm:$0xff]  ;;  %v5204_v57 = vld [vmem:[%s13303_s7 + $0x100] sm:$0xff]  ;;  %v5059_v2 = vrot.slane %v12156_v44, 2 }
 0x5cc   : > { %5436 = vmatpush.msra.mxu2 %v5239_v32  ;;  %5357 = vmatpush.msrb.mxu1 %v5204_v57 }
 0x5ce   : > { %5437 = vmatpush.msra.mxu2 %v5238_v30 }
 0x5d2   : > { %5279 = vmatmul.f32.gmra.mxu2 %v5148_v60  ;;  %v5237_v60 = vld [vmem:[%s13303_s7 + $0x208] sm:$0xff] }
 0x5d3   : > { %5438 = vmatpush.msra.mxu2 %v5237_v60 }
 0x5d8   : > { %v5027_v26 = vpop.permute.xlu0 %5026 }
 0x5d9   : > { %v5149_v31 = vsel %vm3728_vm7, %v12085_v11, %v5027_v26  ;;  %v5156_v1 = vsel %vm3728_vm7, %v12313_v3, %v5027_v26  ;;  %v5236_v26 = vld [vmem:[%s13303_s7 + $0x200] sm:$0xff]  ;;  %v5539_v11 = vld [vmem:[%s13305_s9 + $0x78] sm:$0xff] }
 0x5da   : > { %5282 = vmatmul.f32.gmra.mxu2 %v5149_v31  ;;  %5320 = vmatmul.f32.gmra.mxu0 %v5156_v1  ;;  %v12326_v8 = vpop.permute.xlu2 %6948  ;;  %v5223_v31 = vld [vmem:[%s13303_s7 + $0x198] sm:$0xff]  ;;  %v5222_v1 = vld [vmem:[%s13303_s7 + $0x190] sm:$0xff] }
 0x5db   : > { %v6950_v49 = vunpack.i.l.bf16 %v12326_v8  ;;  %v6951_v17 = vunpack.i.h.bf16 %v12326_v8  ;;  %5439 = vmatpush.msra.mxu2 %v5236_v26  ;;  %5395 = vmatpush.msra.mxu3 %v5223_v31  ;;  %v12447_v8 = vsel %vm1081_vm1, %v5055_v47, %v5057_v42  ;;  %v5530_v26 = vld [vmem:[%s13305_s9 + $0x30] sm:$0xff] }
 0x5dc   : > { %5743 = vmatpush.msra.mxu1 %v5539_v11 }
 0x5dd   : > { %v5159_v63 = vsel %vm3728_vm7, %v12342_v43, %v6950_v49  ;;  %v5151_v23 = vsel %vm3728_vm7, %v12106_v62, %v6951_v17  ;;  %v5158_v24 = vsel %vm3728_vm7, %v12406_v51, %v6951_v17  ;;  %v5152_v9 = vsel %vm3728_vm7, %v12126_v52, %v6950_v49  ;;  %5396 = vmatpush.msra.mxu3 %v5222_v1  ;;  %v5529_v1 = vld [vmem:[%s13305_s9 + $0x28] sm:$0xff] }
 0x5de   : > { %5329 = vmatmul.f32.vlgmr.msrb.gmra.mxu3 %v5159_v63  ;;  %v12455_v63 = vsel %vm1081_vm1, %v5057_v42, %v5059_v2  ;;  %v5133_v17 = vrot.slane %v12106_v62, 4  ;;  %v5535_v62 = vld [vmem:[%s13305_s9 + $0x58] sm:$0xff]  ;;  %v5526_v42 = vld [vmem:[%s13305_s9 + $0x10] sm:$0xff] }
 0x5df   : > { %5397 = vmatpush.msra.mxu3 %v5221_v36 }
 0x5e0   : > { %v5029_v28 = vpop.permute.xlu1 %5028 }
 0x5e1   : > { %v5150_v15 = vsel %vm3728_vm7, %v12097_v7, %v5029_v28  ;;  %v5157_v59 = vsel %vm3728_vm7, %v12365_v34, %v5029_v28  ;;  %5398 = vmatpush.msra.mxu3 %v5220_v20  ;;  %v5131_v28 = vrot.slane %v12097_v7, 4  ;;  %v4912_v7 = vpop.f32.mrf.mxu3 }
 0x5e2   : > { %5285 = vmatmul.f32.gmra.mxu2 %v5150_v15  ;;  %5323 = vmatmul.f32.gmra.mxu0 %v5157_v59  ;;  %v12468_v59 = vsel %vm1081_vm1, %v5059_v2, %v5061_v4 }
 0x5e3   : > { %v5132_v32 = vsel %vm1771_vm3, %v5130_v18, %v5131_v28  ;;  %v5134_v27 = vsel %vm1771_vm3, %v5131_v28, %v5133_v17 }
 0x5ea   : > { %5288 = vmatmul.f32.gmra.mxu2 %v5151_v23  ;;  %5326 = vmatmul.f32.gmra.mxu0 %v5158_v24  ;;  %v5135_v23 = vrot.slane %v12126_v52, 4  ;;  %v5532_v24 = vld [vmem:[%s13305_s9 + $0x40] sm:$0xff]  ;;  %v5531_v52 = vld [vmem:[%s13305_s9 + $0x38] sm:$0xff] }
 0x5ec   : > { %v5136_v38 = vsel %vm1771_vm3, %v5133_v17, %v5135_v23  ;;  %v5570_v17 = vld [vmem:[%s13305_s9 + $0x170] sm:$0xff] }
 0x5f1   : > { %v5075_v29 = vpop.permute.xlu2 %5074 }
 0x5f2   : > { %5291 = vmatmul.f32.gmra.mxu2 %v5152_v9  ;;  %v5162_v56 = vsel %vm3728_vm7, %v12468_v59, %v5075_v29  ;;  %v5528_v9 = vld [vmem:[%s13305_s9 + $0x20] sm:$0xff]  ;;  %v5143_v29 = vrot.slane %v12210_v13, 4 }
 0x5f8   : > { %v5035_v48 = vpop.permute.xlu0 %5034 }
 0x5f9   : > { %v5153_v49 = vsel %vm3728_vm7, %v12136_v12, %v5035_v48  ;;  %v5160_v39 = vsel %vm3728_vm7, %v12447_v8, %v5035_v48  ;;  %v5102_v60 = vpop.permute.xlu2 %5101 }
 0x5fa   : > { %5294 = vmatmul.f32.gmra.mxu2 %v5153_v49  ;;  %5332 = vmatmul.f32.gmra.mxu3 %v5160_v39  ;;  %v5165_v57 = vsel %vm3728_vm7, %v12406_v51, %v5102_v60  ;;  %v5137_v51 = vrot.slane %v12136_v12, 4  ;;  %v5527_v12 = vld [vmem:[%s13305_s9 + $0x18] sm:$0xff]  ;;  %v5525_v49 = vld [vmem:[%s13305_s9 + $0x8] sm:$0xff]  ;;  %v5524_v39 = vld [vmem:[%s13305_s9] sm:$0xff] }
 0x5fb   : > { %v5567_v60 = vld [vmem:[%s13305_s9 + $0x158] sm:$0xff] }
 0x5fc   : > { %v5138_v20 = vsel %vm1771_vm3, %v5135_v23, %v5137_v51  ;;  %v5587_v23 = vld [vmem:[%s13305_s9 + $0x1f8] sm:$0xff] }
 0x5fd   : > { %5862 = vmatpush.msrb.mxu2 %v5587_v23 }
 0x600   : > { %v5100_v10 = vpop.permute.xlu0 %5099  ;;  %v5037_v53 = vpop.permute.xlu1 %5036 }
 0x601   : > { %v5154_v22 = vsel %vm3728_vm7, %v12156_v44, %v5037_v53  ;;  %v5161_v47 = vsel %vm3728_vm7, %v12455_v63, %v5037_v53  ;;  %v5164_v19 = vsel %vm3728_vm7, %v12365_v34, %v5100_v10  ;;  %v5533_v34 = vld [vmem:[%s13305_s9 + $0x48] sm:$0xff]  ;;  %v5106_v48 = vpop.permute.xlu2 %5105  ;;  %v5141_v53 = vrot.slane %v12180_v25, 4 }
 0x602   : > { %5297 = vmatmul.f32.gmra.mxu2 %v5154_v22  ;;  %5335 = vmatmul.f32.gmra.mxu3 %v5161_v47  ;;  %v5167_v2 = vsel %vm3728_vm7, %v12447_v8, %v5106_v48  ;;  %v5563_v48 = vld [vmem:[%s13305_s9 + $0x138] sm:$0xff] }
 0x608   : > { %v12463_v46 = vpop.permute.xlu0 %4971  ;;  %v5098_v15 = vpop.permute.xlu1 %5097 }
 0x609   : > { %v4984_v5 = vmul.f32 %v12065_v61, %v12463_v46  ;;  %v5163_v55 = vsel %vm3728_vm7, %v12313_v3, %v5098_v15  ;;  %v5538_v61 = vld [vmem:[%s13305_s9 + $0x70] sm:$0xff]  ;;  %v5144_v15 = vsel %vm1771_vm3, %v5141_v53, %v5143_v29  ;;  %v5112_v18 = vpop.permute.xlu2 %5111 }
 0x60a   : > { %5338 = vmatmul.f32.gmra.mxu3 %v5162_v56  ;;  %5358 = vmatmul.f32.vlgmr.msrb.gmra.mxu1 %v5163_v55 }
 0x60b   : > { %v12478_v58 = vadd.f32 %v4984_v5, %v4912_v7  ;;  %6409 = vmatmul.msk.f32.vlgmr.msra.gmra.mxu2 %vm3728_vm7, %v5132_v32  ;;  %5744 = vmatpush.msra.mxu1 %v5538_v61  ;;  %v12577_v7 = vld [vmem:[%s13304_s8] ss:$0 sm:$0xff] }
 0x60c   : > { %v12581_v32 = vmul.f32 %v12577_v7, %v12060_v41  ;;  %v5554_v41 = vld [vmem:[%s13305_s9 + $0xf0] sm:$0xff] }
 0x60d   : > { %v5125_v3 = vrot.slane %v12478_v58, 3  ;;  %5745 = vmatpush.msra.mxu1 %v5537_v37  ;;  %v5145_v5 = vrot.slane %v12478_v58, 4  ;;  %v5571_v37 = vld [vmem:[%s13305_s9 + $0x178] sm:$0xff] }
 0x60e   : > { %5809 = vmatpush.msrb.mxu3 %v5571_v37  ;;  %v5578_v37 = vld [vmem:[%s13305_s9 + $0x1b0] sm:$0xff] }
 0x60f   : > { %v5126_v30 = vsel %vm1544_vm2, %v5095_v54, %v5125_v3  ;;  %5746 = vmatpush.msra.mxu1 %v5536_v35  ;;  %v5534_v54 = vld [vmem:[%s13305_s9 + $0x50] sm:$0xff]  ;;  %v5555_v3 = vld [vmem:[%s13305_s9 + $0xf8] sm:$0xff]  ;;  %v5569_v35 = vld [vmem:[%s13305_s9 + $0x168] sm:$0xff] }
 0x610   : > { %5127 = vrot.lane.b32.xlu0 %v5126_v30, %s6975_s22  ;;  %v5104_v31 = vpop.permute.xlu1 %5103  ;;  %5702 = vmatpush.msra.mxu0 %v5555_v3  ;;  %v5553_v30 = vld [vmem:[%s13305_s9 + $0xe8] sm:$0xff]  ;;  %v5558_v3 = vld [vmem:[%s13305_s9 + $0x110] sm:$0xff]  ;;  %s6451_s22 = smul.u32 56, %s14341_s30 }
 0x611   : > { %5747 = vmatpush.msra.mxu1 %v5535_v62  ;;  %v5166_v36 = vsel %vm3728_vm7, %v12342_v43, %v5104_v31  ;;  %v5139_v43 = vrot.slane %v12156_v44, 4  ;;  %v5108_v44 = vpop.permute.xlu0 %5107  ;;  %5810 = vmatpush.msrb.mxu3 %v5570_v17  ;;  %v5548_v31 = vld [vmem:[%s13305_s9 + $0xc0] sm:$0xff]  ;;  %v5557_v17 = vld [vmem:[%s13305_s9 + $0x108] sm:$0xff] }
 0x612   : > { %5361 = vmatmul.f32.gmra.mxu1 %v5164_v19  ;;  %5399 = vmatmul.f32.vlgmr.msra.gmra.mxu3 %v5164_v19  ;;  %v5168_v22 = vsel %vm3728_vm7, %v12455_v63, %v5108_v44  ;;  %v5077_v63 = vrot.slane %v12210_v13, 2  ;;  %v5552_v19 = vld [vmem:[%s13305_s9 + $0xe0] sm:$0xff]  ;;  %v5545_v44 = vld [vmem:[%s13305_s9 + $0xa8] sm:$0xff]  ;;  %s467_s20 = scalar_lea.vmem %s13310_s14, %s6451_s22 }
 0x613   : > { %6410 = vmatmul.msk.f32.gmra.mxu2 %vm3728_vm7, %v5134_v27  ;;  %5748 = vmatpush.msra.mxu1 %v5534_v54  ;;  %v5140_v10 = vsel %vm1771_vm3, %v5137_v51, %v5139_v43  ;;  %v5142_v47 = vsel %vm1771_vm3, %v5139_v43, %v5141_v53  ;;  %v5568_v27 = vld [vmem:[%s13305_s9 + $0x160] sm:$0xff]  ;;  %v5551_v54 = vld [vmem:[%s13305_s9 + $0xd8] sm:$0xff]  ;;  %v5581_v53 = vld [vmem:[%s13305_s9 + $0x1c8] sm:$0xff] }
 0x614   : > { %v5078_v55 = vsel %vm1081_vm1, %v5061_v4, %v5077_v63  ;;  %5703 = vmatpush.msra.mxu0 %v5554_v41  ;;  %5811 = vmatpush.msrb.mxu3 %v5569_v35  ;;  %v5564_v51 = vld [vmem:[%s13305_s9 + $0x140] sm:$0xff]  ;;  %v5583_v43 = vld [vmem:[%s13305_s9 + $0x1d8] sm:$0xff]  ;;  %v5541_v41 = vld [vmem:[%s13305_s9 + $0x88] sm:$0xff] }
 0x615   : > { %5749 = vmatpush.msra.mxu1 %v5533_v34  ;;  %v5170_v56 = vsel %vm3728_vm7, %v5078_v55, %v5112_v18  ;;  %v5550_v34 = vld [vmem:[%s13305_s9 + $0xd0] sm:$0xff]  ;;  %v5559_v55 = vld [vmem:[%s13305_s9 + $0x118] sm:$0xff] }
 0x616   : > { %5704 = vmatpush.msra.mxu0 %v5553_v30  ;;  %5812 = vmatpush.msrb.mxu3 %v5568_v27  ;;  %v5577_v30 = vld [vmem:[%s13305_s9 + $0x1a8] sm:$0xff]  ;;  %v5556_v27 = vld [vmem:[%s13305_s9 + $0x100] sm:$0xff] }
 0x617   : > { %5750 = vmatpush.msra.mxu1 %v5532_v24  ;;  %v5566_v24 = vld [vmem:[%s13305_s9 + $0x150] sm:$0xff] }
 0x618   : > { %v5110_v8 = vpop.permute.xlu1 %5109  ;;  %5705 = vmatpush.msra.mxu0 %v5552_v19  ;;  %5813 = vmatpush.msrb.mxu3 %v5567_v60  ;;  %v5540_v19 = vld [vmem:[%s13305_s9 + $0x80] sm:$0xff] }
 0x619   : > { %5751 = vmatpush.msra.mxu1 %v5531_v52  ;;  %v5169_v28 = vsel %vm3728_vm7, %v12468_v59, %v5110_v8  ;;  %v5146_v59 = vsel %vm1771_vm3, %v5143_v29, %v5145_v5  ;;  %v5565_v52 = vld [vmem:[%s13305_s9 + $0x148] sm:$0xff]  ;;  %v5560_v29 = vld [vmem:[%s13305_s9 + $0x120] sm:$0xff]  ;;  %v5543_v5 = vld [vmem:[%s13305_s9 + $0x98] sm:$0xff] }
 0x61a   : > { %5364 = vmatmul.f32.gmra.mxu1 %v5165_v57  ;;  %5402 = vmatmul.f32.gmra.mxu3 %v5165_v57  ;;  %v5586_v57 = vld [vmem:[%s13305_s9 + $0x1f0] sm:$0xff] }
 0x61b   : > { %6411 = vmatmul.msk.f32.gmra.mxu2 %vm3728_vm7, %v5136_v38  ;;  %5752 = vmatpush.msra.mxu1 %v5530_v26  ;;  %v5549_v38 = vld [vmem:[%s13305_s9 + $0xc8] sm:$0xff] }
 0x61c   : > { %5706 = vmatpush.msra.mxu0 %v5551_v54  ;;  %5814 = vmatpush.msrb.mxu3 %v5566_v24  ;;  %v5585_v26 = vld [vmem:[%s13305_s9 + $0x1e8] sm:$0xff]  ;;  %v5576_v54 = vld [vmem:[%s13305_s9 + $0x1a0] sm:$0xff]  ;;  %v5575_v24 = vld [vmem:[%s13305_s9 + $0x198] sm:$0xff] }
 0x61d   : > { %5753 = vmatpush.msra.mxu1 %v5529_v1  ;;  %5863 = vmatpush.msrb.mxu2 %v5586_v57  ;;  %v5584_v1 = vld [vmem:[%s13305_s9 + $0x1e0] sm:$0xff]  ;;  %v5574_v57 = vld [vmem:[%s13305_s9 + $0x190] sm:$0xff] }
 0x61e   : > { %5707 = vmatpush.msra.mxu0 %v5550_v34  ;;  %5815 = vmatpush.msrb.mxu3 %v5565_v52  ;;  %v5573_v52 = vld [vmem:[%s13305_s9 + $0x188] sm:$0xff] }
 0x61f   : > { %5754 = vmatpush.msra.mxu1 %v5528_v9  ;;  %5864 = vmatpush.msrb.mxu2 %v5585_v26 }
 0x620   : > { %5708 = vmatpush.msra.mxu0 %v5549_v38  ;;  %5816 = vmatpush.msrb.mxu3 %v5564_v51  ;;  %v5572_v51 = vld [vmem:[%s13305_s9 + $0x180] sm:$0xff] }
 0x621   : > { %5755 = vmatpush.msra.mxu1 %v5527_v12  ;;  %5865 = vmatpush.msrb.mxu2 %v5584_v1 }
 0x622   : > { %5367 = vmatmul.f32.gmra.mxu1 %v5166_v36  ;;  %5405 = vmatmul.f32.gmra.mxu3 %v5166_v36 }
 0x623   : > { %6412 = vmatmul.msk.f32.gmra.mxu2 %vm3728_vm7, %v5138_v20  ;;  %5756 = vmatpush.msra.mxu1 %v5526_v42  ;;  %v5547_v42 = vld [vmem:[%s13305_s9 + $0xb8] sm:$0xff] }
 0x624   : > { %5709 = vmatpush.msra.mxu0 %v5548_v31  ;;  %5817 = vmatpush.msrb.mxu3 %v5563_v48 }
 0x625   : > { %5757 = vmatpush.msra.mxu1 %v5525_v49  ;;  %v5122_v49 = vrot.slane %v12478_v58, 2  ;;  %5866 = vmatpush.msrb.mxu2 %v5583_v43  ;;  %v5561_v58 = vld [vmem:[%s13305_s9 + $0x128] sm:$0xff] }
 0x626   : > { %5710 = vmatpush.msra.mxu0 %v5547_v42 }
 0x627   : > { %5758 = vmatpush.msra.mxu1 %v5524_v39  ;;  %v5546_v39 = vld [vmem:[%s13305_s9 + $0xb0] sm:$0xff]  ;;  %v5123_v8 = vsel %vm1081_vm1, %v5077_v63, %v5122_v49 }
 0x628   : > { %5711 = vmatpush.msra.mxu0 %v5546_v39 }
 0x62a   : > { %5370 = vmatmul.f32.gmra.mxu1 %v5167_v2  ;;  %5408 = vmatmul.f32.gmra.mxu3 %v5167_v2  ;;  %v5562_v2 = vld [vmem:[%s13305_s9 + $0x130] sm:$0xff] }
 0x62b   : > { %6413 = vmatmul.msk.f32.gmra.mxu2 %vm3728_vm7, %v5140_v10  ;;  %v5582_v10 = vld [vmem:[%s13305_s9 + $0x1d0] sm:$0xff]  ;;  %5818 = vmatpush.msrb.mxu3 %v5562_v2 }
 0x62c   : > { %5867 = vmatpush.msrb.mxu2 %v5582_v10  ;;  %5712 = vmatpush.msra.mxu0 %v5545_v44 }
 0x62d   : > { %5819 = vmatpush.msrb.mxu3 %v5561_v58 }
 0x62e   : > { %5868 = vmatpush.msrb.mxu2 %v5581_v53 }
 0x62f   : > { %5820 = vmatpush.msrb.mxu3 %v5560_v29  ;;  %v5619_v29 = vld [vmem:[%s13305_s9 + $0x2f8] sm:$0xff] }
 0x630   : > { %5988 = vmatpush.msrb.mxu1 %v5619_v29 }
 0x631   : > { %5821 = vmatpush.msrb.mxu3 %v5559_v55 }
 0x632   : > { %5373 = vmatmul.f32.gmra.mxu1 %v5168_v22  ;;  %5411 = vmatmul.f32.gmra.mxu3 %v5168_v22  ;;  %v5544_v22 = vld [vmem:[%s13305_s9 + $0xa0] sm:$0xff] }
 0x633   : > { %6414 = vmatmul.msk.f32.gmra.mxu2 %vm3728_vm7, %v5142_v47  ;;  %5713 = vmatpush.msra.mxu0 %v5544_v22 }
 0x634   : > { %5822 = vmatpush.msrb.mxu3 %v5558_v3 }
 0x635   : > { %5714 = vmatpush.msra.mxu0 %v5543_v5 }
 0x636   : > { %5823 = vmatpush.msrb.mxu3 %v5557_v17 }
 0x637   : > { %v5318_v35 = vpop.f32.mrf.mxu0 }
 0x638   : > { %5824 = vmatpush.msrb.mxu3 %v5556_v27 }
 0x63a   : > { %5376 = vmatmul.f32.gmra.mxu1 %v5169_v28  ;;  %5414 = vmatmul.f32.gmra.mxu3 %v5169_v28  ;;  %v5580_v28 = vld [vmem:[%s13305_s9 + $0x1c0] sm:$0xff] }
 0x63b   : > { %6415 = vmatmul.msk.f32.gmra.mxu2 %vm3728_vm7, %v5144_v15 }
 0x63c   : > { %5869 = vmatpush.msrb.mxu2 %v5580_v28 }
 0x642   : > { %5379 = vmatmul.f32.gmra.mxu1 %v5170_v56  ;;  %5417 = vmatmul.f32.gmra.mxu3 %v5170_v56  ;;  %v5579_v56 = vld [vmem:[%s13305_s9 + $0x1b8] sm:$0xff] }
 0x643   : > { %6416 = vmatmul.msk.f32.gmra.mxu2 %vm3728_vm7, %v5146_v59  ;;  %v5542_v59 = vld [vmem:[%s13305_s9 + $0x90] sm:$0xff] }
 0x644   : > { %5870 = vmatpush.msrb.mxu2 %v5579_v56  ;;  %5715 = vmatpush.msra.mxu0 %v5542_v59 }
 0x646   : > { %5871 = vmatpush.msrb.mxu2 %v5578_v37  ;;  %5716 = vmatpush.msra.mxu0 %v5541_v41 }
 0x648   : > { %5872 = vmatpush.msrb.mxu2 %v5577_v30  ;;  %5717 = vmatpush.msra.mxu0 %v5540_v19 }
 0x64a   : > { %5759 = vmatmul.f32.vlgmr.msra.gmra.mxu1 %v12581_v32  ;;  %5873 = vmatpush.msrb.mxu2 %v5576_v54  ;;  %v5616_v54 = vld [vmem:[%s13305_s9 + $0x2e0] sm:$0xff] }
 0x64c   : > { %5874 = vmatpush.msrb.mxu2 %v5575_v24 }
 0x64d   : > { %v12584_v25 = vpop.f32.mrf.mxu2 }
 0x64e   : > { %v5319_v38 = vadd.f32 %v5318_v35, %v12584_v25  ;;  %5875 = vmatpush.msrb.mxu2 %v5574_v57 }
 0x650   : > { %5876 = vmatpush.msrb.mxu2 %v5573_v52  ;;  %v5615_v52 = vld [vmem:[%s13305_s9 + $0x2d8] sm:$0xff] }
 0x652   : > { %5877 = vmatpush.msrb.mxu2 %v5572_v51 }
 0x655   : > { %v12586_v4 = vpop.f32.mrf.mxu2 }
 0x657   : > { %v5321_v26 = vpop.f32.mrf.mxu0 }
 0x658   : > { %v5322_v25 = vadd.f32 %v5321_v26, %v12586_v4  ;;  %v5618_v4 = vld [vmem:[%s13305_s9 + $0x2f0] sm:$0xff] }
 0x659   : > { %5989 = vmatpush.msrb.mxu1 %v5618_v4 }
 0x65d   : > { %v12588_v11 = vpop.f32.mrf.mxu2 }
 0x65f   : > { %v5324_v44 = vpop.f32.mrf.mxu0 }
 0x660   : > { %v5325_v55 = vadd.f32 %v5324_v44, %v12588_v11  ;;  %v5617_v11 = vld [vmem:[%s13305_s9 + $0x2e8] sm:$0xff] }
 0x661   : > { %v12654_v9 = vpop.f32.mrf.mxu3  ;;  %5990 = vmatpush.msrb.mxu1 %v5617_v11 }
 0x663   : > { %5991 = vmatpush.msrb.mxu1 %v5616_v54 }
 0x665   : > { %v12590_v61 = vpop.f32.mrf.mxu2  ;;  %5992 = vmatpush.msrb.mxu1 %v5615_v52 }
 0x667   : > { %v5327_v19 = vpop.f32.mrf.mxu0 }
 0x66d   : > { %v12616_v62 = vpop.f32.mrf.mxu2 }
 0x675   : > { %v12656_v36 = vpop.f32.mrf.mxu2 }
 0x67d   : > { %v12658_v20 = vpop.f32.mrf.mxu2  ;;  %v12660_v12 = vpop.f32.mrf.mxu3 }
 0x682   : > { %v5128_v47 = vpop.permute.xlu0 %5127 }
 0x683   : > { %v5171_v15 = vsel %vm3728_vm7, %v5123_v8, %v5128_v47 }
 0x684   : > { %5420 = vmatmul.f32.gmra.mxu3 %v5171_v15  ;;  %v5677_v15 = vrot.slane %v12581_v32, 1 }
 0x685   : > { %v12703_v18 = vpop.f32.mrf.mxu2  ;;  %v12705_v13 = vpop.f32.mrf.mxu3 }
 0x686   : > { %v5337_v52 = vadd.f32 %v12705_v13, %v12658_v20  ;;  %v5605_v20 = vld [vmem:[%s13305_s9 + $0x288] sm:$0xff] }
 0x687   : > { %v5359_v63 = vpop.f32.mrf.mxu1 }
 0x688   : > { %v5360_v31 = vadd.f32 %v5359_v63, %v5319_v38  ;;  %v5784_v63 = vrot.slane %v12581_v32, 2 }
 0x68d   : > { %v12743_v60 = vpop.f32.mrf.mxu3 }
 0x68e   : > { %v5441_v23 = vpop.f32.mrf.mxu2 }
 0x68f   : > { %v5362_v34 = vpop.f32.mrf.mxu1 }
 0x690   : > { %v5363_v2 = vadd.f32 %v5362_v34, %v5322_v25 }
 0x695   : > { %v5400_v1 = vpop.f32.mrf.mxu3 }
 0x696   : > { %v5401_v42 = vadd.f32 %v5400_v1, %v5360_v31  ;;  %v5444_v48 = vpop.f32.mrf.mxu2 }
 0x697   : > { %v5365_v49 = vpop.f32.mrf.mxu1 }
 0x698   : > { %v5442_v43 = vadd.f32 %v5441_v23, %v5401_v42  ;;  %v5366_v41 = vadd.f32 %v5365_v49, %v5325_v55  ;;  %v5610_v55 = vld [vmem:[%s13305_s9 + $0x2b0] sm:$0xff] }
 0x69a   : > { %v5473_v39 = vrot.slane %v5442_v43, 6 }
 0x69c   : > { %v5497_v10 = vsel %vm2461_vm5, 0.0, %v5473_v39 }
 0x69d   : > { %v5504_v58 = vadd.f32 %v12577_v7, %v5497_v10  ;;  %v5403_v53 = vpop.f32.mrf.mxu3 }
 0x69e   : > { %v5404_v22 = vadd.f32 %v5403_v53, %v5363_v2  ;;  %v5447_v47 = vpop.f32.mrf.mxu2 }
 0x69f   : > { %v12762_v8 = vmul.f32 %v5504_v58, %v12067_v14  ;;  %v5368_v59 = vpop.f32.mrf.mxu1  ;;  %v5331_v58 = vadd.f32 %v12654_v9, %v12616_v62  ;;  %v5611_v62 = vld [vmem:[%s13305_s9 + $0x2b8] sm:$0xff] }
 0x6a0   : > { %v5445_v28 = vadd.f32 %v5444_v48, %v5404_v22 }
 0x6a1   : > { %5762 = vmatmul.f32.gmra.mxu1 %v12762_v8  ;;  %v5678_v5 = vrot.slane %v12762_v8, 1  ;;  %v5785_v14 = vrot.slane %v12762_v8, 2 }
 0x6a2   : > { %v5474_v56 = vrot.slane %v5445_v28, 6 }
 0x6a3   : > { %v5679_v3 = vsel %vm854_vm0, %v5677_v15, %v5678_v5  ;;  %v5786_v37 = vsel %vm1081_vm1, %v5784_v63, %v5785_v14 }
 0x6a4   : > { %v5475_v17 = vsel %vm2461_vm5, %v5473_v39, %v5474_v56  ;;  %5718 = vmatmul.f32.vlgmr.msra.gmra.mxu0 %v5679_v3  ;;  %5825 = vmatmul.f32.vlgmr.msrb.gmra.mxu3 %v5786_v37  ;;  %v5613_v39 = vld [vmem:[%s13305_s9 + $0x2c8] sm:$0xff]  ;;  %v5334_v37 = vadd.f32 %v12660_v12, %v12656_v36  ;;  %v5608_v36 = vld [vmem:[%s13305_s9 + $0x2a0] sm:$0xff] }
 0x6a5   : > { %v5505_v32 = vadd.f32 %v12577_v7, %v5475_v17  ;;  %v5406_v30 = vpop.f32.mrf.mxu3 }
 0x6a6   : > { %v5407_v35 = vadd.f32 %v5406_v30, %v5366_v41  ;;  %v5450_v34 = vpop.f32.mrf.mxu2 }
 0x6a7   : > { %v12781_v27 = vmul.f32 %v5505_v32, %v12079_v0  ;;  %v5328_v0 = vadd.f32 %v5327_v19, %v12590_v61  ;;  %v5614_v61 = vld [vmem:[%s13305_s9 + $0x2d0] sm:$0xff]  ;;  %v5371_v48 = vpop.f32.mrf.mxu1 }
 0x6a8   : > { %v5448_v23 = vadd.f32 %v5447_v47, %v5407_v35  ;;  %5993 = vmatpush.msrb.mxu1 %v5614_v61  ;;  %v5372_v4 = vadd.f32 %v5371_v48, %v5331_v58 }
 0x6a9   : > { %5765 = vmatmul.f32.gmra.mxu1 %v12781_v27  ;;  %v5680_v24 = vrot.slane %v12781_v27, 1  ;;  %v5787_v57 = vrot.slane %v12781_v27, 2  ;;  %v5369_v51 = vadd.f32 %v5368_v59, %v5328_v0 }
 0x6aa   : > { %v5476_v38 = vrot.slane %v5448_v23, 6  ;;  %5994 = vmatpush.msrb.mxu1 %v5613_v39 }
 0x6ab   : > { %v5681_v26 = vsel %vm854_vm0, %v5678_v5, %v5680_v24  ;;  %v12798_v31 = vsel %vm1081_vm1, %v5785_v14, %v5787_v57 }
 0x6ac   : > { %v5477_v1 = vsel %vm2461_vm5, %v5474_v56, %v5476_v38  ;;  %5721 = vmatmul.f32.gmra.mxu0 %v5681_v26  ;;  %5828 = vmatmul.f32.gmra.mxu3 %v12798_v31 }
 0x6ad   : > { %v5506_v42 = vadd.f32 %v12577_v7, %v5477_v1  ;;  %5878 = vmatmul.f32.vlgmr.msrb.gmra.mxu2 %v5681_v26  ;;  %v5409_v43 = vpop.f32.mrf.mxu3 }
 0x6ae   : > { %v5410_v49 = vadd.f32 %v5409_v43, %v5369_v51  ;;  %v5453_v22 = vpop.f32.mrf.mxu2 }
 0x6af   : > { %v12807_v25 = vmul.f32 %v5506_v42, %v12091_v21  ;;  %v5612_v21 = vld [vmem:[%s13305_s9 + $0x2c0] sm:$0xff]  ;;  %v5374_v14 = vpop.f32.mrf.mxu1 }
 0x6b0   : > { %v5451_v2 = vadd.f32 %v5450_v34, %v5410_v49  ;;  %5995 = vmatpush.msrb.mxu1 %v5612_v21  ;;  %v5375_v30 = vadd.f32 %v5374_v14, %v5334_v37  ;;  %v5607_v34 = vld [vmem:[%s13305_s9 + $0x298] sm:$0xff]  ;;  %v5634_v37 = vld [vmem:[%s13305_s9 + $0x370] sm:$0xff] }
 0x6b1   : > { %5768 = vmatmul.f32.gmra.mxu1 %v12807_v25  ;;  %v5682_v10 = vrot.slane %v12807_v25, 1  ;;  %v5789_v44 = vrot.slane %v12807_v25, 2 }
 0x6b2   : > { %v5478_v53 = vrot.slane %v5451_v2, 6  ;;  %5996 = vmatpush.msrb.mxu1 %v5611_v62  ;;  %v5604_v2 = vld [vmem:[%s13305_s9 + $0x280] sm:$0xff] }
 0x6b3   : > { %v5683_v47 = vsel %vm854_vm0, %v5680_v24, %v5682_v10  ;;  %v12822_v29 = vsel %vm1081_vm1, %v5787_v57, %v5789_v44 }
 0x6b4   : > { %v5479_v28 = vsel %vm2461_vm5, %v5476_v38, %v5478_v53  ;;  %5724 = vmatmul.f32.gmra.mxu0 %v5683_v47  ;;  %5831 = vmatmul.f32.gmra.mxu3 %v12822_v29 }
 0x6b5   : > { %v5507_v9 = vadd.f32 %v12577_v7, %v5479_v28  ;;  %5881 = vmatmul.f32.gmra.mxu2 %v5683_v47  ;;  %v5412_v15 = vpop.f32.mrf.mxu3  ;;  %5997 = vmatpush.msrb.mxu1 %v5610_v55  ;;  %v5603_v55 = vld [vmem:[%s13305_s9 + $0x278] sm:$0xff] }
 0x6b6   : > { %v5413_v63 = vadd.f32 %v5412_v15, %v5372_v4  ;;  %v5456_v19 = vpop.f32.mrf.mxu2  ;;  %5914 = vmatpush.msrb.mxu0 %v5603_v55  ;;  %v5623_v55 = vld [vmem:[%s13305_s9 + $0x318] sm:$0xff] }
 0x6b7   : > { %v12831_v5 = vmul.f32 %v5507_v9, %v12100_v50  ;;  %v5609_v50 = vld [vmem:[%s13305_s9 + $0x2a8] sm:$0xff]  ;;  %v5377_v57 = vpop.f32.mrf.mxu1 }
 0x6b8   : > { %v5454_v56 = vadd.f32 %v5453_v22, %v5413_v63  ;;  %5998 = vmatpush.msrb.mxu1 %v5609_v50  ;;  %v5378_v61 = vadd.f32 %v5377_v57, %v5337_v52  ;;  %v5963_v63 = vrot.slane %v12762_v8, 3  ;;  %v5633_v50 = vld [vmem:[%s13305_s9 + $0x368] sm:$0xff]  ;;  %v5630_v57 = vld [vmem:[%s13305_s9 + $0x350] sm:$0xff] }
 0x6b9   : > { %5771 = vmatmul.f32.gmra.mxu1 %v12831_v5  ;;  %v5684_v59 = vrot.slane %v12831_v5, 1  ;;  %v5791_v3 = vrot.slane %v12831_v5, 2  ;;  %v5629_v52 = vld [vmem:[%s13305_s9 + $0x348] sm:$0xff] }
 0x6ba   : > { %v5480_v41 = vrot.slane %v5454_v56, 6  ;;  %5999 = vmatpush.msrb.mxu1 %v5608_v36  ;;  %v5635_v56 = vld [vmem:[%s13305_s9 + $0x378] sm:$0xff] }
 0x6bb   : > { %v5685_v17 = vsel %vm854_vm0, %v5682_v10, %v5684_v59  ;;  %v12846_v32 = vsel %vm1081_vm1, %v5789_v44, %v5791_v3  ;;  %6041 = vmatpush.msra.mxu3 %v5635_v56 }
 0x6bc   : > { %v5481_v35 = vsel %vm2461_vm5, %v5478_v53, %v5480_v41  ;;  %5727 = vmatmul.f32.gmra.mxu0 %v5685_v17  ;;  %5834 = vmatmul.f32.gmra.mxu3 %v12846_v32 }
 0x6bd   : > { %v5508_v12 = vadd.f32 %v12577_v7, %v5481_v35  ;;  %5884 = vmatmul.f32.gmra.mxu2 %v5685_v17  ;;  %v5415_v11 = vpop.f32.mrf.mxu3  ;;  %6000 = vmatpush.msrb.mxu1 %v5607_v34  ;;  %v5600_v17 = vld [vmem:[%s13305_s9 + $0x260] sm:$0xff]  ;;  %v5968_v35 = vrot.slane %v12831_v5, 3  ;;  %v5651_v34 = vld [vmem:[%s13305_s9 + $0x3f8] sm:$0xff] }
 0x6be   : > { %v5416_v54 = vadd.f32 %v5415_v11, %v5375_v30  ;;  %v5459_v39 = vpop.f32.mrf.mxu2  ;;  %6042 = vmatpush.msra.mxu3 %v5634_v37  ;;  %v5632_v30 = vld [vmem:[%s13305_s9 + $0x360] sm:$0xff]  ;;  %v5599_v11 = vld [vmem:[%s13305_s9 + $0x258] sm:$0xff]  ;;  %6093 = vmatpush.msra.mxu2 %v5651_v34  ;;  %v5622_v37 = vld [vmem:[%s13305_s9 + $0x310] sm:$0xff] }
 0x6bf   : > { %v12855_v23 = vmul.f32 %v5508_v12, %v12120_v16  ;;  %v5606_v16 = vld [vmem:[%s13305_s9 + $0x290] sm:$0xff] }
 0x6c0   : > { %v5457_v24 = vadd.f32 %v5456_v19, %v5416_v54  ;;  %6001 = vmatpush.msrb.mxu1 %v5606_v16  ;;  %6043 = vmatpush.msra.mxu3 %v5633_v50  ;;  %v5631_v54 = vld [vmem:[%s13305_s9 + $0x358] sm:$0xff]  ;;  %v5649_v16 = vld [vmem:[%s13305_s9 + $0x3e8] sm:$0xff]  ;;  %v5380_v50 = vpop.f32.mrf.mxu1 }
 0x6c1   : > { %5774 = vmatmul.f32.gmra.mxu1 %v12855_v23  ;;  %v5686_v0 = vrot.slane %v12855_v23, 1  ;;  %v5793_v38 = vrot.slane %v12855_v23, 2  ;;  %v5970_v12 = vrot.slane %v12855_v23, 3 }
 0x6c2   : > { %v5482_v26 = vrot.slane %v5457_v24, 6  ;;  %6002 = vmatpush.msrb.mxu1 %v5605_v20  ;;  %6044 = vmatpush.msra.mxu3 %v5632_v30  ;;  %v5598_v24 = vld [vmem:[%s13305_s9 + $0x250] sm:$0xff]  ;;  %v5595_v20 = vld [vmem:[%s13305_s9 + $0x238] sm:$0xff]  ;;  %v5621_v30 = vld [vmem:[%s13305_s9 + $0x308] sm:$0xff] }
 0x6c3   : > { %v5687_v51 = vsel %vm854_vm0, %v5684_v59, %v5686_v0  ;;  %v12870_v1 = vsel %vm1081_vm1, %v5791_v3, %v5793_v38  ;;  %v5602_v59 = vld [vmem:[%s13305_s9 + $0x270] sm:$0xff]  ;;  %v5966_v3 = vrot.slane %v12807_v25, 3  ;;  %v12953_v19 = vsel %vm1544_vm2, %v5968_v35, %v5970_v12 }
 0x6c4   : > { %v5483_v42 = vsel %vm2461_vm5, %v5480_v41, %v5482_v26  ;;  %5730 = vmatmul.f32.gmra.mxu0 %v5687_v51  ;;  %5837 = vmatmul.f32.gmra.mxu3 %v12870_v1  ;;  %v5601_v41 = vld [vmem:[%s13305_s9 + $0x268] sm:$0xff] }
 0x6c5   : > { %v5509_v13 = vadd.f32 %v12577_v7, %v5483_v42  ;;  %5887 = vmatmul.f32.gmra.mxu2 %v5687_v51  ;;  %v5418_v48 = vpop.f32.mrf.mxu3  ;;  %6003 = vmatpush.msrb.mxu1 %v5604_v2  ;;  %v12948_v36 = vsel %vm1544_vm2, %v5966_v3, %v5968_v35  ;;  %v5596_v51 = vld [vmem:[%s13305_s9 + $0x240] sm:$0xff]  ;;  %v5626_v2 = vld [vmem:[%s13305_s9 + $0x330] sm:$0xff]  ;;  %v5340_v35 = vadd.f32 %v12743_v60, %v12703_v18 }
 0x6c6   : > { %v5419_v43 = vadd.f32 %v5418_v48, %v5378_v61  ;;  %5915 = vmatpush.msrb.mxu0 %v5602_v59  ;;  %6045 = vmatpush.msra.mxu3 %v5631_v54  ;;  %v5628_v61 = vld [vmem:[%s13305_s9 + $0x340] sm:$0xff]  ;;  %v5643_v59 = vld [vmem:[%s13305_s9 + $0x3b8] sm:$0xff] }
 0x6c7   : > { %v12879_v49 = vmul.f32 %v5509_v13, %v12124_v45  ;;  %v5648_v42 = vld [vmem:[%s13305_s9 + $0x3e0] sm:$0xff]  ;;  %v5627_v13 = vld [vmem:[%s13305_s9 + $0x338] sm:$0xff]  ;;  %v5381_v34 = vadd.f32 %v5380_v50, %v5340_v35 }
 0x6c8   : > { %v12884_v10 = vadd.f32 %v5459_v39, %v5419_v43  ;;  %5916 = vmatpush.msrb.mxu0 %v5601_v41  ;;  %6046 = vmatpush.msra.mxu3 %v5630_v57  ;;  %v5647_v43 = vld [vmem:[%s13305_s9 + $0x3d8] sm:$0xff]  ;;  %v5594_v39 = vld [vmem:[%s13305_s9 + $0x230] sm:$0xff]  ;;  %v5620_v54 = vld [vmem:[%s13305_s9 + $0x300] sm:$0xff] }
 0x6c9   : > { %5777 = vmatmul.f32.gmra.mxu1 %v12879_v49  ;;  %v5688_v44 = vrot.slane %v12879_v49, 1  ;;  %v5795_v58 = vrot.slane %v12879_v49, 2  ;;  %v5642_v41 = vld [vmem:[%s13305_s9 + $0x3b0] sm:$0xff]  ;;  %v5640_v18 = vld [vmem:[%s13305_s9 + $0x3a0] sm:$0xff]  ;;  %v5639_v57 = vld [vmem:[%s13305_s9 + $0x398] sm:$0xff] }
 0x6ca   : > { %v5484_v53 = vrot.slane %v12884_v10, 6  ;;  %5917 = vmatpush.msrb.mxu0 %v5600_v17  ;;  %6047 = vmatpush.msra.mxu3 %v5629_v52  ;;  %v5589_v17 = vld [vmem:[%s13305_s9 + $0x208] sm:$0xff]  ;;  %v5638_v52 = vld [vmem:[%s13305_s9 + $0x390] sm:$0xff] }
 0x6cb   : > { %v5689_v45 = vsel %vm854_vm0, %v5686_v0, %v5688_v44  ;;  %v12892_v21 = vsel %vm1081_vm1, %v5793_v38, %v5795_v58  ;;  %v5650_v0 = vld [vmem:[%s13305_s9 + $0x3f0] sm:$0xff]  ;;  %v5597_v38 = vld [vmem:[%s13305_s9 + $0x248] sm:$0xff] }
 0x6cc   : > { %v5485_v22 = vsel %vm2461_vm5, %v5482_v26, %v5484_v53  ;;  %5733 = vmatmul.f32.gmra.mxu0 %v5689_v45  ;;  %5840 = vmatmul.f32.gmra.mxu3 %v12892_v21  ;;  %v5972_v26 = vrot.slane %v12879_v49, 3 }
 0x6cd   : > { %v5510_v47 = vadd.f32 %v12577_v7, %v5485_v22  ;;  %5890 = vmatmul.f32.gmra.mxu2 %v5689_v45  ;;  %5918 = vmatpush.msrb.mxu0 %v5599_v11  ;;  %v5625_v45 = vld [vmem:[%s13305_s9 + $0x328] sm:$0xff]  ;;  %v5588_v11 = vld [vmem:[%s13305_s9 + $0x200] sm:$0xff] }
 0x6ce   : > { %6094 = vmatpush.msra.mxu2 %v5650_v0  ;;  %v13000_v48 = vsel %vm1544_vm2, %v5970_v12, %v5972_v26  ;;  %6048 = vmatpush.msra.mxu3 %v5628_v61  ;;  %v5641_v12 = vld [vmem:[%s13305_s9 + $0x3a8] sm:$0xff]  ;;  %v5462_v0 = vpop.f32.mrf.mxu2  ;;  %v5636_v61 = vld [vmem:[%s13305_s9 + $0x380] sm:$0xff] }
 0x6cf   : > { %v12900_v4 = vmul.f32 %v5510_v47, %v12140_v33  ;;  %v5964_v33 = vrot.slane %v12781_v27, 3  ;;  %5919 = vmatpush.msrb.mxu0 %v5598_v24  ;;  %v5645_v47 = vld [vmem:[%s13305_s9 + $0x3c8] sm:$0xff] }
 0x6d0   : > { %6095 = vmatpush.msra.mxu2 %v5649_v16  ;;  %6049 = vmatpush.msra.mxu3 %v5627_v13  ;;  %v5637_v16 = vld [vmem:[%s13305_s9 + $0x388] sm:$0xff] }
 0x6d1   : > { %5780 = vmatmul.f32.gmra.mxu1 %v12900_v4  ;;  %v5690_v28 = vrot.slane %v12900_v4, 1  ;;  %v5797_v62 = vrot.slane %v12900_v4, 2  ;;  %v5965_v14 = vsel %vm1544_vm2, %v5963_v63, %v5964_v33  ;;  %v12928_v8 = vsel %vm1544_vm2, %v5964_v33, %v5966_v3  ;;  %5920 = vmatpush.msrb.mxu0 %v5597_v38  ;;  %v5624_v33 = vld [vmem:[%s13305_s9 + $0x320] sm:$0xff]  ;;  %v5590_v3 = vld [vmem:[%s13305_s9 + $0x210] sm:$0xff] }
 0x6d2   : > { %6096 = vmatpush.msra.mxu2 %v5648_v42  ;;  %v5974_v22 = vrot.slane %v12900_v4, 3  ;;  %6050 = vmatpush.msra.mxu3 %v5626_v2  ;;  %v5644_v63 = vld [vmem:[%s13305_s9 + $0x3c0] sm:$0xff] }
 0x6d3   : > { %v5691_v9 = vsel %vm854_vm0, %v5688_v44, %v5690_v28  ;;  %v12911_v15 = vsel %vm1081_vm1, %v5795_v58, %v5797_v62  ;;  %5921 = vmatpush.msrb.mxu0 %v5596_v51  ;;  %v5646_v44 = vld [vmem:[%s13305_s9 + $0x3d0] sm:$0xff]  ;;  %v5593_v58 = vld [vmem:[%s13305_s9 + $0x228] sm:$0xff] }
 0x6d4   : > { %5736 = vmatmul.f32.gmra.mxu0 %v5691_v9  ;;  %5843 = vmatmul.f32.gmra.mxu3 %v12911_v15  ;;  %v13043_v56 = vsel %vm1544_vm2, %v5972_v26, %v5974_v22 }
 0x6d5   : > { %5893 = vmatmul.f32.gmra.mxu2 %v5691_v9  ;;  %5922 = vmatpush.msrb.mxu0 %v5595_v20  ;;  %v5592_v9 = vld [vmem:[%s13305_s9 + $0x220] sm:$0xff] }
 0x6d6   : > { %6097 = vmatpush.msra.mxu2 %v5647_v43  ;;  %6051 = vmatpush.msra.mxu3 %v5625_v45 }
 0x6d7   : > { %5923 = vmatpush.msrb.mxu0 %v5594_v39 }
 0x6d8   : > { %6098 = vmatpush.msra.mxu2 %v5646_v44  ;;  %6052 = vmatpush.msra.mxu3 %v5624_v33  ;;  %v5667_v33 = vld [vmem:[%s13305_s9 + $0x478] sm:$0xff] }
 0x6d9   : > { %6004 = vmatmul.f32.vlgmr.msrb.gmra.mxu1 %v5965_v14  ;;  %5924 = vmatpush.msrb.mxu0 %v5593_v58  ;;  %v5591_v14 = vld [vmem:[%s13305_s9 + $0x218] sm:$0xff] }
 0x6da   : > { %6099 = vmatpush.msra.mxu2 %v5645_v47  ;;  %6053 = vmatpush.msra.mxu3 %v5623_v55  ;;  %v5664_v55 = vld [vmem:[%s13305_s9 + $0x460] sm:$0xff] }
 0x6db   : > { %5925 = vmatpush.msrb.mxu0 %v5592_v9 }
 0x6dc   : > { %6100 = vmatpush.msra.mxu2 %v5644_v63  ;;  %6054 = vmatpush.msra.mxu3 %v5622_v37  ;;  %v5665_v63 = vld [vmem:[%s13305_s9 + $0x468] sm:$0xff] }
 0x6dd   : > { %5926 = vmatpush.msrb.mxu0 %v5591_v14 }
 0x6de   : > { %6101 = vmatpush.msra.mxu2 %v5643_v59  ;;  %6055 = vmatpush.msra.mxu3 %v5621_v30  ;;  %v5660_v30 = vld [vmem:[%s13305_s9 + $0x440] sm:$0xff] }
 0x6df   : > { %5927 = vmatpush.msrb.mxu0 %v5590_v3 }
 0x6e0   : > { %6102 = vmatpush.msra.mxu2 %v5642_v41  ;;  %6056 = vmatpush.msra.mxu3 %v5620_v54  ;;  %v5663_v41 = vld [vmem:[%s13305_s9 + $0x458] sm:$0xff] }
 0x6e1   : > { %6007 = vmatmul.f32.gmra.mxu1 %v12928_v8  ;;  %5928 = vmatpush.msrb.mxu0 %v5589_v17 }
 0x6e2   : > { %6103 = vmatpush.msra.mxu2 %v5641_v12 }
 0x6e3   : > { %5929 = vmatpush.msrb.mxu0 %v5588_v11 }
 0x6e4   : > { %6104 = vmatpush.msra.mxu2 %v5640_v18 }
 0x6e5   : > { %6167 = vmatpush.msra.mxu0 %v5667_v33 }
 0x6e6   : > { %6105 = vmatpush.msra.mxu2 %v5639_v57  ;;  %v5656_v57 = vld [vmem:[%s13305_s9 + $0x420] sm:$0xff] }
 0x6e8   : > { %6106 = vmatpush.msra.mxu2 %v5638_v52 }
 0x6e9   : > { %6010 = vmatmul.f32.gmra.mxu1 %v12948_v36 }
 0x6ea   : > { %6107 = vmatpush.msra.mxu2 %v5637_v16 }
 0x6ec   : > { %6108 = vmatpush.msra.mxu2 %v5636_v61 }
 0x6f1   : > { %6013 = vmatmul.f32.gmra.mxu1 %v12953_v19 }
 0x6f9   : > { %6016 = vmatmul.f32.gmra.mxu1 %v13000_v48 }
 0x701   : > { %6019 = vmatmul.f32.gmra.mxu1 %v13043_v56 }
 0x707   : > { %v5421_v60 = vpop.f32.mrf.mxu3 }
 0x708   : > { %v5422_v24 = vadd.f32 %v5421_v60, %v5381_v34  ;;  %v5658_v60 = vld [vmem:[%s13305_s9 + $0x430] sm:$0xff] }
 0x70a   : > { %v5463_v38 = vadd.f32 %v5462_v0, %v5422_v24 }
 0x70c   : > { %v5486_v26 = vrot.slane %v5463_v38, 6  ;;  %v13182_v38 = vmul.f32 %v12577_v7, %v12463_v46  ;;  %v5653_v46 = vld [vmem:[%s13305_s9 + $0x408] sm:$0xff] }
 0x70e   : > { %v5487_v51 = vsel %vm2461_vm5, %v5484_v53, %v5486_v26  ;;  %v5498_v42 = vsel %vm2461_vm5, %v5486_v26, 0.0 }
 0x70f   : > { %v5511_v20 = vadd.f32 %v12577_v7, %v5487_v51  ;;  %v5512_v43 = vadd.f32 %v12577_v7, %v5498_v42  ;;  %v6090_v7 = vrot.slane %v13182_v38, 3  ;;  %v5652_v42 = vld [vmem:[%s13305_s9 + $0x400] sm:$0xff] }
 0x711   : > { %v13096_v13 = vmul.f32 %v5511_v20, %v12165_v40  ;;  %v13118_v58 = vmul.f32 %v5512_v43, %v12188_v6 }
 0x713   : > { %v5692_v39 = vrot.slane %v13096_v13, 1  ;;  %v5799_v10 = vrot.slane %v13096_v13, 2  ;;  %v5976_v53 = vrot.slane %v13096_v13, 3  ;;  %v5859_v45 = vrot.slane %v13118_v58, 1 }
 0x715   : > { %v5693_v2 = vsel %vm854_vm0, %v5690_v28, %v5692_v39  ;;  %v13110_v40 = vsel %vm1081_vm1, %v5797_v62, %v5799_v10  ;;  %v13115_v44 = vsel %vm1544_vm2, %v5974_v22, %v5976_v53  ;;  %v5760_v28 = vpop.f32.mrf.mxu1  ;;  %v5978_v62 = vrot.slane %v13118_v58, 3 }
 0x716   : > { %5739 = vmatmul.f32.gmra.mxu0 %v5693_v2  ;;  %5846 = vmatmul.f32.gmra.mxu3 %v13110_v40  ;;  %v5860_v47 = vsel %vm854_vm0, %v5692_v39, %v5859_v45 }
 0x717   : > { %5896 = vmatmul.f32.gmra.mxu2 %v5693_v2  ;;  %6022 = vmatmul.f32.gmra.mxu1 %v13115_v44  ;;  %v13129_v6 = vsel %vm1544_vm2, %v5976_v53, %v5978_v62  ;;  %v6091_v20 = vsel %vm1544_vm2, %v5978_v62, %v6090_v7 }
 0x71e   : > { %5930 = vmatmul.f32.vlgmr.msrb.gmra.mxu0 %v12798_v31  ;;  %6057 = vmatmul.f32.vlgmr.msra.gmra.mxu3 %v12822_v29  ;;  %v5763_v22 = vpop.f32.mrf.mxu1  ;;  %v5666_v31 = vld [vmem:[%s13305_s9 + $0x470] sm:$0xff] }
 0x71f   : > { %5899 = vmatmul.f32.gmra.mxu2 %v5860_v47  ;;  %6025 = vmatmul.f32.gmra.mxu1 %v13129_v6 }
 0x720   : > { %6168 = vmatpush.msra.mxu0 %v5666_v31  ;;  %v5911_v31 = vrot.slane %v13118_v58, 2 }
 0x721   : > { %v5719_v9 = vpop.f32.mrf.mxu0 }
 0x722   : > { %v5761_v14 = vadd.f32 %v5760_v28, %v5719_v9  ;;  %6169 = vmatpush.msra.mxu0 %v5665_v63 }
 0x724   : > { %6170 = vmatpush.msra.mxu0 %v5664_v55 }
 0x726   : > { %5933 = vmatmul.f32.gmra.mxu0 %v12822_v29  ;;  %6060 = vmatmul.f32.gmra.mxu3 %v12846_v32  ;;  %v5662_v29 = vld [vmem:[%s13305_s9 + $0x450] sm:$0xff]  ;;  %v5766_v17 = vpop.f32.mrf.mxu1 }
 0x727   : > { %6109 = vmatmul.f32.vlgmr.msra.gmra.mxu2 %v12928_v8  ;;  %v5826_v59 = vpop.f32.mrf.mxu3  ;;  %6171 = vmatpush.msra.mxu0 %v5663_v41  ;;  %v5661_v8 = vld [vmem:[%s13305_s9 + $0x448] sm:$0xff] }
 0x728   : > { %v5850_v3 = vadd.f32 %v5826_v59, %v5761_v14  ;;  %v5912_v14 = vsel %vm1081_vm1, %v5799_v10, %v5911_v31 }
 0x729   : > { %v5722_v37 = vpop.f32.mrf.mxu0  ;;  %6172 = vmatpush.msra.mxu0 %v5662_v29 }
 0x72a   : > { %v5764_v50 = vadd.f32 %v5763_v22, %v5722_v37  ;;  %v6038_v37 = vrot.slane %v13182_v38, 2 }
 0x72b   : > { %6173 = vmatpush.msra.mxu0 %v5661_v8 }
 0x72d   : > { %6174 = vmatpush.msra.mxu0 %v5660_v30  ;;  %v6145_v30 = vrot.slane %v12831_v5, 4  ;;  %v6153_v5 = vrot.slane %v13096_v13, 4 }
 0x72e   : > { %5936 = vmatmul.f32.gmra.mxu0 %v12846_v32  ;;  %6063 = vmatmul.f32.gmra.mxu3 %v12870_v1  ;;  %v5659_v32 = vld [vmem:[%s13305_s9 + $0x438] sm:$0xff]  ;;  %v5769_v24 = vpop.f32.mrf.mxu1 }
 0x72f   : > { %6112 = vmatmul.f32.gmra.mxu2 %v12948_v36  ;;  %v5829_v35 = vpop.f32.mrf.mxu3  ;;  %6175 = vmatpush.msra.mxu0 %v5659_v32  ;;  %v5657_v36 = vld [vmem:[%s13305_s9 + $0x428] sm:$0xff] }
 0x730   : > { %v5851_v12 = vadd.f32 %v5829_v35, %v5764_v50  ;;  %v5879_v11 = vpop.f32.mrf.mxu2  ;;  %v6039_v50 = vsel %vm1081_vm1, %v5911_v31, %v6038_v37 }
 0x731   : > { %v13163_v54 = vadd.f32 %v5879_v11, %v5850_v3  ;;  %v5725_v34 = vpop.f32.mrf.mxu0  ;;  %6176 = vmatpush.msra.mxu0 %v5658_v60 }
 0x732   : > { %v5767_v18 = vadd.f32 %v5766_v17, %v5725_v34  ;;  %v6143_v17 = vrot.slane %v12807_v25, 4 }
 0x733   : > { %6177 = vmatpush.msra.mxu0 %v5657_v36 }
 0x734   : > { %v6146_v35 = vsel %vm1771_vm3, %v6143_v17, %v6145_v30 }
 0x735   : > { %6178 = vmatpush.msra.mxu0 %v5656_v57 }
 0x736   : > { %5939 = vmatmul.f32.gmra.mxu0 %v12870_v1  ;;  %6066 = vmatmul.f32.gmra.mxu3 %v12892_v21  ;;  %v5655_v1 = vld [vmem:[%s13305_s9 + $0x418] sm:$0xff]  ;;  %v5772_v43 = vpop.f32.mrf.mxu1 }
 0x737   : > { %6115 = vmatmul.f32.gmra.mxu2 %v12953_v19  ;;  %v5832_v0 = vpop.f32.mrf.mxu3  ;;  %v5654_v19 = vld [vmem:[%s13305_s9 + $0x410] sm:$0xff]  ;;  %6179 = vmatpush.msra.mxu0 %v5655_v1 }
 0x738   : > { %v5852_v52 = vadd.f32 %v5832_v0, %v5767_v18  ;;  %v5882_v26 = vpop.f32.mrf.mxu2 }
 0x739   : > { %v13184_v16 = vadd.f32 %v5882_v26, %v5851_v12  ;;  %v5728_v51 = vpop.f32.mrf.mxu0  ;;  %6180 = vmatpush.msra.mxu0 %v5654_v19  ;;  %v6147_v12 = vrot.slane %v12855_v23, 4  ;;  %v6155_v23 = vrot.slane %v13118_v58, 4 }
 0x73a   : > { %v5770_v61 = vadd.f32 %v5769_v24, %v5728_v51  ;;  %v6157_v24 = vrot.slane %v13182_v38, 4 }
 0x73b   : > { %6181 = vmatpush.msra.mxu0 %v5653_v46  ;;  %v6148_v11 = vsel %vm1771_vm3, %v6145_v30, %v6147_v12  ;;  %v6156_v18 = vsel %vm1771_vm3, %v6153_v5, %v6155_v23 }
 0x73d   : > { %6182 = vmatpush.msra.mxu0 %v5652_v42 }
 0x73e   : > { %5942 = vmatmul.f32.gmra.mxu0 %v12892_v21  ;;  %6069 = vmatmul.f32.gmra.mxu3 %v12911_v15  ;;  %v5775_v9 = vpop.f32.mrf.mxu1 }
 0x73f   : > { %6118 = vmatmul.f32.gmra.mxu2 %v13000_v48  ;;  %v5835_v39 = vpop.f32.mrf.mxu3 }
 0x740   : > { %v5853_v53 = vadd.f32 %v5835_v39, %v5770_v61  ;;  %v5885_v2 = vpop.f32.mrf.mxu2 }
 0x741   : > { %v13205_v28 = vadd.f32 %v5885_v2, %v5852_v52  ;;  %v5731_v21 = vpop.f32.mrf.mxu0 }
 0x742   : > { %v5773_v45 = vadd.f32 %v5772_v43, %v5731_v21 }
 0x746   : > { %5945 = vmatmul.f32.gmra.mxu0 %v12911_v15  ;;  %6072 = vmatmul.f32.gmra.mxu3 %v13110_v40  ;;  %v5778_v41 = vpop.f32.mrf.mxu1 }
 0x747   : > { %6121 = vmatmul.f32.gmra.mxu2 %v13043_v56  ;;  %v5838_v47 = vpop.f32.mrf.mxu3 }
 0x748   : > { %v5854_v62 = vadd.f32 %v5838_v47, %v5773_v45  ;;  %v5888_v22 = vpop.f32.mrf.mxu2 }
 0x749   : > { %v13210_v48 = vadd.f32 %v5888_v22, %v5853_v53  ;;  %v5734_v33 = vpop.f32.mrf.mxu0 }
 0x74a   : > { %v5776_v63 = vadd.f32 %v5775_v9, %v5734_v33 }
 0x74e   : > { %5948 = vmatmul.f32.gmra.mxu0 %v13110_v40  ;;  %6075 = vmatmul.f32.gmra.mxu3 %v5912_v14 }
 0x74f   : > { %6124 = vmatmul.f32.gmra.mxu2 %v13115_v44  ;;  %v5841_v15 = vpop.f32.mrf.mxu3  ;;  %v6142_v44 = vrot.slane %v12781_v27, 4  ;;  %v6151_v27 = vrot.slane %v12900_v4, 4  ;;  %v6158_v4 = vsel %vm1771_vm3, %v6155_v23, %v6157_v24 }
 0x750   : > { %v5855_v56 = vadd.f32 %v5841_v15, %v5776_v63  ;;  %v5891_v55 = vpop.f32.mrf.mxu2 }
 0x751   : > { %v5907_v59 = vadd.f32 %v5891_v55, %v5854_v62  ;;  %v5737_v3 = vpop.f32.mrf.mxu0  ;;  %v6144_v8 = vsel %vm1771_vm3, %v6142_v44, %v6143_v17  ;;  %v6154_v32 = vsel %vm1771_vm3, %v6151_v27, %v6153_v5 }
 0x752   : > { %v5779_v29 = vadd.f32 %v5778_v41, %v5737_v3 }
 0x756   : > { %5951 = vmatmul.f32.gmra.mxu0 %v5912_v14  ;;  %6078 = vmatmul.f32.gmra.mxu3 %v6039_v50 }
 0x757   : > { %6127 = vmatmul.f32.gmra.mxu2 %v13129_v6  ;;  %v5844_v10 = vpop.f32.mrf.mxu3  ;;  %v6149_v6 = vrot.slane %v12879_v49, 4  ;;  %v5781_v49 = vpop.f32.mrf.mxu1 }
 0x758   : > { %v5856_v40 = vadd.f32 %v5844_v10, %v5779_v29  ;;  %v5894_v60 = vpop.f32.mrf.mxu2 }
 0x759   : > { %v6150_v25 = vsel %vm1771_vm3, %v6147_v12, %v6149_v6  ;;  %v6152_v34 = vsel %vm1771_vm3, %v6149_v6, %v6151_v27 }
 0x75e   : > { %6183 = vmatmul.f32.vlgmr.msra.gmra.mxu0 %v6144_v8 }
 0x75f   : > { %6130 = vmatmul.f32.gmra.mxu2 %v6091_v20  ;;  %v6005_v51 = vpop.f32.mrf.mxu1 }
 0x766   : > { %6186 = vmatmul.f32.gmra.mxu0 %v6146_v35 }
 0x767   : > { %v6008_v33 = vpop.f32.mrf.mxu1 }
 0x76e   : > { %6189 = vmatmul.f32.gmra.mxu0 %v6148_v11 }
 0x76f   : > { %v6011_v15 = vpop.f32.mrf.mxu1 }
 0x776   : > { %6192 = vmatmul.f32.gmra.mxu0 %v6150_v25 }
 0x77e   : > { %6195 = vmatmul.f32.gmra.mxu0 %v6152_v34 }
 0x786   : > { %6198 = vmatmul.f32.gmra.mxu0 %v6154_v32 }
 0x78e   : > { %6201 = vmatmul.f32.gmra.mxu0 %v6156_v18 }
 0x793   : > { %v5740_v36 = vpop.f32.mrf.mxu0 }
 0x794   : > { %v5782_v11 = vadd.f32 %v5781_v49, %v5740_v36 }
 0x796   : > { %6204 = vmatmul.f32.gmra.mxu0 %v6158_v4 }
 0x799   : > { %v5847_v57 = vpop.f32.mrf.mxu3 }
 0x79a   : > { %v5897_v0 = vpop.f32.mrf.mxu2  ;;  %v5857_v25 = vadd.f32 %v5847_v57, %v5782_v11 }
 0x79b   : > { %v5909_v52 = vadd.f32 %v5897_v0, %v5856_v40  ;;  %v5931_v13 = vpop.f32.mrf.mxu0 }
 0x79c   : > { %v5955_v26 = vadd.f32 %v5931_v13, %v13163_v54  ;;  %v5908_v54 = vadd.f32 %v5894_v60, %v5855_v56  ;;  %v6014_v56 = vpop.f32.mrf.mxu1 }
 0x79e   : > { %v6029_v1 = vadd.f32 %v6005_v51, %v5955_v26 }
 0x7a1   : > { %v6058_v58 = vpop.f32.mrf.mxu3 }
 0x7a2   : > { %v5900_v61 = vpop.f32.mrf.mxu2  ;;  %v6082_v19 = vadd.f32 %v6058_v58, %v6029_v1 }
 0x7a3   : > { %v5934_v46 = vpop.f32.mrf.mxu0  ;;  %v5910_v27 = vadd.f32 %v5900_v61, %v5857_v25 }
 0x7a4   : > { %v13240_v7 = vadd.f32 %v5934_v46, %v13184_v16  ;;  %v6017_v50 = vpop.f32.mrf.mxu1 }
 0x7a9   : > { %v13244_v9 = vpop.f32.mrf.mxu3 }
 0x7aa   : > { %v6110_v42 = vpop.f32.mrf.mxu2 }
 0x7ab   : > { %v6134_v38 = vadd.f32 %v6110_v42, %v6082_v19  ;;  %v5937_v20 = vpop.f32.mrf.mxu0 }
 0x7ac   : > { %v5957_v43 = vadd.f32 %v5937_v20, %v13205_v28  ;;  %v6020_v17 = vpop.f32.mrf.mxu1 }
 0x7ae   : > { %v6031_v46 = vadd.f32 %v6011_v15, %v5957_v43  ;;  %v6957_v15 = vld [vmem:[%s13306_s10] ss:$0 sm:$0xff] }
 0x7b1   : > { %v6064_v63 = vpop.f32.mrf.mxu3 }
 0x7b2   : > { %v13246_v16 = vpop.f32.mrf.mxu2 }
 0x7b3   : > { %v5940_v39 = vpop.f32.mrf.mxu0 }
 0x7b4   : > { %v5958_v53 = vadd.f32 %v5940_v39, %v13210_v48  ;;  %v6023_v30 = vpop.f32.mrf.mxu1  ;;  %v6030_v39 = vadd.f32 %v6008_v33, %v13240_v7  ;;  %v6217_v7 = vld [vmem:[%s13308_s12 + $0x8] sm:$0xff]  ;;  %v6218_v33 = vld [vmem:[%s13308_s12 + $0x10] sm:$0xff] }
 0x7b6   : > { %v6032_v49 = vadd.f32 %v6014_v56, %v5958_v53  ;;  %v6083_v53 = vadd.f32 %v13244_v9, %v6030_v39  ;;  %v6216_v9 = vld [vmem:[%s13308_s12] sm:$0xff] }
 0x7b8   : > { %v6135_v43 = vadd.f32 %v13246_v16, %v6083_v53  ;;  %v6219_v16 = vld [vmem:[%s13308_s12 + $0x18] sm:$0xff] }
 0x7ba   : > { %v6116_v55 = vpop.f32.mrf.mxu2 }
 0x7bb   : > { %v5943_v2 = vpop.f32.mrf.mxu0 }
 0x7bc   : > { %v5959_v21 = vadd.f32 %v5943_v2, %v5907_v59  ;;  %v6067_v59 = vpop.f32.mrf.mxu3  ;;  %v6026_v32 = vpop.f32.mrf.mxu1  ;;  %v6084_v2 = vadd.f32 %v6064_v63, %v6031_v46  ;;  %v6221_v63 = vld [vmem:[%s13308_s12 + $0x28] sm:$0xff] }
 0x7bd   : > { %v6085_v42 = vadd.f32 %v6067_v59, %v6032_v49 }
 0x7be   : > { %v6033_v51 = vadd.f32 %v6017_v50, %v5959_v21 }
 0x7c2   : > { %v6119_v3 = vpop.f32.mrf.mxu2 }
 0x7c3   : > { %v5946_v45 = vpop.f32.mrf.mxu0 }
 0x7c4   : > { %v5960_v47 = vadd.f32 %v5946_v45, %v5908_v54  ;;  %v6070_v41 = vpop.f32.mrf.mxu3  ;;  %v6137_v54 = vadd.f32 %v6119_v3, %v6085_v42  ;;  %v6136_v45 = vadd.f32 %v6116_v55, %v6084_v2 }
 0x7c5   : > { %v6086_v36 = vadd.f32 %v6070_v41, %v6033_v51 }
 0x7c6   : > { %v6034_v0 = vadd.f32 %v6020_v17, %v5960_v47 }
 0x7ca   : > { %v6122_v29 = vpop.f32.mrf.mxu2 }
 0x7cb   : > { %v5949_v62 = vpop.f32.mrf.mxu0 }
 0x7cc   : > { %v5961_v22 = vadd.f32 %v5949_v62, %v5909_v52  ;;  %v6073_v40 = vpop.f32.mrf.mxu3 }
 0x7cd   : > { %v6087_v1 = vadd.f32 %v6073_v40, %v6034_v0 }
 0x7ce   : > { %v6035_v24 = vadd.f32 %v6023_v30, %v5961_v22 }
 0x7d2   : > { %v6125_v44 = vpop.f32.mrf.mxu2 }
 0x7d3   : > { %v5952_v31 = vpop.f32.mrf.mxu0  ;;  %v6139_v57 = vadd.f32 %v6125_v44, %v6087_v1 }
 0x7d4   : > { %v6076_v35 = vpop.f32.mrf.mxu3  ;;  %v5962_v34 = vadd.f32 %v5952_v31, %v5910_v27  ;;  %v6220_v31 = vld [vmem:[%s13308_s12 + $0x20] sm:$0xff] }
 0x7d5   : > { %v6088_v52 = vadd.f32 %v6076_v35, %v6035_v24 }
 0x7d6   : > { %v6036_v18 = vadd.f32 %v6026_v32, %v5962_v34 }
 0x7da   : > { %v6128_v6 = vpop.f32.mrf.mxu2 }
 0x7db   : > { %v6184_v14 = vpop.f32.mrf.mxu0  ;;  %v6140_v58 = vadd.f32 %v6128_v6, %v6088_v52 }
 0x7dc   : > { %v13248_v28 = vadd.f32 %v6184_v14, %v6134_v38  ;;  %v6079_v23 = vpop.f32.mrf.mxu3  ;;  %v6138_v38 = vadd.f32 %v6122_v29, %v6086_v36  ;;  %v6222_v14 = vld [vmem:[%s13308_s12 + $0x30] sm:$0xff] }
 0x7dd   : > { %v6089_v4 = vadd.f32 %v6079_v23, %v6036_v18 }
 0x7e2   : > { %v6131_v60 = vpop.f32.mrf.mxu2 }
 0x7e3   : > { %v13250_v48 = vpop.f32.mrf.mxu0  ;;  %v6141_v13 = vadd.f32 %v6131_v60, %v6089_v4 }
 0x7e4   : > { %v6209_v22 = vadd.f32 %v13250_v48, %v6135_v43 }
 0x7eb   : > { %v6190_v37 = vpop.f32.mrf.mxu0 }
 0x7ec   : > { %v6210_v62 = vadd.f32 %v6190_v37, %v6136_v45 }
 0x7f3   : > { %v6193_v10 = vpop.f32.mrf.mxu0 }
 0x7f4   : > { %v6211_v47 = vadd.f32 %v6193_v10, %v6137_v54 }
 0x7fb   : > { %v6196_v8 = vpop.f32.mrf.mxu0 }
 0x7fc   : > { %v6212_v21 = vadd.f32 %v6196_v8, %v6138_v38 }
 0x803   : > { %v6199_v12 = vpop.f32.mrf.mxu0 }
 0x804   : > { %v6213_v20 = vadd.f32 %v6199_v12, %v6139_v57 }
 0x80b   : > { %v6202_v5 = vpop.f32.mrf.mxu0 }
 0x80c   : > { %v6214_v61 = vadd.f32 %v6202_v5, %v6140_v58 }
 0x813   : > { %v6205_v26 = vpop.f32.mrf.mxu0 }
 0x814   : > { %v6215_v19 = vadd.f32 %v6205_v26, %v6141_v13 }
 0x816   : > { %6256 = vmatpush.msrb.mxu0 %v6215_v19  ;;  %6442 = vmatpush.msra.mxu1 %v6215_v19 }
 0x818   : > { %6257 = vmatpush.msrb.mxu0 %v6214_v61  ;;  %6443 = vmatpush.msra.mxu1 %v6214_v61 }
 0x81a   : > { %6258 = vmatpush.msrb.mxu0 %v6213_v20  ;;  %6444 = vmatpush.msra.mxu1 %v6213_v20 }
 0x81c   : > { %6259 = vmatpush.msrb.mxu0 %v6212_v21  ;;  %6445 = vmatpush.msra.mxu1 %v6212_v21 }
 0x81e   : > { %6260 = vmatpush.msrb.mxu0 %v6211_v47  ;;  %6446 = vmatpush.msra.mxu1 %v6211_v47 }
 0x820   : > { %6261 = vmatpush.msrb.mxu0 %v6210_v62  ;;  %6447 = vmatpush.msra.mxu1 %v6210_v62 }
 0x822   : > { %6262 = vmatpush.msrb.mxu0 %v6209_v22  ;;  %6448 = vmatpush.msra.mxu1 %v6209_v22 }
 0x824   : > { %6263 = vmatpush.msrb.mxu0 %v13248_v28  ;;  %6449 = vmatpush.msra.mxu1 %v13248_v28 }
 0x825   : > { %6418 = vmatmul.msk.f32.vlgmr.msra.gmra.mxu1 %vm3728_vm7, %v6217_v7  ;;  %6417 = vmatmul.msk.f32.vlgmr.msrb.gmra.mxu0 %vm3728_vm7, %v6216_v9 }
 0x82d   : > { %6419 = vmatmul.msk.f32.gmra.mxu1 %vm3728_vm7, %v6218_v33 }
 0x835   : > { %6420 = vmatmul.msk.f32.gmra.mxu1 %vm3728_vm7, %v6219_v16 }
 0x83d   : > { %6421 = vmatmul.msk.f32.gmra.mxu1 %vm3728_vm7, %v6220_v31 }
 0x845   : > { %6422 = vmatmul.msk.f32.gmra.mxu1 %vm3728_vm7, %v6221_v63 }
 0x84d   : > { %6423 = vmatmul.msk.f32.gmra.mxu1 %vm3728_vm7, %v6222_v14 }
 0x8a2   : > { %v6268_v28 = vpop.f32.mrf.mxu1  ;;  %v6265_v48 = vpop.f32.mrf.mxu0 }
 0x8a3   : > { %v6269_v55 = vadd.f32 %v6957_v15, %v6268_v28  ;;  %v6266_v59 = vadd.f32 %v6957_v15, %v6265_v48 }
 0x8a5   : > { %6287 = vst [vmem:[%s467_s20 + $0x8] sm:$0xff] %v6269_v55 }
 0x8a6   : > { %6286 = vst [vmem:[%s467_s20] sm:$0xff] %v6266_v59 }
 0x8aa   : > { %v6271_v56 = vpop.f32.mrf.mxu1 }
 0x8ab   : > { %v6272_v3 = vadd.f32 %v6957_v15, %v6271_v56 }
 0x8ad   : > { %6288 = vst [vmem:[%s467_s20 + $0x10] sm:$0xff] %v6272_v3 }
 0x8b2   : > { %v6274_v37 = vpop.f32.mrf.mxu1 }
 0x8b3   : > { %v6275_v41 = vadd.f32 %v6957_v15, %v6274_v37 }
 0x8b5   : > { %6289 = vst [vmem:[%s467_s20 + $0x18] sm:$0xff] %v6275_v41 }
 0x8ba   : > { %v6277_v50 = vpop.f32.mrf.mxu1 }
 0x8bb   : > { %v6278_v29 = vadd.f32 %v6957_v15, %v6277_v50 }
 0x8bd   : > { %6290 = vst [vmem:[%s467_s20 + $0x20] sm:$0xff] %v6278_v29 }
 0x8c2   : > { %v6280_v10 = vpop.f32.mrf.mxu1 }
 0x8c3   : > { %v6281_v40 = vadd.f32 %v6957_v15, %v6280_v10 }
 0x8c5   : > { %6291 = vst [vmem:[%s467_s20 + $0x28] sm:$0xff] %v6281_v40 }
 0x8ca   : > { %v6283_v17 = vpop.f32.mrf.mxu1 }
 0x8cb   : > { %v6284_v44 = vadd.f32 %v6957_v15, %v6283_v17 }
 0x8cd   : > { %6292 = vst [vmem:[%s467_s20 + $0x30] sm:$0xff] %v6284_v44 }
 0x8ce PF: > { %s24_s29 = sadd.s32 1, %s6970_s29  }
 0x8cf   : > { %p21_p4 = scmp.ge.s32.totalorder %s24_s29, 4  }
 0x8d1   :  { %23 = sbr.rel (!%p21_p4) target bundleno = 1 (0x1), region = 106 }

</bundles_post_ra>
